<compile_context>
chip_gen: v5e
topology: v5e:2x2
jax: 0.10.0
libtpu: 0.0.40
codegen_flags: <defaults>
</compile_context>

<pallas_src>
import functools
import math

import jax
import jax.numpy as jnp
from jax import lax
from jax.experimental import pallas as pl
from jax.experimental.pallas import tpu as pltpu  # noqa: F401  (TPU backend)

NEG = -1e9
LN_EPS = 1e-12

CFG = dict(hidden=32, embed=16, heads=4, vocab=128, patch=8, channels=3,
           n_frame=2, img=16, seq_audio=8, seq_dec=8, pad_id=0)


# ----------------------------------------------------------------------------
# in-kernel building blocks (traced inside the fused pallas kernels)
# ----------------------------------------------------------------------------

def _ln2d(x, g, b):
    """LayerNorm over last dim. x: [M, D], g/b: [1, D]."""
    mu = jnp.mean(x, axis=-1, keepdims=True)
    var = jnp.mean((x - mu) ** 2, axis=-1, keepdims=True)
    return (x - mu) * lax.rsqrt(var + LN_EPS) * g + b


def _embed(ids, table, vocab):
    """Embedding lookup via one-hot matmul (MXU friendly, no gather).

    ids: [B, S] int32, table: [V, D] -> [B, S, D] f32."""
    B, S = ids.shape
    iota = lax.broadcasted_iota(jnp.int32, (B, S, vocab), 2)
    onehot = (ids[:, :, None] == iota).astype(jnp.float32)
    emb = jnp.dot(onehot.reshape(B * S, vocab), table,
                  preferred_element_type=jnp.float32)
    return emb.reshape(B, S, table.shape[1])


def _mha_block(x_q, x_kv, wqkv, bqkv, wo, bo, ln_g, ln_b, *, heads,
               key_add=None, causal=False, self_attn=False, want_probs=False):
    """BERT-style attention sub-block: fused QKV proj + MHA + out proj +
    residual + LayerNorm.

    x_q: [B,Sq,D], x_kv: [B,Sk,D], wqkv: [D,3D].  Returns (y, probs|None)."""
    B, Sq, D = x_q.shape
    Sk = x_kv.shape[1]
    dh = D // heads
    scale = 1.0 / math.sqrt(dh)

    xq2 = x_q.reshape(B * Sq, D)
    if self_attn:
        qkv = jnp.dot(xq2, wqkv, preferred_element_type=jnp.float32) + bqkv
        q3 = qkv[:, :D].reshape(B, Sq, D)
        k3 = qkv[:, D:2 * D].reshape(B, Sk, D)
        v3 = qkv[:, 2 * D:].reshape(B, Sk, D)
    else:
        xkv2 = x_kv.reshape(B * Sk, D)
        q2 = jnp.dot(xq2, wqkv[:, :D],
                     preferred_element_type=jnp.float32) + bqkv[:, :D]
        kv = jnp.dot(xkv2, wqkv[:, D:],
                     preferred_element_type=jnp.float32) + bqkv[:, D:]
        q3 = q2.reshape(B, Sq, D)
        k3 = kv[:, :D].reshape(B, Sk, D)
        v3 = kv[:, D:].reshape(B, Sk, D)

    add = None
    if key_add is not None:
        add = key_add[:, None, :]                      # [B, 1, Sk]
    if causal:
        row = lax.broadcasted_iota(jnp.int32, (Sq, Sk), 0)
        col = lax.broadcasted_iota(jnp.int32, (Sq, Sk), 1)
        cm = jnp.where(row >= col, 0.0, NEG).astype(jnp.float32)[None, :, :]
        add = cm if add is None else add + cm

    ctx_parts = []
    prob_parts = []
    for h in range(heads):
        sl = slice(h * dh, (h + 1) * dh)
        # batched dot_general contracting last dims (no explicit transpose)
        s = jnp.einsum('bqd,bkd->bqk', q3[:, :, sl], k3[:, :, sl],
                       preferred_element_type=jnp.float32) * scale
        if add is not None:
            s = s + add
        s = s - jnp.max(s, axis=-1, keepdims=True)
        e = jnp.exp(s)
        p = e / jnp.sum(e, axis=-1, keepdims=True)
        if want_probs:
            prob_parts.append(p)
        ctx_parts.append(jnp.einsum('bqk,bkd->bqd', p, v3[:, :, sl],
                                    preferred_element_type=jnp.float32))

    # one output projection for all heads: concat(ctx_h) @ Wo
    ctx = jnp.concatenate(ctx_parts, axis=-1).reshape(B * Sq, D)
    o = jnp.dot(ctx, wo, preferred_element_type=jnp.float32) + bo
    y = _ln2d(o + xq2, ln_g, ln_b).reshape(B, Sq, D)
    probs = jnp.stack(prob_parts, axis=1) if want_probs else None
    return y, probs


def _ffn_block(x, w1, b1, w2, b2, ln_g, ln_b):
    """FFN sub-block: inter + gelu + out + residual + LayerNorm."""
    B, S, D = x.shape
    x2 = x.reshape(B * S, D)
    h = jnp.dot(x2, w1, preferred_element_type=jnp.float32) + b1
    # TODO(synk): reference BERT uses exact (erf) GELU; tanh approximation here.
    h = jax.nn.gelu(h, approximate=True)
    o = jnp.dot(h, w2, preferred_element_type=jnp.float32) + b2
    return _ln2d(o + x2, ln_g, ln_b).reshape(B, S, D)


# ----------------------------------------------------------------------------
# fused kernel 1: video enc + audio enc + co-modal module + contrastive + agg
# ----------------------------------------------------------------------------

def _cross_module_kernel(heads, vocab,
                         # data
                         patches_ref, aud_ids_ref, aud_mask_ref,
                         # video encoder
                         patch_w_ref, patch_b_ref, vln_g_ref, vln_b_ref,
                         # audio encoder
                         aemb_ref, apos_ref, aln_g_ref, aln_b_ref,
                         # co-modal attention blocks (stacked, 0..3)
                         awqkv_ref, abqkv_ref, awo_ref, abo_ref, ag_ref, ab_ref,
                         # co-modal ffn blocks (stacked, 0..1)
                         fw1_ref, fb1_ref, fw2_ref, fb2_ref, fg_ref, fb_ref,
                         # aggregation module
                         aggw_ref, aggb_ref, aggg_ref, aggbb_ref,
                         # contrastive heads
                         vpw_ref, vpb_ref, apw_ref, apb_ref, lsc_ref,
                         # outputs
                         vhs_ref, clsv_ref, clsa_ref, lpv_ref,
                         p0_ref, p1_ref, p2_ref, p3_ref):
    # ---- video encoder: patch projection + LN ----
    patches = patches_ref[...]                         # [B, Sv, Pd]
    B, Sv, Pd = patches.shape
    D = patch_w_ref.shape[1]
    vid = jnp.dot(patches.reshape(B * Sv, Pd), patch_w_ref[...],
                  preferred_element_type=jnp.float32) + patch_b_ref[...]
    vid = _ln2d(vid, vln_g_ref[...], vln_b_ref[...]).reshape(B, Sv, D)

    # ---- audio/text encoder: embedding + pos + LN ----
    aud_ids = aud_ids_ref[...]                          # [B, Sa] int32
    Sa = aud_ids.shape[1]
    aud = _embed(aud_ids, aemb_ref[...], vocab) + apos_ref[...][None, :, :]
    aud = _ln2d(aud.reshape(B * Sa, D), aln_g_ref[...],
                aln_b_ref[...]).reshape(B, Sa, D)

    # additive key-padding mask for audio tokens: [B, Sa]
    aud_key_add = (1.0 - aud_mask_ref[...]) * NEG

    def attn(i, xq, xkv, **kw):
        return _mha_block(xq, xkv, awqkv_ref[i], abqkv_ref[i], awo_ref[i],
                          abo_ref[i], ag_ref[i], ab_ref[i], heads=heads,
                          want_probs=True, **kw)

    # ---- co-modal layer: 0=sa_video 1=sa_audio 2=ca_video 3=ca_audio ----
    v1, p_sa_v = attn(0, vid, vid, self_attn=True)
    a1, p_sa_a = attn(1, aud, aud, key_add=aud_key_add, self_attn=True)
    v2, p_ca_v = attn(2, v1, a1, key_add=aud_key_add)
    a2, p_ca_a = attn(3, a1, v1)
    vid_cross = _ffn_block(v2, fw1_ref[0], fb1_ref[0], fw2_ref[0], fb2_ref[0],
                           fg_ref[0], fb_ref[0])
    aud_cross = _ffn_block(a2, fw1_ref[1], fb1_ref[1], fw2_ref[1], fb2_ref[1],
                           fg_ref[1], fb_ref[1])

    p0_ref[...] = p_sa_v
    p1_ref[...] = p_sa_a
    p2_ref[...] = p_ca_v
    p3_ref[...] = p_ca_a

    # ---- contrastive heads: project cls tokens, L2-normalize, logits ----
    cls_v = jnp.dot(vid_cross[:, 0, :], vpw_ref[...],
                    preferred_element_type=jnp.float32) + vpb_ref[...]
    cls_a = jnp.dot(aud_cross[:, 0, :], apw_ref[...],
                    preferred_element_type=jnp.float32) + apb_ref[...]
    clsv_ref[...] = cls_v
    clsa_ref[...] = cls_a
    vn = cls_v * lax.rsqrt(jnp.sum(cls_v * cls_v, axis=-1, keepdims=True))
    an = cls_a * lax.rsqrt(jnp.sum(cls_a * cls_a, axis=-1, keepdims=True))
    lpv_ref[...] = jnp.exp(lsc_ref[...]) * jnp.einsum(
        'be,ce->bc', vn, an, preferred_element_type=jnp.float32)

    # ---- aggregation module: concat + linear + LN ----
    agg_in = jnp.concatenate([vid_cross, aud_cross], axis=1)   # [B, Sv+Sa, D]
    Sm = Sv + Sa
    vhs = jnp.dot(agg_in.reshape(B * Sm, D), aggw_ref[...],
                  preferred_element_type=jnp.float32) + aggb_ref[...]
    vhs_ref[...] = _ln2d(vhs, aggg_ref[...], aggbb_ref[...]).reshape(B, Sm, D)


def cross_module_forward(params, cfg, patches, audio_ids, attention_mask):
    B, Sv, _ = patches.shape
    Sa = audio_ids.shape[1]
    D, E, H, V = cfg['hidden'], cfg['embed'], cfg['heads'], cfg['vocab']
    Sm = Sv + Sa
    out_shape = (
        jax.ShapeDtypeStruct((B, Sm, D), jnp.float32),   # video_hidden_state
        jax.ShapeDtypeStruct((B, E), jnp.float32),        # cls_video
        jax.ShapeDtypeStruct((B, E), jnp.float32),        # cls_audio
        jax.ShapeDtypeStruct((B, B), jnp.float32),        # logits_per_video
        jax.ShapeDtypeStruct((B, H, Sv, Sv), jnp.float32),
        jax.ShapeDtypeStruct((B, H, Sa, Sa), jnp.float32),
        jax.ShapeDtypeStruct((B, H, Sv, Sa), jnp.float32),
        jax.ShapeDtypeStruct((B, H, Sa, Sv), jnp.float32),
    )
    kern = functools.partial(_cross_module_kernel, H, V)
    return pl.pallas_call(kern, out_shape=out_shape)(
        patches, audio_ids, attention_mask.astype(jnp.float32),
        params['patch_w'], params['patch_b'],
        params['vid_ln_g'], params['vid_ln_b'],
        params['audio_emb'], params['audio_pos'],
        params['aud_ln_g'], params['aud_ln_b'],
        params['cross_attn_wqkv'], params['cross_attn_bqkv'],
        params['cross_attn_wo'], params['cross_attn_bo'],
        params['cross_attn_ln_g'], params['cross_attn_ln_b'],
        params['cross_ffn_w1'], params['cross_ffn_b1'],
        params['cross_ffn_w2'], params['cross_ffn_b2'],
        params['cross_ffn_ln_g'], params['cross_ffn_ln_b'],
        params['agg_w'], params['agg_b'],
        params['agg_ln_g'], params['agg_ln_b'],
        params['vproj_w'], params['vproj_b'],
        params['aproj_w'], params['aproj_b'],
        params['logits_scale'])


# ----------------------------------------------------------------------------
# fused kernel 2: decoder (embed + causal self-attn + cross-attn + FFN + LM)
# ----------------------------------------------------------------------------

def _decoder_kernel(heads, vocab,
                    ids_ref, dmask_ref, mem_ref,
                    demb_ref, dpos_ref, eln_g_ref, eln_b_ref,
                    dwqkv_ref, dbqkv_ref, dwo_ref, dbo_ref, dg_ref, db_ref,
                    fw1_ref, fb1_ref, fw2_ref, fb2_ref, fg_ref, fb_ref,
                    lm_w_ref, lm_b_ref,
                    logits_ref):
    ids = ids_ref[...]                                  # [B, Sd] int32
    B, Sd = ids.shape
    D = demb_ref.shape[1]

    x = _embed(ids, demb_ref[...], vocab) + dpos_ref[...][None, :, :]
    x = _ln2d(x.reshape(B * Sd, D), eln_g_ref[...],
              eln_b_ref[...]).reshape(B, Sd, D)

    key_add = (1.0 - dmask_ref[...]) * NEG               # [B, Sd]

    # causal masked self-attention (block 0)
    h1, _ = _mha_block(x, x, dwqkv_ref[0], dbqkv_ref[0], dwo_ref[0],
                       dbo_ref[0], dg_ref[0], db_ref[0], heads=heads,
                       key_add=key_add, causal=True, self_attn=True)
    # cross-attention over aggregated memory (block 1).  NOTE: the reference
    # forward passes no encoder_attention_mask, so HF builds an all-ones mask.
    h2, _ = _mha_block(h1, mem_ref[...], dwqkv_ref[1], dbqkv_ref[1],
                       dwo_ref[1], dbo_ref[1], dg_ref[1], db_ref[1],
                       heads=heads)
    h3 = _ffn_block(h2, fw1_ref[...], fb1_ref[...], fw2_ref[...], fb2_ref[...],
                    fg_ref[...], fb_ref[...])

    logits = jnp.dot(h3.reshape(B * Sd, D), lm_w_ref[...],
                     preferred_element_type=jnp.float32) + lm_b_ref[...]
    logits_ref[...] = logits.reshape(B, Sd, vocab)       # lane-dense (V=128)


def decoder_forward(params, cfg, decoder_input_ids, decoder_attention_mask,
                    memory):
    B, Sd = decoder_input_ids.shape
    V, H = cfg['vocab'], cfg['heads']
    kern = functools.partial(_decoder_kernel, H, V)
    return pl.pallas_call(
        kern, out_shape=jax.ShapeDtypeStruct((B, Sd, V), jnp.float32),
    )(decoder_input_ids, decoder_attention_mask.astype(jnp.float32), memory,
      params['dec_emb'], params['dec_pos'],
      params['dec_eln_g'], params['dec_eln_b'],
      params['dec_attn_wqkv'], params['dec_attn_bqkv'],
      params['dec_attn_wo'], params['dec_attn_bo'],
      params['dec_attn_ln_g'], params['dec_attn_ln_b'],
      params['dec_ffn_w1'], params['dec_ffn_b1'],
      params['dec_ffn_w2'], params['dec_ffn_b2'],
      params['dec_ffn_ln_g'], params['dec_ffn_ln_b'],
      params['lm_w'], params['lm_b'])


# ----------------------------------------------------------------------------
# plain-JAX glue (losses only; everything else lives in the two kernels)
# ----------------------------------------------------------------------------

def softmax_ce(logits, labels):
    lse = jax.nn.logsumexp(logits, axis=-1)
    picked = jnp.take_along_axis(logits, labels[:, None], axis=-1)[:, 0]
    return jnp.mean(lse - picked)


def softmax_ce_ignore(logits, labels, ignore=-100):
    lse = jax.nn.logsumexp(logits, axis=-1)
    valid = labels != ignore
    safe = jnp.where(valid, labels, 0)
    picked = jnp.take_along_axis(logits, safe[:, None], axis=-1)[:, 0]
    nll = jnp.where(valid, lse - picked, 0.0)
    return jnp.sum(nll) / jnp.maximum(jnp.sum(valid).astype(jnp.float32), 1.0)


# ----------------------------------------------------------------------------
# parameters (all f32; stacked per-block to minimize operand count)
# ----------------------------------------------------------------------------

def init_params(key, cfg):
    D, E, V = cfg['hidden'], cfg['embed'], cfg['vocab']
    Dff = 2 * D
    Pd = cfg['channels'] * cfg['patch'] * cfg['patch']
    keys = iter(jax.random.split(key, 32))

    def rnd(shape):
        return jax.random.normal(next(keys), shape, jnp.float32) * 0.02

    zeros = lambda s: jnp.zeros(s, jnp.float32)
    ones = lambda s: jnp.ones(s, jnp.float32)

    return {
        # video encoder stand-in (patchify + proj + LN)
        'patch_w': rnd((Pd, D)), 'patch_b': zeros((1, D)),
        'vid_ln_g': ones((1, D)), 'vid_ln_b': zeros((1, D)),
        # audio/text encoder stand-in (embedding + pos + LN)
        'audio_emb': rnd((V, D)), 'audio_pos': rnd((cfg['seq_audio'], D)),
        'aud_ln_g': ones((1, D)), 'aud_ln_b': zeros((1, D)),
        # co-modal attention blocks: 0=sa_video 1=sa_audio 2=ca_video 3=ca_audio
        'cross_attn_wqkv': rnd((4, D, 3 * D)),
        'cross_attn_bqkv': zeros((4, 1, 3 * D)),
        'cross_attn_wo': rnd((4, D, D)), 'cross_attn_bo': zeros((4, 1, D)),
        'cross_attn_ln_g': ones((4, 1, D)), 'cross_attn_ln_b': zeros((4, 1, D)),
        # co-modal ffn blocks: 0=video 1=audio
        'cross_ffn_w1': rnd((2, D, Dff)), 'cross_ffn_b1': zeros((2, 1, Dff)),
        'cross_ffn_w2': rnd((2, Dff, D)), 'cross_ffn_b2': zeros((2, 1, D)),
        'cross_ffn_ln_g': ones((2, 1, D)), 'cross_ffn_ln_b': zeros((2, 1, D)),
        # contrastive heads
        'vproj_w': rnd((D, E)), 'vproj_b': zeros((1, E)),
        'aproj_w': rnd((D, E)), 'aproj_b': zeros((1, E)),
        'logits_scale': jnp.full((1, 1), math.log(1.0 / 0.07), jnp.float32),
        # aggregation module
        'agg_w': rnd((D, D)), 'agg_b': zeros((1, D)),
        'agg_ln_g': ones((1, D)), 'agg_ln_b': zeros((1, D)),
        # text decoder: embedding, attn blocks (0=self, 1=cross), ffn, LM head
        'dec_emb': rnd((V, D)), 'dec_pos': rnd((cfg['seq_dec'], D)),
        'dec_eln_g': ones((1, D)), 'dec_eln_b': zeros((1, D)),
        'dec_attn_wqkv': rnd((2, D, 3 * D)),
        'dec_attn_bqkv': zeros((2, 1, 3 * D)),
        'dec_attn_wo': rnd((2, D, D)), 'dec_attn_bo': zeros((2, 1, D)),
        'dec_attn_ln_g': ones((2, 1, D)), 'dec_attn_ln_b': zeros((2, 1, D)),
        'dec_ffn_w1': rnd((D, Dff)), 'dec_ffn_b1': zeros((1, Dff)),
        'dec_ffn_w2': rnd((Dff, D)), 'dec_ffn_b2': zeros((1, D)),
        'dec_ffn_ln_g': ones((1, D)), 'dec_ffn_ln_b': zeros((1, D)),
        'lm_w': rnd((D, V)), 'lm_b': zeros((1, V)),
    }


# ----------------------------------------------------------------------------
# full forward pass
# ----------------------------------------------------------------------------

def full_model_forward(params, cfg, pixel_values, audio_caption_ids,
                       attention_mask, decoder_input_ids,
                       decoder_attention_mask):
    B, F_, C, H, W = pixel_values.shape
    P = cfg['patch']

    # patchify (pure layout plumbing, done once in XLA)
    x = pixel_values.reshape(B, F_, C, H // P, P, W // P, P)
    patches = x.transpose(0, 1, 3, 5, 2, 4, 6).reshape(
        B, F_ * (H // P) * (W // P), C * P * P)

    # --- fused kernel 1: encoders + co-modal module + contrastive + agg ---
    (video_hidden_state, cls_video, cls_audio, logits_per_video,
     p_sa_v, p_sa_a, p_ca_v, p_ca_a) = cross_module_forward(
        params, cfg, patches, audio_caption_ids, attention_mask)
    attn_tuple = (p_sa_v, p_sa_a, p_ca_v, p_ca_a)

    logits_per_text = logits_per_video.T
    tgt = jnp.arange(B, dtype=jnp.int32)
    loss_contrast = 0.5 * (softmax_ce(logits_per_video, tgt)
                           + softmax_ce(logits_per_text, tgt))

    # --- fused kernel 2: decoder + LM head ---
    logits = decoder_forward(params, cfg, decoder_input_ids,
                             decoder_attention_mask, video_hidden_state)

    # LM loss (labels = ids with pad masked to -100, shifted by one)
    labels = jnp.where(decoder_input_ids == cfg['pad_id'], -100,
                       decoder_input_ids)
    shift_logits = logits[:, :-1, :].reshape(-1, cfg['vocab'])
    shift_labels = labels[:, 1:].reshape(-1)
    loss_lm = softmax_ce_ignore(shift_logits, shift_labels)

    loss_model = loss_lm + loss_contrast
    return (loss_model, logits, attn_tuple,
            logits_per_video, logits_per_text, cls_video, cls_audio)


# ----------------------------------------------------------------------------
# main
# ----------------------------------------------------------------------------

if __name__ == "__main__":
    cfg = CFG
    key = jax.random.PRNGKey(0)
    kp, k1, k2, k3 = jax.random.split(key, 4)
    params = init_params(kp, cfg)

    B = 2
    pixel_values = jax.random.normal(
        k1, (B, cfg['n_frame'], cfg['channels'], cfg['img'], cfg['img']),
        jnp.float32)
    audio_caption_ids = jax.random.randint(
        k2, (B, cfg['seq_audio']), 0, cfg['vocab'], dtype=jnp.int32)
    attention_mask = jnp.array([[1, 1, 1, 1, 1, 1, 1, 1],
                                [1, 1, 1, 1, 1, 1, 0, 0]], dtype=jnp.int32)
    decoder_input_ids = jnp.concatenate(
        [jnp.full((B, 1), 101, jnp.int32),
         jax.random.randint(k3, (B, cfg['seq_dec'] - 1), 1, cfg['vocab'],
                            dtype=jnp.int32)], axis=1)
    decoder_attention_mask = jnp.ones((B, cfg['seq_dec']), jnp.int32)

    @jax.jit
    def fwd(params_, pv, aci, am, dii, dam):
        return full_model_forward(params_, CFG, pv, aci, am, dii, dam)

    outs = fwd(params, pixel_values, audio_caption_ids, attention_mask,
               decoder_input_ids, decoder_attention_mask)
    loss_model, logits = outs[0], outs[1]
    jax.block_until_ready(loss_model)
    jax.block_until_ready(logits)
    assert logits.shape == (B, cfg['seq_dec'], cfg['vocab'])
    assert bool(jnp.isfinite(loss_model))
    print("KERNEL_OK")
</pallas_src>

<mosaic_0001>
module attributes {stable_mosaic.version = 11 : i64} {
  func.func @_cross_module_kernel(%arg0: memref<2x8x192xf32, #tpu.memory_space<vmem>>, %arg1: memref<2x8xi32, #tpu.memory_space<vmem>>, %arg2: memref<2x8xf32, #tpu.memory_space<vmem>>, %arg3: memref<192x32xf32, #tpu.memory_space<vmem>>, %arg4: memref<1x32xf32, #tpu.memory_space<vmem>>, %arg5: memref<1x32xf32, #tpu.memory_space<vmem>>, %arg6: memref<1x32xf32, #tpu.memory_space<vmem>>, %arg7: memref<128x32xf32, #tpu.memory_space<vmem>>, %arg8: memref<8x32xf32, #tpu.memory_space<vmem>>, %arg9: memref<1x32xf32, #tpu.memory_space<vmem>>, %arg10: memref<1x32xf32, #tpu.memory_space<vmem>>, %arg11: memref<4x32x96xf32, #tpu.memory_space<vmem>>, %arg12: memref<4x1x96xf32, #tpu.memory_space<vmem>>, %arg13: memref<4x32x32xf32, #tpu.memory_space<vmem>>, %arg14: memref<4x1x32xf32, #tpu.memory_space<vmem>>, %arg15: memref<4x1x32xf32, #tpu.memory_space<vmem>>, %arg16: memref<4x1x32xf32, #tpu.memory_space<vmem>>, %arg17: memref<2x32x64xf32, #tpu.memory_space<vmem>>, %arg18: memref<2x1x64xf32, #tpu.memory_space<vmem>>, %arg19: memref<2x64x32xf32, #tpu.memory_space<vmem>>, %arg20: memref<2x1x32xf32, #tpu.memory_space<vmem>>, %arg21: memref<2x1x32xf32, #tpu.memory_space<vmem>>, %arg22: memref<2x1x32xf32, #tpu.memory_space<vmem>>, %arg23: memref<32x32xf32, #tpu.memory_space<vmem>>, %arg24: memref<1x32xf32, #tpu.memory_space<vmem>>, %arg25: memref<1x32xf32, #tpu.memory_space<vmem>>, %arg26: memref<1x32xf32, #tpu.memory_space<vmem>>, %arg27: memref<32x16xf32, #tpu.memory_space<vmem>>, %arg28: memref<1x16xf32, #tpu.memory_space<vmem>>, %arg29: memref<32x16xf32, #tpu.memory_space<vmem>>, %arg30: memref<1x16xf32, #tpu.memory_space<vmem>>, %arg31: memref<1x1xf32, #tpu.memory_space<vmem>>, %arg32: memref<2x16x32xf32, #tpu.memory_space<vmem>>, %arg33: memref<2x16xf32, #tpu.memory_space<vmem>>, %arg34: memref<2x16xf32, #tpu.memory_space<vmem>>, %arg35: memref<2x2xf32, #tpu.memory_space<vmem>>, %arg36: memref<2x4x8x8xf32, #tpu.memory_space<vmem>>, %arg37: memref<2x4x8x8xf32, #tpu.memory_space<vmem>>, %arg38: memref<2x4x8x8xf32, #tpu.memory_space<vmem>>, %arg39: memref<2x4x8x8xf32, #tpu.memory_space<vmem>>) attributes {dimension_semantics = [], scalar_prefetch = 0 : i64, scratch_operands = 0 : i64, tpu.core_type = #tpu.core_type<tc>} {
    %c0 = arith.constant 0 : index
    %c0_0 = arith.constant 0 : index
    %c0_1 = arith.constant 0 : index
    %0 = vector.load %arg0[%c0, %c0_0, %c0_1] : memref<2x8x192xf32, #tpu.memory_space<vmem>>, vector<2x8x192xf32>
    %1 = vector.shape_cast %0 : vector<2x8x192xf32> to vector<16x192xf32>
    %c0_2 = arith.constant 0 : index
    %c0_3 = arith.constant 0 : index
    %2 = vector.load %arg3[%c0_2, %c0_3] : memref<192x32xf32, #tpu.memory_space<vmem>>, vector<192x32xf32>
    %cst = arith.constant dense<0.000000e+00> : vector<16x32xf32>
    %3 = tpu.matmul %1, %2, %cst {dimension_numbers = #tpu.dot_dimension_numbers<[1], [0], [0], [1], [0, 0, 1, 1], [], []>} : vector<16x192xf32>, vector<192x32xf32>, vector<16x32xf32> -> vector<16x32xf32>
    %c0_4 = arith.constant 0 : index
    %c0_5 = arith.constant 0 : index
    %4 = vector.load %arg4[%c0_4, %c0_5] : memref<1x32xf32, #tpu.memory_space<vmem>>, vector<1x32xf32>
    %5 = vector.broadcast %4 : vector<1x32xf32> to vector<16x32xf32>
    %6 = arith.addf %3, %5 : vector<16x32xf32>
    %c0_6 = arith.constant 0 : index
    %c0_7 = arith.constant 0 : index
    %7 = vector.load %arg5[%c0_6, %c0_7] : memref<1x32xf32, #tpu.memory_space<vmem>>, vector<1x32xf32>
    %c0_8 = arith.constant 0 : index
    %c0_9 = arith.constant 0 : index
    %8 = vector.load %arg6[%c0_8, %c0_9] : memref<1x32xf32, #tpu.memory_space<vmem>>, vector<1x32xf32>
    %cst_10 = arith.constant dense<0.000000e+00> : vector<16xf32>
    %9 = vector.multi_reduction <add>, %6, %cst_10 [1] : vector<16x32xf32> to vector<16xf32>
    %10 = vector.shape_cast %9 : vector<16xf32> to vector<16x1xf32>
    %cst_11 = arith.constant 3.200000e+01 : f32
    %11 = vector.broadcast %cst_11 : f32 to vector<16x1xf32>
    %12 = arith.divf %10, %11 : vector<16x1xf32>
    %13 = vector.broadcast %12 : vector<16x1xf32> to vector<16x32xf32>
    %14 = arith.subf %6, %13 : vector<16x32xf32>
    %15 = arith.mulf %14, %14 : vector<16x32xf32>
    %cst_12 = arith.constant dense<0.000000e+00> : vector<16xf32>
    %16 = vector.multi_reduction <add>, %15, %cst_12 [1] : vector<16x32xf32> to vector<16xf32>
    %17 = vector.shape_cast %16 : vector<16xf32> to vector<16x1xf32>
    %cst_13 = arith.constant 3.200000e+01 : f32
    %18 = vector.broadcast %cst_13 : f32 to vector<16x1xf32>
    %19 = arith.divf %17, %18 : vector<16x1xf32>
    %20 = vector.broadcast %12 : vector<16x1xf32> to vector<16x32xf32>
    %21 = arith.subf %6, %20 : vector<16x32xf32>
    %cst_14 = arith.constant 9.99999996E-13 : f32
    %22 = vector.broadcast %cst_14 : f32 to vector<16x1xf32>
    %23 = arith.addf %19, %22 : vector<16x1xf32>
    %24 = math.rsqrt %23 : vector<16x1xf32>
    %25 = vector.broadcast %24 : vector<16x1xf32> to vector<16x32xf32>
    %26 = arith.mulf %21, %25 : vector<16x32xf32>
    %27 = vector.broadcast %7 : vector<1x32xf32> to vector<16x32xf32>
    %28 = arith.mulf %26, %27 : vector<16x32xf32>
    %29 = vector.broadcast %8 : vector<1x32xf32> to vector<16x32xf32>
    %30 = arith.addf %28, %29 : vector<16x32xf32>
    %31 = vector.shape_cast %30 : vector<16x32xf32> to vector<2x8x32xf32>
    %c0_15 = arith.constant 0 : index
    %c0_16 = arith.constant 0 : index
    %32 = vector.load %arg1[%c0_15, %c0_16] : memref<2x8xi32, #tpu.memory_space<vmem>>, vector<2x8xi32>
    %c0_17 = arith.constant 0 : index
    %c0_18 = arith.constant 0 : index
    %33 = vector.load %arg7[%c0_17, %c0_18] : memref<128x32xf32, #tpu.memory_space<vmem>>, vector<128x32xf32>
    %34 = tpu.iota {dimensions = array<i32: 2>} : vector<2x8x128xi32>
    %35 = vector.shape_cast %32 : vector<2x8xi32> to vector<2x8x1xi32>
    %36 = vector.broadcast %35 : vector<2x8x1xi32> to vector<2x8x128xi32>
    %37 = arith.cmpi eq, %36, %34 : vector<2x8x128xi32>
    %38 = arith.extui %37 : vector<2x8x128xi1> to vector<2x8x128xi32>
    %39 = arith.sitofp %38 : vector<2x8x128xi32> to vector<2x8x128xf32>
    %40 = vector.shape_cast %39 : vector<2x8x128xf32> to vector<16x128xf32>
    %cst_19 = arith.constant dense<0.000000e+00> : vector<16x32xf32>
    %41 = tpu.matmul %40, %33, %cst_19 {dimension_numbers = #tpu.dot_dimension_numbers<[1], [0], [0], [1], [0, 0, 1, 1], [], []>} : vector<16x128xf32>, vector<128x32xf32>, vector<16x32xf32> -> vector<16x32xf32>
    %42 = vector.shape_cast %41 : vector<16x32xf32> to vector<2x8x32xf32>
    %c0_20 = arith.constant 0 : index
    %c0_21 = arith.constant 0 : index
    %43 = vector.load %arg8[%c0_20, %c0_21] : memref<8x32xf32, #tpu.memory_space<vmem>>, vector<8x32xf32>
    %44 = vector.shape_cast %43 : vector<8x32xf32> to vector<1x8x32xf32>
    %45 = vector.broadcast %44 : vector<1x8x32xf32> to vector<2x8x32xf32>
    %46 = arith.addf %42, %45 : vector<2x8x32xf32>
    %47 = vector.shape_cast %46 : vector<2x8x32xf32> to vector<16x32xf32>
    %c0_22 = arith.constant 0 : index
    %c0_23 = arith.constant 0 : index
    %48 = vector.load %arg9[%c0_22, %c0_23] : memref<1x32xf32, #tpu.memory_space<vmem>>, vector<1x32xf32>
    %c0_24 = arith.constant 0 : index
    %c0_25 = arith.constant 0 : index
    %49 = vector.load %arg10[%c0_24, %c0_25] : memref<1x32xf32, #tpu.memory_space<vmem>>, vector<1x32xf32>
    %cst_26 = arith.constant dense<0.000000e+00> : vector<16xf32>
    %50 = vector.multi_reduction <add>, %47, %cst_26 [1] : vector<16x32xf32> to vector<16xf32>
    %51 = vector.shape_cast %50 : vector<16xf32> to vector<16x1xf32>
    %cst_27 = arith.constant 3.200000e+01 : f32
    %52 = vector.broadcast %cst_27 : f32 to vector<16x1xf32>
    %53 = arith.divf %51, %52 : vector<16x1xf32>
    %54 = vector.broadcast %53 : vector<16x1xf32> to vector<16x32xf32>
    %55 = arith.subf %47, %54 : vector<16x32xf32>
    %56 = arith.mulf %55, %55 : vector<16x32xf32>
    %cst_28 = arith.constant dense<0.000000e+00> : vector<16xf32>
    %57 = vector.multi_reduction <add>, %56, %cst_28 [1] : vector<16x32xf32> to vector<16xf32>
    %58 = vector.shape_cast %57 : vector<16xf32> to vector<16x1xf32>
    %cst_29 = arith.constant 3.200000e+01 : f32
    %59 = vector.broadcast %cst_29 : f32 to vector<16x1xf32>
    %60 = arith.divf %58, %59 : vector<16x1xf32>
    %61 = vector.broadcast %53 : vector<16x1xf32> to vector<16x32xf32>
    %62 = arith.subf %47, %61 : vector<16x32xf32>
    %cst_30 = arith.constant 9.99999996E-13 : f32
    %63 = vector.broadcast %cst_30 : f32 to vector<16x1xf32>
    %64 = arith.addf %60, %63 : vector<16x1xf32>
    %65 = math.rsqrt %64 : vector<16x1xf32>
    %66 = vector.broadcast %65 : vector<16x1xf32> to vector<16x32xf32>
    %67 = arith.mulf %62, %66 : vector<16x32xf32>
    %68 = vector.broadcast %48 : vector<1x32xf32> to vector<16x32xf32>
    %69 = arith.mulf %67, %68 : vector<16x32xf32>
    %70 = vector.broadcast %49 : vector<1x32xf32> to vector<16x32xf32>
    %71 = arith.addf %69, %70 : vector<16x32xf32>
    %72 = vector.shape_cast %71 : vector<16x32xf32> to vector<2x8x32xf32>
    %c0_31 = arith.constant 0 : index
    %c0_32 = arith.constant 0 : index
    %73 = vector.load %arg2[%c0_31, %c0_32] : memref<2x8xf32, #tpu.memory_space<vmem>>, vector<2x8xf32>
    %cst_33 = arith.constant 1.000000e+00 : f32
    %74 = vector.broadcast %cst_33 : f32 to vector<2x8xf32>
    %75 = arith.subf %74, %73 : vector<2x8xf32>
    %cst_34 = arith.constant -1.000000e+09 : f32
    %76 = vector.broadcast %cst_34 : f32 to vector<2x8xf32>
    %77 = arith.mulf %75, %76 : vector<2x8xf32>
    %c0_35 = arith.constant 0 : index
    %c0_36 = arith.constant 0 : index
    %c0_37 = arith.constant 0 : index
    %78 = vector.load %arg11[%c0_35, %c0_36, %c0_37] : memref<4x32x96xf32, #tpu.memory_space<vmem>>, vector<1x32x96xf32>
    %79 = vector.shape_cast %78 : vector<1x32x96xf32> to vector<32x96xf32>
    %c0_38 = arith.constant 0 : index
    %c0_39 = arith.constant 0 : index
    %c0_40 = arith.constant 0 : index
    %80 = vector.load %arg12[%c0_38, %c0_39, %c0_40] : memref<4x1x96xf32, #tpu.memory_space<vmem>>, vector<1x1x96xf32>
    %81 = vector.shape_cast %80 : vector<1x1x96xf32> to vector<1x96xf32>
    %c0_41 = arith.constant 0 : index
    %c0_42 = arith.constant 0 : index
    %c0_43 = arith.constant 0 : index
    %82 = vector.load %arg13[%c0_41, %c0_42, %c0_43] : memref<4x32x32xf32, #tpu.memory_space<vmem>>, vector<1x32x32xf32>
    %83 = vector.shape_cast %82 : vector<1x32x32xf32> to vector<32x32xf32>
    %c0_44 = arith.constant 0 : index
    %c0_45 = arith.constant 0 : index
    %c0_46 = arith.constant 0 : index
    %84 = vector.load %arg14[%c0_44, %c0_45, %c0_46] : memref<4x1x32xf32, #tpu.memory_space<vmem>>, vector<1x1x32xf32>
    %85 = vector.shape_cast %84 : vector<1x1x32xf32> to vector<1x32xf32>
    %c0_47 = arith.constant 0 : index
    %c0_48 = arith.constant 0 : index
    %c0_49 = arith.constant 0 : index
    %86 = vector.load %arg15[%c0_47, %c0_48, %c0_49] : memref<4x1x32xf32, #tpu.memory_space<vmem>>, vector<1x1x32xf32>
    %87 = vector.shape_cast %86 : vector<1x1x32xf32> to vector<1x32xf32>
    %c0_50 = arith.constant 0 : index
    %c0_51 = arith.constant 0 : index
    %c0_52 = arith.constant 0 : index
    %88 = vector.load %arg16[%c0_50, %c0_51, %c0_52] : memref<4x1x32xf32, #tpu.memory_space<vmem>>, vector<1x1x32xf32>
    %89 = vector.shape_cast %88 : vector<1x1x32xf32> to vector<1x32xf32>
    %90 = vector.shape_cast %31 : vector<2x8x32xf32> to vector<16x32xf32>
    %cst_53 = arith.constant dense<0.000000e+00> : vector<16x96xf32>
    %91 = tpu.matmul %90, %79, %cst_53 {dimension_numbers = #tpu.dot_dimension_numbers<[1], [0], [0], [1], [0, 0, 1, 1], [], []>} : vector<16x32xf32>, vector<32x96xf32>, vector<16x96xf32> -> vector<16x96xf32>
    %92 = vector.broadcast %81 : vector<1x96xf32> to vector<16x96xf32>
    %93 = arith.addf %91, %92 : vector<16x96xf32>
    %94 = vector.extract_strided_slice %93 {offsets = [0, 0], sizes = [16, 32], strides = [1, 1]} : vector<16x96xf32> to vector<16x32xf32>
    %95 = vector.shape_cast %94 : vector<16x32xf32> to vector<2x8x32xf32>
    %96 = vector.extract_strided_slice %93 {offsets = [0, 32], sizes = [16, 32], strides = [1, 1]} : vector<16x96xf32> to vector<16x32xf32>
    %97 = vector.shape_cast %96 : vector<16x32xf32> to vector<2x8x32xf32>
    %98 = vector.extract_strided_slice %93 {offsets = [0, 64], sizes = [16, 32], strides = [1, 1]} : vector<16x96xf32> to vector<16x32xf32>
    %99 = vector.shape_cast %98 : vector<16x32xf32> to vector<2x8x32xf32>
    %100 = vector.extract_strided_slice %95 {offsets = [0, 0, 0], sizes = [2, 8, 8], strides = [1, 1, 1]} : vector<2x8x32xf32> to vector<2x8x8xf32>
    %101 = vector.extract_strided_slice %97 {offsets = [0, 0, 0], sizes = [2, 8, 8], strides = [1, 1, 1]} : vector<2x8x32xf32> to vector<2x8x8xf32>
    "tpu.trace_start"() <{level = 10 : i32, message = "bqd,bkd->bqk"}> : () -> ()
    %cst_54 = arith.constant dense<0.000000e+00> : vector<2x8x8xf32>
    %102 = tpu.matmul %100, %101, %cst_54 {dimension_numbers = #tpu.dot_dimension_numbers<[2], [2], [1], [1], [0, 0, 0, 1, 1, 1], [0], [0]>} : vector<2x8x8xf32>, vector<2x8x8xf32>, vector<2x8x8xf32> -> vector<2x8x8xf32>
    "tpu.trace_stop"() : () -> ()
    %cst_55 = arith.constant 0.353553385 : f32
    %103 = vector.broadcast %cst_55 : f32 to vector<2x8x8xf32>
    %104 = arith.mulf %102, %103 : vector<2x8x8xf32>
    %cst_56 = arith.constant dense<0xFF800000> : vector<2x8xf32>
    %105 = vector.multi_reduction <maximumf>, %104, %cst_56 [2] : vector<2x8x8xf32> to vector<2x8xf32>
    %106 = vector.shape_cast %105 : vector<2x8xf32> to vector<2x8x1xf32>
    %107 = vector.broadcast %106 : vector<2x8x1xf32> to vector<2x8x8xf32>
    %108 = arith.subf %104, %107 : vector<2x8x8xf32>
    %109 = math.exp %108 : vector<2x8x8xf32>
    %cst_57 = arith.constant dense<0.000000e+00> : vector<2x8xf32>
    %110 = vector.multi_reduction <add>, %109, %cst_57 [2] : vector<2x8x8xf32> to vector<2x8xf32>
    %111 = vector.shape_cast %110 : vector<2x8xf32> to vector<2x8x1xf32>
    %112 = vector.broadcast %111 : vector<2x8x1xf32> to vector<2x8x8xf32>
    %113 = arith.divf %109, %112 : vector<2x8x8xf32>
    %114 = vector.extract_strided_slice %99 {offsets = [0, 0, 0], sizes = [2, 8, 8], strides = [1, 1, 1]} : vector<2x8x32xf32> to vector<2x8x8xf32>
    "tpu.trace_start"() <{level = 10 : i32, message = "bqk,bkd->bqd"}> : () -> ()
    %cst_58 = arith.constant dense<0.000000e+00> : vector<2x8x8xf32>
    %115 = tpu.matmul %113, %114, %cst_58 {dimension_numbers = #tpu.dot_dimension_numbers<[2], [1], [1], [2], [0, 0, 0, 1, 1, 2], [0], [0]>} : vector<2x8x8xf32>, vector<2x8x8xf32>, vector<2x8x8xf32> -> vector<2x8x8xf32>
    "tpu.trace_stop"() : () -> ()
    %116 = vector.extract_strided_slice %95 {offsets = [0, 0, 8], sizes = [2, 8, 8], strides = [1, 1, 1]} : vector<2x8x32xf32> to vector<2x8x8xf32>
    %117 = vector.extract_strided_slice %97 {offsets = [0, 0, 8], sizes = [2, 8, 8], strides = [1, 1, 1]} : vector<2x8x32xf32> to vector<2x8x8xf32>
    "tpu.trace_start"() <{level = 10 : i32, message = "bqd,bkd->bqk"}> : () -> ()
    %cst_59 = arith.constant dense<0.000000e+00> : vector<2x8x8xf32>
    %118 = tpu.matmul %116, %117, %cst_59 {dimension_numbers = #tpu.dot_dimension_numbers<[2], [2], [1], [1], [0, 0, 0, 1, 1, 1], [0], [0]>} : vector<2x8x8xf32>, vector<2x8x8xf32>, vector<2x8x8xf32> -> vector<2x8x8xf32>
    "tpu.trace_stop"() : () -> ()
    %cst_60 = arith.constant 0.353553385 : f32
    %119 = vector.broadcast %cst_60 : f32 to vector<2x8x8xf32>
    %120 = arith.mulf %118, %119 : vector<2x8x8xf32>
    %cst_61 = arith.constant dense<0xFF800000> : vector<2x8xf32>
    %121 = vector.multi_reduction <maximumf>, %120, %cst_61 [2] : vector<2x8x8xf32> to vector<2x8xf32>
    %122 = vector.shape_cast %121 : vector<2x8xf32> to vector<2x8x1xf32>
    %123 = vector.broadcast %122 : vector<2x8x1xf32> to vector<2x8x8xf32>
    %124 = arith.subf %120, %123 : vector<2x8x8xf32>
    %125 = math.exp %124 : vector<2x8x8xf32>
    %cst_62 = arith.constant dense<0.000000e+00> : vector<2x8xf32>
    %126 = vector.multi_reduction <add>, %125, %cst_62 [2] : vector<2x8x8xf32> to vector<2x8xf32>
    %127 = vector.shape_cast %126 : vector<2x8xf32> to vector<2x8x1xf32>
    %128 = vector.broadcast %127 : vector<2x8x1xf32> to vector<2x8x8xf32>
    %129 = arith.divf %125, %128 : vector<2x8x8xf32>
    %130 = vector.extract_strided_slice %99 {offsets = [0, 0, 8], sizes = [2, 8, 8], strides = [1, 1, 1]} : vector<2x8x32xf32> to vector<2x8x8xf32>
    "tpu.trace_start"() <{level = 10 : i32, message = "bqk,bkd->bqd"}> : () -> ()
    %cst_63 = arith.constant dense<0.000000e+00> : vector<2x8x8xf32>
    %131 = tpu.matmul %129, %130, %cst_63 {dimension_numbers = #tpu.dot_dimension_numbers<[2], [1], [1], [2], [0, 0, 0, 1, 1, 2], [0], [0]>} : vector<2x8x8xf32>, vector<2x8x8xf32>, vector<2x8x8xf32> -> vector<2x8x8xf32>
    "tpu.trace_stop"() : () -> ()
    %132 = vector.extract_strided_slice %95 {offsets = [0, 0, 16], sizes = [2, 8, 8], strides = [1, 1, 1]} : vector<2x8x32xf32> to vector<2x8x8xf32>
    %133 = vector.extract_strided_slice %97 {offsets = [0, 0, 16], sizes = [2, 8, 8], strides = [1, 1, 1]} : vector<2x8x32xf32> to vector<2x8x8xf32>
    "tpu.trace_start"() <{level = 10 : i32, message = "bqd,bkd->bqk"}> : () -> ()
    %cst_64 = arith.constant dense<0.000000e+00> : vector<2x8x8xf32>
    %134 = tpu.matmul %132, %133, %cst_64 {dimension_numbers = #tpu.dot_dimension_numbers<[2], [2], [1], [1], [0, 0, 0, 1, 1, 1], [0], [0]>} : vector<2x8x8xf32>, vector<2x8x8xf32>, vector<2x8x8xf32> -> vector<2x8x8xf32>
    "tpu.trace_stop"() : () -> ()
    %cst_65 = arith.constant 0.353553385 : f32
    %135 = vector.broadcast %cst_65 : f32 to vector<2x8x8xf32>
    %136 = arith.mulf %134, %135 : vector<2x8x8xf32>
    %cst_66 = arith.constant dense<0xFF800000> : vector<2x8xf32>
    %137 = vector.multi_reduction <maximumf>, %136, %cst_66 [2] : vector<2x8x8xf32> to vector<2x8xf32>
    %138 = vector.shape_cast %137 : vector<2x8xf32> to vector<2x8x1xf32>
    %139 = vector.broadcast %138 : vector<2x8x1xf32> to vector<2x8x8xf32>
    %140 = arith.subf %136, %139 : vector<2x8x8xf32>
    %141 = math.exp %140 : vector<2x8x8xf32>
    %cst_67 = arith.constant dense<0.000000e+00> : vector<2x8xf32>
    %142 = vector.multi_reduction <add>, %141, %cst_67 [2] : vector<2x8x8xf32> to vector<2x8xf32>
    %143 = vector.shape_cast %142 : vector<2x8xf32> to vector<2x8x1xf32>
    %144 = vector.broadcast %143 : vector<2x8x1xf32> to vector<2x8x8xf32>
    %145 = arith.divf %141, %144 : vector<2x8x8xf32>
    %146 = vector.extract_strided_slice %99 {offsets = [0, 0, 16], sizes = [2, 8, 8], strides = [1, 1, 1]} : vector<2x8x32xf32> to vector<2x8x8xf32>
    "tpu.trace_start"() <{level = 10 : i32, message = "bqk,bkd->bqd"}> : () -> ()
    %cst_68 = arith.constant dense<0.000000e+00> : vector<2x8x8xf32>
    %147 = tpu.matmul %145, %146, %cst_68 {dimension_numbers = #tpu.dot_dimension_numbers<[2], [1], [1], [2], [0, 0, 0, 1, 1, 2], [0], [0]>} : vector<2x8x8xf32>, vector<2x8x8xf32>, vector<2x8x8xf32> -> vector<2x8x8xf32>
    "tpu.trace_stop"() : () -> ()
    %148 = vector.extract_strided_slice %95 {offsets = [0, 0, 24], sizes = [2, 8, 8], strides = [1, 1, 1]} : vector<2x8x32xf32> to vector<2x8x8xf32>
    %149 = vector.extract_strided_slice %97 {offsets = [0, 0, 24], sizes = [2, 8, 8], strides = [1, 1, 1]} : vector<2x8x32xf32> to vector<2x8x8xf32>
    "tpu.trace_start"() <{level = 10 : i32, message = "bqd,bkd->bqk"}> : () -> ()
    %cst_69 = arith.constant dense<0.000000e+00> : vector<2x8x8xf32>
    %150 = tpu.matmul %148, %149, %cst_69 {dimension_numbers = #tpu.dot_dimension_numbers<[2], [2], [1], [1], [0, 0, 0, 1, 1, 1], [0], [0]>} : vector<2x8x8xf32>, vector<2x8x8xf32>, vector<2x8x8xf32> -> vector<2x8x8xf32>
    "tpu.trace_stop"() : () -> ()
    %cst_70 = arith.constant 0.353553385 : f32
    %151 = vector.broadcast %cst_70 : f32 to vector<2x8x8xf32>
    %152 = arith.mulf %150, %151 : vector<2x8x8xf32>
    %cst_71 = arith.constant dense<0xFF800000> : vector<2x8xf32>
    %153 = vector.multi_reduction <maximumf>, %152, %cst_71 [2] : vector<2x8x8xf32> to vector<2x8xf32>
    %154 = vector.shape_cast %153 : vector<2x8xf32> to vector<2x8x1xf32>
    %155 = vector.broadcast %154 : vector<2x8x1xf32> to vector<2x8x8xf32>
    %156 = arith.subf %152, %155 : vector<2x8x8xf32>
    %157 = math.exp %156 : vector<2x8x8xf32>
    %cst_72 = arith.constant dense<0.000000e+00> : vector<2x8xf32>
    %158 = vector.multi_reduction <add>, %157, %cst_72 [2] : vector<2x8x8xf32> to vector<2x8xf32>
    %159 = vector.shape_cast %158 : vector<2x8xf32> to vector<2x8x1xf32>
    %160 = vector.broadcast %159 : vector<2x8x1xf32> to vector<2x8x8xf32>
    %161 = arith.divf %157, %160 : vector<2x8x8xf32>
    %162 = vector.extract_strided_slice %99 {offsets = [0, 0, 24], sizes = [2, 8, 8], strides = [1, 1, 1]} : vector<2x8x32xf32> to vector<2x8x8xf32>
    "tpu.trace_start"() <{level = 10 : i32, message = "bqk,bkd->bqd"}> : () -> ()
    %cst_73 = arith.constant dense<0.000000e+00> : vector<2x8x8xf32>
    %163 = tpu.matmul %161, %162, %cst_73 {dimension_numbers = #tpu.dot_dimension_numbers<[2], [1], [1], [2], [0, 0, 0, 1, 1, 2], [0], [0]>} : vector<2x8x8xf32>, vector<2x8x8xf32>, vector<2x8x8xf32> -> vector<2x8x8xf32>
    "tpu.trace_stop"() : () -> ()
    %164 = tpu.concatenate %115, %131, %147, %163 in 2 : vector<2x8x8xf32>, vector<2x8x8xf32>, vector<2x8x8xf32>, vector<2x8x8xf32> -> vector<2x8x32xf32>
    %165 = vector.shape_cast %164 : vector<2x8x32xf32> to vector<16x32xf32>
    %cst_74 = arith.constant dense<0.000000e+00> : vector<16x32xf32>
    %166 = tpu.matmul %165, %83, %cst_74 {dimension_numbers = #tpu.dot_dimension_numbers<[1], [0], [0], [1], [0, 0, 1, 1], [], []>} : vector<16x32xf32>, vector<32x32xf32>, vector<16x32xf32> -> vector<16x32xf32>
    %167 = vector.broadcast %85 : vector<1x32xf32> to vector<16x32xf32>
    %168 = arith.addf %166, %167 : vector<16x32xf32>
    %169 = arith.addf %168, %90 : vector<16x32xf32>
    %cst_75 = arith.constant dense<0.000000e+00> : vector<16xf32>
    %170 = vector.multi_reduction <add>, %169, %cst_75 [1] : vector<16x32xf32> to vector<16xf32>
    %171 = vector.shape_cast %170 : vector<16xf32> to vector<16x1xf32>
    %cst_76 = arith.constant 3.200000e+01 : f32
    %172 = vector.broadcast %cst_76 : f32 to vector<16x1xf32>
    %173 = arith.divf %171, %172 : vector<16x1xf32>
    %174 = vector.broadcast %173 : vector<16x1xf32> to vector<16x32xf32>
    %175 = arith.subf %169, %174 : vector<16x32xf32>
    %176 = arith.mulf %175, %175 : vector<16x32xf32>
    %cst_77 = arith.constant dense<0.000000e+00> : vector<16xf32>
    %177 = vector.multi_reduction <add>, %176, %cst_77 [1] : vector<16x32xf32> to vector<16xf32>
    %178 = vector.shape_cast %177 : vector<16xf32> to vector<16x1xf32>
    %cst_78 = arith.constant 3.200000e+01 : f32
    %179 = vector.broadcast %cst_78 : f32 to vector<16x1xf32>
    %180 = arith.divf %178, %179 : vector<16x1xf32>
    %181 = vector.broadcast %173 : vector<16x1xf32> to vector<16x32xf32>
    %182 = arith.subf %169, %181 : vector<16x32xf32>
    %cst_79 = arith.constant 9.99999996E-13 : f32
    %183 = vector.broadcast %cst_79 : f32 to vector<16x1xf32>
    %184 = arith.addf %180, %183 : vector<16x1xf32>
    %185 = math.rsqrt %184 : vector<16x1xf32>
    %186 = vector.broadcast %185 : vector<16x1xf32> to vector<16x32xf32>
    %187 = arith.mulf %182, %186 : vector<16x32xf32>
    %188 = vector.broadcast %87 : vector<1x32xf32> to vector<16x32xf32>
    %189 = arith.mulf %187, %188 : vector<16x32xf32>
    %190 = vector.broadcast %89 : vector<1x32xf32> to vector<16x32xf32>
    %191 = arith.addf %189, %190 : vector<16x32xf32>
    %192 = vector.shape_cast %191 : vector<16x32xf32> to vector<2x8x32xf32>
    %193 = vector.shape_cast %113 : vector<2x8x8xf32> to vector<2x1x8x8xf32>
    %194 = vector.shape_cast %129 : vector<2x8x8xf32> to vector<2x1x8x8xf32>
    %195 = vector.shape_cast %145 : vector<2x8x8xf32> to vector<2x1x8x8xf32>
    %196 = vector.shape_cast %161 : vector<2x8x8xf32> to vector<2x1x8x8xf32>
    %197 = tpu.concatenate %193, %194, %195, %196 in 1 : vector<2x1x8x8xf32>, vector<2x1x8x8xf32>, vector<2x1x8x8xf32>, vector<2x1x8x8xf32> -> vector<2x4x8x8xf32>
    %c1 = arith.constant 1 : index
    %c0_80 = arith.constant 0 : index
    %c0_81 = arith.constant 0 : index
    %198 = vector.load %arg11[%c1, %c0_80, %c0_81] : memref<4x32x96xf32, #tpu.memory_space<vmem>>, vector<1x32x96xf32>
    %199 = vector.shape_cast %198 : vector<1x32x96xf32> to vector<32x96xf32>
    %c1_82 = arith.constant 1 : index
    %c0_83 = arith.constant 0 : index
    %c0_84 = arith.constant 0 : index
    %200 = vector.load %arg12[%c1_82, %c0_83, %c0_84] : memref<4x1x96xf32, #tpu.memory_space<vmem>>, vector<1x1x96xf32>
    %201 = vector.shape_cast %200 : vector<1x1x96xf32> to vector<1x96xf32>
    %c1_85 = arith.constant 1 : index
    %c0_86 = arith.constant 0 : index
    %c0_87 = arith.constant 0 : index
    %202 = vector.load %arg13[%c1_85, %c0_86, %c0_87] : memref<4x32x32xf32, #tpu.memory_space<vmem>>, vector<1x32x32xf32>
    %203 = vector.shape_cast %202 : vector<1x32x32xf32> to vector<32x32xf32>
    %c1_88 = arith.constant 1 : index
    %c0_89 = arith.constant 0 : index
    %c0_90 = arith.constant 0 : index
    %204 = vector.load %arg14[%c1_88, %c0_89, %c0_90] : memref<4x1x32xf32, #tpu.memory_space<vmem>>, vector<1x1x32xf32>
    %205 = vector.shape_cast %204 : vector<1x1x32xf32> to vector<1x32xf32>
    %c1_91 = arith.constant 1 : index
    %c0_92 = arith.constant 0 : index
    %c0_93 = arith.constant 0 : index
    %206 = vector.load %arg15[%c1_91, %c0_92, %c0_93] : memref<4x1x32xf32, #tpu.memory_space<vmem>>, vector<1x1x32xf32>
    %207 = vector.shape_cast %206 : vector<1x1x32xf32> to vector<1x32xf32>
    %c1_94 = arith.constant 1 : index
    %c0_95 = arith.constant 0 : index
    %c0_96 = arith.constant 0 : index
    %208 = vector.load %arg16[%c1_94, %c0_95, %c0_96] : memref<4x1x32xf32, #tpu.memory_space<vmem>>, vector<1x1x32xf32>
    %209 = vector.shape_cast %208 : vector<1x1x32xf32> to vector<1x32xf32>
    %210 = vector.shape_cast %72 : vector<2x8x32xf32> to vector<16x32xf32>
    %cst_97 = arith.constant dense<0.000000e+00> : vector<16x96xf32>
    %211 = tpu.matmul %210, %199, %cst_97 {dimension_numbers = #tpu.dot_dimension_numbers<[1], [0], [0], [1], [0, 0, 1, 1], [], []>} : vector<16x32xf32>, vector<32x96xf32>, vector<16x96xf32> -> vector<16x96xf32>
    %212 = vector.broadcast %201 : vector<1x96xf32> to vector<16x96xf32>
    %213 = arith.addf %211, %212 : vector<16x96xf32>
    %214 = vector.extract_strided_slice %213 {offsets = [0, 0], sizes = [16, 32], strides = [1, 1]} : vector<16x96xf32> to vector<16x32xf32>
    %215 = vector.shape_cast %214 : vector<16x32xf32> to vector<2x8x32xf32>
    %216 = vector.extract_strided_slice %213 {offsets = [0, 32], sizes = [16, 32], strides = [1, 1]} : vector<16x96xf32> to vector<16x32xf32>
    %217 = vector.shape_cast %216 : vector<16x32xf32> to vector<2x8x32xf32>
    %218 = vector.extract_strided_slice %213 {offsets = [0, 64], sizes = [16, 32], strides = [1, 1]} : vector<16x96xf32> to vector<16x32xf32>
    %219 = vector.shape_cast %218 : vector<16x32xf32> to vector<2x8x32xf32>
    %220 = vector.shape_cast %77 : vector<2x8xf32> to vector<2x1x8xf32>
    %221 = vector.extract_strided_slice %215 {offsets = [0, 0, 0], sizes = [2, 8, 8], strides = [1, 1, 1]} : vector<2x8x32xf32> to vector<2x8x8xf32>
    %222 = vector.extract_strided_slice %217 {offsets = [0, 0, 0], sizes = [2, 8, 8], strides = [1, 1, 1]} : vector<2x8x32xf32> to vector<2x8x8xf32>
    "tpu.trace_start"() <{level = 10 : i32, message = "bqd,bkd->bqk"}> : () -> ()
    %cst_98 = arith.constant dense<0.000000e+00> : vector<2x8x8xf32>
    %223 = tpu.matmul %221, %222, %cst_98 {dimension_numbers = #tpu.dot_dimension_numbers<[2], [2], [1], [1], [0, 0, 0, 1, 1, 1], [0], [0]>} : vector<2x8x8xf32>, vector<2x8x8xf32>, vector<2x8x8xf32> -> vector<2x8x8xf32>
    "tpu.trace_stop"() : () -> ()
    %cst_99 = arith.constant 0.353553385 : f32
    %224 = vector.broadcast %cst_99 : f32 to vector<2x8x8xf32>
    %225 = arith.mulf %223, %224 : vector<2x8x8xf32>
    %226 = vector.broadcast %220 : vector<2x1x8xf32> to vector<2x8x8xf32>
    %227 = arith.addf %225, %226 : vector<2x8x8xf32>
    %cst_100 = arith.constant dense<0xFF800000> : vector<2x8xf32>
    %228 = vector.multi_reduction <maximumf>, %227, %cst_100 [2] : vector<2x8x8xf32> to vector<2x8xf32>
    %229 = vector.shape_cast %228 : vector<2x8xf32> to vector<2x8x1xf32>
    %230 = vector.broadcast %229 : vector<2x8x1xf32> to vector<2x8x8xf32>
    %231 = arith.subf %227, %230 : vector<2x8x8xf32>
    %232 = math.exp %231 : vector<2x8x8xf32>
    %cst_101 = arith.constant dense<0.000000e+00> : vector<2x8xf32>
    %233 = vector.multi_reduction <add>, %232, %cst_101 [2] : vector<2x8x8xf32> to vector<2x8xf32>
    %234 = vector.shape_cast %233 : vector<2x8xf32> to vector<2x8x1xf32>
    %235 = vector.broadcast %234 : vector<2x8x1xf32> to vector<2x8x8xf32>
    %236 = arith.divf %232, %235 : vector<2x8x8xf32>
    %237 = vector.extract_strided_slice %219 {offsets = [0, 0, 0], sizes = [2, 8, 8], strides = [1, 1, 1]} : vector<2x8x32xf32> to vector<2x8x8xf32>
    "tpu.trace_start"() <{level = 10 : i32, message = "bqk,bkd->bqd"}> : () -> ()
    %cst_102 = arith.constant dense<0.000000e+00> : vector<2x8x8xf32>
    %238 = tpu.matmul %236, %237, %cst_102 {dimension_numbers = #tpu.dot_dimension_numbers<[2], [1], [1], [2], [0, 0, 0, 1, 1, 2], [0], [0]>} : vector<2x8x8xf32>, vector<2x8x8xf32>, vector<2x8x8xf32> -> vector<2x8x8xf32>
    "tpu.trace_stop"() : () -> ()
    %239 = vector.extract_strided_slice %215 {offsets = [0, 0, 8], sizes = [2, 8, 8], strides = [1, 1, 1]} : vector<2x8x32xf32> to vector<2x8x8xf32>
    %240 = vector.extract_strided_slice %217 {offsets = [0, 0, 8], sizes = [2, 8, 8], strides = [1, 1, 1]} : vector<2x8x32xf32> to vector<2x8x8xf32>
    "tpu.trace_start"() <{level = 10 : i32, message = "bqd,bkd->bqk"}> : () -> ()
    %cst_103 = arith.constant dense<0.000000e+00> : vector<2x8x8xf32>
    %241 = tpu.matmul %239, %240, %cst_103 {dimension_numbers = #tpu.dot_dimension_numbers<[2], [2], [1], [1], [0, 0, 0, 1, 1, 1], [0], [0]>} : vector<2x8x8xf32>, vector<2x8x8xf32>, vector<2x8x8xf32> -> vector<2x8x8xf32>
    "tpu.trace_stop"() : () -> ()
    %cst_104 = arith.constant 0.353553385 : f32
    %242 = vector.broadcast %cst_104 : f32 to vector<2x8x8xf32>
    %243 = arith.mulf %241, %242 : vector<2x8x8xf32>
    %244 = vector.broadcast %220 : vector<2x1x8xf32> to vector<2x8x8xf32>
    %245 = arith.addf %243, %244 : vector<2x8x8xf32>
    %cst_105 = arith.constant dense<0xFF800000> : vector<2x8xf32>
    %246 = vector.multi_reduction <maximumf>, %245, %cst_105 [2] : vector<2x8x8xf32> to vector<2x8xf32>
    %247 = vector.shape_cast %246 : vector<2x8xf32> to vector<2x8x1xf32>
    %248 = vector.broadcast %247 : vector<2x8x1xf32> to vector<2x8x8xf32>
    %249 = arith.subf %245, %248 : vector<2x8x8xf32>
    %250 = math.exp %249 : vector<2x8x8xf32>
    %cst_106 = arith.constant dense<0.000000e+00> : vector<2x8xf32>
    %251 = vector.multi_reduction <add>, %250, %cst_106 [2] : vector<2x8x8xf32> to vector<2x8xf32>
    %252 = vector.shape_cast %251 : vector<2x8xf32> to vector<2x8x1xf32>
    %253 = vector.broadcast %252 : vector<2x8x1xf32> to vector<2x8x8xf32>
    %254 = arith.divf %250, %253 : vector<2x8x8xf32>
    %255 = vector.extract_strided_slice %219 {offsets = [0, 0, 8], sizes = [2, 8, 8], strides = [1, 1, 1]} : vector<2x8x32xf32> to vector<2x8x8xf32>
    "tpu.trace_start"() <{level = 10 : i32, message = "bqk,bkd->bqd"}> : () -> ()
    %cst_107 = arith.constant dense<0.000000e+00> : vector<2x8x8xf32>
    %256 = tpu.matmul %254, %255, %cst_107 {dimension_numbers = #tpu.dot_dimension_numbers<[2], [1], [1], [2], [0, 0, 0, 1, 1, 2], [0], [0]>} : vector<2x8x8xf32>, vector<2x8x8xf32>, vector<2x8x8xf32> -> vector<2x8x8xf32>
    "tpu.trace_stop"() : () -> ()
    %257 = vector.extract_strided_slice %215 {offsets = [0, 0, 16], sizes = [2, 8, 8], strides = [1, 1, 1]} : vector<2x8x32xf32> to vector<2x8x8xf32>
    %258 = vector.extract_strided_slice %217 {offsets = [0, 0, 16], sizes = [2, 8, 8], strides = [1, 1, 1]} : vector<2x8x32xf32> to vector<2x8x8xf32>
    "tpu.trace_start"() <{level = 10 : i32, message = "bqd,bkd->bqk"}> : () -> ()
    %cst_108 = arith.constant dense<0.000000e+00> : vector<2x8x8xf32>
    %259 = tpu.matmul %257, %258, %cst_108 {dimension_numbers = #tpu.dot_dimension_numbers<[2], [2], [1], [1], [0, 0, 0, 1, 1, 1], [0], [0]>} : vector<2x8x8xf32>, vector<2x8x8xf32>, vector<2x8x8xf32> -> vector<2x8x8xf32>
    "tpu.trace_stop"() : () -> ()
    %cst_109 = arith.constant 0.353553385 : f32
    %260 = vector.broadcast %cst_109 : f32 to vector<2x8x8xf32>
    %261 = arith.mulf %259, %260 : vector<2x8x8xf32>
    %262 = vector.broadcast %220 : vector<2x1x8xf32> to vector<2x8x8xf32>
    %263 = arith.addf %261, %262 : vector<2x8x8xf32>
    %cst_110 = arith.constant dense<0xFF800000> : vector<2x8xf32>
    %264 = vector.multi_reduction <maximumf>, %263, %cst_110 [2] : vector<2x8x8xf32> to vector<2x8xf32>
    %265 = vector.shape_cast %264 : vector<2x8xf32> to vector<2x8x1xf32>
    %266 = vector.broadcast %265 : vector<2x8x1xf32> to vector<2x8x8xf32>
    %267 = arith.subf %263, %266 : vector<2x8x8xf32>
    %268 = math.exp %267 : vector<2x8x8xf32>
    %cst_111 = arith.constant dense<0.000000e+00> : vector<2x8xf32>
    %269 = vector.multi_reduction <add>, %268, %cst_111 [2] : vector<2x8x8xf32> to vector<2x8xf32>
    %270 = vector.shape_cast %269 : vector<2x8xf32> to vector<2x8x1xf32>
    %271 = vector.broadcast %270 : vector<2x8x1xf32> to vector<2x8x8xf32>
    %272 = arith.divf %268, %271 : vector<2x8x8xf32>
    %273 = vector.extract_strided_slice %219 {offsets = [0, 0, 16], sizes = [2, 8, 8], strides = [1, 1, 1]} : vector<2x8x32xf32> to vector<2x8x8xf32>
    "tpu.trace_start"() <{level = 10 : i32, message = "bqk,bkd->bqd"}> : () -> ()
    %cst_112 = arith.constant dense<0.000000e+00> : vector<2x8x8xf32>
    %274 = tpu.matmul %272, %273, %cst_112 {dimension_numbers = #tpu.dot_dimension_numbers<[2], [1], [1], [2], [0, 0, 0, 1, 1, 2], [0], [0]>} : vector<2x8x8xf32>, vector<2x8x8xf32>, vector<2x8x8xf32> -> vector<2x8x8xf32>
    "tpu.trace_stop"() : () -> ()
    %275 = vector.extract_strided_slice %215 {offsets = [0, 0, 24], sizes = [2, 8, 8], strides = [1, 1, 1]} : vector<2x8x32xf32> to vector<2x8x8xf32>
    %276 = vector.extract_strided_slice %217 {offsets = [0, 0, 24], sizes = [2, 8, 8], strides = [1, 1, 1]} : vector<2x8x32xf32> to vector<2x8x8xf32>
    "tpu.trace_start"() <{level = 10 : i32, message = "bqd,bkd->bqk"}> : () -> ()
    %cst_113 = arith.constant dense<0.000000e+00> : vector<2x8x8xf32>
    %277 = tpu.matmul %275, %276, %cst_113 {dimension_numbers = #tpu.dot_dimension_numbers<[2], [2], [1], [1], [0, 0, 0, 1, 1, 1], [0], [0]>} : vector<2x8x8xf32>, vector<2x8x8xf32>, vector<2x8x8xf32> -> vector<2x8x8xf32>
    "tpu.trace_stop"() : () -> ()
    %cst_114 = arith.constant 0.353553385 : f32
    %278 = vector.broadcast %cst_114 : f32 to vector<2x8x8xf32>
    %279 = arith.mulf %277, %278 : vector<2x8x8xf32>
    %280 = vector.broadcast %220 : vector<2x1x8xf32> to vector<2x8x8xf32>
    %281 = arith.addf %279, %280 : vector<2x8x8xf32>
    %cst_115 = arith.constant dense<0xFF800000> : vector<2x8xf32>
    %282 = vector.multi_reduction <maximumf>, %281, %cst_115 [2] : vector<2x8x8xf32> to vector<2x8xf32>
    %283 = vector.shape_cast %282 : vector<2x8xf32> to vector<2x8x1xf32>
    %284 = vector.broadcast %283 : vector<2x8x1xf32> to vector<2x8x8xf32>
    %285 = arith.subf %281, %284 : vector<2x8x8xf32>
    %286 = math.exp %285 : vector<2x8x8xf32>
    %cst_116 = arith.constant dense<0.000000e+00> : vector<2x8xf32>
    %287 = vector.multi_reduction <add>, %286, %cst_116 [2] : vector<2x8x8xf32> to vector<2x8xf32>
    %288 = vector.shape_cast %287 : vector<2x8xf32> to vector<2x8x1xf32>
    %289 = vector.broadcast %288 : vector<2x8x1xf32> to vector<2x8x8xf32>
    %290 = arith.divf %286, %289 : vector<2x8x8xf32>
    %291 = vector.extract_strided_slice %219 {offsets = [0, 0, 24], sizes = [2, 8, 8], strides = [1, 1, 1]} : vector<2x8x32xf32> to vector<2x8x8xf32>
    "tpu.trace_start"() <{level = 10 : i32, message = "bqk,bkd->bqd"}> : () -> ()
    %cst_117 = arith.constant dense<0.000000e+00> : vector<2x8x8xf32>
    %292 = tpu.matmul %290, %291, %cst_117 {dimension_numbers = #tpu.dot_dimension_numbers<[2], [1], [1], [2], [0, 0, 0, 1, 1, 2], [0], [0]>} : vector<2x8x8xf32>, vector<2x8x8xf32>, vector<2x8x8xf32> -> vector<2x8x8xf32>
    "tpu.trace_stop"() : () -> ()
    %293 = tpu.concatenate %238, %256, %274, %292 in 2 : vector<2x8x8xf32>, vector<2x8x8xf32>, vector<2x8x8xf32>, vector<2x8x8xf32> -> vector<2x8x32xf32>
    %294 = vector.shape_cast %293 : vector<2x8x32xf32> to vector<16x32xf32>
    %cst_118 = arith.constant dense<0.000000e+00> : vector<16x32xf32>
    %295 = tpu.matmul %294, %203, %cst_118 {dimension_numbers = #tpu.dot_dimension_numbers<[1], [0], [0], [1], [0, 0, 1, 1], [], []>} : vector<16x32xf32>, vector<32x32xf32>, vector<16x32xf32> -> vector<16x32xf32>
    %296 = vector.broadcast %205 : vector<1x32xf32> to vector<16x32xf32>
    %297 = arith.addf %295, %296 : vector<16x32xf32>
    %298 = arith.addf %297, %210 : vector<16x32xf32>
    %cst_119 = arith.constant dense<0.000000e+00> : vector<16xf32>
    %299 = vector.multi_reduction <add>, %298, %cst_119 [1] : vector<16x32xf32> to vector<16xf32>
    %300 = vector.shape_cast %299 : vector<16xf32> to vector<16x1xf32>
    %cst_120 = arith.constant 3.200000e+01 : f32
    %301 = vector.broadcast %cst_120 : f32 to vector<16x1xf32>
    %302 = arith.divf %300, %301 : vector<16x1xf32>
    %303 = vector.broadcast %302 : vector<16x1xf32> to vector<16x32xf32>
    %304 = arith.subf %298, %303 : vector<16x32xf32>
    %305 = arith.mulf %304, %304 : vector<16x32xf32>
    %cst_121 = arith.constant dense<0.000000e+00> : vector<16xf32>
    %306 = vector.multi_reduction <add>, %305, %cst_121 [1] : vector<16x32xf32> to vector<16xf32>
    %307 = vector.shape_cast %306 : vector<16xf32> to vector<16x1xf32>
    %cst_122 = arith.constant 3.200000e+01 : f32
    %308 = vector.broadcast %cst_122 : f32 to vector<16x1xf32>
    %309 = arith.divf %307, %308 : vector<16x1xf32>
    %310 = vector.broadcast %302 : vector<16x1xf32> to vector<16x32xf32>
    %311 = arith.subf %298, %310 : vector<16x32xf32>
    %cst_123 = arith.constant 9.99999996E-13 : f32
    %312 = vector.broadcast %cst_123 : f32 to vector<16x1xf32>
    %313 = arith.addf %309, %312 : vector<16x1xf32>
    %314 = math.rsqrt %313 : vector<16x1xf32>
    %315 = vector.broadcast %314 : vector<16x1xf32> to vector<16x32xf32>
    %316 = arith.mulf %311, %315 : vector<16x32xf32>
    %317 = vector.broadcast %207 : vector<1x32xf32> to vector<16x32xf32>
    %318 = arith.mulf %316, %317 : vector<16x32xf32>
    %319 = vector.broadcast %209 : vector<1x32xf32> to vector<16x32xf32>
    %320 = arith.addf %318, %319 : vector<16x32xf32>
    %321 = vector.shape_cast %320 : vector<16x32xf32> to vector<2x8x32xf32>
    %322 = vector.shape_cast %236 : vector<2x8x8xf32> to vector<2x1x8x8xf32>
    %323 = vector.shape_cast %254 : vector<2x8x8xf32> to vector<2x1x8x8xf32>
    %324 = vector.shape_cast %272 : vector<2x8x8xf32> to vector<2x1x8x8xf32>
    %325 = vector.shape_cast %290 : vector<2x8x8xf32> to vector<2x1x8x8xf32>
    %326 = tpu.concatenate %322, %323, %324, %325 in 1 : vector<2x1x8x8xf32>, vector<2x1x8x8xf32>, vector<2x1x8x8xf32>, vector<2x1x8x8xf32> -> vector<2x4x8x8xf32>
    %c2 = arith.constant 2 : index
    %c0_124 = arith.constant 0 : index
    %c0_125 = arith.constant 0 : index
    %327 = vector.load %arg11[%c2, %c0_124, %c0_125] : memref<4x32x96xf32, #tpu.memory_space<vmem>>, vector<1x32x96xf32>
    %328 = vector.shape_cast %327 : vector<1x32x96xf32> to vector<32x96xf32>
    %c2_126 = arith.constant 2 : index
    %c0_127 = arith.constant 0 : index
    %c0_128 = arith.constant 0 : index
    %329 = vector.load %arg12[%c2_126, %c0_127, %c0_128] : memref<4x1x96xf32, #tpu.memory_space<vmem>>, vector<1x1x96xf32>
    %330 = vector.shape_cast %329 : vector<1x1x96xf32> to vector<1x96xf32>
    %c2_129 = arith.constant 2 : index
    %c0_130 = arith.constant 0 : index
    %c0_131 = arith.constant 0 : index
    %331 = vector.load %arg13[%c2_129, %c0_130, %c0_131] : memref<4x32x32xf32, #tpu.memory_space<vmem>>, vector<1x32x32xf32>
    %332 = vector.shape_cast %331 : vector<1x32x32xf32> to vector<32x32xf32>
    %c2_132 = arith.constant 2 : index
    %c0_133 = arith.constant 0 : index
    %c0_134 = arith.constant 0 : index
    %333 = vector.load %arg14[%c2_132, %c0_133, %c0_134] : memref<4x1x32xf32, #tpu.memory_space<vmem>>, vector<1x1x32xf32>
    %334 = vector.shape_cast %333 : vector<1x1x32xf32> to vector<1x32xf32>
    %c2_135 = arith.constant 2 : index
    %c0_136 = arith.constant 0 : index
    %c0_137 = arith.constant 0 : index
    %335 = vector.load %arg15[%c2_135, %c0_136, %c0_137] : memref<4x1x32xf32, #tpu.memory_space<vmem>>, vector<1x1x32xf32>
    %336 = vector.shape_cast %335 : vector<1x1x32xf32> to vector<1x32xf32>
    %c2_138 = arith.constant 2 : index
    %c0_139 = arith.constant 0 : index
    %c0_140 = arith.constant 0 : index
    %337 = vector.load %arg16[%c2_138, %c0_139, %c0_140] : memref<4x1x32xf32, #tpu.memory_space<vmem>>, vector<1x1x32xf32>
    %338 = vector.shape_cast %337 : vector<1x1x32xf32> to vector<1x32xf32>
    %339 = vector.shape_cast %192 : vector<2x8x32xf32> to vector<16x32xf32>
    %340 = vector.shape_cast %321 : vector<2x8x32xf32> to vector<16x32xf32>
    %341 = vector.extract_strided_slice %328 {offsets = [0, 0], sizes = [32, 32], strides = [1, 1]} : vector<32x96xf32> to vector<32x32xf32>
    %cst_141 = arith.constant dense<0.000000e+00> : vector<16x32xf32>
    %342 = tpu.matmul %339, %341, %cst_141 {dimension_numbers = #tpu.dot_dimension_numbers<[1], [0], [0], [1], [0, 0, 1, 1], [], []>} : vector<16x32xf32>, vector<32x32xf32>, vector<16x32xf32> -> vector<16x32xf32>
    %343 = vector.extract_strided_slice %330 {offsets = [0, 0], sizes = [1, 32], strides = [1, 1]} : vector<1x96xf32> to vector<1x32xf32>
    %344 = vector.broadcast %343 : vector<1x32xf32> to vector<16x32xf32>
    %345 = arith.addf %342, %344 : vector<16x32xf32>
    %346 = vector.extract_strided_slice %328 {offsets = [0, 32], sizes = [32, 64], strides = [1, 1]} : vector<32x96xf32> to vector<32x64xf32>
    %cst_142 = arith.constant dense<0.000000e+00> : vector<16x64xf32>
    %347 = tpu.matmul %340, %346, %cst_142 {dimension_numbers = #tpu.dot_dimension_numbers<[1], [0], [0], [1], [0, 0, 1, 1], [], []>} : vector<16x32xf32>, vector<32x64xf32>, vector<16x64xf32> -> vector<16x64xf32>
    %348 = vector.extract_strided_slice %330 {offsets = [0, 32], sizes = [1, 64], strides = [1, 1]} : vector<1x96xf32> to vector<1x64xf32>
    %349 = vector.broadcast %348 : vector<1x64xf32> to vector<16x64xf32>
    %350 = arith.addf %347, %349 : vector<16x64xf32>
    %351 = vector.shape_cast %345 : vector<16x32xf32> to vector<2x8x32xf32>
    %352 = vector.extract_strided_slice %350 {offsets = [0, 0], sizes = [16, 32], strides = [1, 1]} : vector<16x64xf32> to vector<16x32xf32>
    %353 = vector.shape_cast %352 : vector<16x32xf32> to vector<2x8x32xf32>
    %354 = vector.extract_strided_slice %350 {offsets = [0, 32], sizes = [16, 32], strides = [1, 1]} : vector<16x64xf32> to vector<16x32xf32>
    %355 = vector.shape_cast %354 : vector<16x32xf32> to vector<2x8x32xf32>
    %356 = vector.shape_cast %77 : vector<2x8xf32> to vector<2x1x8xf32>
    %357 = vector.extract_strided_slice %351 {offsets = [0, 0, 0], sizes = [2, 8, 8], strides = [1, 1, 1]} : vector<2x8x32xf32> to vector<2x8x8xf32>
    %358 = vector.extract_strided_slice %353 {offsets = [0, 0, 0], sizes = [2, 8, 8], strides = [1, 1, 1]} : vector<2x8x32xf32> to vector<2x8x8xf32>
    "tpu.trace_start"() <{level = 10 : i32, message = "bqd,bkd->bqk"}> : () -> ()
    %cst_143 = arith.constant dense<0.000000e+00> : vector<2x8x8xf32>
    %359 = tpu.matmul %357, %358, %cst_143 {dimension_numbers = #tpu.dot_dimension_numbers<[2], [2], [1], [1], [0, 0, 0, 1, 1, 1], [0], [0]>} : vector<2x8x8xf32>, vector<2x8x8xf32>, vector<2x8x8xf32> -> vector<2x8x8xf32>
    "tpu.trace_stop"() : () -> ()
    %cst_144 = arith.constant 0.353553385 : f32
    %360 = vector.broadcast %cst_144 : f32 to vector<2x8x8xf32>
    %361 = arith.mulf %359, %360 : vector<2x8x8xf32>
    %362 = vector.broadcast %356 : vector<2x1x8xf32> to vector<2x8x8xf32>
    %363 = arith.addf %361, %362 : vector<2x8x8xf32>
    %cst_145 = arith.constant dense<0xFF800000> : vector<2x8xf32>
    %364 = vector.multi_reduction <maximumf>, %363, %cst_145 [2] : vector<2x8x8xf32> to vector<2x8xf32>
    %365 = vector.shape_cast %364 : vector<2x8xf32> to vector<2x8x1xf32>
    %366 = vector.broadcast %365 : vector<2x8x1xf32> to vector<2x8x8xf32>
    %367 = arith.subf %363, %366 : vector<2x8x8xf32>
    %368 = math.exp %367 : vector<2x8x8xf32>
    %cst_146 = arith.constant dense<0.000000e+00> : vector<2x8xf32>
    %369 = vector.multi_reduction <add>, %368, %cst_146 [2] : vector<2x8x8xf32> to vector<2x8xf32>
    %370 = vector.shape_cast %369 : vector<2x8xf32> to vector<2x8x1xf32>
    %371 = vector.broadcast %370 : vector<2x8x1xf32> to vector<2x8x8xf32>
    %372 = arith.divf %368, %371 : vector<2x8x8xf32>
    %373 = vector.extract_strided_slice %355 {offsets = [0, 0, 0], sizes = [2, 8, 8], strides = [1, 1, 1]} : vector<2x8x32xf32> to vector<2x8x8xf32>
    "tpu.trace_start"() <{level = 10 : i32, message = "bqk,bkd->bqd"}> : () -> ()
    %cst_147 = arith.constant dense<0.000000e+00> : vector<2x8x8xf32>
    %374 = tpu.matmul %372, %373, %cst_147 {dimension_numbers = #tpu.dot_dimension_numbers<[2], [1], [1], [2], [0, 0, 0, 1, 1, 2], [0], [0]>} : vector<2x8x8xf32>, vector<2x8x8xf32>, vector<2x8x8xf32> -> vector<2x8x8xf32>
    "tpu.trace_stop"() : () -> ()
    %375 = vector.extract_strided_slice %351 {offsets = [0, 0, 8], sizes = [2, 8, 8], strides = [1, 1, 1]} : vector<2x8x32xf32> to vector<2x8x8xf32>
    %376 = vector.extract_strided_slice %353 {offsets = [0, 0, 8], sizes = [2, 8, 8], strides = [1, 1, 1]} : vector<2x8x32xf32> to vector<2x8x8xf32>
    "tpu.trace_start"() <{level = 10 : i32, message = "bqd,bkd->bqk"}> : () -> ()
    %cst_148 = arith.constant dense<0.000000e+00> : vector<2x8x8xf32>
    %377 = tpu.matmul %375, %376, %cst_148 {dimension_numbers = #tpu.dot_dimension_numbers<[2], [2], [1], [1], [0, 0, 0, 1, 1, 1], [0], [0]>} : vector<2x8x8xf32>, vector<2x8x8xf32>, vector<2x8x8xf32> -> vector<2x8x8xf32>
    "tpu.trace_stop"() : () -> ()
    %cst_149 = arith.constant 0.353553385 : f32
    %378 = vector.broadcast %cst_149 : f32 to vector<2x8x8xf32>
    %379 = arith.mulf %377, %378 : vector<2x8x8xf32>
    %380 = vector.broadcast %356 : vector<2x1x8xf32> to vector<2x8x8xf32>
    %381 = arith.addf %379, %380 : vector<2x8x8xf32>
    %cst_150 = arith.constant dense<0xFF800000> : vector<2x8xf32>
    %382 = vector.multi_reduction <maximumf>, %381, %cst_150 [2] : vector<2x8x8xf32> to vector<2x8xf32>
    %383 = vector.shape_cast %382 : vector<2x8xf32> to vector<2x8x1xf32>
    %384 = vector.broadcast %383 : vector<2x8x1xf32> to vector<2x8x8xf32>
    %385 = arith.subf %381, %384 : vector<2x8x8xf32>
    %386 = math.exp %385 : vector<2x8x8xf32>
    %cst_151 = arith.constant dense<0.000000e+00> : vector<2x8xf32>
    %387 = vector.multi_reduction <add>, %386, %cst_151 [2] : vector<2x8x8xf32> to vector<2x8xf32>
    %388 = vector.shape_cast %387 : vector<2x8xf32> to vector<2x8x1xf32>
    %389 = vector.broadcast %388 : vector<2x8x1xf32> to vector<2x8x8xf32>
    %390 = arith.divf %386, %389 : vector<2x8x8xf32>
    %391 = vector.extract_strided_slice %355 {offsets = [0, 0, 8], sizes = [2, 8, 8], strides = [1, 1, 1]} : vector<2x8x32xf32> to vector<2x8x8xf32>
    "tpu.trace_start"() <{level = 10 : i32, message = "bqk,bkd->bqd"}> : () -> ()
    %cst_152 = arith.constant dense<0.000000e+00> : vector<2x8x8xf32>
    %392 = tpu.matmul %390, %391, %cst_152 {dimension_numbers = #tpu.dot_dimension_numbers<[2], [1], [1], [2], [0, 0, 0, 1, 1, 2], [0], [0]>} : vector<2x8x8xf32>, vector<2x8x8xf32>, vector<2x8x8xf32> -> vector<2x8x8xf32>
    "tpu.trace_stop"() : () -> ()
    %393 = vector.extract_strided_slice %351 {offsets = [0, 0, 16], sizes = [2, 8, 8], strides = [1, 1, 1]} : vector<2x8x32xf32> to vector<2x8x8xf32>
    %394 = vector.extract_strided_slice %353 {offsets = [0, 0, 16], sizes = [2, 8, 8], strides = [1, 1, 1]} : vector<2x8x32xf32> to vector<2x8x8xf32>
    "tpu.trace_start"() <{level = 10 : i32, message = "bqd,bkd->bqk"}> : () -> ()
    %cst_153 = arith.constant dense<0.000000e+00> : vector<2x8x8xf32>
    %395 = tpu.matmul %393, %394, %cst_153 {dimension_numbers = #tpu.dot_dimension_numbers<[2], [2], [1], [1], [0, 0, 0, 1, 1, 1], [0], [0]>} : vector<2x8x8xf32>, vector<2x8x8xf32>, vector<2x8x8xf32> -> vector<2x8x8xf32>
    "tpu.trace_stop"() : () -> ()
    %cst_154 = arith.constant 0.353553385 : f32
    %396 = vector.broadcast %cst_154 : f32 to vector<2x8x8xf32>
    %397 = arith.mulf %395, %396 : vector<2x8x8xf32>
    %398 = vector.broadcast %356 : vector<2x1x8xf32> to vector<2x8x8xf32>
    %399 = arith.addf %397, %398 : vector<2x8x8xf32>
    %cst_155 = arith.constant dense<0xFF800000> : vector<2x8xf32>
    %400 = vector.multi_reduction <maximumf>, %399, %cst_155 [2] : vector<2x8x8xf32> to vector<2x8xf32>
    %401 = vector.shape_cast %400 : vector<2x8xf32> to vector<2x8x1xf32>
    %402 = vector.broadcast %401 : vector<2x8x1xf32> to vector<2x8x8xf32>
    %403 = arith.subf %399, %402 : vector<2x8x8xf32>
    %404 = math.exp %403 : vector<2x8x8xf32>
    %cst_156 = arith.constant dense<0.000000e+00> : vector<2x8xf32>
    %405 = vector.multi_reduction <add>, %404, %cst_156 [2] : vector<2x8x8xf32> to vector<2x8xf32>
    %406 = vector.shape_cast %405 : vector<2x8xf32> to vector<2x8x1xf32>
    %407 = vector.broadcast %406 : vector<2x8x1xf32> to vector<2x8x8xf32>
    %408 = arith.divf %404, %407 : vector<2x8x8xf32>
    %409 = vector.extract_strided_slice %355 {offsets = [0, 0, 16], sizes = [2, 8, 8], strides = [1, 1, 1]} : vector<2x8x32xf32> to vector<2x8x8xf32>
    "tpu.trace_start"() <{level = 10 : i32, message = "bqk,bkd->bqd"}> : () -> ()
    %cst_157 = arith.constant dense<0.000000e+00> : vector<2x8x8xf32>
    %410 = tpu.matmul %408, %409, %cst_157 {dimension_numbers = #tpu.dot_dimension_numbers<[2], [1], [1], [2], [0, 0, 0, 1, 1, 2], [0], [0]>} : vector<2x8x8xf32>, vector<2x8x8xf32>, vector<2x8x8xf32> -> vector<2x8x8xf32>
    "tpu.trace_stop"() : () -> ()
    %411 = vector.extract_strided_slice %351 {offsets = [0, 0, 24], sizes = [2, 8, 8], strides = [1, 1, 1]} : vector<2x8x32xf32> to vector<2x8x8xf32>
    %412 = vector.extract_strided_slice %353 {offsets = [0, 0, 24], sizes = [2, 8, 8], strides = [1, 1, 1]} : vector<2x8x32xf32> to vector<2x8x8xf32>
    "tpu.trace_start"() <{level = 10 : i32, message = "bqd,bkd->bqk"}> : () -> ()
    %cst_158 = arith.constant dense<0.000000e+00> : vector<2x8x8xf32>
    %413 = tpu.matmul %411, %412, %cst_158 {dimension_numbers = #tpu.dot_dimension_numbers<[2], [2], [1], [1], [0, 0, 0, 1, 1, 1], [0], [0]>} : vector<2x8x8xf32>, vector<2x8x8xf32>, vector<2x8x8xf32> -> vector<2x8x8xf32>
    "tpu.trace_stop"() : () -> ()
    %cst_159 = arith.constant 0.353553385 : f32
    %414 = vector.broadcast %cst_159 : f32 to vector<2x8x8xf32>
    %415 = arith.mulf %413, %414 : vector<2x8x8xf32>
    %416 = vector.broadcast %356 : vector<2x1x8xf32> to vector<2x8x8xf32>
    %417 = arith.addf %415, %416 : vector<2x8x8xf32>
    %cst_160 = arith.constant dense<0xFF800000> : vector<2x8xf32>
    %418 = vector.multi_reduction <maximumf>, %417, %cst_160 [2] : vector<2x8x8xf32> to vector<2x8xf32>
    %419 = vector.shape_cast %418 : vector<2x8xf32> to vector<2x8x1xf32>
    %420 = vector.broadcast %419 : vector<2x8x1xf32> to vector<2x8x8xf32>
    %421 = arith.subf %417, %420 : vector<2x8x8xf32>
    %422 = math.exp %421 : vector<2x8x8xf32>
    %cst_161 = arith.constant dense<0.000000e+00> : vector<2x8xf32>
    %423 = vector.multi_reduction <add>, %422, %cst_161 [2] : vector<2x8x8xf32> to vector<2x8xf32>
    %424 = vector.shape_cast %423 : vector<2x8xf32> to vector<2x8x1xf32>
    %425 = vector.broadcast %424 : vector<2x8x1xf32> to vector<2x8x8xf32>
    %426 = arith.divf %422, %425 : vector<2x8x8xf32>
    %427 = vector.extract_strided_slice %355 {offsets = [0, 0, 24], sizes = [2, 8, 8], strides = [1, 1, 1]} : vector<2x8x32xf32> to vector<2x8x8xf32>
    "tpu.trace_start"() <{level = 10 : i32, message = "bqk,bkd->bqd"}> : () -> ()
    %cst_162 = arith.constant dense<0.000000e+00> : vector<2x8x8xf32>
    %428 = tpu.matmul %426, %427, %cst_162 {dimension_numbers = #tpu.dot_dimension_numbers<[2], [1], [1], [2], [0, 0, 0, 1, 1, 2], [0], [0]>} : vector<2x8x8xf32>, vector<2x8x8xf32>, vector<2x8x8xf32> -> vector<2x8x8xf32>
    "tpu.trace_stop"() : () -> ()
    %429 = tpu.concatenate %374, %392, %410, %428 in 2 : vector<2x8x8xf32>, vector<2x8x8xf32>, vector<2x8x8xf32>, vector<2x8x8xf32> -> vector<2x8x32xf32>
    %430 = vector.shape_cast %429 : vector<2x8x32xf32> to vector<16x32xf32>
    %cst_163 = arith.constant dense<0.000000e+00> : vector<16x32xf32>
    %431 = tpu.matmul %430, %332, %cst_163 {dimension_numbers = #tpu.dot_dimension_numbers<[1], [0], [0], [1], [0, 0, 1, 1], [], []>} : vector<16x32xf32>, vector<32x32xf32>, vector<16x32xf32> -> vector<16x32xf32>
    %432 = vector.broadcast %334 : vector<1x32xf32> to vector<16x32xf32>
    %433 = arith.addf %431, %432 : vector<16x32xf32>
    %434 = arith.addf %433, %339 : vector<16x32xf32>
    %cst_164 = arith.constant dense<0.000000e+00> : vector<16xf32>
    %435 = vector.multi_reduction <add>, %434, %cst_164 [1] : vector<16x32xf32> to vector<16xf32>
    %436 = vector.shape_cast %435 : vector<16xf32> to vector<16x1xf32>
    %cst_165 = arith.constant 3.200000e+01 : f32
    %437 = vector.broadcast %cst_165 : f32 to vector<16x1xf32>
    %438 = arith.divf %436, %437 : vector<16x1xf32>
    %439 = vector.broadcast %438 : vector<16x1xf32> to vector<16x32xf32>
    %440 = arith.subf %434, %439 : vector<16x32xf32>
    %441 = arith.mulf %440, %440 : vector<16x32xf32>
    %cst_166 = arith.constant dense<0.000000e+00> : vector<16xf32>
    %442 = vector.multi_reduction <add>, %441, %cst_166 [1] : vector<16x32xf32> to vector<16xf32>
    %443 = vector.shape_cast %442 : vector<16xf32> to vector<16x1xf32>
    %cst_167 = arith.constant 3.200000e+01 : f32
    %444 = vector.broadcast %cst_167 : f32 to vector<16x1xf32>
    %445 = arith.divf %443, %444 : vector<16x1xf32>
    %446 = vector.broadcast %438 : vector<16x1xf32> to vector<16x32xf32>
    %447 = arith.subf %434, %446 : vector<16x32xf32>
    %cst_168 = arith.constant 9.99999996E-13 : f32
    %448 = vector.broadcast %cst_168 : f32 to vector<16x1xf32>
    %449 = arith.addf %445, %448 : vector<16x1xf32>
    %450 = math.rsqrt %449 : vector<16x1xf32>
    %451 = vector.broadcast %450 : vector<16x1xf32> to vector<16x32xf32>
    %452 = arith.mulf %447, %451 : vector<16x32xf32>
    %453 = vector.broadcast %336 : vector<1x32xf32> to vector<16x32xf32>
    %454 = arith.mulf %452, %453 : vector<16x32xf32>
    %455 = vector.broadcast %338 : vector<1x32xf32> to vector<16x32xf32>
    %456 = arith.addf %454, %455 : vector<16x32xf32>
    %457 = vector.shape_cast %456 : vector<16x32xf32> to vector<2x8x32xf32>
    %458 = vector.shape_cast %372 : vector<2x8x8xf32> to vector<2x1x8x8xf32>
    %459 = vector.shape_cast %390 : vector<2x8x8xf32> to vector<2x1x8x8xf32>
    %460 = vector.shape_cast %408 : vector<2x8x8xf32> to vector<2x1x8x8xf32>
    %461 = vector.shape_cast %426 : vector<2x8x8xf32> to vector<2x1x8x8xf32>
    %462 = tpu.concatenate %458, %459, %460, %461 in 1 : vector<2x1x8x8xf32>, vector<2x1x8x8xf32>, vector<2x1x8x8xf32>, vector<2x1x8x8xf32> -> vector<2x4x8x8xf32>
    %c3 = arith.constant 3 : index
    %c0_169 = arith.constant 0 : index
    %c0_170 = arith.constant 0 : index
    %463 = vector.load %arg11[%c3, %c0_169, %c0_170] : memref<4x32x96xf32, #tpu.memory_space<vmem>>, vector<1x32x96xf32>
    %464 = vector.shape_cast %463 : vector<1x32x96xf32> to vector<32x96xf32>
    %c3_171 = arith.constant 3 : index
    %c0_172 = arith.constant 0 : index
    %c0_173 = arith.constant 0 : index
    %465 = vector.load %arg12[%c3_171, %c0_172, %c0_173] : memref<4x1x96xf32, #tpu.memory_space<vmem>>, vector<1x1x96xf32>
    %466 = vector.shape_cast %465 : vector<1x1x96xf32> to vector<1x96xf32>
    %c3_174 = arith.constant 3 : index
    %c0_175 = arith.constant 0 : index
    %c0_176 = arith.constant 0 : index
    %467 = vector.load %arg13[%c3_174, %c0_175, %c0_176] : memref<4x32x32xf32, #tpu.memory_space<vmem>>, vector<1x32x32xf32>
    %468 = vector.shape_cast %467 : vector<1x32x32xf32> to vector<32x32xf32>
    %c3_177 = arith.constant 3 : index
    %c0_178 = arith.constant 0 : index
    %c0_179 = arith.constant 0 : index
    %469 = vector.load %arg14[%c3_177, %c0_178, %c0_179] : memref<4x1x32xf32, #tpu.memory_space<vmem>>, vector<1x1x32xf32>
    %470 = vector.shape_cast %469 : vector<1x1x32xf32> to vector<1x32xf32>
    %c3_180 = arith.constant 3 : index
    %c0_181 = arith.constant 0 : index
    %c0_182 = arith.constant 0 : index
    %471 = vector.load %arg15[%c3_180, %c0_181, %c0_182] : memref<4x1x32xf32, #tpu.memory_space<vmem>>, vector<1x1x32xf32>
    %472 = vector.shape_cast %471 : vector<1x1x32xf32> to vector<1x32xf32>
    %c3_183 = arith.constant 3 : index
    %c0_184 = arith.constant 0 : index
    %c0_185 = arith.constant 0 : index
    %473 = vector.load %arg16[%c3_183, %c0_184, %c0_185] : memref<4x1x32xf32, #tpu.memory_space<vmem>>, vector<1x1x32xf32>
    %474 = vector.shape_cast %473 : vector<1x1x32xf32> to vector<1x32xf32>
    %475 = vector.shape_cast %321 : vector<2x8x32xf32> to vector<16x32xf32>
    %476 = vector.shape_cast %192 : vector<2x8x32xf32> to vector<16x32xf32>
    %477 = vector.extract_strided_slice %464 {offsets = [0, 0], sizes = [32, 32], strides = [1, 1]} : vector<32x96xf32> to vector<32x32xf32>
    %cst_186 = arith.constant dense<0.000000e+00> : vector<16x32xf32>
    %478 = tpu.matmul %475, %477, %cst_186 {dimension_numbers = #tpu.dot_dimension_numbers<[1], [0], [0], [1], [0, 0, 1, 1], [], []>} : vector<16x32xf32>, vector<32x32xf32>, vector<16x32xf32> -> vector<16x32xf32>
    %479 = vector.extract_strided_slice %466 {offsets = [0, 0], sizes = [1, 32], strides = [1, 1]} : vector<1x96xf32> to vector<1x32xf32>
    %480 = vector.broadcast %479 : vector<1x32xf32> to vector<16x32xf32>
    %481 = arith.addf %478, %480 : vector<16x32xf32>
    %482 = vector.extract_strided_slice %464 {offsets = [0, 32], sizes = [32, 64], strides = [1, 1]} : vector<32x96xf32> to vector<32x64xf32>
    %cst_187 = arith.constant dense<0.000000e+00> : vector<16x64xf32>
    %483 = tpu.matmul %476, %482, %cst_187 {dimension_numbers = #tpu.dot_dimension_numbers<[1], [0], [0], [1], [0, 0, 1, 1], [], []>} : vector<16x32xf32>, vector<32x64xf32>, vector<16x64xf32> -> vector<16x64xf32>
    %484 = vector.extract_strided_slice %466 {offsets = [0, 32], sizes = [1, 64], strides = [1, 1]} : vector<1x96xf32> to vector<1x64xf32>
    %485 = vector.broadcast %484 : vector<1x64xf32> to vector<16x64xf32>
    %486 = arith.addf %483, %485 : vector<16x64xf32>
    %487 = vector.shape_cast %481 : vector<16x32xf32> to vector<2x8x32xf32>
    %488 = vector.extract_strided_slice %486 {offsets = [0, 0], sizes = [16, 32], strides = [1, 1]} : vector<16x64xf32> to vector<16x32xf32>
    %489 = vector.shape_cast %488 : vector<16x32xf32> to vector<2x8x32xf32>
    %490 = vector.extract_strided_slice %486 {offsets = [0, 32], sizes = [16, 32], strides = [1, 1]} : vector<16x64xf32> to vector<16x32xf32>
    %491 = vector.shape_cast %490 : vector<16x32xf32> to vector<2x8x32xf32>
    %492 = vector.extract_strided_slice %487 {offsets = [0, 0, 0], sizes = [2, 8, 8], strides = [1, 1, 1]} : vector<2x8x32xf32> to vector<2x8x8xf32>
    %493 = vector.extract_strided_slice %489 {offsets = [0, 0, 0], sizes = [2, 8, 8], strides = [1, 1, 1]} : vector<2x8x32xf32> to vector<2x8x8xf32>
    "tpu.trace_start"() <{level = 10 : i32, message = "bqd,bkd->bqk"}> : () -> ()
    %cst_188 = arith.constant dense<0.000000e+00> : vector<2x8x8xf32>
    %494 = tpu.matmul %492, %493, %cst_188 {dimension_numbers = #tpu.dot_dimension_numbers<[2], [2], [1], [1], [0, 0, 0, 1, 1, 1], [0], [0]>} : vector<2x8x8xf32>, vector<2x8x8xf32>, vector<2x8x8xf32> -> vector<2x8x8xf32>
    "tpu.trace_stop"() : () -> ()
    %cst_189 = arith.constant 0.353553385 : f32
    %495 = vector.broadcast %cst_189 : f32 to vector<2x8x8xf32>
    %496 = arith.mulf %494, %495 : vector<2x8x8xf32>
    %cst_190 = arith.constant dense<0xFF800000> : vector<2x8xf32>
    %497 = vector.multi_reduction <maximumf>, %496, %cst_190 [2] : vector<2x8x8xf32> to vector<2x8xf32>
    %498 = vector.shape_cast %497 : vector<2x8xf32> to vector<2x8x1xf32>
    %499 = vector.broadcast %498 : vector<2x8x1xf32> to vector<2x8x8xf32>
    %500 = arith.subf %496, %499 : vector<2x8x8xf32>
    %501 = math.exp %500 : vector<2x8x8xf32>
    %cst_191 = arith.constant dense<0.000000e+00> : vector<2x8xf32>
    %502 = vector.multi_reduction <add>, %501, %cst_191 [2] : vector<2x8x8xf32> to vector<2x8xf32>
    %503 = vector.shape_cast %502 : vector<2x8xf32> to vector<2x8x1xf32>
    %504 = vector.broadcast %503 : vector<2x8x1xf32> to vector<2x8x8xf32>
    %505 = arith.divf %501, %504 : vector<2x8x8xf32>
    %506 = vector.extract_strided_slice %491 {offsets = [0, 0, 0], sizes = [2, 8, 8], strides = [1, 1, 1]} : vector<2x8x32xf32> to vector<2x8x8xf32>
    "tpu.trace_start"() <{level = 10 : i32, message = "bqk,bkd->bqd"}> : () -> ()
    %cst_192 = arith.constant dense<0.000000e+00> : vector<2x8x8xf32>
    %507 = tpu.matmul %505, %506, %cst_192 {dimension_numbers = #tpu.dot_dimension_numbers<[2], [1], [1], [2], [0, 0, 0, 1, 1, 2], [0], [0]>} : vector<2x8x8xf32>, vector<2x8x8xf32>, vector<2x8x8xf32> -> vector<2x8x8xf32>
    "tpu.trace_stop"() : () -> ()
    %508 = vector.extract_strided_slice %487 {offsets = [0, 0, 8], sizes = [2, 8, 8], strides = [1, 1, 1]} : vector<2x8x32xf32> to vector<2x8x8xf32>
    %509 = vector.extract_strided_slice %489 {offsets = [0, 0, 8], sizes = [2, 8, 8], strides = [1, 1, 1]} : vector<2x8x32xf32> to vector<2x8x8xf32>
    "tpu.trace_start"() <{level = 10 : i32, message = "bqd,bkd->bqk"}> : () -> ()
    %cst_193 = arith.constant dense<0.000000e+00> : vector<2x8x8xf32>
    %510 = tpu.matmul %508, %509, %cst_193 {dimension_numbers = #tpu.dot_dimension_numbers<[2], [2], [1], [1], [0, 0, 0, 1, 1, 1], [0], [0]>} : vector<2x8x8xf32>, vector<2x8x8xf32>, vector<2x8x8xf32> -> vector<2x8x8xf32>
    "tpu.trace_stop"() : () -> ()
    %cst_194 = arith.constant 0.353553385 : f32
    %511 = vector.broadcast %cst_194 : f32 to vector<2x8x8xf32>
    %512 = arith.mulf %510, %511 : vector<2x8x8xf32>
    %cst_195 = arith.constant dense<0xFF800000> : vector<2x8xf32>
    %513 = vector.multi_reduction <maximumf>, %512, %cst_195 [2] : vector<2x8x8xf32> to vector<2x8xf32>
    %514 = vector.shape_cast %513 : vector<2x8xf32> to vector<2x8x1xf32>
    %515 = vector.broadcast %514 : vector<2x8x1xf32> to vector<2x8x8xf32>
    %516 = arith.subf %512, %515 : vector<2x8x8xf32>
    %517 = math.exp %516 : vector<2x8x8xf32>
    %cst_196 = arith.constant dense<0.000000e+00> : vector<2x8xf32>
    %518 = vector.multi_reduction <add>, %517, %cst_196 [2] : vector<2x8x8xf32> to vector<2x8xf32>
    %519 = vector.shape_cast %518 : vector<2x8xf32> to vector<2x8x1xf32>
    %520 = vector.broadcast %519 : vector<2x8x1xf32> to vector<2x8x8xf32>
    %521 = arith.divf %517, %520 : vector<2x8x8xf32>
    %522 = vector.extract_strided_slice %491 {offsets = [0, 0, 8], sizes = [2, 8, 8], strides = [1, 1, 1]} : vector<2x8x32xf32> to vector<2x8x8xf32>
    "tpu.trace_start"() <{level = 10 : i32, message = "bqk,bkd->bqd"}> : () -> ()
    %cst_197 = arith.constant dense<0.000000e+00> : vector<2x8x8xf32>
    %523 = tpu.matmul %521, %522, %cst_197 {dimension_numbers = #tpu.dot_dimension_numbers<[2], [1], [1], [2], [0, 0, 0, 1, 1, 2], [0], [0]>} : vector<2x8x8xf32>, vector<2x8x8xf32>, vector<2x8x8xf32> -> vector<2x8x8xf32>
    "tpu.trace_stop"() : () -> ()
    %524 = vector.extract_strided_slice %487 {offsets = [0, 0, 16], sizes = [2, 8, 8], strides = [1, 1, 1]} : vector<2x8x32xf32> to vector<2x8x8xf32>
    %525 = vector.extract_strided_slice %489 {offsets = [0, 0, 16], sizes = [2, 8, 8], strides = [1, 1, 1]} : vector<2x8x32xf32> to vector<2x8x8xf32>
    "tpu.trace_start"() <{level = 10 : i32, message = "bqd,bkd->bqk"}> : () -> ()
    %cst_198 = arith.constant dense<0.000000e+00> : vector<2x8x8xf32>
    %526 = tpu.matmul %524, %525, %cst_198 {dimension_numbers = #tpu.dot_dimension_numbers<[2], [2], [1], [1], [0, 0, 0, 1, 1, 1], [0], [0]>} : vector<2x8x8xf32>, vector<2x8x8xf32>, vector<2x8x8xf32> -> vector<2x8x8xf32>
    "tpu.trace_stop"() : () -> ()
    %cst_199 = arith.constant 0.353553385 : f32
    %527 = vector.broadcast %cst_199 : f32 to vector<2x8x8xf32>
    %528 = arith.mulf %526, %527 : vector<2x8x8xf32>
    %cst_200 = arith.constant dense<0xFF800000> : vector<2x8xf32>
    %529 = vector.multi_reduction <maximumf>, %528, %cst_200 [2] : vector<2x8x8xf32> to vector<2x8xf32>
    %530 = vector.shape_cast %529 : vector<2x8xf32> to vector<2x8x1xf32>
    %531 = vector.broadcast %530 : vector<2x8x1xf32> to vector<2x8x8xf32>
    %532 = arith.subf %528, %531 : vector<2x8x8xf32>
    %533 = math.exp %532 : vector<2x8x8xf32>
    %cst_201 = arith.constant dense<0.000000e+00> : vector<2x8xf32>
    %534 = vector.multi_reduction <add>, %533, %cst_201 [2] : vector<2x8x8xf32> to vector<2x8xf32>
    %535 = vector.shape_cast %534 : vector<2x8xf32> to vector<2x8x1xf32>
    %536 = vector.broadcast %535 : vector<2x8x1xf32> to vector<2x8x8xf32>
    %537 = arith.divf %533, %536 : vector<2x8x8xf32>
    %538 = vector.extract_strided_slice %491 {offsets = [0, 0, 16], sizes = [2, 8, 8], strides = [1, 1, 1]} : vector<2x8x32xf32> to vector<2x8x8xf32>
    "tpu.trace_start"() <{level = 10 : i32, message = "bqk,bkd->bqd"}> : () -> ()
    %cst_202 = arith.constant dense<0.000000e+00> : vector<2x8x8xf32>
    %539 = tpu.matmul %537, %538, %cst_202 {dimension_numbers = #tpu.dot_dimension_numbers<[2], [1], [1], [2], [0, 0, 0, 1, 1, 2], [0], [0]>} : vector<2x8x8xf32>, vector<2x8x8xf32>, vector<2x8x8xf32> -> vector<2x8x8xf32>
    "tpu.trace_stop"() : () -> ()
    %540 = vector.extract_strided_slice %487 {offsets = [0, 0, 24], sizes = [2, 8, 8], strides = [1, 1, 1]} : vector<2x8x32xf32> to vector<2x8x8xf32>
    %541 = vector.extract_strided_slice %489 {offsets = [0, 0, 24], sizes = [2, 8, 8], strides = [1, 1, 1]} : vector<2x8x32xf32> to vector<2x8x8xf32>
    "tpu.trace_start"() <{level = 10 : i32, message = "bqd,bkd->bqk"}> : () -> ()
    %cst_203 = arith.constant dense<0.000000e+00> : vector<2x8x8xf32>
    %542 = tpu.matmul %540, %541, %cst_203 {dimension_numbers = #tpu.dot_dimension_numbers<[2], [2], [1], [1], [0, 0, 0, 1, 1, 1], [0], [0]>} : vector<2x8x8xf32>, vector<2x8x8xf32>, vector<2x8x8xf32> -> vector<2x8x8xf32>
    "tpu.trace_stop"() : () -> ()
    %cst_204 = arith.constant 0.353553385 : f32
    %543 = vector.broadcast %cst_204 : f32 to vector<2x8x8xf32>
    %544 = arith.mulf %542, %543 : vector<2x8x8xf32>
    %cst_205 = arith.constant dense<0xFF800000> : vector<2x8xf32>
    %545 = vector.multi_reduction <maximumf>, %544, %cst_205 [2] : vector<2x8x8xf32> to vector<2x8xf32>
    %546 = vector.shape_cast %545 : vector<2x8xf32> to vector<2x8x1xf32>
    %547 = vector.broadcast %546 : vector<2x8x1xf32> to vector<2x8x8xf32>
    %548 = arith.subf %544, %547 : vector<2x8x8xf32>
    %549 = math.exp %548 : vector<2x8x8xf32>
    %cst_206 = arith.constant dense<0.000000e+00> : vector<2x8xf32>
    %550 = vector.multi_reduction <add>, %549, %cst_206 [2] : vector<2x8x8xf32> to vector<2x8xf32>
    %551 = vector.shape_cast %550 : vector<2x8xf32> to vector<2x8x1xf32>
    %552 = vector.broadcast %551 : vector<2x8x1xf32> to vector<2x8x8xf32>
    %553 = arith.divf %549, %552 : vector<2x8x8xf32>
    %554 = vector.extract_strided_slice %491 {offsets = [0, 0, 24], sizes = [2, 8, 8], strides = [1, 1, 1]} : vector<2x8x32xf32> to vector<2x8x8xf32>
    "tpu.trace_start"() <{level = 10 : i32, message = "bqk,bkd->bqd"}> : () -> ()
    %cst_207 = arith.constant dense<0.000000e+00> : vector<2x8x8xf32>
    %555 = tpu.matmul %553, %554, %cst_207 {dimension_numbers = #tpu.dot_dimension_numbers<[2], [1], [1], [2], [0, 0, 0, 1, 1, 2], [0], [0]>} : vector<2x8x8xf32>, vector<2x8x8xf32>, vector<2x8x8xf32> -> vector<2x8x8xf32>
    "tpu.trace_stop"() : () -> ()
    %556 = tpu.concatenate %507, %523, %539, %555 in 2 : vector<2x8x8xf32>, vector<2x8x8xf32>, vector<2x8x8xf32>, vector<2x8x8xf32> -> vector<2x8x32xf32>
    %557 = vector.shape_cast %556 : vector<2x8x32xf32> to vector<16x32xf32>
    %cst_208 = arith.constant dense<0.000000e+00> : vector<16x32xf32>
    %558 = tpu.matmul %557, %468, %cst_208 {dimension_numbers = #tpu.dot_dimension_numbers<[1], [0], [0], [1], [0, 0, 1, 1], [], []>} : vector<16x32xf32>, vector<32x32xf32>, vector<16x32xf32> -> vector<16x32xf32>
    %559 = vector.broadcast %470 : vector<1x32xf32> to vector<16x32xf32>
    %560 = arith.addf %558, %559 : vector<16x32xf32>
    %561 = arith.addf %560, %475 : vector<16x32xf32>
    %cst_209 = arith.constant dense<0.000000e+00> : vector<16xf32>
    %562 = vector.multi_reduction <add>, %561, %cst_209 [1] : vector<16x32xf32> to vector<16xf32>
    %563 = vector.shape_cast %562 : vector<16xf32> to vector<16x1xf32>
    %cst_210 = arith.constant 3.200000e+01 : f32
    %564 = vector.broadcast %cst_210 : f32 to vector<16x1xf32>
    %565 = arith.divf %563, %564 : vector<16x1xf32>
    %566 = vector.broadcast %565 : vector<16x1xf32> to vector<16x32xf32>
    %567 = arith.subf %561, %566 : vector<16x32xf32>
    %568 = arith.mulf %567, %567 : vector<16x32xf32>
    %cst_211 = arith.constant dense<0.000000e+00> : vector<16xf32>
    %569 = vector.multi_reduction <add>, %568, %cst_211 [1] : vector<16x32xf32> to vector<16xf32>
    %570 = vector.shape_cast %569 : vector<16xf32> to vector<16x1xf32>
    %cst_212 = arith.constant 3.200000e+01 : f32
    %571 = vector.broadcast %cst_212 : f32 to vector<16x1xf32>
    %572 = arith.divf %570, %571 : vector<16x1xf32>
    %573 = vector.broadcast %565 : vector<16x1xf32> to vector<16x32xf32>
    %574 = arith.subf %561, %573 : vector<16x32xf32>
    %cst_213 = arith.constant 9.99999996E-13 : f32
    %575 = vector.broadcast %cst_213 : f32 to vector<16x1xf32>
    %576 = arith.addf %572, %575 : vector<16x1xf32>
    %577 = math.rsqrt %576 : vector<16x1xf32>
    %578 = vector.broadcast %577 : vector<16x1xf32> to vector<16x32xf32>
    %579 = arith.mulf %574, %578 : vector<16x32xf32>
    %580 = vector.broadcast %472 : vector<1x32xf32> to vector<16x32xf32>
    %581 = arith.mulf %579, %580 : vector<16x32xf32>
    %582 = vector.broadcast %474 : vector<1x32xf32> to vector<16x32xf32>
    %583 = arith.addf %581, %582 : vector<16x32xf32>
    %584 = vector.shape_cast %583 : vector<16x32xf32> to vector<2x8x32xf32>
    %585 = vector.shape_cast %505 : vector<2x8x8xf32> to vector<2x1x8x8xf32>
    %586 = vector.shape_cast %521 : vector<2x8x8xf32> to vector<2x1x8x8xf32>
    %587 = vector.shape_cast %537 : vector<2x8x8xf32> to vector<2x1x8x8xf32>
    %588 = vector.shape_cast %553 : vector<2x8x8xf32> to vector<2x1x8x8xf32>
    %589 = tpu.concatenate %585, %586, %587, %588 in 1 : vector<2x1x8x8xf32>, vector<2x1x8x8xf32>, vector<2x1x8x8xf32>, vector<2x1x8x8xf32> -> vector<2x4x8x8xf32>
    %c0_214 = arith.constant 0 : index
    %c0_215 = arith.constant 0 : index
    %c0_216 = arith.constant 0 : index
    %590 = vector.load %arg17[%c0_214, %c0_215, %c0_216] : memref<2x32x64xf32, #tpu.memory_space<vmem>>, vector<1x32x64xf32>
    %591 = vector.shape_cast %590 : vector<1x32x64xf32> to vector<32x64xf32>
    %c0_217 = arith.constant 0 : index
    %c0_218 = arith.constant 0 : index
    %c0_219 = arith.constant 0 : index
    %592 = vector.load %arg18[%c0_217, %c0_218, %c0_219] : memref<2x1x64xf32, #tpu.memory_space<vmem>>, vector<1x1x64xf32>
    %593 = vector.shape_cast %592 : vector<1x1x64xf32> to vector<1x64xf32>
    %c0_220 = arith.constant 0 : index
    %c0_221 = arith.constant 0 : index
    %c0_222 = arith.constant 0 : index
    %594 = vector.load %arg19[%c0_220, %c0_221, %c0_222] : memref<2x64x32xf32, #tpu.memory_space<vmem>>, vector<1x64x32xf32>
    %595 = vector.shape_cast %594 : vector<1x64x32xf32> to vector<64x32xf32>
    %c0_223 = arith.constant 0 : index
    %c0_224 = arith.constant 0 : index
    %c0_225 = arith.constant 0 : index
    %596 = vector.load %arg20[%c0_223, %c0_224, %c0_225] : memref<2x1x32xf32, #tpu.memory_space<vmem>>, vector<1x1x32xf32>
    %597 = vector.shape_cast %596 : vector<1x1x32xf32> to vector<1x32xf32>
    %c0_226 = arith.constant 0 : index
    %c0_227 = arith.constant 0 : index
    %c0_228 = arith.constant 0 : index
    %598 = vector.load %arg21[%c0_226, %c0_227, %c0_228] : memref<2x1x32xf32, #tpu.memory_space<vmem>>, vector<1x1x32xf32>
    %599 = vector.shape_cast %598 : vector<1x1x32xf32> to vector<1x32xf32>
    %c0_229 = arith.constant 0 : index
    %c0_230 = arith.constant 0 : index
    %c0_231 = arith.constant 0 : index
    %600 = vector.load %arg22[%c0_229, %c0_230, %c0_231] : memref<2x1x32xf32, #tpu.memory_space<vmem>>, vector<1x1x32xf32>
    %601 = vector.shape_cast %600 : vector<1x1x32xf32> to vector<1x32xf32>
    %602 = vector.shape_cast %457 : vector<2x8x32xf32> to vector<16x32xf32>
    %cst_232 = arith.constant dense<0.000000e+00> : vector<16x64xf32>
    %603 = tpu.matmul %602, %591, %cst_232 {dimension_numbers = #tpu.dot_dimension_numbers<[1], [0], [0], [1], [0, 0, 1, 1], [], []>} : vector<16x32xf32>, vector<32x64xf32>, vector<16x64xf32> -> vector<16x64xf32>
    %604 = vector.broadcast %593 : vector<1x64xf32> to vector<16x64xf32>
    %605 = arith.addf %603, %604 : vector<16x64xf32>
    %606 = arith.mulf %605, %605 : vector<16x64xf32>
    %607 = arith.mulf %605, %606 : vector<16x64xf32>
    %cst_233 = arith.constant 4.471500e-02 : f32
    %608 = vector.broadcast %cst_233 : f32 to vector<16x64xf32>
    %609 = arith.mulf %608, %607 : vector<16x64xf32>
    %610 = arith.addf %605, %609 : vector<16x64xf32>
    %cst_234 = arith.constant 0.797884583 : f32
    %611 = vector.broadcast %cst_234 : f32 to vector<16x64xf32>
    %612 = arith.mulf %611, %610 : vector<16x64xf32>
    %613 = math.tanh %612 : vector<16x64xf32>
    %cst_235 = arith.constant 1.000000e+00 : f32
    %614 = vector.broadcast %cst_235 : f32 to vector<16x64xf32>
    %615 = arith.addf %614, %613 : vector<16x64xf32>
    %cst_236 = arith.constant 5.000000e-01 : f32
    %616 = vector.broadcast %cst_236 : f32 to vector<16x64xf32>
    %617 = arith.mulf %616, %615 : vector<16x64xf32>
    %618 = arith.mulf %605, %617 : vector<16x64xf32>
    %cst_237 = arith.constant dense<0.000000e+00> : vector<16x32xf32>
    %619 = tpu.matmul %618, %595, %cst_237 {dimension_numbers = #tpu.dot_dimension_numbers<[1], [0], [0], [1], [0, 0, 1, 1], [], []>} : vector<16x64xf32>, vector<64x32xf32>, vector<16x32xf32> -> vector<16x32xf32>
    %620 = vector.broadcast %597 : vector<1x32xf32> to vector<16x32xf32>
    %621 = arith.addf %619, %620 : vector<16x32xf32>
    %622 = arith.addf %621, %602 : vector<16x32xf32>
    %cst_238 = arith.constant dense<0.000000e+00> : vector<16xf32>
    %623 = vector.multi_reduction <add>, %622, %cst_238 [1] : vector<16x32xf32> to vector<16xf32>
    %624 = vector.shape_cast %623 : vector<16xf32> to vector<16x1xf32>
    %cst_239 = arith.constant 3.200000e+01 : f32
    %625 = vector.broadcast %cst_239 : f32 to vector<16x1xf32>
    %626 = arith.divf %624, %625 : vector<16x1xf32>
    %627 = vector.broadcast %626 : vector<16x1xf32> to vector<16x32xf32>
    %628 = arith.subf %622, %627 : vector<16x32xf32>
    %629 = arith.mulf %628, %628 : vector<16x32xf32>
    %cst_240 = arith.constant dense<0.000000e+00> : vector<16xf32>
    %630 = vector.multi_reduction <add>, %629, %cst_240 [1] : vector<16x32xf32> to vector<16xf32>
    %631 = vector.shape_cast %630 : vector<16xf32> to vector<16x1xf32>
    %cst_241 = arith.constant 3.200000e+01 : f32
    %632 = vector.broadcast %cst_241 : f32 to vector<16x1xf32>
    %633 = arith.divf %631, %632 : vector<16x1xf32>
    %634 = vector.broadcast %626 : vector<16x1xf32> to vector<16x32xf32>
    %635 = arith.subf %622, %634 : vector<16x32xf32>
    %cst_242 = arith.constant 9.99999996E-13 : f32
    %636 = vector.broadcast %cst_242 : f32 to vector<16x1xf32>
    %637 = arith.addf %633, %636 : vector<16x1xf32>
    %638 = math.rsqrt %637 : vector<16x1xf32>
    %639 = vector.broadcast %638 : vector<16x1xf32> to vector<16x32xf32>
    %640 = arith.mulf %635, %639 : vector<16x32xf32>
    %641 = vector.broadcast %599 : vector<1x32xf32> to vector<16x32xf32>
    %642 = arith.mulf %640, %641 : vector<16x32xf32>
    %643 = vector.broadcast %601 : vector<1x32xf32> to vector<16x32xf32>
    %644 = arith.addf %642, %643 : vector<16x32xf32>
    %645 = vector.shape_cast %644 : vector<16x32xf32> to vector<2x8x32xf32>
    %c1_243 = arith.constant 1 : index
    %c0_244 = arith.constant 0 : index
    %c0_245 = arith.constant 0 : index
    %646 = vector.load %arg17[%c1_243, %c0_244, %c0_245] : memref<2x32x64xf32, #tpu.memory_space<vmem>>, vector<1x32x64xf32>
    %647 = vector.shape_cast %646 : vector<1x32x64xf32> to vector<32x64xf32>
    %c1_246 = arith.constant 1 : index
    %c0_247 = arith.constant 0 : index
    %c0_248 = arith.constant 0 : index
    %648 = vector.load %arg18[%c1_246, %c0_247, %c0_248] : memref<2x1x64xf32, #tpu.memory_space<vmem>>, vector<1x1x64xf32>
    %649 = vector.shape_cast %648 : vector<1x1x64xf32> to vector<1x64xf32>
    %c1_249 = arith.constant 1 : index
    %c0_250 = arith.constant 0 : index
    %c0_251 = arith.constant 0 : index
    %650 = vector.load %arg19[%c1_249, %c0_250, %c0_251] : memref<2x64x32xf32, #tpu.memory_space<vmem>>, vector<1x64x32xf32>
    %651 = vector.shape_cast %650 : vector<1x64x32xf32> to vector<64x32xf32>
    %c1_252 = arith.constant 1 : index
    %c0_253 = arith.constant 0 : index
    %c0_254 = arith.constant 0 : index
    %652 = vector.load %arg20[%c1_252, %c0_253, %c0_254] : memref<2x1x32xf32, #tpu.memory_space<vmem>>, vector<1x1x32xf32>
    %653 = vector.shape_cast %652 : vector<1x1x32xf32> to vector<1x32xf32>
    %c1_255 = arith.constant 1 : index
    %c0_256 = arith.constant 0 : index
    %c0_257 = arith.constant 0 : index
    %654 = vector.load %arg21[%c1_255, %c0_256, %c0_257] : memref<2x1x32xf32, #tpu.memory_space<vmem>>, vector<1x1x32xf32>
    %655 = vector.shape_cast %654 : vector<1x1x32xf32> to vector<1x32xf32>
    %c1_258 = arith.constant 1 : index
    %c0_259 = arith.constant 0 : index
    %c0_260 = arith.constant 0 : index
    %656 = vector.load %arg22[%c1_258, %c0_259, %c0_260] : memref<2x1x32xf32, #tpu.memory_space<vmem>>, vector<1x1x32xf32>
    %657 = vector.shape_cast %656 : vector<1x1x32xf32> to vector<1x32xf32>
    %658 = vector.shape_cast %584 : vector<2x8x32xf32> to vector<16x32xf32>
    %cst_261 = arith.constant dense<0.000000e+00> : vector<16x64xf32>
    %659 = tpu.matmul %658, %647, %cst_261 {dimension_numbers = #tpu.dot_dimension_numbers<[1], [0], [0], [1], [0, 0, 1, 1], [], []>} : vector<16x32xf32>, vector<32x64xf32>, vector<16x64xf32> -> vector<16x64xf32>
    %660 = vector.broadcast %649 : vector<1x64xf32> to vector<16x64xf32>
    %661 = arith.addf %659, %660 : vector<16x64xf32>
    %662 = arith.mulf %661, %661 : vector<16x64xf32>
    %663 = arith.mulf %661, %662 : vector<16x64xf32>
    %cst_262 = arith.constant 4.471500e-02 : f32
    %664 = vector.broadcast %cst_262 : f32 to vector<16x64xf32>
    %665 = arith.mulf %664, %663 : vector<16x64xf32>
    %666 = arith.addf %661, %665 : vector<16x64xf32>
    %cst_263 = arith.constant 0.797884583 : f32
    %667 = vector.broadcast %cst_263 : f32 to vector<16x64xf32>
    %668 = arith.mulf %667, %666 : vector<16x64xf32>
    %669 = math.tanh %668 : vector<16x64xf32>
    %cst_264 = arith.constant 1.000000e+00 : f32
    %670 = vector.broadcast %cst_264 : f32 to vector<16x64xf32>
    %671 = arith.addf %670, %669 : vector<16x64xf32>
    %cst_265 = arith.constant 5.000000e-01 : f32
    %672 = vector.broadcast %cst_265 : f32 to vector<16x64xf32>
    %673 = arith.mulf %672, %671 : vector<16x64xf32>
    %674 = arith.mulf %661, %673 : vector<16x64xf32>
    %cst_266 = arith.constant dense<0.000000e+00> : vector<16x32xf32>
    %675 = tpu.matmul %674, %651, %cst_266 {dimension_numbers = #tpu.dot_dimension_numbers<[1], [0], [0], [1], [0, 0, 1, 1], [], []>} : vector<16x64xf32>, vector<64x32xf32>, vector<16x32xf32> -> vector<16x32xf32>
    %676 = vector.broadcast %653 : vector<1x32xf32> to vector<16x32xf32>
    %677 = arith.addf %675, %676 : vector<16x32xf32>
    %678 = arith.addf %677, %658 : vector<16x32xf32>
    %cst_267 = arith.constant dense<0.000000e+00> : vector<16xf32>
    %679 = vector.multi_reduction <add>, %678, %cst_267 [1] : vector<16x32xf32> to vector<16xf32>
    %680 = vector.shape_cast %679 : vector<16xf32> to vector<16x1xf32>
    %cst_268 = arith.constant 3.200000e+01 : f32
    %681 = vector.broadcast %cst_268 : f32 to vector<16x1xf32>
    %682 = arith.divf %680, %681 : vector<16x1xf32>
    %683 = vector.broadcast %682 : vector<16x1xf32> to vector<16x32xf32>
    %684 = arith.subf %678, %683 : vector<16x32xf32>
    %685 = arith.mulf %684, %684 : vector<16x32xf32>
    %cst_269 = arith.constant dense<0.000000e+00> : vector<16xf32>
    %686 = vector.multi_reduction <add>, %685, %cst_269 [1] : vector<16x32xf32> to vector<16xf32>
    %687 = vector.shape_cast %686 : vector<16xf32> to vector<16x1xf32>
    %cst_270 = arith.constant 3.200000e+01 : f32
    %688 = vector.broadcast %cst_270 : f32 to vector<16x1xf32>
    %689 = arith.divf %687, %688 : vector<16x1xf32>
    %690 = vector.broadcast %682 : vector<16x1xf32> to vector<16x32xf32>
    %691 = arith.subf %678, %690 : vector<16x32xf32>
    %cst_271 = arith.constant 9.99999996E-13 : f32
    %692 = vector.broadcast %cst_271 : f32 to vector<16x1xf32>
    %693 = arith.addf %689, %692 : vector<16x1xf32>
    %694 = math.rsqrt %693 : vector<16x1xf32>
    %695 = vector.broadcast %694 : vector<16x1xf32> to vector<16x32xf32>
    %696 = arith.mulf %691, %695 : vector<16x32xf32>
    %697 = vector.broadcast %655 : vector<1x32xf32> to vector<16x32xf32>
    %698 = arith.mulf %696, %697 : vector<16x32xf32>
    %699 = vector.broadcast %657 : vector<1x32xf32> to vector<16x32xf32>
    %700 = arith.addf %698, %699 : vector<16x32xf32>
    %701 = vector.shape_cast %700 : vector<16x32xf32> to vector<2x8x32xf32>
    %c0_272 = arith.constant 0 : index
    %c0_273 = arith.constant 0 : index
    %c0_274 = arith.constant 0 : index
    %c0_275 = arith.constant 0 : index
    %702 = vector.load %arg36[%c0_272, %c0_273, %c0_274, %c0_275] : memref<2x4x8x8xf32, #tpu.memory_space<vmem>>, vector<2x4x8x8xf32>
    tpu.vector_store %arg36[%c0_272, %c0_273, %c0_274, %c0_275], %197 {strides = array<i32>} : memref<2x4x8x8xf32, #tpu.memory_space<vmem>>, vector<2x4x8x8xf32>,
    %c0_276 = arith.constant 0 : index
    %c0_277 = arith.constant 0 : index
    %c0_278 = arith.constant 0 : index
    %c0_279 = arith.constant 0 : index
    %703 = vector.load %arg37[%c0_276, %c0_277, %c0_278, %c0_279] : memref<2x4x8x8xf32, #tpu.memory_space<vmem>>, vector<2x4x8x8xf32>
    tpu.vector_store %arg37[%c0_276, %c0_277, %c0_278, %c0_279], %326 {strides = array<i32>} : memref<2x4x8x8xf32, #tpu.memory_space<vmem>>, vector<2x4x8x8xf32>,
    %c0_280 = arith.constant 0 : index
    %c0_281 = arith.constant 0 : index
    %c0_282 = arith.constant 0 : index
    %c0_283 = arith.constant 0 : index
    %704 = vector.load %arg38[%c0_280, %c0_281, %c0_282, %c0_283] : memref<2x4x8x8xf32, #tpu.memory_space<vmem>>, vector<2x4x8x8xf32>
    tpu.vector_store %arg38[%c0_280, %c0_281, %c0_282, %c0_283], %462 {strides = array<i32>} : memref<2x4x8x8xf32, #tpu.memory_space<vmem>>, vector<2x4x8x8xf32>,
    %c0_284 = arith.constant 0 : index
    %c0_285 = arith.constant 0 : index
    %c0_286 = arith.constant 0 : index
    %c0_287 = arith.constant 0 : index
    %705 = vector.load %arg39[%c0_284, %c0_285, %c0_286, %c0_287] : memref<2x4x8x8xf32, #tpu.memory_space<vmem>>, vector<2x4x8x8xf32>
    tpu.vector_store %arg39[%c0_284, %c0_285, %c0_286, %c0_287], %589 {strides = array<i32>} : memref<2x4x8x8xf32, #tpu.memory_space<vmem>>, vector<2x4x8x8xf32>,
    %706 = vector.extract_strided_slice %645 {offsets = [0, 0, 0], sizes = [2, 1, 32], strides = [1, 1, 1]} : vector<2x8x32xf32> to vector<2x1x32xf32>
    %707 = vector.shape_cast %706 : vector<2x1x32xf32> to vector<2x32xf32>
    %c0_288 = arith.constant 0 : index
    %c0_289 = arith.constant 0 : index
    %708 = vector.load %arg27[%c0_288, %c0_289] : memref<32x16xf32, #tpu.memory_space<vmem>>, vector<32x16xf32>
    %cst_290 = arith.constant dense<0.000000e+00> : vector<2x16xf32>
    %709 = tpu.matmul %707, %708, %cst_290 {dimension_numbers = #tpu.dot_dimension_numbers<[1], [0], [0], [1], [0, 0, 1, 1], [], []>} : vector<2x32xf32>, vector<32x16xf32>, vector<2x16xf32> -> vector<2x16xf32>
    %c0_291 = arith.constant 0 : index
    %c0_292 = arith.constant 0 : index
    %710 = vector.load %arg28[%c0_291, %c0_292] : memref<1x16xf32, #tpu.memory_space<vmem>>, vector<1x16xf32>
    %711 = vector.broadcast %710 : vector<1x16xf32> to vector<2x16xf32>
    %712 = arith.addf %709, %711 : vector<2x16xf32>
    %713 = vector.extract_strided_slice %701 {offsets = [0, 0, 0], sizes = [2, 1, 32], strides = [1, 1, 1]} : vector<2x8x32xf32> to vector<2x1x32xf32>
    %714 = vector.shape_cast %713 : vector<2x1x32xf32> to vector<2x32xf32>
    %c0_293 = arith.constant 0 : index
    %c0_294 = arith.constant 0 : index
    %715 = vector.load %arg29[%c0_293, %c0_294] : memref<32x16xf32, #tpu.memory_space<vmem>>, vector<32x16xf32>
    %cst_295 = arith.constant dense<0.000000e+00> : vector<2x16xf32>
    %716 = tpu.matmul %714, %715, %cst_295 {dimension_numbers = #tpu.dot_dimension_numbers<[1], [0], [0], [1], [0, 0, 1, 1], [], []>} : vector<2x32xf32>, vector<32x16xf32>, vector<2x16xf32> -> vector<2x16xf32>
    %c0_296 = arith.constant 0 : index
    %c0_297 = arith.constant 0 : index
    %717 = vector.load %arg30[%c0_296, %c0_297] : memref<1x16xf32, #tpu.memory_space<vmem>>, vector<1x16xf32>
    %718 = vector.broadcast %717 : vector<1x16xf32> to vector<2x16xf32>
    %719 = arith.addf %716, %718 : vector<2x16xf32>
    %c0_298 = arith.constant 0 : index
    %c0_299 = arith.constant 0 : index
    %720 = vector.load %arg33[%c0_298, %c0_299] : memref<2x16xf32, #tpu.memory_space<vmem>>, vector<2x16xf32>
    tpu.vector_store %arg33[%c0_298, %c0_299], %712 {strides = array<i32>} : memref<2x16xf32, #tpu.memory_space<vmem>>, vector<2x16xf32>,
    %c0_300 = arith.constant 0 : index
    %c0_301 = arith.constant 0 : index
    %721 = vector.load %arg34[%c0_300, %c0_301] : memref<2x16xf32, #tpu.memory_space<vmem>>, vector<2x16xf32>
    tpu.vector_store %arg34[%c0_300, %c0_301], %719 {strides = array<i32>} : memref<2x16xf32, #tpu.memory_space<vmem>>, vector<2x16xf32>,
    %722 = arith.mulf %712, %712 : vector<2x16xf32>
    %cst_302 = arith.constant dense<0.000000e+00> : vector<2xf32>
    %723 = vector.multi_reduction <add>, %722, %cst_302 [1] : vector<2x16xf32> to vector<2xf32>
    %724 = vector.shape_cast %723 : vector<2xf32> to vector<2x1xf32>
    %725 = math.rsqrt %724 : vector<2x1xf32>
    %726 = vector.broadcast %725 : vector<2x1xf32> to vector<2x16xf32>
    %727 = arith.mulf %712, %726 : vector<2x16xf32>
    %728 = arith.mulf %719, %719 : vector<2x16xf32>
    %cst_303 = arith.constant dense<0.000000e+00> : vector<2xf32>
    %729 = vector.multi_reduction <add>, %728, %cst_303 [1] : vector<2x16xf32> to vector<2xf32>
    %730 = vector.shape_cast %729 : vector<2xf32> to vector<2x1xf32>
    %731 = math.rsqrt %730 : vector<2x1xf32>
    %732 = vector.broadcast %731 : vector<2x1xf32> to vector<2x16xf32>
    %733 = arith.mulf %719, %732 : vector<2x16xf32>
    %c0_304 = arith.constant 0 : index
    %c0_305 = arith.constant 0 : index
    %734 = vector.load %arg31[%c0_304, %c0_305] : memref<1x1xf32, #tpu.memory_space<vmem>>, vector<1x1xf32>
    %735 = math.exp %734 : vector<1x1xf32>
    "tpu.trace_start"() <{level = 10 : i32, message = "be,ce->bc"}> : () -> ()
    %cst_306 = arith.constant dense<0.000000e+00> : vector<2x2xf32>
    %736 = tpu.matmul %727, %733, %cst_306 {dimension_numbers = #tpu.dot_dimension_numbers<[1], [1], [0], [0], [0, 0, 1, 0], [], []>} : vector<2x16xf32>, vector<2x16xf32>, vector<2x2xf32> -> vector<2x2xf32>
    "tpu.trace_stop"() : () -> ()
    %737 = vector.broadcast %735 : vector<1x1xf32> to vector<2x2xf32>
    %738 = arith.mulf %737, %736 : vector<2x2xf32>
    %c0_307 = arith.constant 0 : index
    %c0_308 = arith.constant 0 : index
    %739 = vector.load %arg35[%c0_307, %c0_308] : memref<2x2xf32, #tpu.memory_space<vmem>>, vector<2x2xf32>
    tpu.vector_store %arg35[%c0_307, %c0_308], %738 {strides = array<i32>} : memref<2x2xf32, #tpu.memory_space<vmem>>, vector<2x2xf32>,
    %740 = tpu.concatenate %645, %701 in 1 : vector<2x8x32xf32>, vector<2x8x32xf32> -> vector<2x16x32xf32>
    %741 = vector.shape_cast %740 : vector<2x16x32xf32> to vector<32x32xf32>
    %c0_309 = arith.constant 0 : index
    %c0_310 = arith.constant 0 : index
    %742 = vector.load %arg23[%c0_309, %c0_310] : memref<32x32xf32, #tpu.memory_space<vmem>>, vector<32x32xf32>
    %cst_311 = arith.constant dense<0.000000e+00> : vector<32x32xf32>
    %743 = tpu.matmul %741, %742, %cst_311 {dimension_numbers = #tpu.dot_dimension_numbers<[1], [0], [0], [1], [0, 0, 1, 1], [], []>} : vector<32x32xf32>, vector<32x32xf32>, vector<32x32xf32> -> vector<32x32xf32>
    %c0_312 = arith.constant 0 : index
    %c0_313 = arith.constant 0 : index
    %744 = vector.load %arg24[%c0_312, %c0_313] : memref<1x32xf32, #tpu.memory_space<vmem>>, vector<1x32xf32>
    %745 = vector.broadcast %744 : vector<1x32xf32> to vector<32x32xf32>
    %746 = arith.addf %743, %745 : vector<32x32xf32>
    %c0_314 = arith.constant 0 : index
    %c0_315 = arith.constant 0 : index
    %747 = vector.load %arg25[%c0_314, %c0_315] : memref<1x32xf32, #tpu.memory_space<vmem>>, vector<1x32xf32>
    %c0_316 = arith.constant 0 : index
    %c0_317 = arith.constant 0 : index
    %748 = vector.load %arg26[%c0_316, %c0_317] : memref<1x32xf32, #tpu.memory_space<vmem>>, vector<1x32xf32>
    %cst_318 = arith.constant dense<0.000000e+00> : vector<32xf32>
    %749 = vector.multi_reduction <add>, %746, %cst_318 [1] : vector<32x32xf32> to vector<32xf32>
    %750 = vector.shape_cast %749 : vector<32xf32> to vector<32x1xf32>
    %cst_319 = arith.constant 3.200000e+01 : f32
    %751 = vector.broadcast %cst_319 : f32 to vector<32x1xf32>
    %752 = arith.divf %750, %751 : vector<32x1xf32>
    %753 = vector.broadcast %752 : vector<32x1xf32> to vector<32x32xf32>
    %754 = arith.subf %746, %753 : vector<32x32xf32>
    %755 = arith.mulf %754, %754 : vector<32x32xf32>
    %cst_320 = arith.constant dense<0.000000e+00> : vector<32xf32>
    %756 = vector.multi_reduction <add>, %755, %cst_320 [1] : vector<32x32xf32> to vector<32xf32>
    %757 = vector.shape_cast %756 : vector<32xf32> to vector<32x1xf32>
    %cst_321 = arith.constant 3.200000e+01 : f32
    %758 = vector.broadcast %cst_321 : f32 to vector<32x1xf32>
    %759 = arith.divf %757, %758 : vector<32x1xf32>
    %760 = vector.broadcast %752 : vector<32x1xf32> to vector<32x32xf32>
    %761 = arith.subf %746, %760 : vector<32x32xf32>
    %cst_322 = arith.constant 9.99999996E-13 : f32
    %762 = vector.broadcast %cst_322 : f32 to vector<32x1xf32>
    %763 = arith.addf %759, %762 : vector<32x1xf32>
    %764 = math.rsqrt %763 : vector<32x1xf32>
    %765 = vector.broadcast %764 : vector<32x1xf32> to vector<32x32xf32>
    %766 = arith.mulf %761, %765 : vector<32x32xf32>
    %767 = vector.broadcast %747 : vector<1x32xf32> to vector<32x32xf32>
    %768 = arith.mulf %766, %767 : vector<32x32xf32>
    %769 = vector.broadcast %748 : vector<1x32xf32> to vector<32x32xf32>
    %770 = arith.addf %768, %769 : vector<32x32xf32>
    %771 = vector.shape_cast %770 : vector<32x32xf32> to vector<2x16x32xf32>
    %c0_323 = arith.constant 0 : index
    %c0_324 = arith.constant 0 : index
    %c0_325 = arith.constant 0 : index
    %772 = vector.load %arg32[%c0_323, %c0_324, %c0_325] : memref<2x16x32xf32, #tpu.memory_space<vmem>>, vector<2x16x32xf32>
    tpu.vector_store %arg32[%c0_323, %c0_324, %c0_325], %771 {strides = array<i32>} : memref<2x16x32xf32, #tpu.memory_space<vmem>>, vector<2x16x32xf32>,
    return
  }
}

module attributes {stable_mosaic.version = 11 : i64} {
  func.func @_decoder_kernel(%arg0: memref<2x8xi32, #tpu.memory_space<vmem>>, %arg1: memref<2x8xf32, #tpu.memory_space<vmem>>, %arg2: memref<2x16x32xf32, #tpu.memory_space<vmem>>, %arg3: memref<128x32xf32, #tpu.memory_space<vmem>>, %arg4: memref<8x32xf32, #tpu.memory_space<vmem>>, %arg5: memref<1x32xf32, #tpu.memory_space<vmem>>, %arg6: memref<1x32xf32, #tpu.memory_space<vmem>>, %arg7: memref<2x32x96xf32, #tpu.memory_space<vmem>>, %arg8: memref<2x1x96xf32, #tpu.memory_space<vmem>>, %arg9: memref<2x32x32xf32, #tpu.memory_space<vmem>>, %arg10: memref<2x1x32xf32, #tpu.memory_space<vmem>>, %arg11: memref<2x1x32xf32, #tpu.memory_space<vmem>>, %arg12: memref<2x1x32xf32, #tpu.memory_space<vmem>>, %arg13: memref<32x64xf32, #tpu.memory_space<vmem>>, %arg14: memref<1x64xf32, #tpu.memory_space<vmem>>, %arg15: memref<64x32xf32, #tpu.memory_space<vmem>>, %arg16: memref<1x32xf32, #tpu.memory_space<vmem>>, %arg17: memref<1x32xf32, #tpu.memory_space<vmem>>, %arg18: memref<1x32xf32, #tpu.memory_space<vmem>>, %arg19: memref<32x128xf32, #tpu.memory_space<vmem>>, %arg20: memref<1x128xf32, #tpu.memory_space<vmem>>, %arg21: memref<2x8x128xf32, #tpu.memory_space<vmem>>) attributes {dimension_semantics = [], scalar_prefetch = 0 : i64, scratch_operands = 0 : i64, tpu.core_type = #tpu.core_type<tc>} {
    %c0 = arith.constant 0 : index
    %c0_0 = arith.constant 0 : index
    %0 = vector.load %arg0[%c0, %c0_0] : memref<2x8xi32, #tpu.memory_space<vmem>>, vector<2x8xi32>
    %c0_1 = arith.constant 0 : index
    %c0_2 = arith.constant 0 : index
    %1 = vector.load %arg3[%c0_1, %c0_2] : memref<128x32xf32, #tpu.memory_space<vmem>>, vector<128x32xf32>
    %2 = tpu.iota {dimensions = array<i32: 2>} : vector<2x8x128xi32>
    %3 = vector.shape_cast %0 : vector<2x8xi32> to vector<2x8x1xi32>
    %4 = vector.broadcast %3 : vector<2x8x1xi32> to vector<2x8x128xi32>
    %5 = arith.cmpi eq, %4, %2 : vector<2x8x128xi32>
    %6 = arith.extui %5 : vector<2x8x128xi1> to vector<2x8x128xi32>
    %7 = arith.sitofp %6 : vector<2x8x128xi32> to vector<2x8x128xf32>
    %8 = vector.shape_cast %7 : vector<2x8x128xf32> to vector<16x128xf32>
    %cst = arith.constant dense<0.000000e+00> : vector<16x32xf32>
    %9 = tpu.matmul %8, %1, %cst {dimension_numbers = #tpu.dot_dimension_numbers<[1], [0], [0], [1], [0, 0, 1, 1], [], []>} : vector<16x128xf32>, vector<128x32xf32>, vector<16x32xf32> -> vector<16x32xf32>
    %10 = vector.shape_cast %9 : vector<16x32xf32> to vector<2x8x32xf32>
    %c0_3 = arith.constant 0 : index
    %c0_4 = arith.constant 0 : index
    %11 = vector.load %arg4[%c0_3, %c0_4] : memref<8x32xf32, #tpu.memory_space<vmem>>, vector<8x32xf32>
    %12 = vector.shape_cast %11 : vector<8x32xf32> to vector<1x8x32xf32>
    %13 = vector.broadcast %12 : vector<1x8x32xf32> to vector<2x8x32xf32>
    %14 = arith.addf %10, %13 : vector<2x8x32xf32>
    %15 = vector.shape_cast %14 : vector<2x8x32xf32> to vector<16x32xf32>
    %c0_5 = arith.constant 0 : index
    %c0_6 = arith.constant 0 : index
    %16 = vector.load %arg5[%c0_5, %c0_6] : memref<1x32xf32, #tpu.memory_space<vmem>>, vector<1x32xf32>
    %c0_7 = arith.constant 0 : index
    %c0_8 = arith.constant 0 : index
    %17 = vector.load %arg6[%c0_7, %c0_8] : memref<1x32xf32, #tpu.memory_space<vmem>>, vector<1x32xf32>
    %cst_9 = arith.constant dense<0.000000e+00> : vector<16xf32>
    %18 = vector.multi_reduction <add>, %15, %cst_9 [1] : vector<16x32xf32> to vector<16xf32>
    %19 = vector.shape_cast %18 : vector<16xf32> to vector<16x1xf32>
    %cst_10 = arith.constant 3.200000e+01 : f32
    %20 = vector.broadcast %cst_10 : f32 to vector<16x1xf32>
    %21 = arith.divf %19, %20 : vector<16x1xf32>
    %22 = vector.broadcast %21 : vector<16x1xf32> to vector<16x32xf32>
    %23 = arith.subf %15, %22 : vector<16x32xf32>
    %24 = arith.mulf %23, %23 : vector<16x32xf32>
    %cst_11 = arith.constant dense<0.000000e+00> : vector<16xf32>
    %25 = vector.multi_reduction <add>, %24, %cst_11 [1] : vector<16x32xf32> to vector<16xf32>
    %26 = vector.shape_cast %25 : vector<16xf32> to vector<16x1xf32>
    %cst_12 = arith.constant 3.200000e+01 : f32
    %27 = vector.broadcast %cst_12 : f32 to vector<16x1xf32>
    %28 = arith.divf %26, %27 : vector<16x1xf32>
    %29 = vector.broadcast %21 : vector<16x1xf32> to vector<16x32xf32>
    %30 = arith.subf %15, %29 : vector<16x32xf32>
    %cst_13 = arith.constant 9.99999996E-13 : f32
    %31 = vector.broadcast %cst_13 : f32 to vector<16x1xf32>
    %32 = arith.addf %28, %31 : vector<16x1xf32>
    %33 = math.rsqrt %32 : vector<16x1xf32>
    %34 = vector.broadcast %33 : vector<16x1xf32> to vector<16x32xf32>
    %35 = arith.mulf %30, %34 : vector<16x32xf32>
    %36 = vector.broadcast %16 : vector<1x32xf32> to vector<16x32xf32>
    %37 = arith.mulf %35, %36 : vector<16x32xf32>
    %38 = vector.broadcast %17 : vector<1x32xf32> to vector<16x32xf32>
    %39 = arith.addf %37, %38 : vector<16x32xf32>
    %40 = vector.shape_cast %39 : vector<16x32xf32> to vector<2x8x32xf32>
    %c0_14 = arith.constant 0 : index
    %c0_15 = arith.constant 0 : index
    %41 = vector.load %arg1[%c0_14, %c0_15] : memref<2x8xf32, #tpu.memory_space<vmem>>, vector<2x8xf32>
    %cst_16 = arith.constant 1.000000e+00 : f32
    %42 = vector.broadcast %cst_16 : f32 to vector<2x8xf32>
    %43 = arith.subf %42, %41 : vector<2x8xf32>
    %cst_17 = arith.constant -1.000000e+09 : f32
    %44 = vector.broadcast %cst_17 : f32 to vector<2x8xf32>
    %45 = arith.mulf %43, %44 : vector<2x8xf32>
    %c0_18 = arith.constant 0 : index
    %c0_19 = arith.constant 0 : index
    %c0_20 = arith.constant 0 : index
    %46 = vector.load %arg7[%c0_18, %c0_19, %c0_20] : memref<2x32x96xf32, #tpu.memory_space<vmem>>, vector<1x32x96xf32>
    %47 = vector.shape_cast %46 : vector<1x32x96xf32> to vector<32x96xf32>
    %c0_21 = arith.constant 0 : index
    %c0_22 = arith.constant 0 : index
    %c0_23 = arith.constant 0 : index
    %48 = vector.load %arg8[%c0_21, %c0_22, %c0_23] : memref<2x1x96xf32, #tpu.memory_space<vmem>>, vector<1x1x96xf32>
    %49 = vector.shape_cast %48 : vector<1x1x96xf32> to vector<1x96xf32>
    %c0_24 = arith.constant 0 : index
    %c0_25 = arith.constant 0 : index
    %c0_26 = arith.constant 0 : index
    %50 = vector.load %arg9[%c0_24, %c0_25, %c0_26] : memref<2x32x32xf32, #tpu.memory_space<vmem>>, vector<1x32x32xf32>
    %51 = vector.shape_cast %50 : vector<1x32x32xf32> to vector<32x32xf32>
    %c0_27 = arith.constant 0 : index
    %c0_28 = arith.constant 0 : index
    %c0_29 = arith.constant 0 : index
    %52 = vector.load %arg10[%c0_27, %c0_28, %c0_29] : memref<2x1x32xf32, #tpu.memory_space<vmem>>, vector<1x1x32xf32>
    %53 = vector.shape_cast %52 : vector<1x1x32xf32> to vector<1x32xf32>
    %c0_30 = arith.constant 0 : index
    %c0_31 = arith.constant 0 : index
    %c0_32 = arith.constant 0 : index
    %54 = vector.load %arg11[%c0_30, %c0_31, %c0_32] : memref<2x1x32xf32, #tpu.memory_space<vmem>>, vector<1x1x32xf32>
    %55 = vector.shape_cast %54 : vector<1x1x32xf32> to vector<1x32xf32>
    %c0_33 = arith.constant 0 : index
    %c0_34 = arith.constant 0 : index
    %c0_35 = arith.constant 0 : index
    %56 = vector.load %arg12[%c0_33, %c0_34, %c0_35] : memref<2x1x32xf32, #tpu.memory_space<vmem>>, vector<1x1x32xf32>
    %57 = vector.shape_cast %56 : vector<1x1x32xf32> to vector<1x32xf32>
    %58 = vector.shape_cast %40 : vector<2x8x32xf32> to vector<16x32xf32>
    %cst_36 = arith.constant dense<0.000000e+00> : vector<16x96xf32>
    %59 = tpu.matmul %58, %47, %cst_36 {dimension_numbers = #tpu.dot_dimension_numbers<[1], [0], [0], [1], [0, 0, 1, 1], [], []>} : vector<16x32xf32>, vector<32x96xf32>, vector<16x96xf32> -> vector<16x96xf32>
    %60 = vector.broadcast %49 : vector<1x96xf32> to vector<16x96xf32>
    %61 = arith.addf %59, %60 : vector<16x96xf32>
    %62 = vector.extract_strided_slice %61 {offsets = [0, 0], sizes = [16, 32], strides = [1, 1]} : vector<16x96xf32> to vector<16x32xf32>
    %63 = vector.shape_cast %62 : vector<16x32xf32> to vector<2x8x32xf32>
    %64 = vector.extract_strided_slice %61 {offsets = [0, 32], sizes = [16, 32], strides = [1, 1]} : vector<16x96xf32> to vector<16x32xf32>
    %65 = vector.shape_cast %64 : vector<16x32xf32> to vector<2x8x32xf32>
    %66 = vector.extract_strided_slice %61 {offsets = [0, 64], sizes = [16, 32], strides = [1, 1]} : vector<16x96xf32> to vector<16x32xf32>
    %67 = vector.shape_cast %66 : vector<16x32xf32> to vector<2x8x32xf32>
    %68 = vector.shape_cast %45 : vector<2x8xf32> to vector<2x1x8xf32>
    %69 = tpu.iota {dimensions = array<i32: 0>} : vector<8x8xi32>
    %70 = tpu.iota {dimensions = array<i32: 1>} : vector<8x8xi32>
    %71 = arith.cmpi sge, %69, %70 : vector<8x8xi32>
    %cst_37 = arith.constant 0.000000e+00 : f32
    %cst_38 = arith.constant -1.000000e+09 : f32
    %72 = vector.broadcast %cst_37 : f32 to vector<8x8xf32>
    %73 = vector.broadcast %cst_38 : f32 to vector<8x8xf32>
    %74 = arith.select %71, %72, %73 : vector<8x8xi1>, vector<8x8xf32>
    %75 = vector.shape_cast %74 : vector<8x8xf32> to vector<1x8x8xf32>
    %76 = vector.broadcast %68 : vector<2x1x8xf32> to vector<2x8x8xf32>
    %77 = vector.broadcast %75 : vector<1x8x8xf32> to vector<2x8x8xf32>
    %78 = arith.addf %76, %77 : vector<2x8x8xf32>
    %79 = vector.extract_strided_slice %63 {offsets = [0, 0, 0], sizes = [2, 8, 8], strides = [1, 1, 1]} : vector<2x8x32xf32> to vector<2x8x8xf32>
    %80 = vector.extract_strided_slice %65 {offsets = [0, 0, 0], sizes = [2, 8, 8], strides = [1, 1, 1]} : vector<2x8x32xf32> to vector<2x8x8xf32>
    "tpu.trace_start"() <{level = 10 : i32, message = "bqd,bkd->bqk"}> : () -> ()
    %cst_39 = arith.constant dense<0.000000e+00> : vector<2x8x8xf32>
    %81 = tpu.matmul %79, %80, %cst_39 {dimension_numbers = #tpu.dot_dimension_numbers<[2], [2], [1], [1], [0, 0, 0, 1, 1, 1], [0], [0]>} : vector<2x8x8xf32>, vector<2x8x8xf32>, vector<2x8x8xf32> -> vector<2x8x8xf32>
    "tpu.trace_stop"() : () -> ()
    %cst_40 = arith.constant 0.353553385 : f32
    %82 = vector.broadcast %cst_40 : f32 to vector<2x8x8xf32>
    %83 = arith.mulf %81, %82 : vector<2x8x8xf32>
    %84 = arith.addf %83, %78 : vector<2x8x8xf32>
    %cst_41 = arith.constant dense<0xFF800000> : vector<2x8xf32>
    %85 = vector.multi_reduction <maximumf>, %84, %cst_41 [2] : vector<2x8x8xf32> to vector<2x8xf32>
    %86 = vector.shape_cast %85 : vector<2x8xf32> to vector<2x8x1xf32>
    %87 = vector.broadcast %86 : vector<2x8x1xf32> to vector<2x8x8xf32>
    %88 = arith.subf %84, %87 : vector<2x8x8xf32>
    %89 = math.exp %88 : vector<2x8x8xf32>
    %cst_42 = arith.constant dense<0.000000e+00> : vector<2x8xf32>
    %90 = vector.multi_reduction <add>, %89, %cst_42 [2] : vector<2x8x8xf32> to vector<2x8xf32>
    %91 = vector.shape_cast %90 : vector<2x8xf32> to vector<2x8x1xf32>
    %92 = vector.broadcast %91 : vector<2x8x1xf32> to vector<2x8x8xf32>
    %93 = arith.divf %89, %92 : vector<2x8x8xf32>
    %94 = vector.extract_strided_slice %67 {offsets = [0, 0, 0], sizes = [2, 8, 8], strides = [1, 1, 1]} : vector<2x8x32xf32> to vector<2x8x8xf32>
    "tpu.trace_start"() <{level = 10 : i32, message = "bqk,bkd->bqd"}> : () -> ()
    %cst_43 = arith.constant dense<0.000000e+00> : vector<2x8x8xf32>
    %95 = tpu.matmul %93, %94, %cst_43 {dimension_numbers = #tpu.dot_dimension_numbers<[2], [1], [1], [2], [0, 0, 0, 1, 1, 2], [0], [0]>} : vector<2x8x8xf32>, vector<2x8x8xf32>, vector<2x8x8xf32> -> vector<2x8x8xf32>
    "tpu.trace_stop"() : () -> ()
    %96 = vector.extract_strided_slice %63 {offsets = [0, 0, 8], sizes = [2, 8, 8], strides = [1, 1, 1]} : vector<2x8x32xf32> to vector<2x8x8xf32>
    %97 = vector.extract_strided_slice %65 {offsets = [0, 0, 8], sizes = [2, 8, 8], strides = [1, 1, 1]} : vector<2x8x32xf32> to vector<2x8x8xf32>
    "tpu.trace_start"() <{level = 10 : i32, message = "bqd,bkd->bqk"}> : () -> ()
    %cst_44 = arith.constant dense<0.000000e+00> : vector<2x8x8xf32>
    %98 = tpu.matmul %96, %97, %cst_44 {dimension_numbers = #tpu.dot_dimension_numbers<[2], [2], [1], [1], [0, 0, 0, 1, 1, 1], [0], [0]>} : vector<2x8x8xf32>, vector<2x8x8xf32>, vector<2x8x8xf32> -> vector<2x8x8xf32>
    "tpu.trace_stop"() : () -> ()
    %cst_45 = arith.constant 0.353553385 : f32
    %99 = vector.broadcast %cst_45 : f32 to vector<2x8x8xf32>
    %100 = arith.mulf %98, %99 : vector<2x8x8xf32>
    %101 = arith.addf %100, %78 : vector<2x8x8xf32>
    %cst_46 = arith.constant dense<0xFF800000> : vector<2x8xf32>
    %102 = vector.multi_reduction <maximumf>, %101, %cst_46 [2] : vector<2x8x8xf32> to vector<2x8xf32>
    %103 = vector.shape_cast %102 : vector<2x8xf32> to vector<2x8x1xf32>
    %104 = vector.broadcast %103 : vector<2x8x1xf32> to vector<2x8x8xf32>
    %105 = arith.subf %101, %104 : vector<2x8x8xf32>
    %106 = math.exp %105 : vector<2x8x8xf32>
    %cst_47 = arith.constant dense<0.000000e+00> : vector<2x8xf32>
    %107 = vector.multi_reduction <add>, %106, %cst_47 [2] : vector<2x8x8xf32> to vector<2x8xf32>
    %108 = vector.shape_cast %107 : vector<2x8xf32> to vector<2x8x1xf32>
    %109 = vector.broadcast %108 : vector<2x8x1xf32> to vector<2x8x8xf32>
    %110 = arith.divf %106, %109 : vector<2x8x8xf32>
    %111 = vector.extract_strided_slice %67 {offsets = [0, 0, 8], sizes = [2, 8, 8], strides = [1, 1, 1]} : vector<2x8x32xf32> to vector<2x8x8xf32>
    "tpu.trace_start"() <{level = 10 : i32, message = "bqk,bkd->bqd"}> : () -> ()
    %cst_48 = arith.constant dense<0.000000e+00> : vector<2x8x8xf32>
    %112 = tpu.matmul %110, %111, %cst_48 {dimension_numbers = #tpu.dot_dimension_numbers<[2], [1], [1], [2], [0, 0, 0, 1, 1, 2], [0], [0]>} : vector<2x8x8xf32>, vector<2x8x8xf32>, vector<2x8x8xf32> -> vector<2x8x8xf32>
    "tpu.trace_stop"() : () -> ()
    %113 = vector.extract_strided_slice %63 {offsets = [0, 0, 16], sizes = [2, 8, 8], strides = [1, 1, 1]} : vector<2x8x32xf32> to vector<2x8x8xf32>
    %114 = vector.extract_strided_slice %65 {offsets = [0, 0, 16], sizes = [2, 8, 8], strides = [1, 1, 1]} : vector<2x8x32xf32> to vector<2x8x8xf32>
    "tpu.trace_start"() <{level = 10 : i32, message = "bqd,bkd->bqk"}> : () -> ()
    %cst_49 = arith.constant dense<0.000000e+00> : vector<2x8x8xf32>
    %115 = tpu.matmul %113, %114, %cst_49 {dimension_numbers = #tpu.dot_dimension_numbers<[2], [2], [1], [1], [0, 0, 0, 1, 1, 1], [0], [0]>} : vector<2x8x8xf32>, vector<2x8x8xf32>, vector<2x8x8xf32> -> vector<2x8x8xf32>
    "tpu.trace_stop"() : () -> ()
    %cst_50 = arith.constant 0.353553385 : f32
    %116 = vector.broadcast %cst_50 : f32 to vector<2x8x8xf32>
    %117 = arith.mulf %115, %116 : vector<2x8x8xf32>
    %118 = arith.addf %117, %78 : vector<2x8x8xf32>
    %cst_51 = arith.constant dense<0xFF800000> : vector<2x8xf32>
    %119 = vector.multi_reduction <maximumf>, %118, %cst_51 [2] : vector<2x8x8xf32> to vector<2x8xf32>
    %120 = vector.shape_cast %119 : vector<2x8xf32> to vector<2x8x1xf32>
    %121 = vector.broadcast %120 : vector<2x8x1xf32> to vector<2x8x8xf32>
    %122 = arith.subf %118, %121 : vector<2x8x8xf32>
    %123 = math.exp %122 : vector<2x8x8xf32>
    %cst_52 = arith.constant dense<0.000000e+00> : vector<2x8xf32>
    %124 = vector.multi_reduction <add>, %123, %cst_52 [2] : vector<2x8x8xf32> to vector<2x8xf32>
    %125 = vector.shape_cast %124 : vector<2x8xf32> to vector<2x8x1xf32>
    %126 = vector.broadcast %125 : vector<2x8x1xf32> to vector<2x8x8xf32>
    %127 = arith.divf %123, %126 : vector<2x8x8xf32>
    %128 = vector.extract_strided_slice %67 {offsets = [0, 0, 16], sizes = [2, 8, 8], strides = [1, 1, 1]} : vector<2x8x32xf32> to vector<2x8x8xf32>
    "tpu.trace_start"() <{level = 10 : i32, message = "bqk,bkd->bqd"}> : () -> ()
    %cst_53 = arith.constant dense<0.000000e+00> : vector<2x8x8xf32>
    %129 = tpu.matmul %127, %128, %cst_53 {dimension_numbers = #tpu.dot_dimension_numbers<[2], [1], [1], [2], [0, 0, 0, 1, 1, 2], [0], [0]>} : vector<2x8x8xf32>, vector<2x8x8xf32>, vector<2x8x8xf32> -> vector<2x8x8xf32>
    "tpu.trace_stop"() : () -> ()
    %130 = vector.extract_strided_slice %63 {offsets = [0, 0, 24], sizes = [2, 8, 8], strides = [1, 1, 1]} : vector<2x8x32xf32> to vector<2x8x8xf32>
    %131 = vector.extract_strided_slice %65 {offsets = [0, 0, 24], sizes = [2, 8, 8], strides = [1, 1, 1]} : vector<2x8x32xf32> to vector<2x8x8xf32>
    "tpu.trace_start"() <{level = 10 : i32, message = "bqd,bkd->bqk"}> : () -> ()
    %cst_54 = arith.constant dense<0.000000e+00> : vector<2x8x8xf32>
    %132 = tpu.matmul %130, %131, %cst_54 {dimension_numbers = #tpu.dot_dimension_numbers<[2], [2], [1], [1], [0, 0, 0, 1, 1, 1], [0], [0]>} : vector<2x8x8xf32>, vector<2x8x8xf32>, vector<2x8x8xf32> -> vector<2x8x8xf32>
    "tpu.trace_stop"() : () -> ()
    %cst_55 = arith.constant 0.353553385 : f32
    %133 = vector.broadcast %cst_55 : f32 to vector<2x8x8xf32>
    %134 = arith.mulf %132, %133 : vector<2x8x8xf32>
    %135 = arith.addf %134, %78 : vector<2x8x8xf32>
    %cst_56 = arith.constant dense<0xFF800000> : vector<2x8xf32>
    %136 = vector.multi_reduction <maximumf>, %135, %cst_56 [2] : vector<2x8x8xf32> to vector<2x8xf32>
    %137 = vector.shape_cast %136 : vector<2x8xf32> to vector<2x8x1xf32>
    %138 = vector.broadcast %137 : vector<2x8x1xf32> to vector<2x8x8xf32>
    %139 = arith.subf %135, %138 : vector<2x8x8xf32>
    %140 = math.exp %139 : vector<2x8x8xf32>
    %cst_57 = arith.constant dense<0.000000e+00> : vector<2x8xf32>
    %141 = vector.multi_reduction <add>, %140, %cst_57 [2] : vector<2x8x8xf32> to vector<2x8xf32>
    %142 = vector.shape_cast %141 : vector<2x8xf32> to vector<2x8x1xf32>
    %143 = vector.broadcast %142 : vector<2x8x1xf32> to vector<2x8x8xf32>
    %144 = arith.divf %140, %143 : vector<2x8x8xf32>
    %145 = vector.extract_strided_slice %67 {offsets = [0, 0, 24], sizes = [2, 8, 8], strides = [1, 1, 1]} : vector<2x8x32xf32> to vector<2x8x8xf32>
    "tpu.trace_start"() <{level = 10 : i32, message = "bqk,bkd->bqd"}> : () -> ()
    %cst_58 = arith.constant dense<0.000000e+00> : vector<2x8x8xf32>
    %146 = tpu.matmul %144, %145, %cst_58 {dimension_numbers = #tpu.dot_dimension_numbers<[2], [1], [1], [2], [0, 0, 0, 1, 1, 2], [0], [0]>} : vector<2x8x8xf32>, vector<2x8x8xf32>, vector<2x8x8xf32> -> vector<2x8x8xf32>
    "tpu.trace_stop"() : () -> ()
    %147 = tpu.concatenate %95, %112, %129, %146 in 2 : vector<2x8x8xf32>, vector<2x8x8xf32>, vector<2x8x8xf32>, vector<2x8x8xf32> -> vector<2x8x32xf32>
    %148 = vector.shape_cast %147 : vector<2x8x32xf32> to vector<16x32xf32>
    %cst_59 = arith.constant dense<0.000000e+00> : vector<16x32xf32>
    %149 = tpu.matmul %148, %51, %cst_59 {dimension_numbers = #tpu.dot_dimension_numbers<[1], [0], [0], [1], [0, 0, 1, 1], [], []>} : vector<16x32xf32>, vector<32x32xf32>, vector<16x32xf32> -> vector<16x32xf32>
    %150 = vector.broadcast %53 : vector<1x32xf32> to vector<16x32xf32>
    %151 = arith.addf %149, %150 : vector<16x32xf32>
    %152 = arith.addf %151, %58 : vector<16x32xf32>
    %cst_60 = arith.constant dense<0.000000e+00> : vector<16xf32>
    %153 = vector.multi_reduction <add>, %152, %cst_60 [1] : vector<16x32xf32> to vector<16xf32>
    %154 = vector.shape_cast %153 : vector<16xf32> to vector<16x1xf32>
    %cst_61 = arith.constant 3.200000e+01 : f32
    %155 = vector.broadcast %cst_61 : f32 to vector<16x1xf32>
    %156 = arith.divf %154, %155 : vector<16x1xf32>
    %157 = vector.broadcast %156 : vector<16x1xf32> to vector<16x32xf32>
    %158 = arith.subf %152, %157 : vector<16x32xf32>
    %159 = arith.mulf %158, %158 : vector<16x32xf32>
    %cst_62 = arith.constant dense<0.000000e+00> : vector<16xf32>
    %160 = vector.multi_reduction <add>, %159, %cst_62 [1] : vector<16x32xf32> to vector<16xf32>
    %161 = vector.shape_cast %160 : vector<16xf32> to vector<16x1xf32>
    %cst_63 = arith.constant 3.200000e+01 : f32
    %162 = vector.broadcast %cst_63 : f32 to vector<16x1xf32>
    %163 = arith.divf %161, %162 : vector<16x1xf32>
    %164 = vector.broadcast %156 : vector<16x1xf32> to vector<16x32xf32>
    %165 = arith.subf %152, %164 : vector<16x32xf32>
    %cst_64 = arith.constant 9.99999996E-13 : f32
    %166 = vector.broadcast %cst_64 : f32 to vector<16x1xf32>
    %167 = arith.addf %163, %166 : vector<16x1xf32>
    %168 = math.rsqrt %167 : vector<16x1xf32>
    %169 = vector.broadcast %168 : vector<16x1xf32> to vector<16x32xf32>
    %170 = arith.mulf %165, %169 : vector<16x32xf32>
    %171 = vector.broadcast %55 : vector<1x32xf32> to vector<16x32xf32>
    %172 = arith.mulf %170, %171 : vector<16x32xf32>
    %173 = vector.broadcast %57 : vector<1x32xf32> to vector<16x32xf32>
    %174 = arith.addf %172, %173 : vector<16x32xf32>
    %175 = vector.shape_cast %174 : vector<16x32xf32> to vector<2x8x32xf32>
    %c0_65 = arith.constant 0 : index
    %c0_66 = arith.constant 0 : index
    %c0_67 = arith.constant 0 : index
    %176 = vector.load %arg2[%c0_65, %c0_66, %c0_67] : memref<2x16x32xf32, #tpu.memory_space<vmem>>, vector<2x16x32xf32>
    %c1 = arith.constant 1 : index
    %c0_68 = arith.constant 0 : index
    %c0_69 = arith.constant 0 : index
    %177 = vector.load %arg7[%c1, %c0_68, %c0_69] : memref<2x32x96xf32, #tpu.memory_space<vmem>>, vector<1x32x96xf32>
    %178 = vector.shape_cast %177 : vector<1x32x96xf32> to vector<32x96xf32>
    %c1_70 = arith.constant 1 : index
    %c0_71 = arith.constant 0 : index
    %c0_72 = arith.constant 0 : index
    %179 = vector.load %arg8[%c1_70, %c0_71, %c0_72] : memref<2x1x96xf32, #tpu.memory_space<vmem>>, vector<1x1x96xf32>
    %180 = vector.shape_cast %179 : vector<1x1x96xf32> to vector<1x96xf32>
    %c1_73 = arith.constant 1 : index
    %c0_74 = arith.constant 0 : index
    %c0_75 = arith.constant 0 : index
    %181 = vector.load %arg9[%c1_73, %c0_74, %c0_75] : memref<2x32x32xf32, #tpu.memory_space<vmem>>, vector<1x32x32xf32>
    %182 = vector.shape_cast %181 : vector<1x32x32xf32> to vector<32x32xf32>
    %c1_76 = arith.constant 1 : index
    %c0_77 = arith.constant 0 : index
    %c0_78 = arith.constant 0 : index
    %183 = vector.load %arg10[%c1_76, %c0_77, %c0_78] : memref<2x1x32xf32, #tpu.memory_space<vmem>>, vector<1x1x32xf32>
    %184 = vector.shape_cast %183 : vector<1x1x32xf32> to vector<1x32xf32>
    %c1_79 = arith.constant 1 : index
    %c0_80 = arith.constant 0 : index
    %c0_81 = arith.constant 0 : index
    %185 = vector.load %arg11[%c1_79, %c0_80, %c0_81] : memref<2x1x32xf32, #tpu.memory_space<vmem>>, vector<1x1x32xf32>
    %186 = vector.shape_cast %185 : vector<1x1x32xf32> to vector<1x32xf32>
    %c1_82 = arith.constant 1 : index
    %c0_83 = arith.constant 0 : index
    %c0_84 = arith.constant 0 : index
    %187 = vector.load %arg12[%c1_82, %c0_83, %c0_84] : memref<2x1x32xf32, #tpu.memory_space<vmem>>, vector<1x1x32xf32>
    %188 = vector.shape_cast %187 : vector<1x1x32xf32> to vector<1x32xf32>
    %189 = vector.shape_cast %175 : vector<2x8x32xf32> to vector<16x32xf32>
    %190 = vector.shape_cast %176 : vector<2x16x32xf32> to vector<32x32xf32>
    %191 = vector.extract_strided_slice %178 {offsets = [0, 0], sizes = [32, 32], strides = [1, 1]} : vector<32x96xf32> to vector<32x32xf32>
    %cst_85 = arith.constant dense<0.000000e+00> : vector<16x32xf32>
    %192 = tpu.matmul %189, %191, %cst_85 {dimension_numbers = #tpu.dot_dimension_numbers<[1], [0], [0], [1], [0, 0, 1, 1], [], []>} : vector<16x32xf32>, vector<32x32xf32>, vector<16x32xf32> -> vector<16x32xf32>
    %193 = vector.extract_strided_slice %180 {offsets = [0, 0], sizes = [1, 32], strides = [1, 1]} : vector<1x96xf32> to vector<1x32xf32>
    %194 = vector.broadcast %193 : vector<1x32xf32> to vector<16x32xf32>
    %195 = arith.addf %192, %194 : vector<16x32xf32>
    %196 = vector.extract_strided_slice %178 {offsets = [0, 32], sizes = [32, 64], strides = [1, 1]} : vector<32x96xf32> to vector<32x64xf32>
    %cst_86 = arith.constant dense<0.000000e+00> : vector<32x64xf32>
    %197 = tpu.matmul %190, %196, %cst_86 {dimension_numbers = #tpu.dot_dimension_numbers<[1], [0], [0], [1], [0, 0, 1, 1], [], []>} : vector<32x32xf32>, vector<32x64xf32>, vector<32x64xf32> -> vector<32x64xf32>
    %198 = vector.extract_strided_slice %180 {offsets = [0, 32], sizes = [1, 64], strides = [1, 1]} : vector<1x96xf32> to vector<1x64xf32>
    %199 = vector.broadcast %198 : vector<1x64xf32> to vector<32x64xf32>
    %200 = arith.addf %197, %199 : vector<32x64xf32>
    %201 = vector.shape_cast %195 : vector<16x32xf32> to vector<2x8x32xf32>
    %202 = vector.extract_strided_slice %200 {offsets = [0, 0], sizes = [32, 32], strides = [1, 1]} : vector<32x64xf32> to vector<32x32xf32>
    %203 = vector.shape_cast %202 : vector<32x32xf32> to vector<2x16x32xf32>
    %204 = vector.extract_strided_slice %200 {offsets = [0, 32], sizes = [32, 32], strides = [1, 1]} : vector<32x64xf32> to vector<32x32xf32>
    %205 = vector.shape_cast %204 : vector<32x32xf32> to vector<2x16x32xf32>
    %206 = vector.extract_strided_slice %201 {offsets = [0, 0, 0], sizes = [2, 8, 8], strides = [1, 1, 1]} : vector<2x8x32xf32> to vector<2x8x8xf32>
    %207 = vector.extract_strided_slice %203 {offsets = [0, 0, 0], sizes = [2, 16, 8], strides = [1, 1, 1]} : vector<2x16x32xf32> to vector<2x16x8xf32>
    "tpu.trace_start"() <{level = 10 : i32, message = "bqd,bkd->bqk"}> : () -> ()
    %cst_87 = arith.constant dense<0.000000e+00> : vector<2x8x16xf32>
    %208 = tpu.matmul %206, %207, %cst_87 {dimension_numbers = #tpu.dot_dimension_numbers<[2], [2], [1], [1], [0, 0, 0, 1, 1, 1], [0], [0]>} : vector<2x8x8xf32>, vector<2x16x8xf32>, vector<2x8x16xf32> -> vector<2x8x16xf32>
    "tpu.trace_stop"() : () -> ()
    %cst_88 = arith.constant 0.353553385 : f32
    %209 = vector.broadcast %cst_88 : f32 to vector<2x8x16xf32>
    %210 = arith.mulf %208, %209 : vector<2x8x16xf32>
    %cst_89 = arith.constant dense<0xFF800000> : vector<2x8xf32>
    %211 = vector.multi_reduction <maximumf>, %210, %cst_89 [2] : vector<2x8x16xf32> to vector<2x8xf32>
    %212 = vector.shape_cast %211 : vector<2x8xf32> to vector<2x8x1xf32>
    %213 = vector.broadcast %212 : vector<2x8x1xf32> to vector<2x8x16xf32>
    %214 = arith.subf %210, %213 : vector<2x8x16xf32>
    %215 = math.exp %214 : vector<2x8x16xf32>
    %cst_90 = arith.constant dense<0.000000e+00> : vector<2x8xf32>
    %216 = vector.multi_reduction <add>, %215, %cst_90 [2] : vector<2x8x16xf32> to vector<2x8xf32>
    %217 = vector.shape_cast %216 : vector<2x8xf32> to vector<2x8x1xf32>
    %218 = vector.broadcast %217 : vector<2x8x1xf32> to vector<2x8x16xf32>
    %219 = arith.divf %215, %218 : vector<2x8x16xf32>
    %220 = vector.extract_strided_slice %205 {offsets = [0, 0, 0], sizes = [2, 16, 8], strides = [1, 1, 1]} : vector<2x16x32xf32> to vector<2x16x8xf32>
    "tpu.trace_start"() <{level = 10 : i32, message = "bqk,bkd->bqd"}> : () -> ()
    %cst_91 = arith.constant dense<0.000000e+00> : vector<2x8x8xf32>
    %221 = tpu.matmul %219, %220, %cst_91 {dimension_numbers = #tpu.dot_dimension_numbers<[2], [1], [1], [2], [0, 0, 0, 1, 1, 2], [0], [0]>} : vector<2x8x16xf32>, vector<2x16x8xf32>, vector<2x8x8xf32> -> vector<2x8x8xf32>
    "tpu.trace_stop"() : () -> ()
    %222 = vector.extract_strided_slice %201 {offsets = [0, 0, 8], sizes = [2, 8, 8], strides = [1, 1, 1]} : vector<2x8x32xf32> to vector<2x8x8xf32>
    %223 = vector.extract_strided_slice %203 {offsets = [0, 0, 8], sizes = [2, 16, 8], strides = [1, 1, 1]} : vector<2x16x32xf32> to vector<2x16x8xf32>
    "tpu.trace_start"() <{level = 10 : i32, message = "bqd,bkd->bqk"}> : () -> ()
    %cst_92 = arith.constant dense<0.000000e+00> : vector<2x8x16xf32>
    %224 = tpu.matmul %222, %223, %cst_92 {dimension_numbers = #tpu.dot_dimension_numbers<[2], [2], [1], [1], [0, 0, 0, 1, 1, 1], [0], [0]>} : vector<2x8x8xf32>, vector<2x16x8xf32>, vector<2x8x16xf32> -> vector<2x8x16xf32>
    "tpu.trace_stop"() : () -> ()
    %cst_93 = arith.constant 0.353553385 : f32
    %225 = vector.broadcast %cst_93 : f32 to vector<2x8x16xf32>
    %226 = arith.mulf %224, %225 : vector<2x8x16xf32>
    %cst_94 = arith.constant dense<0xFF800000> : vector<2x8xf32>
    %227 = vector.multi_reduction <maximumf>, %226, %cst_94 [2] : vector<2x8x16xf32> to vector<2x8xf32>
    %228 = vector.shape_cast %227 : vector<2x8xf32> to vector<2x8x1xf32>
    %229 = vector.broadcast %228 : vector<2x8x1xf32> to vector<2x8x16xf32>
    %230 = arith.subf %226, %229 : vector<2x8x16xf32>
    %231 = math.exp %230 : vector<2x8x16xf32>
    %cst_95 = arith.constant dense<0.000000e+00> : vector<2x8xf32>
    %232 = vector.multi_reduction <add>, %231, %cst_95 [2] : vector<2x8x16xf32> to vector<2x8xf32>
    %233 = vector.shape_cast %232 : vector<2x8xf32> to vector<2x8x1xf32>
    %234 = vector.broadcast %233 : vector<2x8x1xf32> to vector<2x8x16xf32>
    %235 = arith.divf %231, %234 : vector<2x8x16xf32>
    %236 = vector.extract_strided_slice %205 {offsets = [0, 0, 8], sizes = [2, 16, 8], strides = [1, 1, 1]} : vector<2x16x32xf32> to vector<2x16x8xf32>
    "tpu.trace_start"() <{level = 10 : i32, message = "bqk,bkd->bqd"}> : () -> ()
    %cst_96 = arith.constant dense<0.000000e+00> : vector<2x8x8xf32>
    %237 = tpu.matmul %235, %236, %cst_96 {dimension_numbers = #tpu.dot_dimension_numbers<[2], [1], [1], [2], [0, 0, 0, 1, 1, 2], [0], [0]>} : vector<2x8x16xf32>, vector<2x16x8xf32>, vector<2x8x8xf32> -> vector<2x8x8xf32>
    "tpu.trace_stop"() : () -> ()
    %238 = vector.extract_strided_slice %201 {offsets = [0, 0, 16], sizes = [2, 8, 8], strides = [1, 1, 1]} : vector<2x8x32xf32> to vector<2x8x8xf32>
    %239 = vector.extract_strided_slice %203 {offsets = [0, 0, 16], sizes = [2, 16, 8], strides = [1, 1, 1]} : vector<2x16x32xf32> to vector<2x16x8xf32>
    "tpu.trace_start"() <{level = 10 : i32, message = "bqd,bkd->bqk"}> : () -> ()
    %cst_97 = arith.constant dense<0.000000e+00> : vector<2x8x16xf32>
    %240 = tpu.matmul %238, %239, %cst_97 {dimension_numbers = #tpu.dot_dimension_numbers<[2], [2], [1], [1], [0, 0, 0, 1, 1, 1], [0], [0]>} : vector<2x8x8xf32>, vector<2x16x8xf32>, vector<2x8x16xf32> -> vector<2x8x16xf32>
    "tpu.trace_stop"() : () -> ()
    %cst_98 = arith.constant 0.353553385 : f32
    %241 = vector.broadcast %cst_98 : f32 to vector<2x8x16xf32>
    %242 = arith.mulf %240, %241 : vector<2x8x16xf32>
    %cst_99 = arith.constant dense<0xFF800000> : vector<2x8xf32>
    %243 = vector.multi_reduction <maximumf>, %242, %cst_99 [2] : vector<2x8x16xf32> to vector<2x8xf32>
    %244 = vector.shape_cast %243 : vector<2x8xf32> to vector<2x8x1xf32>
    %245 = vector.broadcast %244 : vector<2x8x1xf32> to vector<2x8x16xf32>
    %246 = arith.subf %242, %245 : vector<2x8x16xf32>
    %247 = math.exp %246 : vector<2x8x16xf32>
    %cst_100 = arith.constant dense<0.000000e+00> : vector<2x8xf32>
    %248 = vector.multi_reduction <add>, %247, %cst_100 [2] : vector<2x8x16xf32> to vector<2x8xf32>
    %249 = vector.shape_cast %248 : vector<2x8xf32> to vector<2x8x1xf32>
    %250 = vector.broadcast %249 : vector<2x8x1xf32> to vector<2x8x16xf32>
    %251 = arith.divf %247, %250 : vector<2x8x16xf32>
    %252 = vector.extract_strided_slice %205 {offsets = [0, 0, 16], sizes = [2, 16, 8], strides = [1, 1, 1]} : vector<2x16x32xf32> to vector<2x16x8xf32>
    "tpu.trace_start"() <{level = 10 : i32, message = "bqk,bkd->bqd"}> : () -> ()
    %cst_101 = arith.constant dense<0.000000e+00> : vector<2x8x8xf32>
    %253 = tpu.matmul %251, %252, %cst_101 {dimension_numbers = #tpu.dot_dimension_numbers<[2], [1], [1], [2], [0, 0, 0, 1, 1, 2], [0], [0]>} : vector<2x8x16xf32>, vector<2x16x8xf32>, vector<2x8x8xf32> -> vector<2x8x8xf32>
    "tpu.trace_stop"() : () -> ()
    %254 = vector.extract_strided_slice %201 {offsets = [0, 0, 24], sizes = [2, 8, 8], strides = [1, 1, 1]} : vector<2x8x32xf32> to vector<2x8x8xf32>
    %255 = vector.extract_strided_slice %203 {offsets = [0, 0, 24], sizes = [2, 16, 8], strides = [1, 1, 1]} : vector<2x16x32xf32> to vector<2x16x8xf32>
    "tpu.trace_start"() <{level = 10 : i32, message = "bqd,bkd->bqk"}> : () -> ()
    %cst_102 = arith.constant dense<0.000000e+00> : vector<2x8x16xf32>
    %256 = tpu.matmul %254, %255, %cst_102 {dimension_numbers = #tpu.dot_dimension_numbers<[2], [2], [1], [1], [0, 0, 0, 1, 1, 1], [0], [0]>} : vector<2x8x8xf32>, vector<2x16x8xf32>, vector<2x8x16xf32> -> vector<2x8x16xf32>
    "tpu.trace_stop"() : () -> ()
    %cst_103 = arith.constant 0.353553385 : f32
    %257 = vector.broadcast %cst_103 : f32 to vector<2x8x16xf32>
    %258 = arith.mulf %256, %257 : vector<2x8x16xf32>
    %cst_104 = arith.constant dense<0xFF800000> : vector<2x8xf32>
    %259 = vector.multi_reduction <maximumf>, %258, %cst_104 [2] : vector<2x8x16xf32> to vector<2x8xf32>
    %260 = vector.shape_cast %259 : vector<2x8xf32> to vector<2x8x1xf32>
    %261 = vector.broadcast %260 : vector<2x8x1xf32> to vector<2x8x16xf32>
    %262 = arith.subf %258, %261 : vector<2x8x16xf32>
    %263 = math.exp %262 : vector<2x8x16xf32>
    %cst_105 = arith.constant dense<0.000000e+00> : vector<2x8xf32>
    %264 = vector.multi_reduction <add>, %263, %cst_105 [2] : vector<2x8x16xf32> to vector<2x8xf32>
    %265 = vector.shape_cast %264 : vector<2x8xf32> to vector<2x8x1xf32>
    %266 = vector.broadcast %265 : vector<2x8x1xf32> to vector<2x8x16xf32>
    %267 = arith.divf %263, %266 : vector<2x8x16xf32>
    %268 = vector.extract_strided_slice %205 {offsets = [0, 0, 24], sizes = [2, 16, 8], strides = [1, 1, 1]} : vector<2x16x32xf32> to vector<2x16x8xf32>
    "tpu.trace_start"() <{level = 10 : i32, message = "bqk,bkd->bqd"}> : () -> ()
    %cst_106 = arith.constant dense<0.000000e+00> : vector<2x8x8xf32>
    %269 = tpu.matmul %267, %268, %cst_106 {dimension_numbers = #tpu.dot_dimension_numbers<[2], [1], [1], [2], [0, 0, 0, 1, 1, 2], [0], [0]>} : vector<2x8x16xf32>, vector<2x16x8xf32>, vector<2x8x8xf32> -> vector<2x8x8xf32>
    "tpu.trace_stop"() : () -> ()
    %270 = tpu.concatenate %221, %237, %253, %269 in 2 : vector<2x8x8xf32>, vector<2x8x8xf32>, vector<2x8x8xf32>, vector<2x8x8xf32> -> vector<2x8x32xf32>
    %271 = vector.shape_cast %270 : vector<2x8x32xf32> to vector<16x32xf32>
    %cst_107 = arith.constant dense<0.000000e+00> : vector<16x32xf32>
    %272 = tpu.matmul %271, %182, %cst_107 {dimension_numbers = #tpu.dot_dimension_numbers<[1], [0], [0], [1], [0, 0, 1, 1], [], []>} : vector<16x32xf32>, vector<32x32xf32>, vector<16x32xf32> -> vector<16x32xf32>
    %273 = vector.broadcast %184 : vector<1x32xf32> to vector<16x32xf32>
    %274 = arith.addf %272, %273 : vector<16x32xf32>
    %275 = arith.addf %274, %189 : vector<16x32xf32>
    %cst_108 = arith.constant dense<0.000000e+00> : vector<16xf32>
    %276 = vector.multi_reduction <add>, %275, %cst_108 [1] : vector<16x32xf32> to vector<16xf32>
    %277 = vector.shape_cast %276 : vector<16xf32> to vector<16x1xf32>
    %cst_109 = arith.constant 3.200000e+01 : f32
    %278 = vector.broadcast %cst_109 : f32 to vector<16x1xf32>
    %279 = arith.divf %277, %278 : vector<16x1xf32>
    %280 = vector.broadcast %279 : vector<16x1xf32> to vector<16x32xf32>
    %281 = arith.subf %275, %280 : vector<16x32xf32>
    %282 = arith.mulf %281, %281 : vector<16x32xf32>
    %cst_110 = arith.constant dense<0.000000e+00> : vector<16xf32>
    %283 = vector.multi_reduction <add>, %282, %cst_110 [1] : vector<16x32xf32> to vector<16xf32>
    %284 = vector.shape_cast %283 : vector<16xf32> to vector<16x1xf32>
    %cst_111 = arith.constant 3.200000e+01 : f32
    %285 = vector.broadcast %cst_111 : f32 to vector<16x1xf32>
    %286 = arith.divf %284, %285 : vector<16x1xf32>
    %287 = vector.broadcast %279 : vector<16x1xf32> to vector<16x32xf32>
    %288 = arith.subf %275, %287 : vector<16x32xf32>
    %cst_112 = arith.constant 9.99999996E-13 : f32
    %289 = vector.broadcast %cst_112 : f32 to vector<16x1xf32>
    %290 = arith.addf %286, %289 : vector<16x1xf32>
    %291 = math.rsqrt %290 : vector<16x1xf32>
    %292 = vector.broadcast %291 : vector<16x1xf32> to vector<16x32xf32>
    %293 = arith.mulf %288, %292 : vector<16x32xf32>
    %294 = vector.broadcast %186 : vector<1x32xf32> to vector<16x32xf32>
    %295 = arith.mulf %293, %294 : vector<16x32xf32>
    %296 = vector.broadcast %188 : vector<1x32xf32> to vector<16x32xf32>
    %297 = arith.addf %295, %296 : vector<16x32xf32>
    %298 = vector.shape_cast %297 : vector<16x32xf32> to vector<2x8x32xf32>
    %c0_113 = arith.constant 0 : index
    %c0_114 = arith.constant 0 : index
    %299 = vector.load %arg13[%c0_113, %c0_114] : memref<32x64xf32, #tpu.memory_space<vmem>>, vector<32x64xf32>
    %c0_115 = arith.constant 0 : index
    %c0_116 = arith.constant 0 : index
    %300 = vector.load %arg14[%c0_115, %c0_116] : memref<1x64xf32, #tpu.memory_space<vmem>>, vector<1x64xf32>
    %c0_117 = arith.constant 0 : index
    %c0_118 = arith.constant 0 : index
    %301 = vector.load %arg15[%c0_117, %c0_118] : memref<64x32xf32, #tpu.memory_space<vmem>>, vector<64x32xf32>
    %c0_119 = arith.constant 0 : index
    %c0_120 = arith.constant 0 : index
    %302 = vector.load %arg16[%c0_119, %c0_120] : memref<1x32xf32, #tpu.memory_space<vmem>>, vector<1x32xf32>
    %c0_121 = arith.constant 0 : index
    %c0_122 = arith.constant 0 : index
    %303 = vector.load %arg17[%c0_121, %c0_122] : memref<1x32xf32, #tpu.memory_space<vmem>>, vector<1x32xf32>
    %c0_123 = arith.constant 0 : index
    %c0_124 = arith.constant 0 : index
    %304 = vector.load %arg18[%c0_123, %c0_124] : memref<1x32xf32, #tpu.memory_space<vmem>>, vector<1x32xf32>
    %305 = vector.shape_cast %298 : vector<2x8x32xf32> to vector<16x32xf32>
    %cst_125 = arith.constant dense<0.000000e+00> : vector<16x64xf32>
    %306 = tpu.matmul %305, %299, %cst_125 {dimension_numbers = #tpu.dot_dimension_numbers<[1], [0], [0], [1], [0, 0, 1, 1], [], []>} : vector<16x32xf32>, vector<32x64xf32>, vector<16x64xf32> -> vector<16x64xf32>
    %307 = vector.broadcast %300 : vector<1x64xf32> to vector<16x64xf32>
    %308 = arith.addf %306, %307 : vector<16x64xf32>
    %309 = arith.mulf %308, %308 : vector<16x64xf32>
    %310 = arith.mulf %308, %309 : vector<16x64xf32>
    %cst_126 = arith.constant 4.471500e-02 : f32
    %311 = vector.broadcast %cst_126 : f32 to vector<16x64xf32>
    %312 = arith.mulf %311, %310 : vector<16x64xf32>
    %313 = arith.addf %308, %312 : vector<16x64xf32>
    %cst_127 = arith.constant 0.797884583 : f32
    %314 = vector.broadcast %cst_127 : f32 to vector<16x64xf32>
    %315 = arith.mulf %314, %313 : vector<16x64xf32>
    %316 = math.tanh %315 : vector<16x64xf32>
    %cst_128 = arith.constant 1.000000e+00 : f32
    %317 = vector.broadcast %cst_128 : f32 to vector<16x64xf32>
    %318 = arith.addf %317, %316 : vector<16x64xf32>
    %cst_129 = arith.constant 5.000000e-01 : f32
    %319 = vector.broadcast %cst_129 : f32 to vector<16x64xf32>
    %320 = arith.mulf %319, %318 : vector<16x64xf32>
    %321 = arith.mulf %308, %320 : vector<16x64xf32>
    %cst_130 = arith.constant dense<0.000000e+00> : vector<16x32xf32>
    %322 = tpu.matmul %321, %301, %cst_130 {dimension_numbers = #tpu.dot_dimension_numbers<[1], [0], [0], [1], [0, 0, 1, 1], [], []>} : vector<16x64xf32>, vector<64x32xf32>, vector<16x32xf32> -> vector<16x32xf32>
    %323 = vector.broadcast %302 : vector<1x32xf32> to vector<16x32xf32>
    %324 = arith.addf %322, %323 : vector<16x32xf32>
    %325 = arith.addf %324, %305 : vector<16x32xf32>
    %cst_131 = arith.constant dense<0.000000e+00> : vector<16xf32>
    %326 = vector.multi_reduction <add>, %325, %cst_131 [1] : vector<16x32xf32> to vector<16xf32>
    %327 = vector.shape_cast %326 : vector<16xf32> to vector<16x1xf32>
    %cst_132 = arith.constant 3.200000e+01 : f32
    %328 = vector.broadcast %cst_132 : f32 to vector<16x1xf32>
    %329 = arith.divf %327, %328 : vector<16x1xf32>
    %330 = vector.broadcast %329 : vector<16x1xf32> to vector<16x32xf32>
    %331 = arith.subf %325, %330 : vector<16x32xf32>
    %332 = arith.mulf %331, %331 : vector<16x32xf32>
    %cst_133 = arith.constant dense<0.000000e+00> : vector<16xf32>
    %333 = vector.multi_reduction <add>, %332, %cst_133 [1] : vector<16x32xf32> to vector<16xf32>
    %334 = vector.shape_cast %333 : vector<16xf32> to vector<16x1xf32>
    %cst_134 = arith.constant 3.200000e+01 : f32
    %335 = vector.broadcast %cst_134 : f32 to vector<16x1xf32>
    %336 = arith.divf %334, %335 : vector<16x1xf32>
    %337 = vector.broadcast %329 : vector<16x1xf32> to vector<16x32xf32>
    %338 = arith.subf %325, %337 : vector<16x32xf32>
    %cst_135 = arith.constant 9.99999996E-13 : f32
    %339 = vector.broadcast %cst_135 : f32 to vector<16x1xf32>
    %340 = arith.addf %336, %339 : vector<16x1xf32>
    %341 = math.rsqrt %340 : vector<16x1xf32>
    %342 = vector.broadcast %341 : vector<16x1xf32> to vector<16x32xf32>
    %343 = arith.mulf %338, %342 : vector<16x32xf32>
    %344 = vector.broadcast %303 : vector<1x32xf32> to vector<16x32xf32>
    %345 = arith.mulf %343, %344 : vector<16x32xf32>
    %346 = vector.broadcast %304 : vector<1x32xf32> to vector<16x32xf32>
    %347 = arith.addf %345, %346 : vector<16x32xf32>
    %348 = vector.shape_cast %347 : vector<16x32xf32> to vector<2x8x32xf32>
    %349 = vector.shape_cast %348 : vector<2x8x32xf32> to vector<16x32xf32>
    %c0_136 = arith.constant 0 : index
    %c0_137 = arith.constant 0 : index
    %350 = vector.load %arg19[%c0_136, %c0_137] : memref<32x128xf32, #tpu.memory_space<vmem>>, vector<32x128xf32>
    %cst_138 = arith.constant dense<0.000000e+00> : vector<16x128xf32>
    %351 = tpu.matmul %349, %350, %cst_138 {dimension_numbers = #tpu.dot_dimension_numbers<[1], [0], [0], [1], [0, 0, 1, 1], [], []>} : vector<16x32xf32>, vector<32x128xf32>, vector<16x128xf32> -> vector<16x128xf32>
    %c0_139 = arith.constant 0 : index
    %c0_140 = arith.constant 0 : index
    %352 = vector.load %arg20[%c0_139, %c0_140] : memref<1x128xf32, #tpu.memory_space<vmem>>, vector<1x128xf32>
    %353 = vector.broadcast %352 : vector<1x128xf32> to vector<16x128xf32>
    %354 = arith.addf %351, %353 : vector<16x128xf32>
    %355 = vector.shape_cast %354 : vector<16x128xf32> to vector<2x8x128xf32>
    %c0_141 = arith.constant 0 : index
    %c0_142 = arith.constant 0 : index
    %c0_143 = arith.constant 0 : index
    %356 = vector.load %arg21[%c0_141, %c0_142, %c0_143] : memref<2x8x128xf32, #tpu.memory_space<vmem>>, vector<2x8x128xf32>
    tpu.vector_store %arg21[%c0_141, %c0_142, %c0_143], %355 {strides = array<i32>} : memref<2x8x128xf32, #tpu.memory_space<vmem>>, vector<2x8x128xf32>,
    return
  }
}

</mosaic_0001>

<bundles_post_ra>
// kernel: fwd.3
= control target key start
LH: loop header
LB: loop body
LE: loop exit
PB: predicated region body
PF: predicated region fallthrough
CT: control target
= control target key end

     0   :  { %v85_v0 = vlaneseq  ;;  %v2386_v23 = vmov 1.0   ;;  %vm135_vm2 = vcmask 261120   ;;  %v2387_v32 = vmov 32.0   ;;  %s2388_s23 = smov 96   ;;  %s2390_s24 = smov 120   ;;  %s3089_s3 = inlined_call_operand.vmem [shape: f32[128,32], index: 3, kind: input, shape index: {}]   ;;  %s3090_s0 = inlined_call_operand.vmem [shape: s32[2,8], index: 0, kind: input, shape index: {}]   ;;  %s3091_s4 = inlined_call_operand.vmem [shape: f32[8,32], index: 4, kind: input, shape index: {}]   ;;  %s3092_s5 = inlined_call_operand.vmem [shape: f32[1,32], index: 5, kind: input, shape index: {}]   ;;  %s3093_s6 = inlined_call_operand.vmem [shape: f32[1,32], index: 6, kind: input, shape index: {}]   ;;  %s3094_s8 = inlined_call_operand.vmem [shape: f32[2,1,96], index: 8, kind: input, shape index: {}]   ;;  %s3095_s7 = inlined_call_operand.vmem [shape: f32[2,32,96], index: 7, kind: input, shape index: {}]   ;;  %s3096_s1 = inlined_call_operand.vmem [shape: f32[2,8], index: 1, kind: input, shape index: {}]   ;;  %s3097_s9 = inlined_call_operand.vmem [shape: f32[2,32,32], index: 9, kind: input, shape index: {}]   ;;  %s3098_s10 = inlined_call_operand.vmem [shape: f32[2,1,32], index: 10, kind: input, shape index: {}]   ;;  %s3099_s11 = inlined_call_operand.vmem [shape: f32[2,1,32], index: 11, kind: input, shape index: {}]   ;;  %s3100_s12 = inlined_call_operand.vmem [shape: f32[2,1,32], index: 12, kind: input, shape index: {}]   ;;  %s3101_s2 = inlined_call_operand.vmem [shape: f32[2,16,32], index: 2, kind: input, shape index: {}]   ;;  %s3102_s14 = inlined_call_operand.vmem [shape: f32[1,64], index: 14, kind: input, shape index: {}]   ;;  %s3103_s13 = inlined_call_operand.vmem [shape: f32[32,64], index: 13, kind: input, shape index: {}]   ;;  %s3104_s16 = inlined_call_operand.vmem [shape: f32[1,32], index: 16, kind: input, shape index: {}]   ;;  %s3105_s15 = inlined_call_operand.vmem [shape: f32[64,32], index: 15, kind: input, shape index: {}]   ;;  %s3106_s17 = inlined_call_operand.vmem [shape: f32[1,32], index: 17, kind: input, shape index: {}]   ;;  %s3107_s18 = inlined_call_operand.vmem [shape: f32[1,32], index: 18, kind: input, shape index: {}]   ;;  %s3108_s20 = inlined_call_operand.vmem [shape: f32[1,128], index: 20, kind: input, shape index: {}]   ;;  %s3109_s19 = inlined_call_operand.vmem [shape: f32[32,128], index: 19, kind: input, shape index: {}]   ;;  %s3110_s21 = inlined_call_operand.vmem [shape: f32[2,8,128], index: 21, kind: output, shape index: {}]  }
   0x1   :  { %3119 = sst [smem:[#allocation2_spill]] %s3089_s3  ;;  %2300 = vrcp.f32 %v2387_v32  ;;  %v203_v49 = vld [vmem:[%s3095_s7 + $0x18] sm:$0xff]  ;;  %v202_v50 = vld [vmem:[%s3095_s7 + $0x10] sm:$0xff]  ;;  %v201_v51 = vld [vmem:[%s3095_s7 + $0x8] sm:$0xff]  ;;  %s2392_s25 = smov 80   ;;  %vm259_vm10 = vcmask 64512  }
   0x2   :  { %3120 = sst [smem:[#allocation3_spill]] %s3090_s0  ;;  %v2516_v2 = vshrl.u32 %v85_v0, 7  ;;  %v2567_v21 = vand.u32 127, %v85_v0  ;;  %233 = vmatpush.msra.mxu1 %v203_v49  ;;  %v200_v52 = vld [vmem:[%s3095_s7] sm:$0xff]  ;;  %s2389_s0 = smov 88  }
   0x3   :  { %3121 = sst [smem:[#allocation4_spill]] %s3091_s4  ;;  %s2391_s4 = smov 64  }
   0x4   :  { %3122 = sst [smem:[#allocation5_spill]] %s3092_s5  ;;  %2234 = vset.pattern.permute.xlu0 %v2516_v2  ;;  %234 = vmatpush.msra.mxu1 %v202_v50  ;;  %s2393_s27 = smov 112   ;;  %vm248_vm11 = vcmp.ge.s32.totalorder %v2516_v2, %v2567_v21 }
   0x5   :  { %3123 = sst [smem:[#allocation6_spill]] %s3093_s6  ;;  %s2397_s3 = smov 56  }
   0x6   :  { %3124 = sst [smem:[#allocation7_spill]] %s3094_s8  ;;  %235 = vmatpush.msra.mxu1 %v201_v51  ;;  %s2398_s6 = smov 48  }
   0x7   :  { %s3125_s26 = sld [smem:[#allocation2_spill]]  ;;  %v2301_v33 = vpop.eup %2300 }
   0x8   :  { %s3126_s30 = sld [smem:[#allocation3_spill]]  ;;  %v143_v34 = vmul.f32 32.0, %v2301_v33  ;;  %vm147_vm3 = vweird.f32 %v2301_v33  ;;  %236 = vmatpush.msra.mxu1 %v200_v52 }
   0x9   :  { %s3127_s8 = sld [smem:[#allocation4_spill]] }
   0xa   :  { %v144_v35 = vsub.f32 1.0, %v143_v34  ;;  %s3128_s29 = sld [smem:[#allocation5_spill]] }
   0xb   :  { %s3130_s22 = sld [smem:[#allocation7_spill]] }
   0xc   :  { %v145_v36 = vmul.f32 %v2301_v33, %v144_v35  ;;  %v2394_v35 = vmov -1e+09  }
   0xd   :  { %v84_v1 = vld [vmem:[%s3125_s26 + $0x78] sm:$0xff]  ;;  %v83_v3 = vld [vmem:[%s3125_s26 + $0x70] sm:$0xff]  ;;  %v82_v4 = vld [vmem:[%s3125_s26 + $0x68] sm:$0xff] }
   0xe   :  { %107 = vmatpush.msra.mxu0 %v84_v1  ;;  %v68_v5 = vld [vmem:[%s3126_s30] sm:$0x3]  ;;  %v80_v7 = vld [vmem:[%s3125_s26 + $0x58] sm:$0xff]  ;;  %v79_v9 = vld [vmem:[%s3125_s26 + $0x50] sm:$0xff]  ;;  %v146_v37 = vadd.f32 %v2301_v33, %v145_v36  ;;  %s3129_s30 = sld [smem:[#allocation6_spill]]  ;;  %v249_v36 = vsel %vm248_vm11, 0.0, %v2394_v35 }
   0xf   :  { %v81_v6 = vld [vmem:[%s3125_s26 + $0x60] sm:$0xff]  ;;  %v87_v8 = vperm.slane %v68_v5, 0  ;;  %v78_v10 = vld [vmem:[%s3125_s26 + $0x48] sm:$0xff]  ;;  %v76_v12 = vld [vmem:[%s3125_s26 + $0x38] sm:$0xff]  ;;  %v94_v13 = vperm.slane %v68_v5, 1 }
  0x10   :  { %108 = vmatpush.msra.mxu0 %v83_v3  ;;  %v77_v11 = vld [vmem:[%s3125_s26 + $0x40] sm:$0xff]  ;;  %v75_v14 = vld [vmem:[%s3125_s26 + $0x30] sm:$0xff]  ;;  %v74_v15 = vld [vmem:[%s3125_s26 + $0x28] sm:$0xff]  ;;  %v2576_v38 = vsel %vm147_vm3, %v2301_v33, %v146_v37 }
  0x11   :  { %92 = vperm.xlu0 %2234, %v87_v8   ;;  %v73_v16 = vld [vmem:[%s3125_s26 + $0x20] sm:$0xff]  ;;  %v72_v17 = vld [vmem:[%s3125_s26 + $0x18] sm:$0xff]  ;;  %v71_v18 = vld [vmem:[%s3125_s26 + $0x10] sm:$0xff] }
  0x12   :  { %109 = vmatpush.msra.mxu0 %v82_v4  ;;  %v70_v19 = vld [vmem:[%s3125_s26 + $0x8] sm:$0xff]  ;;  %v69_v20 = vld [vmem:[%s3125_s26] sm:$0xff]  ;;  %s3117_s26 = smov 16  }
  0x13   :  { %v130_v25 = vld [vmem:[%s3127_s8] sm:$0xff]  ;;  %s3113_s8 = smov 8  }
  0x14   :  { %110 = vmatpush.msra.mxu0 %v81_v6  ;;  %v2285_v4 = vld [vmem:[%s3128_s29] ss:$0 sm:$0xff]  ;;  %s2396_s29 = smov 104  }
  0x15   :  { %v2286_v8 = vld [vmem:[%s3129_s30] ss:$0 sm:$0xff]  ;;  %s2399_s30 = smov 40  }
  0x16   :  { %111 = vmatpush.msra.mxu0 %v80_v7 }
  0x18   :  { %112 = vmatpush.msra.mxu0 %v79_v9 }
  0x19   :  { %99 = vperm.xlu0 %2234, %v94_v13  }
  0x1a   :  { %113 = vmatpush.msra.mxu0 %v78_v10 }
  0x1c   :  { %114 = vmatpush.msra.mxu0 %v77_v11 }
  0x1e   :  { %115 = vmatpush.msra.mxu0 %v76_v12 }
  0x20   :  { %116 = vmatpush.msra.mxu0 %v75_v14 }
  0x22   :  { %117 = vmatpush.msra.mxu0 %v74_v15 }
  0x24   :  { %118 = vmatpush.msra.mxu0 %v73_v16 }
  0x26   :  { %119 = vmatpush.msra.mxu0 %v72_v17 }
  0x28   :  { %120 = vmatpush.msra.mxu0 %v71_v18  ;;  %v2287_v18 = vld [vmem:[%s3130_s22] ss:$0 sm:$0xff] }
  0x2a   :  { %121 = vmatpush.msra.mxu0 %v70_v19 }
  0x2c   :  { %122 = vmatpush.msra.mxu0 %v69_v20 }
  0x83   :  { %v93_v22 = vpop.permute.xlu0 %92 }
  0x84   :  { %vm101_vm0 = vcmp.eq.s32.totalorder %v93_v22, %v2567_v21 }
  0x85   :  { %2129 = vmatmul.msk.f32.vlgmr.msra.gmra.mxu0 %vm101_vm0, %v2386_v23 }
  0x8b   :  { %v100_v24 = vpop.permute.xlu0 %99 }
  0x8c   :  { %vm102_vm1 = vcmp.eq.s32.totalorder %v100_v24, %v2567_v21 }
  0x8d   :  { %2130 = vmatmul.msk.f32.gmra.mxu0 %vm102_vm1, %v2386_v23 }
 0x102   :  { %v124_v26 = vpop.f32.mrf.mxu0 }
 0x103   :  { %v131_v27 = vadd.f32 %v130_v25, %v124_v26 }
 0x105   :  { %v136_v28 = vsel %vm135_vm2, %v131_v27, 0.0 }
 0x106   :  { %137 = vadd.xlane.f32.xlu1 %v136_v28 }
 0x10a   :  { %v127_v29 = vpop.f32.mrf.mxu0 }
 0x10b   :  { %v132_v30 = vadd.f32 %v130_v25, %v127_v29 }
 0x10d   :  { %v139_v31 = vsel %vm135_vm2, %v132_v30, 0.0 }
 0x10e   :  { %140 = vadd.xlane.f32.xlu1 %v139_v31 }
 0x179   :  { %v138_v39 = vpop.xlane.xlu1 %137 }
 0x17a   :  { %v149_v40 = vmul.f32 %v2576_v38, %v138_v39 }
 0x17c   :  { %v151_v41 = vsub.f32 %v131_v27, %v149_v40 }
 0x17e   :  { %v153_v42 = vmul.f32 %v151_v41, %v151_v41 }
 0x180   :  { %v155_v43 = vsel %vm135_vm2, %v153_v42, 0.0 }
 0x181   :  { %156 = vadd.xlane.f32.xlu2 %v155_v43  ;;  %v141_v44 = vpop.xlane.xlu1 %140 }
 0x182   :  { %v150_v45 = vmul.f32 %v2576_v38, %v141_v44 }
 0x184   :  { %v152_v46 = vsub.f32 %v132_v30, %v150_v45  ;;  %v197_v30 = vld [vmem:[%s3096_s1] sm:$0x3]  ;;  %s3115_s1 = smov 72  }
 0x185   :  { %v198_v31 = vsub.f32 1.0, %v197_v30 }
 0x186   :  { %v154_v47 = vmul.f32 %v152_v46, %v152_v46 }
 0x187   :  { %v199_v32 = vmul.f32 -1e+09, %v198_v31 }
 0x188   :  { %v158_v48 = vsel %vm135_vm2, %v154_v47, 0.0 }
 0x189   :  { %159 = vadd.xlane.f32.xlu2 %v158_v48  ;;  %v245_v33 = vrot.slane %v199_v32, 1  ;;  %v250_v34 = vperm.slane %v199_v32, 0 }
 0x18b   :  { %v251_v37 = vperm.slane %v245_v33, 0  ;;  %v2647_v39 = vadd.f32 %v250_v34, %v249_v36 }
 0x1f4   :  { %v157_v53 = vpop.xlane.xlu2 %156 }
 0x1f5   :  { %v161_v54 = vmul.f32 %v157_v53, %v2576_v38 }
 0x1f7   :  { %v163_v55 = vadd.f32 1e-12, %v161_v54 }
 0x1f9   :  { %2302 = vrsqrt.f32 %v163_v55  ;;  %vm171_vm5 = vweird.f32 %v163_v55 }
 0x1fc   :  { %v160_v56 = vpop.xlane.xlu2 %159 }
 0x1fd   :  { %v162_v57 = vmul.f32 %v160_v56, %v2576_v38 }
 0x1ff   :  { %v2303_v58 = vpop.eup %2302  ;;  %v164_v59 = vadd.f32 1e-12, %v162_v57 }
 0x200   :  { %v166_v60 = vmul.f32 %v2303_v58, %v163_v55  ;;  %vm172_vm4 = vweird.f32 %v2303_v58 }
 0x201   :  { %2304 = vrsqrt.f32 %v164_v59  ;;  %vm173_vm6 = vmor %vm171_vm5, %vm172_vm4  ;;  %vm181_vm8 = vweird.f32 %v164_v59 }
 0x202   :  { %v167_v61 = vmul.f32 %v2303_v58, %v166_v60 }
 0x204   :  { %v168_v62 = vmul.f32 0.5, %v167_v61 }
 0x206   :  { %v169_v63 = vsub.f32 1.5, %v168_v62 }
 0x207   :  { %v2305_v0 = vpop.eup %2304 }
 0x208   :  { %v170_v1 = vmul.f32 %v2303_v58, %v169_v63  ;;  %v176_v3 = vmul.f32 %v2305_v0, %v164_v59  ;;  %vm182_vm7 = vweird.f32 %v2305_v0 }
 0x209   :  { %vm183_vm9 = vmor %vm181_vm8, %vm182_vm7 }
 0x20a   :  { %v174_v5 = vsel %vm173_vm6, %v2303_v58, %v170_v1  ;;  %v177_v6 = vmul.f32 %v2305_v0, %v176_v3 }
 0x20b   :  { %v185_v7 = vmul.f32 %v174_v5, %v151_v41  ;;  %v2649_v41 = vadd.f32 %v251_v37, %v249_v36 }
 0x20c   :  { %v178_v9 = vmul.f32 0.5, %v177_v6 }
 0x20d   :  { %v190_v10 = vmul.f32 %v2285_v4, %v185_v7 }
 0x20e   :  { %v179_v11 = vsub.f32 1.5, %v178_v9 }
 0x20f   :  { %v2602_v12 = vadd.f32 %v2286_v8, %v190_v10 }
 0x210   :  { %v180_v13 = vmul.f32 %v2305_v0, %v179_v11 }
 0x211   :  { %2131 = vmatmul.msk.f32.vlgmr.msra.gmra.mxu1 %vm135_vm2, %v2602_v12 }
 0x212   :  { %v184_v14 = vsel %vm183_vm9, %v2305_v0, %v180_v13 }
 0x213   :  { %v186_v15 = vmul.f32 %v184_v14, %v152_v46 }
 0x215   :  { %v191_v16 = vmul.f32 %v2285_v4, %v186_v15 }
 0x217   :  { %v2606_v17 = vadd.f32 %v2286_v8, %v191_v16 }
 0x219   :  { %2132 = vmatmul.msk.f32.gmra.mxu1 %vm135_vm2, %v2606_v17 }
 0x28e   :  { %v238_v19 = vpop.f32.mrf.mxu1 }
 0x28f   :  { %v2613_v20 = vadd.f32 %v2287_v18, %v238_v19 }
 0x291   :  { %257 = vrot.lane.b32.xlu0 %v2613_v20, %s2388_s23 }
 0x296   :  { %v241_v22 = vpop.f32.mrf.mxu1 }
 0x297   :  { %v2617_v23 = vadd.f32 %v2287_v18, %v241_v22 }
 0x299   :  { %285 = vrot.lane.b32.xlu1 %v2617_v23, %s2388_s23 }
 0x2a1   :  { %417 = vrot.lane.b32.xlu1 %v2613_v20, %s2389_s0 }
 0x2a9   :  { %415 = vrot.lane.b32.xlu1 %v2613_v20, %s2390_s24 }
 0x2b1   :  { %389 = vrot.lane.b32.xlu1 %v2617_v23, %s2391_s4 }
 0x2b9   :  { %445 = vrot.lane.b32.xlu1 %v2617_v23, %s2389_s0 }
 0x2c1   :  { %577 = vrot.lane.b32.xlu1 %v2613_v20, %s2392_s25 }
 0x2c9   :  { %575 = vrot.lane.b32.xlu1 %v2613_v20, %s2393_s27 }
 0x303   :  { %v258_v24 = vpop.permute.xlu0 %257 }
 0x304   :  { %2133 = vmatpush.xpose.msk.msra.mxu2 %vm259_vm10, %v258_v24 }
 0x307   :  { %2134 = vmatmul.msk.f32.vlgmr.msra.gmra.mxu2 %vm259_vm10, %v2613_v20 }
 0x30b   :  { %v286_v25 = vpop.permute.xlu1 %285 }
 0x30c   :  { %2135 = vmatpush.xpose.msk.msrb.mxu1 %vm259_vm10, %v286_v25 }
 0x30f   :  { %2136 = vmatmul.msk.f32.vlgmr.msrb.gmra.mxu1 %vm259_vm10, %v2617_v23 }
 0x313   :  { %v418_v26 = vpop.permute.xlu1 %417 }
 0x31b   :  { %v2639_v27 = vpop.permute.xlu1 %415 }
 0x323   :  { %v390_v28 = vpop.permute.xlu1 %389 }
 0x324   :  { %410 = vmatpush.msra.mxu3 %v390_v28 }
 0x32b   :  { %v446_v29 = vpop.permute.xlu1 %445 }
 0x32c   :  { %2141 = vmatpush.xpose.msk.msrb.mxu3 %vm259_vm10, %v446_v29 }
 0x333   :  { %v578_v24 = vpop.permute.xlu1 %577 }
 0x38a   :  { %v281_v40 = vpop.f32.mrf.mxu2 }
 0x38b   :  { %v311_v42 = vmul.f32 0.35355338, %v281_v40 }
 0x38c   :  { %v308_v43 = vpop.f32.mrf.mxu1 }
 0x38d   :  { %v312_v44 = vmul.f32 0.35355338, %v308_v43  ;;  %v313_v45 = vadd.f32 %v311_v42, %v2647_v39 }
 0x38f   :  { %v315_v46 = vsel %vm259_vm10, %v313_v45, -inf  ;;  %v314_v47 = vadd.f32 %v312_v44, %v2649_v41 }
 0x390   :  { %316 = vmax.xlane.f32.xlu2 %v315_v46 }
 0x391   :  { %v318_v2 = vsel %vm259_vm10, %v314_v47, -inf }
 0x392   :  { %319 = vmax.xlane.f32.xlu0 %v318_v2 }
 0x3a6   :  { %443 = vrot.lane.b32.xlu0 %v2617_v23, %s2390_s24 }
 0x403   :  { %v317_v21 = vpop.xlane.xlu2 %316 }
 0x404   :  { %v321_v48 = vsub.f32 %v313_v45, %v317_v21 }
 0x405   :  { %v320_v52 = vpop.xlane.xlu0 %319 }
 0x406   :  { %v323_v49 = vmul.f32 1.442695, %v321_v48  ;;  %v322_v53 = vsub.f32 %v314_v47, %v320_v52 }
 0x408   :  { %2306 = vpow2.f32 %v323_v49  ;;  %v325_v54 = vmul.f32 1.442695, %v322_v53 }
 0x40a   :  { %2308 = vpow2.f32 %v325_v54 }
 0x40e   :  { %v2307_v50 = vpop.eup %2306 }
 0x40f   :  { %v327_v51 = vsel %vm259_vm10, %v2307_v50, 0.0 }
 0x410   :  { %328 = vadd.xlane.f32.xlu2 %v327_v51  ;;  %v2309_v55 = vpop.eup %2308 }
 0x411   :  { %v330_v56 = vsel %vm259_vm10, %v2309_v55, 0.0 }
 0x418   :  { %v444_v25 = vpop.permute.xlu0 %443 }
 0x428   :  { %363 = vrot.lane.b32.xlu2 %v2613_v20, %s2391_s4  ;;  %s2402_s4 = smov 24  }
 0x451   :  { %331 = vadd.xlane.f32.xlu2 %v330_v56 }
 0x483   :  { %v329_v57 = vpop.xlane.xlu2 %328 }
 0x484   :  { %2310 = vrcp.f32 %v329_v57  ;;  %v344_v62 = vand.u32 2147483648, %v329_v57  ;;  %v342_v0 = vand.u32 2147483647, %v329_v57  ;;  %vm338_vm13 = vweird.f32 %v329_v57 }
 0x486   :  { %v345_v3 = vor.u32 1.1754944e-38, %v344_v62  ;;  %vm343_vm15 = vcmp.eq.f32.partialorder %v342_v0, 8.507059e+37 }
 0x48a   :  { %v2311_v58 = vpop.eup %2310 }
 0x48b   :  { %v334_v59 = vmul.f32 %v2311_v58, %v329_v57  ;;  %v364_v60 = vpop.permute.xlu2 %363  ;;  %vm339_vm12 = vweird.f32 %v2311_v58 }
 0x48c   :  { %384 = vmatpush.msrb.mxu2 %v364_v60  ;;  %vm340_vm14 = vmor %vm338_vm13, %vm339_vm12 }
 0x48d   :  { %v335_v61 = vsub.f32 1.0, %v334_v59 }
 0x48e   :  { %2139 = vmatpush.xpose.msk.msra.mxu2 %vm259_vm10, %v418_v26  ;;  %v576_v26 = vpop.permute.xlu1 %575 }
 0x48f   :  { %v336_v63 = vmul.f32 %v2311_v58, %v335_v61 }
 0x491   :  { %v337_v1 = vadd.f32 %v2311_v58, %v336_v63 }
 0x493   :  { %v341_v4 = vsel %vm340_vm14, %v2311_v58, %v337_v1 }
 0x494   :  { %v346_v5 = vsel %vm343_vm15, %v345_v3, %v341_v4 }
 0x495   :  { %v347_v6 = vmul.f32 %v2307_v50, %v346_v5 }
 0x497   :  { %2137 = vmatmul.msk.f32.vlgmr.msrb.gmra.mxu2 %vm259_vm10, %v347_v6 }
 0x49f   :  { %2140 = vmatmul.msk.f32.vlgmr.msra.gmra.mxu2 %vm259_vm10, %v2639_v27 }
 0x4c4   :  { %v332_v7 = vpop.xlane.xlu2 %331 }
 0x4c5   :  { %2312 = vrcp.f32 %v332_v7  ;;  %v359_v11 = vand.u32 2147483648, %v332_v7  ;;  %v357_v14 = vand.u32 2147483647, %v332_v7  ;;  %vm353_vm1 = vweird.f32 %v332_v7 }
 0x4c7   :  { %v360_v16 = vor.u32 1.1754944e-38, %v359_v11  ;;  %vm358_vm4 = vcmp.eq.f32.partialorder %v357_v14, 8.507059e+37 }
 0x4cb   :  { %v2313_v8 = vpop.eup %2312 }
 0x4cc   :  { %v349_v9 = vmul.f32 %v2313_v8, %v332_v7  ;;  %vm354_vm0 = vweird.f32 %v2313_v8 }
 0x4cd   :  { %vm355_vm3 = vmor %vm353_vm1, %vm354_vm0 }
 0x4ce   :  { %v350_v10 = vsub.f32 1.0, %v349_v9 }
 0x4d0   :  { %v351_v13 = vmul.f32 %v2313_v8, %v350_v10 }
 0x4d2   :  { %v352_v15 = vadd.f32 %v2313_v8, %v351_v13 }
 0x4d4   :  { %v356_v18 = vsel %vm355_vm3, %v2313_v8, %v352_v15 }
 0x4d5   :  { %v361_v19 = vsel %vm358_vm4, %v360_v16, %v356_v18 }
 0x4d6   :  { %v362_v22 = vmul.f32 %v2309_v55, %v361_v19 }
 0x4d8   :  { %2138 = vmatmul.msk.f32.vlgmr.msra.gmra.mxu3 %vm259_vm10, %v362_v22 }
 0x4d9   :  { %2145 = vmatpush.xpose.msk.msra.mxu3 %vm259_vm10, %v578_v24 }
 0x4e0   :  { %2142 = vmatmul.msk.f32.vlgmr.msrb.gmra.mxu3 %vm259_vm10, %v444_v25 }
 0x4e8   :  { %2146 = vmatmul.msk.f32.vlgmr.msra.gmra.mxu3 %vm259_vm10, %v576_v26 }
 0x51a   :  { %v2669_v27 = vpop.f32.mrf.mxu2 }
 0x522   :  { %v440_v28 = vpop.f32.mrf.mxu2 }
 0x523   :  { %v471_v29 = vmul.f32 0.35355338, %v440_v28 }
 0x525   :  { %v473_v30 = vadd.f32 %v471_v29, %v2647_v39 }
 0x527   :  { %v475_v31 = vsel %vm259_vm10, %v473_v30, -inf }
 0x528   :  { %476 = vmax.xlane.f32.xlu0 %v475_v31 }
 0x53c   :  { %605 = vrot.lane.b32.xlu0 %v2617_v23, %s2392_s25 }
 0x544   :  { %737 = vrot.lane.b32.xlu0 %v2613_v20, %s3115_s1 }
 0x54c   :  { %735 = vrot.lane.b32.xlu0 %v2613_v20, %s2396_s29 }
 0x554   :  { %549 = vrot.lane.b32.xlu0 %v2617_v23, %s2397_s3 }
 0x55b   :  { %v2680_v32 = vpop.f32.mrf.mxu3 }
 0x55c   :  { %683 = vrot.lane.b32.xlu0 %v2613_v20, %s2398_s6 }
 0x563   :  { %v468_v33 = vpop.f32.mrf.mxu3 }
 0x564   :  { %v472_v34 = vmul.f32 0.35355338, %v468_v33  ;;  %763 = vrot.lane.b32.xlu0 %v2617_v23, %s2396_s29 }
 0x566   :  { %v474_v35 = vadd.f32 %v472_v34, %v2649_v41 }
 0x568   :  { %v478_v36 = vsel %vm259_vm10, %v474_v35, -inf }
 0x569   :  { %479 = vmax.xlane.f32.xlu1 %v478_v36 }
 0x56b   :  { %v600_v37 = vpop.f32.mrf.mxu3 }
 0x56c   :  { %v631_v40 = vmul.f32 0.35355338, %v600_v37 }
 0x56e   :  { %v633_v42 = vadd.f32 %v631_v40, %v2647_v39 }
 0x570   :  { %v635_v43 = vsel %vm259_vm10, %v633_v42, -inf }
 0x571   :  { %636 = vmax.xlane.f32.xlu2 %v635_v43 }
 0x582   :  { %603 = vrot.lane.b32.xlu1 %v2617_v23, %s2393_s27 }
 0x59b   :  { %v477_v44 = vpop.xlane.xlu0 %476 }
 0x59c   :  { %v481_v45 = vsub.f32 %v473_v30, %v477_v44 }
 0x59e   :  { %v483_v46 = vmul.f32 1.442695, %v481_v45 }
 0x5a0   :  { %2314 = vpow2.f32 %v483_v46 }
 0x5a6   :  { %v2315_v47 = vpop.eup %2314 }
 0x5a7   :  { %v487_v2 = vsel %vm259_vm10, %v2315_v47, 0.0 }
 0x5a8   :  { %488 = vadd.xlane.f32.xlu2 %v487_v2 }
 0x5ae   :  { %v606_v21 = vpop.permute.xlu0 %605 }
 0x5b6   :  { %v738_v48 = vpop.permute.xlu0 %737 }
 0x5be   :  { %v736_v49 = vpop.permute.xlu0 %735 }
 0x5c0   :  { %523 = vrot.lane.b32.xlu2 %v2613_v20, %s2397_s3 }
 0x5c6   :  { %v550_v50 = vpop.permute.xlu0 %549 }
 0x5c7   :  { %570 = vmatpush.msrb.mxu2 %v550_v50 }
 0x5ce   :  { %v684_v51 = vpop.permute.xlu0 %683 }
 0x5cf   :  { %704 = vmatpush.msra.mxu2 %v684_v51 }
 0x5d6   :  { %v764_v2 = vpop.permute.xlu0 %763 }
 0x5dc   :  { %v480_v52 = vpop.xlane.xlu1 %479 }
 0x5dd   :  { %v482_v53 = vsub.f32 %v474_v35, %v480_v52 }
 0x5df   :  { %v485_v54 = vmul.f32 1.442695, %v482_v53 }
 0x5e1   :  { %2316 = vpow2.f32 %v485_v54 }
 0x5e4   :  { %v637_v55 = vpop.xlane.xlu2 %636 }
 0x5e5   :  { %v641_v56 = vsub.f32 %v633_v42, %v637_v55 }
 0x5e7   :  { %v2317_v57 = vpop.eup %2316  ;;  %v643_v58 = vmul.f32 1.442695, %v641_v56 }
 0x5e8   :  { %v490_v59 = vsel %vm259_vm10, %v2317_v57, 0.0 }
 0x5e9   :  { %2318 = vpow2.f32 %v643_v58  ;;  %491 = vadd.xlane.f32.xlu2 %v490_v59 }
 0x5ef   :  { %v2695_v60 = vpop.eup %2318 }
 0x5f0   :  { %v647_v61 = vsel %vm259_vm10, %v2695_v60, 0.0 }
 0x5f1   :  { %648 = vadd.xlane.f32.xlu1 %v647_v61 }
 0x5f4   :  { %v604_v13 = vpop.permute.xlu1 %603 }
 0x601   :  { %765 = vrot.lane.b32.xlu2 %v2617_v23, %s3115_s1 }
 0x61b   :  { %v489_v62 = vpop.xlane.xlu2 %488 }
 0x61c   :  { %2320 = vrcp.f32 %v489_v62  ;;  %v504_v4 = vand.u32 2147483648, %v489_v62  ;;  %v502_v6 = vand.u32 2147483647, %v489_v62  ;;  %vm498_vm6 = vweird.f32 %v489_v62 }
 0x61e   :  { %v505_v8 = vor.u32 1.1754944e-38, %v504_v4  ;;  %vm503_vm8 = vcmp.eq.f32.partialorder %v502_v6, 8.507059e+37 }
 0x622   :  { %v2321_v63 = vpop.eup %2320 }
 0x623   :  { %v494_v0 = vmul.f32 %v2321_v63, %v489_v62  ;;  %v524_v1 = vpop.permute.xlu2 %523  ;;  %vm499_vm5 = vweird.f32 %v2321_v63 }
 0x624   :  { %544 = vmatpush.msra.mxu1 %v524_v1  ;;  %vm500_vm7 = vmor %vm498_vm6, %vm499_vm5 }
 0x625   :  { %v495_v3 = vsub.f32 1.0, %v494_v0 }
 0x626   :  { %2147 = vmatpush.xpose.msk.msrb.mxu1 %vm259_vm10, %v606_v21 }
 0x627   :  { %v496_v5 = vmul.f32 %v2321_v63, %v495_v3 }
 0x629   :  { %v497_v7 = vadd.f32 %v2321_v63, %v496_v5 }
 0x62b   :  { %v501_v9 = vsel %vm500_vm7, %v2321_v63, %v497_v7 }
 0x62c   :  { %v506_v10 = vsel %vm503_vm8, %v505_v8, %v501_v9 }
 0x62d   :  { %v507_v11 = vmul.f32 %v2315_v47, %v506_v10 }
 0x62f   :  { %2143 = vmatmul.msk.f32.vlgmr.msra.gmra.mxu1 %vm259_vm10, %v507_v11 }
 0x630   :  { %2151 = vmatpush.xpose.msk.msra.mxu1 %vm259_vm10, %v738_v48 }
 0x637   :  { %2148 = vmatmul.msk.f32.vlgmr.msrb.gmra.mxu1 %vm259_vm10, %v604_v13 }
 0x63f   :  { %2152 = vmatmul.msk.f32.vlgmr.msra.gmra.mxu1 %vm259_vm10, %v736_v49 }
 0x65c   :  { %v492_v14 = vpop.xlane.xlu2 %491 }
 0x65d   :  { %2322 = vrcp.f32 %v492_v14  ;;  %v519_v22 = vand.u32 2147483648, %v492_v14  ;;  %v517_v25 = vand.u32 2147483647, %v492_v14  ;;  %vm513_vm11 = vweird.f32 %v492_v14 }
 0x65f   :  { %v520_v29 = vor.u32 1.1754944e-38, %v519_v22  ;;  %vm518_vm13 = vcmp.eq.f32.partialorder %v517_v25, 8.507059e+37 }
 0x663   :  { %v2323_v15 = vpop.eup %2322 }
 0x664   :  { %v509_v16 = vmul.f32 %v2323_v15, %v492_v14  ;;  %v649_v18 = vpop.xlane.xlu1 %648  ;;  %vm514_vm9 = vweird.f32 %v2323_v15  ;;  %v766_v42 = vpop.permute.xlu2 %765 }
 0x665   :  { %2324 = vrcp.f32 %v649_v18  ;;  %vm515_vm12 = vmor %vm513_vm11, %vm514_vm9  ;;  %v664_v36 = vand.u32 2147483648, %v649_v18  ;;  %v662_v40 = vand.u32 2147483647, %v649_v18  ;;  %vm658_vm15 = vweird.f32 %v649_v18 }
 0x666   :  { %v510_v19 = vsub.f32 1.0, %v509_v16 }
 0x667   :  { %v665_v44 = vor.u32 1.1754944e-38, %v664_v36  ;;  %vm663_vm1 = vcmp.eq.f32.partialorder %v662_v40, 8.507059e+37 }
 0x668   :  { %v511_v24 = vmul.f32 %v2323_v15, %v510_v19 }
 0x66a   :  { %v512_v26 = vadd.f32 %v2323_v15, %v511_v24 }
 0x66b   :  { %v2325_v28 = vpop.eup %2324 }
 0x66c   :  { %v516_v30 = vsel %vm515_vm12, %v2323_v15, %v512_v26  ;;  %v654_v31 = vmul.f32 %v2325_v28, %v649_v18  ;;  %vm659_vm14 = vweird.f32 %v2325_v28 }
 0x66d   :  { %v521_v33 = vsel %vm518_vm13, %v520_v29, %v516_v30  ;;  %vm660_vm0 = vmor %vm658_vm15, %vm659_vm14 }
 0x66e   :  { %v655_v34 = vsub.f32 1.0, %v654_v31  ;;  %v522_v35 = vmul.f32 %v2317_v57, %v521_v33 }
 0x670   :  { %v656_v37 = vmul.f32 %v2325_v28, %v655_v34  ;;  %2144 = vmatmul.msk.f32.vlgmr.msrb.gmra.mxu2 %vm259_vm10, %v522_v35 }
 0x671   :  { %2153 = vmatpush.xpose.msk.msrb.mxu2 %vm259_vm10, %v766_v42 }
 0x672   :  { %v657_v43 = vadd.f32 %v2325_v28, %v656_v37 }
 0x674   :  { %v661_v45 = vsel %vm660_vm0, %v2325_v28, %v657_v43  ;;  %vm921_vm0 = vcmask 130048  }
 0x675   :  { %v666_v46 = vsel %vm663_vm1, %v665_v44, %v661_v45  ;;  %vm924_vm1 = vcmask 195584  }
 0x676   :  { %v667_v47 = vmul.f32 %v2695_v60, %v666_v46 }
 0x678   :  { %2149 = vmatmul.msk.f32.vlgmr.msra.gmra.mxu2 %vm259_vm10, %v667_v47 }
 0x680   :  { %2154 = vmatmul.msk.f32.vlgmr.msrb.gmra.mxu2 %vm259_vm10, %v764_v2 }
 0x6ac   :  { %v546_v21 = vpop.f32.mrf.mxu1 }
 0x6b4   :  { %v628_v48 = vpop.f32.mrf.mxu1 }
 0x6b5   :  { %v632_v49 = vmul.f32 0.35355338, %v628_v48 }
 0x6b7   :  { %v634_v50 = vadd.f32 %v632_v49, %v2649_v41 }
 0x6b9   :  { %v638_v51 = vsel %vm259_vm10, %v634_v50, -inf }
 0x6ba   :  { %639 = vmax.xlane.f32.xlu0 %v638_v51 }
 0x6bc   :  { %v760_v52 = vpop.f32.mrf.mxu1 }
 0x6bd   :  { %v791_v53 = vmul.f32 0.35355338, %v760_v52 }
 0x6bf   :  { %v793_v54 = vadd.f32 %v791_v53, %v2647_v39 }
 0x6c1   :  { %v795_v55 = vsel %vm259_vm10, %v793_v54, -inf }
 0x6c2   :  { %796 = vmax.xlane.f32.xlu1 %v795_v55 }
 0x6ce   :  { %843 = vrot.lane.b32.xlu0 %v2613_v20, %s2399_s30 }
 0x6d6   :  { %897 = vrot.lane.b32.xlu0 %v546_v21, %s3113_s8 }
 0x6f3   :  { %v572_v56 = vpop.f32.mrf.mxu2 }
 0x6f4   :  { %899 = vrot.lane.b32.xlu0 %v572_v56, %s3113_s8 }
 0x6fb   :  { %v706_v57 = vpop.f32.mrf.mxu2 }
 0x703   :  { %v788_v58 = vpop.f32.mrf.mxu2 }
 0x704   :  { %v792_v59 = vmul.f32 0.35355338, %v788_v58 }
 0x706   :  { %v794_v60 = vadd.f32 %v792_v59, %v2649_v41  ;;  %v208_v59 = vld [vmem:[%s3097_s9 + $0x18] sm:$0xff] }
 0x707   :  { %948 = vmatpush.msrb.mxu1 %v208_v59 }
 0x708   :  { %v798_v61 = vsel %vm259_vm10, %v794_v60, -inf }
 0x709   :  { %799 = vmax.xlane.f32.xlu2 %v798_v61  ;;  %v206_v61 = vld [vmem:[%s3097_s9 + $0x8] sm:$0xff] }
 0x72d   :  { %v640_v39 = vpop.xlane.xlu0 %639 }
 0x72e   :  { %v642_v62 = vsub.f32 %v634_v50, %v640_v39 }
 0x730   :  { %v645_v63 = vmul.f32 1.442695, %v642_v62  ;;  %v205_v62 = vld [vmem:[%s3097_s9] sm:$0xff] }
 0x732   :  { %2326 = vpow2.f32 %v645_v63 }
 0x735   :  { %v797_v0 = vpop.xlane.xlu1 %796 }
 0x736   :  { %v801_v20 = vsub.f32 %v793_v54, %v797_v0 }
 0x738   :  { %v2327_v1 = vpop.eup %2326  ;;  %v803_v3 = vmul.f32 1.442695, %v801_v20 }
 0x739   :  { %v650_v4 = vsel %vm259_vm10, %v2327_v1, 0.0 }
 0x73a   :  { %2328 = vpow2.f32 %v803_v3  ;;  %651 = vadd.xlane.f32.xlu1 %v650_v4 }
 0x740   :  { %v2329_v5 = vpop.eup %2328  ;;  %v844_v40 = vpop.permute.xlu0 %843 }
 0x741   :  { %v807_v6 = vsel %vm259_vm10, %v2329_v5, 0.0 }
 0x742   :  { %808 = vadd.xlane.f32.xlu1 %v807_v6 }
 0x748   :  { %v898_v63 = vpop.permute.xlu0 %897 }
 0x749   :  { %v919_v20 = vsel %vm259_vm10, %v2669_v27, %v898_v63  ;;  %v2288_v27 = vld [vmem:[%s3098_s10] ss:$0 sm:$0xff] }
 0x75b   :  { %709 = vrot.lane.b32.xlu1 %v2617_v23, %s2398_s6 }
 0x763   :  { %869 = vrot.lane.b32.xlu1 %v2617_v23, %s2399_s30 }
 0x77c   :  { %v800_v41 = vpop.xlane.xlu2 %799 }
 0x77d   :  { %v802_v7 = vsub.f32 %v794_v60, %v800_v41  ;;  %v207_v60 = vld [vmem:[%s3097_s9 + $0x10] sm:$0xff] }
 0x77e   :  { %949 = vmatpush.msrb.mxu1 %v207_v60 }
 0x77f   :  { %v805_v8 = vmul.f32 1.442695, %v802_v7 }
 0x780   :  { %950 = vmatpush.msrb.mxu1 %v206_v61  ;;  %v2291_v61 = vld [vmem:[%s3100_s12] ss:$0 sm:$0xff] }
 0x781   :  { %2330 = vpow2.f32 %v805_v8 }
 0x782   :  { %951 = vmatpush.msrb.mxu1 %v205_v62 }
 0x787   :  { %v2725_v9 = vpop.eup %2330 }
 0x788   :  { %v810_v10 = vsel %vm259_vm10, %v2725_v9, 0.0 }
 0x789   :  { %811 = vadd.xlane.f32.xlu2 %v810_v10 }
 0x7a1   :  { %905 = vrot.lane.b32.xlu2 %v706_v57, %s3117_s26 }
 0x7ad   :  { %v652_v11 = vpop.xlane.xlu1 %651 }
 0x7ae   :  { %2332 = vrcp.f32 %v652_v11  ;;  %v679_v25 = vand.u32 2147483648, %v652_v11  ;;  %vm673_vm4 = vweird.f32 %v652_v11  ;;  %v677_v26 = vand.u32 2147483647, %v652_v11 }
 0x7b0   :  { %v680_v30 = vor.u32 1.1754944e-38, %v679_v25  ;;  %vm678_vm6 = vcmp.eq.f32.partialorder %v677_v26, 8.507059e+37 }
 0x7b4   :  { %v2333_v13 = vpop.eup %2332 }
 0x7b5   :  { %v809_v14 = vpop.xlane.xlu1 %808  ;;  %v669_v15 = vmul.f32 %v2333_v13, %v652_v11  ;;  %vm674_vm3 = vweird.f32 %v2333_v13 }
 0x7b6   :  { %2334 = vrcp.f32 %v809_v14  ;;  %vm675_vm5 = vmor %vm673_vm4, %vm674_vm3  ;;  %v824_v34 = vand.u32 2147483648, %v809_v14  ;;  %vm818_vm8 = vweird.f32 %v809_v14  ;;  %v822_v35 = vand.u32 2147483647, %v809_v14 }
 0x7b7   :  { %v670_v23 = vsub.f32 1.0, %v669_v15  ;;  %v2162_v15 = vld [vmem:[%s3095_s7 + $0x38] sm:$0xff] }
 0x7b8   :  { %v825_v43 = vor.u32 1.1754944e-38, %v824_v34  ;;  %vm823_vm11 = vcmp.eq.f32.partialorder %v822_v35, 8.507059e+37  ;;  %1058 = vmatpush.msra.mxu2 %v2162_v15 }
 0x7b9   :  { %v671_v18 = vmul.f32 %v2333_v13, %v670_v23 }
 0x7bb   :  { %v672_v22 = vadd.f32 %v2333_v13, %v671_v18 }
 0x7bc   :  { %v2335_v16 = vpop.eup %2334 }
 0x7bd   :  { %v814_v19 = vmul.f32 %v2335_v16, %v809_v14  ;;  %v676_v28 = vsel %vm675_vm5, %v2333_v13, %v672_v22  ;;  %vm819_vm7 = vweird.f32 %v2335_v16 }
 0x7be   :  { %v681_v31 = vsel %vm678_vm6, %v680_v30, %v676_v28  ;;  %vm820_vm9 = vmor %vm818_vm8, %vm819_vm7 }
 0x7bf   :  { %v815_v24 = vsub.f32 1.0, %v814_v19  ;;  %v682_v37 = vmul.f32 %v2327_v1, %v681_v31 }
 0x7c1   :  { %v816_v29 = vmul.f32 %v2335_v16, %v815_v24 }
 0x7c3   :  { %v817_v33 = vadd.f32 %v2335_v16, %v816_v29 }
 0x7c5   :  { %v821_v42 = vsel %vm820_vm9, %v2335_v16, %v817_v33  ;;  %v2160_v16 = vld [vmem:[%s3095_s7 + $0x28] sm:$0xff] }
 0x7c6   :  { %v826_v44 = vsel %vm823_vm11, %v825_v43, %v821_v42 }
 0x7c7   :  { %v827_v46 = vmul.f32 %v2329_v5, %v826_v44  ;;  %v900_v5 = vpop.permute.xlu0 %899 }
 0x7c8   :  { %v920_v41 = vsel %vm259_vm10, %v2680_v32, %v900_v5  ;;  %v2161_v32 = vld [vmem:[%s3095_s7 + $0x30] sm:$0xff] }
 0x7c9   :  { %v2235_v23 = vpack.i.bf16 %v2161_v32, %v2162_v15  ;;  %1059 = vmatpush.msra.mxu2 %v2161_v32 }
 0x7cb   :  { %1060 = vmatpush.msra.mxu2 %v2160_v16 }
 0x7cd   :  { %v710_v36 = vpop.permute.xlu1 %709 }
 0x7ce   :  { %730 = vmatpush.msrb.mxu3 %v710_v36 }
 0x7cf   :  { %2150 = vmatmul.msk.f32.vlgmr.msrb.gmra.mxu3 %vm259_vm10, %v682_v37 }
 0x7d0   :  { %864 = vmatpush.msra.mxu3 %v844_v40 }
 0x7d5   :  { %v870_v45 = vpop.permute.xlu1 %869 }
 0x7d6   :  { %890 = vmatpush.msrb.mxu0 %v870_v45 }
 0x7d7   :  { %2155 = vmatmul.msk.f32.vlgmr.msra.gmra.mxu3 %vm259_vm10, %v827_v46  ;;  %v1015_v46 = vld [vmem:[%s3101_s2] sm:$0xff] }
 0x7fc   :  { %v812_v47 = vpop.xlane.xlu2 %811 }
 0x7fd   :  { %2336 = vrcp.f32 %v812_v47  ;;  %v839_v49 = vand.u32 2147483648, %v812_v47  ;;  %v837_v51 = vand.u32 2147483647, %v812_v47  ;;  %vm833_vm13 = vweird.f32 %v812_v47 }
 0x7ff   :  { %v840_v53 = vor.u32 1.1754944e-38, %v839_v49  ;;  %vm838_vm15 = vcmp.eq.f32.partialorder %v837_v51, 8.507059e+37 }
 0x803   :  { %v2337_v2 = vpop.eup %2336 }
 0x804   :  { %v829_v21 = vmul.f32 %v2337_v2, %v812_v47  ;;  %vm834_vm12 = vweird.f32 %v2337_v2  ;;  %v906_v0 = vpop.permute.xlu2 %905  ;;  %v1016_v47 = vld [vmem:[%s3101_s2 + $0x8] sm:$0xff] }
 0x805   :  { %vm835_vm14 = vmor %vm833_vm13, %vm834_vm12  ;;  %v922_v1 = vsel %vm921_vm0, %v919_v20, %v906_v0 }
 0x806   :  { %v830_v48 = vsub.f32 1.0, %v829_v21  ;;  %v1018_v21 = vld [vmem:[%s3101_s2 + $0x18] sm:$0xff] }
 0x808   :  { %v831_v50 = vmul.f32 %v2337_v2, %v830_v48  ;;  %v2803_v48 = vld [vmem:[%s3130_s22 + $0x1] ss:$0 sm:$0xff] }
 0x80a   :  { %v832_v52 = vadd.f32 %v2337_v2, %v831_v50 }
 0x80c   :  { %v836_v54 = vsel %vm835_vm14, %v2337_v2, %v832_v52  ;;  %v1017_v2 = vld [vmem:[%s3101_s2 + $0x10] sm:$0xff] }
 0x80d   :  { %v841_v55 = vsel %vm838_vm15, %v840_v53, %v836_v54 }
 0x80e   :  { %v842_v56 = vmul.f32 %v2725_v9, %v841_v55 }
 0x810   :  { %2156 = vmatmul.msk.f32.vlgmr.msrb.gmra.mxu0 %vm259_vm10, %v842_v56 }
 0x852   :  { %v732_v57 = vpop.f32.mrf.mxu3 }
 0x85a   :  { %v866_v58 = vpop.f32.mrf.mxu3 }
 0x85b   :  { %913 = vrot.lane.b32.xlu1 %v866_v58, %s2402_s4  ;;  %v2289_v58 = vld [vmem:[%s3099_s11] ss:$0 sm:$0xff] }
 0x863   :  { %907 = vrot.lane.b32.xlu1 %v732_v57, %s3117_s26 }
 0x88d   :  { %v892_v39 = vpop.f32.mrf.mxu0 }
 0x88e   :  { %915 = vrot.lane.b32.xlu0 %v892_v39, %s2402_s4 }
 0x8cd   :  { %v914_v3 = vpop.permute.xlu1 %913 }
 0x8ce   :  { %v925_v4 = vsel %vm924_vm1, %v922_v1, %v914_v3 }
 0x8cf   :  { %2157 = vmatmul.msk.f32.vlgmr.msrb.gmra.mxu1 %vm135_vm2, %v925_v4 }
 0x8d5   :  { %v908_v6 = vpop.permute.xlu1 %907 }
 0x8d6   :  { %v923_v7 = vsel %vm921_vm0, %v920_v41, %v908_v6 }
 0x900   :  { %v916_v8 = vpop.permute.xlu0 %915 }
 0x901   :  { %v926_v9 = vsel %vm924_vm1, %v923_v7, %v916_v8 }
 0x902   :  { %2158 = vmatmul.msk.f32.gmra.mxu1 %vm135_vm2, %v926_v9 }
 0x94c   :  { %v953_v10 = vpop.f32.mrf.mxu1 }
 0x94d   :  { %v954_v11 = vadd.f32 %v2288_v27, %v953_v10 }
 0x94f   :  { %v959_v13 = vadd.f32 %v954_v11, %v2602_v12  ;;  %v2159_v12 = vld [vmem:[%s3095_s7 + $0x20] sm:$0xff] }
 0x950   :  { %1061 = vmatpush.msra.mxu2 %v2159_v12  ;;  %v2240_v25 = vpack.i.bf16 %v2159_v12, %v2160_v16 }
 0x951   :  { %v961_v14 = vsel %vm135_vm2, %v959_v13, 0.0 }
 0x952   :  { %962 = vadd.xlane.f32.xlu1 %v961_v14 }
 0x96b   :  { %2236 = vrot.lane.b32.xlu1 %v2235_v23, %s2388_s23 }
 0x97f   :  { %v956_v18 = vpop.f32.mrf.mxu1 }
 0x980   :  { %v957_v19 = vadd.f32 %v2288_v27, %v956_v18 }
 0x982   :  { %v960_v22 = vadd.f32 %v957_v19, %v2606_v17 }
 0x984   :  { %v964_v24 = vsel %vm135_vm2, %v960_v22, 0.0 }
 0x985   :  { %965 = vadd.xlane.f32.xlu0 %v964_v24 }
 0x999   :  { %2241 = vrot.lane.b32.xlu0 %v2240_v25, %s2388_s23 }
 0x9c5   :  { %v963_v26 = vpop.xlane.xlu1 %962 }
 0x9c6   :  { %v967_v28 = vmul.f32 %v963_v26, %v2576_v38 }
 0x9c8   :  { %v969_v29 = vsub.f32 %v959_v13, %v967_v28 }
 0x9ca   :  { %v971_v30 = vmul.f32 %v969_v29, %v969_v29 }
 0x9cc   :  { %v973_v31 = vsel %vm135_vm2, %v971_v30, 0.0 }
 0x9cd   :  { %974 = vadd.xlane.f32.xlu2 %v973_v31 }
 0x9dd   :  { %v2237_v33 = vpop.permute.xlu1 %2236 }
 0x9de   :  { %v2239_v34 = vunpack.i.h.bf16 %v2237_v33  ;;  %v2238_v35 = vunpack.i.l.bf16 %v2237_v33 }
 0x9e0   :  { %1112 = vmatpush.msrb.mxu3 %v2238_v35 }
 0x9e2   :  { %1113 = vmatpush.msrb.mxu3 %v2239_v34 }
 0x9f8   :  { %v966_v17 = vpop.xlane.xlu0 %965 }
 0x9f9   :  { %v968_v36 = vmul.f32 %v966_v17, %v2576_v38 }
 0x9fb   :  { %v970_v37 = vsub.f32 %v960_v22, %v968_v36 }
 0x9fd   :  { %v972_v40 = vmul.f32 %v970_v37, %v970_v37 }
 0x9ff   :  { %v976_v42 = vsel %vm135_vm2, %v972_v40, 0.0 }
 0xa00   :  { %977 = vadd.xlane.f32.xlu2 %v976_v42 }
 0xa0b   :  { %v2242_v43 = vpop.permute.xlu0 %2241 }
 0xa0c   :  { %v2244_v44 = vunpack.i.h.bf16 %v2242_v43  ;;  %v2243_v45 = vunpack.i.l.bf16 %v2242_v43 }
 0xa0e   :  { %1114 = vmatpush.msrb.mxu3 %v2243_v45 }
 0xa10   :  { %1115 = vmatpush.msrb.mxu3 %v2244_v44 }
 0xa11   :  { %2173 = vmatmul.msk.f32.vlgmr.msrb.gmra.mxu3 %vm135_vm2, %v1015_v46 }
 0xa18   :  { %1085 = vrot.lane.b32.xlu2 %v2803_v48, %s2388_s23 }
 0xa19   :  { %2174 = vmatmul.msk.f32.gmra.mxu3 %vm135_vm2, %v1016_v47 }
 0xa21   :  { %2175 = vmatmul.msk.f32.gmra.mxu3 %vm135_vm2, %v1017_v2 }
 0xa29   :  { %2176 = vmatmul.msk.f32.gmra.mxu3 %vm135_vm2, %v1018_v21 }
 0xa40   :  { %v975_v49 = vpop.xlane.xlu2 %974 }
 0xa41   :  { %v979_v50 = vmul.f32 %v975_v49, %v2576_v38 }
 0xa43   :  { %v981_v51 = vadd.f32 1e-12, %v979_v50 }
 0xa45   :  { %2338 = vrsqrt.f32 %v981_v51  ;;  %vm989_vm4 = vweird.f32 %v981_v51 }
 0xa4b   :  { %v2339_v52 = vpop.eup %2338 }
 0xa4c   :  { %v984_v53 = vmul.f32 %v2339_v52, %v981_v51  ;;  %vm990_vm3 = vweird.f32 %v2339_v52 }
 0xa4d   :  { %vm991_vm5 = vmor %vm989_vm4, %vm990_vm3 }
 0xa4e   :  { %v985_v54 = vmul.f32 %v2339_v52, %v984_v53 }
 0xa50   :  { %v986_v55 = vmul.f32 0.5, %v985_v54 }
 0xa52   :  { %v987_v56 = vsub.f32 1.5, %v986_v55 }
 0xa54   :  { %v988_v57 = vmul.f32 %v2339_v52, %v987_v56 }
 0xa56   :  { %v992_v59 = vsel %vm991_vm5, %v2339_v52, %v988_v57 }
 0xa57   :  { %v1003_v60 = vmul.f32 %v992_v59, %v969_v29 }
 0xa59   :  { %v1008_v39 = vmul.f32 %v2289_v58, %v1003_v60 }
 0xa5b   :  { %v2814_v62 = vadd.f32 %v2291_v61, %v1008_v39 }
 0xa5d   :  { %2171 = vmatmul.msk.f32.vlgmr.msra.gmra.mxu2 %vm135_vm2, %v2814_v62 }
 0xa73   :  { %v978_v63 = vpop.xlane.xlu2 %977 }
 0xa74   :  { %v980_v0 = vmul.f32 %v978_v63, %v2576_v38 }
 0xa76   :  { %v982_v20 = vadd.f32 1e-12, %v980_v0 }
 0xa78   :  { %2340 = vrsqrt.f32 %v982_v20  ;;  %vm999_vm7 = vweird.f32 %v982_v20 }
 0xa7b   :  { %v1086_v11 = vpop.permute.xlu2 %1085 }
 0xa7e   :  { %v2341_v1 = vpop.eup %2340 }
 0xa7f   :  { %v994_v3 = vmul.f32 %v2341_v1, %v982_v20  ;;  %vm1000_vm6 = vweird.f32 %v2341_v1 }
 0xa80   :  { %vm1001_vm8 = vmor %vm999_vm7, %vm1000_vm6 }
 0xa81   :  { %v995_v4 = vmul.f32 %v2341_v1, %v994_v3 }
 0xa83   :  { %v996_v5 = vmul.f32 0.5, %v995_v4 }
 0xa85   :  { %v997_v6 = vsub.f32 1.5, %v996_v5 }
 0xa87   :  { %v998_v41 = vmul.f32 %v2341_v1, %v997_v6 }
 0xa89   :  { %v1002_v7 = vsel %vm1001_vm8, %v2341_v1, %v998_v41 }
 0xa8a   :  { %v1004_v8 = vmul.f32 %v1002_v7, %v970_v37 }
 0xa8c   :  { %v1009_v9 = vmul.f32 %v2289_v58, %v1004_v8 }
 0xa8e   :  { %v2819_v27 = vadd.f32 %v2291_v61, %v1009_v9 }
 0xa90   :  { %2172 = vmatmul.msk.f32.gmra.mxu2 %vm135_vm2, %v2819_v27 }
 0xa94   :  { %v1117_v10 = vpop.f32.mrf.mxu3 }
 0xa95   :  { %v2823_v13 = vadd.f32 %v1117_v10, %v1086_v11 }
 0xa97   :  { %1297 = vrot.lane.b32.xlu1 %v2823_v13, %s2390_s24 }
 0xa9c   :  { %v1120_v14 = vpop.f32.mrf.mxu3 }
 0xa9d   :  { %v1121_v32 = vadd.f32 %v1120_v14, %v1086_v11 }
 0xa9f   :  { %v2828_v15 = vpack.i.bf16 %v2823_v13, %v1121_v32  ;;  %1299 = vrot.lane.b32.xlu0 %v1121_v32, %s2390_s24  ;;  %2177 = vmatpush.xpose.msk.msra.mxu0 %vm259_vm10, %v1121_v32 }
 0xaa1   :  { %2246 = vrot.lane.b32.xlu1 %v2828_v15, %s2388_s23 }
 0xaa3   :  { %2178 = vmatpush.xpose.msk.msra.mxu0 %vm259_vm10, %v2823_v13 }
 0xaa4   :  { %v1123_v23 = vpop.f32.mrf.mxu3 }
 0xaa5   :  { %v2836_v16 = vadd.f32 %v1123_v23, %v1086_v11 }
 0xaa9   :  { %1329 = vrot.lane.b32.xlu1 %v2836_v16, %s2390_s24 }
 0xaac   :  { %v1126_v12 = vpop.f32.mrf.mxu3 }
 0xaad   :  { %v2840_v18 = vadd.f32 %v1126_v12, %v1086_v11 }
 0xaaf   :  { %1331 = vrot.lane.b32.xlu2 %v2840_v18, %s2390_s24  ;;  %2180 = vmatpush.xpose.msk.msrb.mxu0 %vm259_vm10, %v2840_v18  ;;  %v2857_v24 = vpack.i.bf16 %v2836_v16, %v2840_v18 }
 0xab1   :  { %2256 = vrot.lane.b32.xlu1 %v2828_v15, %s2389_s0 }
 0xab3   :  { %2181 = vmatpush.xpose.msk.msrb.mxu0 %vm259_vm10, %v2836_v16 }
 0xab7   :  { %1469 = vrot.lane.b32.xlu2 %v2823_v13, %s2393_s27 }
 0xae0   :  { %v1063_v19 = vpop.f32.mrf.mxu2 }
 0xae1   :  { %v1064_v22 = vadd.f32 %v2803_v48, %v1063_v19 }
 0xae3   :  { %1295 = vrot.lane.b32.xlu0 %v1064_v22, %s2390_s24  ;;  %2179 = vmatmul.msk.f32.vlgmr.msra.gmra.mxu0 %vm259_vm10, %v1064_v22 }
 0xaeb   :  { %2251 = vrot.lane.b32.xlu0 %v2857_v24, %s2388_s23  ;;  %s3131_s23 = smov 72  }
 0xaf3   :  { %1471 = vrot.lane.b32.xlu0 %v1121_v32, %s2393_s27 }
 0xafb   :  { %1467 = vrot.lane.b32.xlu0 %v1064_v22, %s2393_s27 }
 0xb03   :  { %1501 = vrot.lane.b32.xlu0 %v2836_v16, %s2393_s27 }
 0xb09   :  { %v1298_v25 = vpop.permute.xlu1 %1297  ;;  %v1332_v34 = vpop.permute.xlu2 %1331 }
 0xb11   :  { %v1300_v26 = vpop.permute.xlu0 %1299  ;;  %v1470_v57 = vpop.permute.xlu2 %1469 }
 0xb12   :  { %2185 = vmatpush.xpose.msk.msra.mxu0 %vm259_vm10, %v1300_v26 }
 0xb13   :  { %v1066_v28 = vpop.f32.mrf.mxu2  ;;  %v2247_v29 = vpop.permute.xlu1 %2246 }
 0xb14   :  { %v2867_v30 = vadd.f32 %v2803_v48, %v1066_v28  ;;  %v2248_v31 = vunpack.i.l.bf16 %v2247_v29  ;;  %v2249_v33 = vunpack.i.h.bf16 %v2247_v29 }
 0xb16   :  { %1327 = vrot.lane.b32.xlu2 %v2867_v30, %s2390_s24  ;;  %2182 = vmatmul.msk.f32.vlgmr.msrb.gmra.mxu0 %vm259_vm10, %v2867_v30  ;;  %s3133_s24 = smov 16  }
 0xb17   :  { %1260 = vmatpush.msra.mxu1 %v2248_v31  ;;  %2186 = vmatpush.xpose.msk.msra.mxu0 %vm259_vm10, %v1298_v25 }
 0xb19   :  { %1261 = vmatpush.msra.mxu1 %v2249_v33 }
 0xb1b   :  { %2188 = vmatpush.xpose.msk.msrb.mxu1 %vm259_vm10, %v1332_v34  ;;  %v1330_v35 = vpop.permute.xlu1 %1329 }
 0xb1e   :  { %1643 = vrot.lane.b32.xlu2 %v1121_v32, %s2396_s29 }
 0xb1f   :  { %2189 = vmatpush.xpose.msk.msrb.mxu1 %vm259_vm10, %v1330_v35 }
 0xb23   :  { %v2257_v37 = vpop.permute.xlu1 %2256 }
 0xb24   :  { %v2258_v44 = vunpack.i.l.bf16 %v2257_v37  ;;  %v2259_v46 = vunpack.i.h.bf16 %v2257_v37 }
 0xb55   :  { %v1296_v17 = vpop.permute.xlu0 %1295 }
 0xb56   :  { %2187 = vmatmul.msk.f32.vlgmr.msra.gmra.mxu0 %vm259_vm10, %v1296_v17 }
 0xb5d   :  { %v2252_v36 = vpop.permute.xlu0 %2251 }
 0xb5e   :  { %v2253_v40 = vunpack.i.l.bf16 %v2252_v36  ;;  %v2254_v42 = vunpack.i.h.bf16 %v2252_v36 }
 0xb60   :  { %v1155_v43 = vpop.f32.mrf.mxu0  ;;  %1289 = vmatpush.msrb.mxu2 %v2253_v40 }
 0xb61   :  { %v1187_v45 = vmul.f32 0.35355338, %v1155_v43 }
 0xb62   :  { %1290 = vmatpush.msrb.mxu2 %v2254_v42 }
 0xb63   :  { %v1189_v47 = vsel %vm921_vm0, %v1187_v45, -inf }
 0xb64   :  { %1432 = vmatpush.msra.mxu2 %v2258_v44  ;;  %1190 = vmax.xlane.f32.xlu1 %v1189_v47 }
 0xb65   :  { %v1472_v20 = vpop.permute.xlu0 %1471 }
 0xb66   :  { %1433 = vmatpush.msra.mxu2 %v2259_v46 }
 0xb6d   :  { %v1468_v1 = vpop.permute.xlu0 %1467 }
 0xb70   :  { %v1328_v58 = vpop.permute.xlu2 %1327 }
 0xb75   :  { %v1502_v3 = vpop.permute.xlu0 %1501 }
 0xb78   :  { %v1644_v59 = vpop.permute.xlu2 %1643 }
 0xb7d   :  { %1503 = vrot.lane.b32.xlu1 %v2840_v18, %s2393_s27 }
 0xb93   :  { %v1184_v2 = vpop.f32.mrf.mxu0 }
 0xb94   :  { %v1188_v21 = vmul.f32 0.35355338, %v1184_v2 }
 0xb96   :  { %v1192_v48 = vsel %vm921_vm0, %v1188_v21, -inf }
 0xb97   :  { %1193 = vmax.xlane.f32.xlu2 %v1192_v48 }
 0xbaf   :  { %1499 = vrot.lane.b32.xlu2 %v2867_v30, %s2393_s27 }
 0xbd3   :  { %v1324_v49 = vpop.f32.mrf.mxu0 }
 0xbd4   :  { %v1359_v50 = vmul.f32 0.35355338, %v1324_v49 }
 0xbd6   :  { %v1361_v51 = vsel %vm921_vm0, %v1359_v50, -inf }
 0xbd7   :  { %v1191_v52 = vpop.xlane.xlu1 %1190  ;;  %1362 = vmax.xlane.f32.xlu0 %v1361_v51 }
 0xbd8   :  { %v1195_v53 = vsub.f32 %v1187_v45, %v1191_v52 }
 0xbda   :  { %v1197_v54 = vmul.f32 1.442695, %v1195_v53 }
 0xbdc   :  { %2342 = vpow2.f32 %v1197_v54 }
 0xbe2   :  { %v2343_v55 = vpop.eup %2342 }
 0xbe3   :  { %v1201_v56 = vsel %vm921_vm0, %v2343_v55, 0.0 }
 0xbe4   :  { %1202 = vadd.xlane.f32.xlu1 %v1201_v56 }
 0xbeb   :  { %1639 = vrot.lane.b32.xlu0 %v1064_v22, %s2396_s29 }
 0xbef   :  { %v1504_v41 = vpop.permute.xlu1 %1503 }
 0xbfd   :  { %1641 = vrot.lane.b32.xlu1 %v2823_v13, %s2396_s29 }
 0xc05   :  { %1675 = vrot.lane.b32.xlu1 %v2840_v18, %s2396_s29 }
 0xc0a   :  { %v1194_v60 = vpop.xlane.xlu2 %1193 }
 0xc0b   :  { %v1196_v61 = vsub.f32 %v1188_v21, %v1194_v60 }
 0xc0d   :  { %v1199_v39 = vmul.f32 1.442695, %v1196_v61 }
 0xc0f   :  { %2344 = vpow2.f32 %v1199_v39 }
 0xc12   :  { %v1500_v26 = vpop.permute.xlu2 %1499 }
 0xc15   :  { %v2345_v63 = vpop.eup %2344 }
 0xc16   :  { %v1204_v0 = vsel %vm921_vm0, %v2345_v63, 0.0 }
 0xc17   :  { %1205 = vadd.xlane.f32.xlu2 %v1204_v0 }
 0xc2f   :  { %1673 = vrot.lane.b32.xlu2 %v2836_v16, %s2396_s29 }
 0xc4a   :  { %v1363_v4 = vpop.xlane.xlu0 %1362 }
 0xc4b   :  { %v1367_v5 = vsub.f32 %v1359_v50, %v1363_v4 }
 0xc4d   :  { %v1369_v6 = vmul.f32 1.442695, %v1367_v5 }
 0xc4f   :  { %2346 = vpow2.f32 %v1369_v6 }
 0xc55   :  { %v2894_v7 = vpop.eup %2346 }
 0xc56   :  { %v1373_v8 = vsel %vm921_vm0, %v2894_v7, 0.0 }
 0xc57   :  { %v1203_v9 = vpop.xlane.xlu1 %1202  ;;  %1374 = vadd.xlane.f32.xlu0 %v1373_v8 }
 0xc58   :  { %2348 = vrcp.f32 %v1203_v9  ;;  %v1218_v14 = vand.u32 2147483648, %v1203_v9  ;;  %v1216_v23 = vand.u32 2147483647, %v1203_v9  ;;  %vm1212_vm11 = vweird.f32 %v1203_v9 }
 0xc5a   :  { %v1219_v12 = vor.u32 1.1754944e-38, %v1218_v14  ;;  %vm1217_vm13 = vcmp.eq.f32.partialorder %v1216_v23, 8.507059e+37 }
 0xc5d   :  { %v1640_v28 = vpop.permute.xlu0 %1639 }
 0xc5e   :  { %v2349_v10 = vpop.eup %2348 }
 0xc5f   :  { %v1208_v11 = vmul.f32 %v2349_v10, %v1203_v9  ;;  %vm1213_vm9 = vweird.f32 %v2349_v10 }
 0xc60   :  { %vm1214_vm12 = vmor %vm1212_vm11, %vm1213_vm9 }
 0xc61   :  { %v1209_v13 = vsub.f32 1.0, %v1208_v11 }
 0xc63   :  { %v1210_v32 = vmul.f32 %v2349_v10, %v1209_v13 }
 0xc65   :  { %v1211_v16 = vadd.f32 %v2349_v10, %v1210_v32 }
 0xc67   :  { %v1215_v18 = vsel %vm1214_vm12, %v2349_v10, %v1211_v16 }
 0xc68   :  { %v1220_v19 = vsel %vm1217_vm13, %v1219_v12, %v1215_v18 }
 0xc69   :  { %v1221_v22 = vmul.f32 %v2343_v55, %v1220_v19 }
 0xc6b   :  { %2183 = vmatmul.msk.f32.vlgmr.msra.gmra.mxu1 %vm921_vm0, %v1221_v22  ;;  %1671 = vrot.lane.b32.xlu0 %v2867_v30, %s2396_s29 }
 0xc6c   :  { %2193 = vmatpush.xpose.msk.msra.mxu1 %vm259_vm10, %v1472_v20 }
 0xc6f   :  { %v1642_v25 = vpop.permute.xlu1 %1641 }
 0xc70   :  { %2194 = vmatpush.xpose.msk.msra.mxu1 %vm259_vm10, %v1470_v57 }
 0xc73   :  { %2190 = vmatmul.msk.f32.vlgmr.msrb.gmra.mxu1 %vm259_vm10, %v1328_v58 }
 0xc74   :  { %2201 = vmatpush.xpose.msk.msrb.mxu1 %vm259_vm10, %v1644_v59 }
 0xc77   :  { %v1676_v54 = vpop.permute.xlu1 %1675 }
 0xc78   :  { %2202 = vmatpush.xpose.msk.msrb.mxu1 %vm259_vm10, %v1642_v25 }
 0xc7b   :  { %2195 = vmatmul.msk.f32.vlgmr.msra.gmra.mxu1 %vm259_vm10, %v1468_v1 }
 0xc83   :  { %2203 = vmatmul.msk.f32.vlgmr.msrb.gmra.mxu1 %vm259_vm10, %v1640_v28 }
 0xc8a   :  { %v1206_v29 = vpop.xlane.xlu2 %1205 }
 0xc8b   :  { %2350 = vrcp.f32 %v1206_v29  ;;  %v1233_v34 = vand.u32 2147483648, %v1206_v29  ;;  %v1231_v17 = vand.u32 2147483647, %v1206_v29  ;;  %vm1227_vm15 = vweird.f32 %v1206_v29 }
 0xc8d   :  { %v1234_v37 = vor.u32 1.1754944e-38, %v1233_v34  ;;  %vm1232_vm4 = vcmp.eq.f32.partialorder %v1231_v17, 8.507059e+37 }
 0xc91   :  { %v2351_v30 = vpop.eup %2350 }
 0xc92   :  { %v1223_v31 = vmul.f32 %v2351_v30, %v1206_v29  ;;  %vm1228_vm14 = vweird.f32 %v2351_v30  ;;  %v1674_v55 = vpop.permute.xlu2 %1673 }
 0xc93   :  { %vm1229_vm3 = vmor %vm1227_vm15, %vm1228_vm14 }
 0xc94   :  { %v1224_v33 = vsub.f32 1.0, %v1223_v31 }
 0xc96   :  { %v1225_v35 = vmul.f32 %v2351_v30, %v1224_v33 }
 0xc98   :  { %v1226_v36 = vadd.f32 %v2351_v30, %v1225_v35 }
 0xc9a   :  { %v1230_v40 = vsel %vm1229_vm3, %v2351_v30, %v1226_v36 }
 0xc9b   :  { %v1235_v42 = vsel %vm1232_vm4, %v1234_v37, %v1230_v40 }
 0xc9c   :  { %v1236_v43 = vmul.f32 %v2345_v63, %v1235_v42 }
 0xc9e   :  { %2184 = vmatmul.msk.f32.vlgmr.msrb.gmra.mxu2 %vm921_vm0, %v1236_v43 }
 0xc9f   :  { %2196 = vmatpush.xpose.msk.msrb.mxu2 %vm259_vm10, %v1504_v41 }
 0xca3   :  { %2197 = vmatpush.xpose.msk.msrb.mxu2 %vm259_vm10, %v1502_v3 }
 0xcca   :  { %v1375_v44 = vpop.xlane.xlu0 %1374 }
 0xccb   :  { %2352 = vrcp.f32 %v1375_v44  ;;  %v1390_v2 = vand.u32 2147483648, %v1375_v44  ;;  %v1388_v48 = vand.u32 2147483647, %v1375_v44  ;;  %vm1384_vm6 = vweird.f32 %v1375_v44 }
 0xccd   :  { %v1391_v50 = vor.u32 1.1754944e-38, %v1390_v2  ;;  %vm1389_vm8 = vcmp.eq.f32.partialorder %v1388_v48, 8.507059e+37 }
 0xcd1   :  { %v2353_v45 = vpop.eup %2352 }
 0xcd2   :  { %v1380_v46 = vmul.f32 %v2353_v45, %v1375_v44  ;;  %vm1385_vm5 = vweird.f32 %v2353_v45 }
 0xcd3   :  { %vm1386_vm7 = vmor %vm1384_vm6, %vm1385_vm5 }
 0xcd4   :  { %v1381_v47 = vsub.f32 1.0, %v1380_v46 }
 0xcd6   :  { %v1382_v21 = vmul.f32 %v2353_v45, %v1381_v47 }
 0xcd8   :  { %v1383_v49 = vadd.f32 %v2353_v45, %v1382_v21 }
 0xcda   :  { %v1387_v51 = vsel %vm1386_vm7, %v2353_v45, %v1383_v49 }
 0xcdb   :  { %v1392_v52 = vsel %vm1389_vm8, %v1391_v50, %v1387_v51 }
 0xcdc   :  { %v1393_v53 = vmul.f32 %v2894_v7, %v1392_v52 }
 0xcdd   :  { %v1672_v57 = vpop.permute.xlu0 %1671 }
 0xcde   :  { %2191 = vmatmul.msk.f32.vlgmr.msra.gmra.mxu2 %vm921_vm0, %v1393_v53 }
 0xcdf   :  { %2204 = vmatpush.xpose.msk.msra.mxu2 %vm259_vm10, %v1676_v54 }
 0xce3   :  { %2205 = vmatpush.xpose.msk.msra.mxu2 %vm259_vm10, %v1674_v55 }
 0xce6   :  { %2198 = vmatmul.msk.f32.vlgmr.msrb.gmra.mxu2 %vm259_vm10, %v1500_v26 }
 0xce8   :  { %v2916_v56 = vpop.f32.mrf.mxu1 }
 0xcee   :  { %2206 = vmatmul.msk.f32.vlgmr.msra.gmra.mxu2 %vm259_vm10, %v1672_v57 }
 0xcf0   :  { %v1356_v58 = vpop.f32.mrf.mxu1 }
 0xcf1   :  { %v1360_v59 = vmul.f32 0.35355338, %v1356_v58 }
 0xcf3   :  { %v1364_v60 = vsel %vm921_vm0, %v1360_v59, -inf }
 0xcf4   :  { %1365 = vmax.xlane.f32.xlu2 %v1364_v60 }
 0xcf8   :  { %v1496_v61 = vpop.f32.mrf.mxu1 }
 0xcf9   :  { %v1531_v39 = vmul.f32 0.35355338, %v1496_v61 }
 0xcfb   :  { %v1533_v63 = vsel %vm921_vm0, %v1531_v39, -inf }
 0xcfc   :  { %1534 = vmax.xlane.f32.xlu1 %v1533_v63 }
 0xd00   :  { %v1668_v0 = vpop.f32.mrf.mxu1 }
 0xd01   :  { %v1703_v20 = vmul.f32 0.35355338, %v1668_v0 }
 0xd03   :  { %v1705_v1 = vsel %vm921_vm0, %v1703_v20, -inf }
 0xd04   :  { %1706 = vmax.xlane.f32.xlu0 %v1705_v1 }
 0xd18   :  { %2266 = vrot.lane.b32.xlu0 %v2857_v24, %s2389_s0  ;;  %s3132_s0 = smov 8  }
 0xd21   :  { %v2924_v3 = vpop.f32.mrf.mxu2 }
 0xd61   :  { %v2926_v4 = vpop.f32.mrf.mxu2 }
 0xd67   :  { %v1366_v28 = vpop.xlane.xlu2 %1365 }
 0xd68   :  { %v1368_v29 = vsub.f32 %v1360_v59, %v1366_v28 }
 0xd69   :  { %v1528_v5 = vpop.f32.mrf.mxu2 }
 0xd6a   :  { %v1532_v6 = vmul.f32 0.35355338, %v1528_v5  ;;  %v1371_v30 = vmul.f32 1.442695, %v1368_v29 }
 0xd6c   :  { %v1536_v41 = vsel %vm921_vm0, %v1532_v6, -inf }
 0xd6d   :  { %1537 = vmax.xlane.f32.xlu2 %v1536_v41 }
 0xd6f   :  { %v1535_v7 = vpop.xlane.xlu1 %1534 }
 0xd70   :  { %v1539_v8 = vsub.f32 %v1531_v39, %v1535_v7 }
 0xd71   :  { %v1700_v9 = vpop.f32.mrf.mxu2 }
 0xd72   :  { %v1541_v10 = vmul.f32 1.442695, %v1539_v8  ;;  %v1704_v11 = vmul.f32 0.35355338, %v1700_v9 }
 0xd74   :  { %2354 = vpow2.f32 %v1541_v10  ;;  %v1708_v13 = vsel %vm921_vm0, %v1704_v11, -inf }
 0xd75   :  { %1709 = vmax.xlane.f32.xlu1 %v1708_v13 }
 0xd77   :  { %v1707_v14 = vpop.xlane.xlu0 %1706 }
 0xd78   :  { %v1711_v32 = vsub.f32 %v1703_v20, %v1707_v14 }
 0xd7a   :  { %v2355_v23 = vpop.eup %2354  ;;  %v1713_v16 = vmul.f32 1.442695, %v1711_v32 }
 0xd7b   :  { %v1545_v12 = vsel %vm921_vm0, %v2355_v23, 0.0 }
 0xd7c   :  { %2356 = vpow2.f32 %v1713_v16  ;;  %1546 = vadd.xlane.f32.xlu0 %v1545_v12 }
 0xd7d   :  { %2358 = vpow2.f32 %v1371_v30 }
 0xd82   :  { %v2931_v18 = vpop.eup %2356 }
 0xd83   :  { %v1717_v19 = vsel %vm921_vm0, %v2931_v18, 0.0  ;;  %v2359_v31 = vpop.eup %2358 }
 0xd84   :  { %1718 = vadd.xlane.f32.xlu1 %v1717_v19  ;;  %v1376_v33 = vsel %vm921_vm0, %v2359_v31, 0.0 }
 0xd85   :  { %2261 = vrot.lane.b32.xlu2 %v2828_v15, %s2392_s25 }
 0xd8a   :  { %v2267_v22 = vpop.permute.xlu0 %2266 }
 0xd8b   :  { %v2268_v25 = vunpack.i.l.bf16 %v2267_v22  ;;  %v2269_v26 = vunpack.i.h.bf16 %v2267_v22 }
 0xd8d   :  { %1461 = vmatpush.msrb.mxu0 %v2268_v25 }
 0xd8f   :  { %1462 = vmatpush.msrb.mxu0 %v2269_v26 }
 0xdae   :  { %1377 = vadd.xlane.f32.xlu2 %v1376_v33 }
 0xdc6   :  { %2281 = vrot.lane.b32.xlu2 %v2857_v24, %s3131_s23 }
 0xde0   :  { %v1538_v34 = vpop.xlane.xlu2 %1537 }
 0xde1   :  { %v1540_v35 = vsub.f32 %v1532_v6, %v1538_v34 }
 0xde3   :  { %v1543_v17 = vmul.f32 1.442695, %v1540_v35 }
 0xde5   :  { %2360 = vpow2.f32 %v1543_v17 }
 0xde8   :  { %v1710_v36 = vpop.xlane.xlu1 %1709  ;;  %v2262_v37 = vpop.permute.xlu2 %2261 }
 0xde9   :  { %v1712_v40 = vsub.f32 %v1704_v11, %v1710_v36  ;;  %v2263_v42 = vunpack.i.l.bf16 %v2262_v37  ;;  %v2264_v45 = vunpack.i.h.bf16 %v2262_v37 }
 0xdeb   :  { %v2940_v43 = vpop.eup %2360  ;;  %v1715_v44 = vmul.f32 1.442695, %v1712_v40  ;;  %1604 = vmatpush.msra.mxu3 %v2263_v42 }
 0xdec   :  { %v1548_v46 = vsel %vm921_vm0, %v2940_v43, 0.0 }
 0xded   :  { %2362 = vpow2.f32 %v1715_v44  ;;  %1549 = vadd.xlane.f32.xlu0 %v1548_v46  ;;  %1605 = vmatpush.msra.mxu3 %v2264_v45 }
 0xdef   :  { %v1547_v47 = vpop.xlane.xlu0 %1546 }
 0xdf0   :  { %2364 = vrcp.f32 %v1547_v47  ;;  %v1562_v51 = vand.u32 2147483648, %v1547_v47  ;;  %v1560_v53 = vand.u32 2147483647, %v1547_v47  ;;  %vm1556_vm11 = vweird.f32 %v1547_v47 }
 0xdf2   :  { %v1563_v55 = vor.u32 1.1754944e-38, %v1562_v51  ;;  %vm1561_vm13 = vcmp.eq.f32.partialorder %v1560_v53, 8.507059e+37 }
 0xdf3   :  { %v2944_v2 = vpop.eup %2362 }
 0xdf4   :  { %v1720_v21 = vsel %vm921_vm0, %v2944_v2, 0.0 }
 0xdf5   :  { %1721 = vadd.xlane.f32.xlu1 %v1720_v21 }
 0xdf6   :  { %v2365_v48 = vpop.eup %2364 }
 0xdf7   :  { %v1552_v49 = vmul.f32 %v2365_v48, %v1547_v47  ;;  %vm1557_vm9 = vweird.f32 %v2365_v48 }
 0xdf8   :  { %vm1558_vm12 = vmor %vm1556_vm11, %vm1557_vm9 }
 0xdf9   :  { %v1553_v50 = vsub.f32 1.0, %v1552_v49 }
 0xdfb   :  { %v1554_v52 = vmul.f32 %v2365_v48, %v1553_v50 }
 0xdfd   :  { %v1555_v54 = vadd.f32 %v2365_v48, %v1554_v52 }
 0xdff   :  { %v1559_v57 = vsel %vm1558_vm12, %v2365_v48, %v1555_v54 }
 0xe00   :  { %v1564_v58 = vsel %vm1561_vm13, %v1563_v55, %v1559_v57 }
 0xe01   :  { %2276 = vrot.lane.b32.xlu0 %v2857_v24, %s2392_s25  ;;  %v1565_v59 = vmul.f32 %v2355_v23, %v1564_v58 }
 0xe03   :  { %2199 = vmatmul.msk.f32.vlgmr.msra.gmra.mxu3 %vm921_vm0, %v1565_v59 }
 0xe09   :  { %1813 = vrot.lane.b32.xlu0 %v2926_v4, %s3132_s0 }
 0xe0e   :  { %2271 = vrot.lane.b32.xlu1 %v2828_v15, %s3131_s23  ;;  %v1719_v15 = vpop.xlane.xlu1 %1718 }
 0xe0f   :  { %v1734_v49 = vand.u32 2147483648, %v1719_v15  ;;  %v1732_v50 = vand.u32 2147483647, %v1719_v15 }
 0xe21   :  { %v1378_v60 = vpop.xlane.xlu2 %1377 }
 0xe22   :  { %2366 = vrcp.f32 %v1378_v60  ;;  %v1405_v0 = vand.u32 2147483648, %v1378_v60  ;;  %v1403_v1 = vand.u32 2147483647, %v1378_v60  ;;  %vm1399_vm15 = vweird.f32 %v1378_v60 }
 0xe24   :  { %v1406_v24 = vor.u32 1.1754944e-38, %v1405_v0  ;;  %vm1404_vm4 = vcmp.eq.f32.partialorder %v1403_v1, 8.507059e+37  ;;  %v2166_v0 = vld [vmem:[%s3097_s9 + $0x30] sm:$0xff]  ;;  %v2164_v1 = vld [vmem:[%s3097_s9 + $0x20] sm:$0xff] }
 0xe28   :  { %v2367_v61 = vpop.eup %2366 }
 0xe29   :  { %v1395_v39 = vmul.f32 %v2367_v61, %v1378_v60  ;;  %vm1400_vm14 = vweird.f32 %v2367_v61  ;;  %v2282_v35 = vpop.permute.xlu2 %2281 }
 0xe2a   :  { %vm1401_vm3 = vmor %vm1399_vm15, %vm1400_vm14  ;;  %v2283_v45 = vunpack.i.l.bf16 %v2282_v35  ;;  %v2284_v21 = vunpack.i.h.bf16 %v2282_v35  ;;  %vm1728_vm15 = vweird.f32 %v1719_v15 }
 0xe2b   :  { %v1396_v63 = vsub.f32 1.0, %v1395_v39 }
 0xe2d   :  { %v1397_v20 = vmul.f32 %v2367_v61, %v1396_v63 }
 0xe2f   :  { %v1398_v5 = vadd.f32 %v2367_v61, %v1397_v20  ;;  %v2165_v20 = vld [vmem:[%s3097_s9 + $0x28] sm:$0xff] }
 0xe31   :  { %v1402_v6 = vsel %vm1401_vm3, %v2367_v61, %v1398_v5 }
 0xe32   :  { %v1407_v41 = vsel %vm1404_vm4, %v1406_v24, %v1402_v6  ;;  %vm1733_vm4 = vcmp.eq.f32.partialorder %v1732_v50, 8.507059e+37 }
 0xe33   :  { %v1408_v4 = vmul.f32 %v2359_v31, %v1407_v41 }
 0xe35   :  { %2192 = vmatmul.msk.f32.vlgmr.msrb.gmra.mxu0 %vm921_vm0, %v1408_v4 }
 0xe60   :  { %v1550_v7 = vpop.xlane.xlu0 %1549 }
 0xe61   :  { %2368 = vrcp.f32 %v1550_v7  ;;  %v1577_v16 = vand.u32 2147483648, %v1550_v7  ;;  %vm1571_vm6 = vweird.f32 %v1550_v7  ;;  %v1575_v19 = vand.u32 2147483647, %v1550_v7 }
 0xe62   :  { %2370 = vrcp.f32 %v1719_v15 }
 0xe63   :  { %v1578_v28 = vor.u32 1.1754944e-38, %v1577_v16  ;;  %vm1576_vm8 = vcmp.eq.f32.partialorder %v1575_v19, 8.507059e+37 }
 0xe67   :  { %v2369_v8 = vpop.eup %2368 }
 0xe68   :  { %v1567_v9 = vmul.f32 %v2369_v8, %v1550_v7  ;;  %v1722_v10 = vpop.xlane.xlu1 %1721  ;;  %v2371_v13 = vpop.eup %2370  ;;  %vm1572_vm5 = vweird.f32 %v2369_v8 }
 0xe69   :  { %2372 = vrcp.f32 %v1722_v10  ;;  %v1724_v32 = vmul.f32 %v2371_v13, %v1719_v15  ;;  %vm1573_vm7 = vmor %vm1571_vm6, %vm1572_vm5  ;;  %v1749_v37 = vand.u32 2147483648, %v1722_v10  ;;  %vm1743_vm11 = vweird.f32 %v1722_v10 }
 0xe6a   :  { %v1568_v11 = vsub.f32 1.0, %v1567_v9  ;;  %v1747_v42 = vand.u32 2147483647, %v1722_v10  ;;  %vm1729_vm13 = vweird.f32 %v2371_v13 }
 0xe6b   :  { %v1725_v26 = vsub.f32 1.0, %v1724_v32  ;;  %v1750_v48 = vor.u32 1.1754944e-38, %v1749_v37  ;;  %vm1730_vm3 = vmor %vm1728_vm15, %vm1729_vm13  ;;  %v1929_v37 = vld [vmem:[%s3103_s13] sm:$0xff] }
 0xe6c   :  { %v1569_v14 = vmul.f32 %v2369_v8, %v1568_v11  ;;  %vm1748_vm14 = vcmp.eq.f32.partialorder %v1747_v42, 8.507059e+37 }
 0xe6d   :  { %v1726_v17 = vmul.f32 %v2371_v13, %v1725_v26 }
 0xe6e   :  { %v1570_v23 = vadd.f32 %v2369_v8, %v1569_v14 }
 0xe6f   :  { %v2373_v12 = vpop.eup %2372  ;;  %v1727_v47 = vadd.f32 %v2371_v13, %v1726_v17  ;;  %v1931_v17 = vld [vmem:[%s3103_s13 + $0x10] sm:$0xff] }
 0xe70   :  { %v1739_v22 = vmul.f32 %v2373_v12, %v1722_v10  ;;  %v1574_v25 = vsel %vm1573_vm7, %v2369_v8, %v1570_v23  ;;  %vm1744_vm9 = vweird.f32 %v2373_v12 }
 0xe71   :  { %v1579_v31 = vsel %vm1576_vm8, %v1578_v28, %v1574_v25  ;;  %vm1745_vm12 = vmor %vm1743_vm11, %vm1744_vm9  ;;  %v1731_v52 = vsel %vm1730_vm3, %v2371_v13, %v1727_v47  ;;  %vm1998_vm8 = vcmask 523264  }
 0xe72   :  { %v1740_v29 = vsub.f32 1.0, %v1739_v22  ;;  %v1580_v44 = vmul.f32 %v2940_v43, %v1579_v31  ;;  %v1735_v43 = vor.u32 1.1754944e-38, %v1734_v49 }
 0xe73   :  { %v2277_v30 = vpop.permute.xlu0 %2276 }
 0xe74   :  { %v1741_v33 = vmul.f32 %v2373_v12, %v1740_v29  ;;  %v2278_v34 = vunpack.i.l.bf16 %v2277_v30  ;;  %v2279_v40 = vunpack.i.h.bf16 %v2277_v30  ;;  %v1736_v55 = vsel %vm1733_vm4, %v1735_v43, %v1731_v52 }
 0xe75   :  { %v1737_v59 = vmul.f32 %v2931_v18, %v1736_v55  ;;  %v2167_v18 = vld [vmem:[%s3097_s9 + $0x38] sm:$0xff] }
 0xe76   :  { %v1742_v36 = vadd.f32 %v2373_v12, %v1741_v33  ;;  %1633 = vmatpush.msra.mxu0 %v2278_v34  ;;  %1862 = vmatpush.msra.mxu1 %v2167_v18 }
 0xe78   :  { %1634 = vmatpush.msra.mxu0 %v2279_v40  ;;  %v1746_v46 = vsel %vm1745_vm12, %v2373_v12, %v1742_v36  ;;  %1863 = vmatpush.msra.mxu1 %v2166_v0  ;;  %v1930_v36 = vld [vmem:[%s3103_s13 + $0x8] sm:$0xff] }
 0xe79   :  { %2200 = vmatmul.msk.f32.vlgmr.msra.gmra.mxu0 %vm921_vm0, %v1580_v44  ;;  %v1751_v51 = vsel %vm1748_vm14, %v1750_v48, %v1746_v46 }
 0xe7a   :  { %1805 = vmatpush.msrb.mxu0 %v2283_v45  ;;  %v1752_v53 = vmul.f32 %v2944_v2, %v1751_v51  ;;  %1864 = vmatpush.msra.mxu1 %v2165_v20 }
 0xe7b   :  { %v1814_v5 = vpop.permute.xlu0 %1813 }
 0xe7c   :  { %1806 = vmatpush.msrb.mxu0 %v2284_v21  ;;  %1865 = vmatpush.msra.mxu1 %v2164_v1  ;;  %v1835_v6 = vsel %vm259_vm10, %v2916_v56, %v1814_v5  ;;  %v2292_v56 = vld [vmem:[%s3098_s10 + $0x1] ss:$0 sm:$0xff]  ;;  %v1941_v5 = vld [vmem:[%s3105_s15 + $0x38] sm:$0xff] }
 0xe80   :  { %v2272_v54 = vpop.permute.xlu1 %2271 }
 0xe81   :  { %v2273_v57 = vunpack.i.l.bf16 %v2272_v54  ;;  %2208 = vmatmul.msk.f32.vlgmr.msrb.gmra.mxu0 %vm921_vm0, %v1752_v53  ;;  %v2274_v58 = vunpack.i.h.bf16 %v2272_v54  ;;  %v2293_v54 = vld [vmem:[%s3099_s11 + $0x1] ss:$0 sm:$0xff] }
 0xe83   :  { %1776 = vmatpush.msrb.mxu3 %v2273_v57 }
 0xe85   :  { %1777 = vmatpush.msrb.mxu3 %v2274_v58 }
 0xe86   :  { %v1607_v60 = vpop.f32.mrf.mxu3  ;;  %2207 = vmatmul.msk.f32.vlgmr.msrb.gmra.mxu3 %vm921_vm0, %v1737_v59  ;;  %v2294_v59 = vld [vmem:[%s3100_s12 + $0x1] ss:$0 sm:$0xff] }
 0xe87   :  { %1821 = vrot.lane.b32.xlu2 %v1607_v60, %s3133_s24  ;;  %2013 = vmatpush.msra.mxu3 %v1941_v5 }
 0xeb2   :  { %v1464_v61 = vpop.f32.mrf.mxu0 }
 0xeb3   :  { %1815 = vrot.lane.b32.xlu0 %v1464_v61, %s3132_s0 }
 0xee1   :  { %v1822_v24 = vpop.permute.xlu2 %1821 }
 0xee2   :  { %v1837_v41 = vsel %vm921_vm0, %v1835_v6, %v1822_v24  ;;  %v1940_v24 = vld [vmem:[%s3105_s15 + $0x30] sm:$0xff]  ;;  %v1939_v6 = vld [vmem:[%s3105_s15 + $0x28] sm:$0xff] }
 0xee3   :  { %2014 = vmatpush.msra.mxu3 %v1940_v24 }
 0xee5   :  { %2015 = vmatpush.msra.mxu3 %v1939_v6 }
 0xef6   :  { %v1636_v2 = vpop.f32.mrf.mxu0 }
 0xef7   :  { %1823 = vrot.lane.b32.xlu2 %v1636_v2, %s3133_s24 }
 0xefe   :  { %v1808_v63 = vpop.f32.mrf.mxu0 }
 0xf09   :  { %v1779_v39 = vpop.f32.mrf.mxu3 }
 0xf0a   :  { %1829 = vrot.lane.b32.xlu1 %v1779_v39, %s2402_s4 }
 0xf12   :  { %1831 = vrot.lane.b32.xlu1 %v1808_v63, %s2402_s4 }
 0xf25   :  { %v1816_v7 = vpop.permute.xlu0 %1815 }
 0xf26   :  { %v1836_v9 = vsel %vm259_vm10, %v2924_v3, %v1816_v7  ;;  %v1935_v7 = vld [vmem:[%s3105_s15 + $0x8] sm:$0xff] }
 0xf51   :  { %v1824_v8 = vpop.permute.xlu2 %1823 }
 0xf52   :  { %v1838_v10 = vsel %vm921_vm0, %v1836_v9, %v1824_v8  ;;  %v1934_v8 = vld [vmem:[%s3105_s15] sm:$0xff] }
 0xf53   :  { %v2295_v9 = vld [vmem:[%s3102_s14] ss:$0 sm:$0xff] }
 0xf7c   :  { %v1830_v4 = vpop.permute.xlu1 %1829 }
 0xf7d   :  { %v1839_v15 = vsel %vm924_vm1, %v1837_v41, %v1830_v4  ;;  %v1938_v41 = vld [vmem:[%s3105_s15 + $0x20] sm:$0xff]  ;;  %v1937_v4 = vld [vmem:[%s3105_s15 + $0x18] sm:$0xff] }
 0xf7e   :  { %2209 = vmatmul.msk.f32.vlgmr.msra.gmra.mxu1 %vm135_vm2, %v1839_v15  ;;  %2016 = vmatpush.msra.mxu3 %v1938_v41  ;;  %v1936_v15 = vld [vmem:[%s3105_s15 + $0x10] sm:$0xff] }
 0xf80   :  { %2017 = vmatpush.msra.mxu3 %v1937_v4 }
 0xf82   :  { %2018 = vmatpush.msra.mxu3 %v1936_v15  ;;  %v2297_v15 = vld [vmem:[%s3106_s17] ss:$0 sm:$0xff] }
 0xf84   :  { %v1832_v11 = vpop.permute.xlu1 %1831  ;;  %2019 = vmatpush.msra.mxu3 %v1935_v7 }
 0xf85   :  { %v1840_v13 = vsel %vm924_vm1, %v1838_v10, %v1832_v11 }
 0xf86   :  { %2210 = vmatmul.msk.f32.gmra.mxu1 %vm135_vm2, %v1840_v13  ;;  %2020 = vmatpush.msra.mxu3 %v1934_v8 }
 0xffb   :  { %v1867_v14 = vpop.f32.mrf.mxu1 }
 0xffc   :  { %v1868_v32 = vadd.f32 %v2292_v56, %v1867_v14 }
 0xffe   :  { %v1873_v23 = vadd.f32 %v1868_v32, %v2814_v62 }
0x1000   :  { %v1875_v16 = vsel %vm135_vm2, %v1873_v23, 0.0 }
0x1001   :  { %1876 = vadd.xlane.f32.xlu0 %v1875_v16 }
0x1003   :  { %v1870_v12 = vpop.f32.mrf.mxu1 }
0x1004   :  { %v1871_v3 = vadd.f32 %v2292_v56, %v1870_v12 }
0x1006   :  { %v1874_v19 = vadd.f32 %v1871_v3, %v2819_v27  ;;  %v1932_v27 = vld [vmem:[%s3103_s13 + $0x18] sm:$0xff] }
0x1007   :  { %1966 = vmatpush.msrb.mxu2 %v1932_v27  ;;  %v2296_v27 = vld [vmem:[%s3104_s16] ss:$0 sm:$0xff] }
0x1008   :  { %v1878_v22 = vsel %vm135_vm2, %v1874_v19, 0.0 }
0x1009   :  { %1879 = vadd.xlane.f32.xlu2 %v1878_v22  ;;  %1967 = vmatpush.msrb.mxu2 %v1931_v17 }
0x100b   :  { %1968 = vmatpush.msrb.mxu2 %v1930_v36 }
0x100d   :  { %1969 = vmatpush.msrb.mxu2 %v1929_v37 }
0x1074   :  { %v1877_v25 = vpop.xlane.xlu0 %1876 }
0x1075   :  { %v1881_v26 = vmul.f32 %v1877_v25, %v2576_v38 }
0x1077   :  { %v1883_v28 = vsub.f32 %v1873_v23, %v1881_v26 }
0x1079   :  { %v1885_v29 = vmul.f32 %v1883_v28, %v1883_v28 }
0x107b   :  { %v1887_v30 = vsel %vm135_vm2, %v1885_v29, 0.0 }
0x107c   :  { %1888 = vadd.xlane.f32.xlu1 %v1887_v30  ;;  %v1880_v31 = vpop.xlane.xlu2 %1879 }
0x107d   :  { %v1882_v62 = vmul.f32 %v1880_v31, %v2576_v38 }
0x107f   :  { %v1884_v33 = vsub.f32 %v1874_v19, %v1882_v62 }
0x1081   :  { %v1886_v34 = vmul.f32 %v1884_v33, %v1884_v33 }
0x1083   :  { %v1890_v35 = vsel %vm135_vm2, %v1886_v34, 0.0 }
0x1084   :  { %1891 = vadd.xlane.f32.xlu0 %v1890_v35 }
0x10ef   :  { %v1889_v40 = vpop.xlane.xlu1 %1888 }
0x10f0   :  { %v1893_v42 = vmul.f32 %v1889_v40, %v2576_v38 }
0x10f2   :  { %v1895_v44 = vadd.f32 1e-12, %v1893_v42 }
0x10f4   :  { %2374 = vrsqrt.f32 %v1895_v44  ;;  %vm1903_vm0 = vweird.f32 %v1895_v44 }
0x10f7   :  { %v1892_v45 = vpop.xlane.xlu0 %1891 }
0x10f8   :  { %v1894_v46 = vmul.f32 %v1892_v45, %v2576_v38 }
0x10fa   :  { %v2375_v47 = vpop.eup %2374  ;;  %v1896_v21 = vadd.f32 1e-12, %v1894_v46 }
0x10fb   :  { %v1898_v48 = vmul.f32 %v2375_v47, %v1895_v44  ;;  %vm1904_vm10 = vweird.f32 %v2375_v47 }
0x10fc   :  { %2376 = vrsqrt.f32 %v1896_v21  ;;  %vm1905_vm1 = vmor %vm1903_vm0, %vm1904_vm10  ;;  %vm1913_vm6 = vweird.f32 %v1896_v21 }
0x10fd   :  { %v1899_v49 = vmul.f32 %v2375_v47, %v1898_v48 }
0x10ff   :  { %v1900_v50 = vmul.f32 0.5, %v1899_v49 }
0x1101   :  { %v1901_v51 = vsub.f32 1.5, %v1900_v50 }
0x1102   :  { %v2377_v52 = vpop.eup %2376 }
0x1103   :  { %v1902_v43 = vmul.f32 %v2375_v47, %v1901_v51  ;;  %v1908_v53 = vmul.f32 %v2377_v52, %v1896_v21  ;;  %vm1914_vm5 = vweird.f32 %v2377_v52 }
0x1104   :  { %vm1915_vm7 = vmor %vm1913_vm6, %vm1914_vm5 }
0x1105   :  { %v1906_v55 = vsel %vm1905_vm1, %v2375_v47, %v1902_v43  ;;  %v1909_v57 = vmul.f32 %v2377_v52, %v1908_v53 }
0x1106   :  { %v1917_v58 = vmul.f32 %v1906_v55, %v1883_v28  ;;  %v2087_v55 = vld [vmem:[%s3109_s19 + $0x18] sm:$0xff] }
0x1107   :  { %v1910_v60 = vmul.f32 0.5, %v1909_v57  ;;  %2110 = vmatpush.msra.mxu0 %v2087_v55  ;;  %v2086_v57 = vld [vmem:[%s3109_s19 + $0x10] sm:$0xff] }
0x1108   :  { %v1922_v61 = vmul.f32 %v2293_v54, %v1917_v58  ;;  %v2085_v58 = vld [vmem:[%s3109_s19 + $0x8] sm:$0xff] }
0x1109   :  { %v1911_v2 = vsub.f32 1.5, %v1910_v60  ;;  %2111 = vmatpush.msra.mxu0 %v2086_v57 }
0x110a   :  { %v1927_v39 = vadd.f32 %v2294_v59, %v1922_v61 }
0x110b   :  { %v1912_v63 = vmul.f32 %v2377_v52, %v1911_v2  ;;  %2112 = vmatpush.msra.mxu0 %v2085_v58 }
0x110c   :  { %2211 = vmatmul.msk.f32.vlgmr.msrb.gmra.mxu2 %vm135_vm2, %v1927_v39 }
0x110d   :  { %v1916_v18 = vsel %vm1915_vm7, %v2377_v52, %v1912_v63 }
0x110e   :  { %v1918_v0 = vmul.f32 %v1916_v18, %v1884_v33 }
0x1110   :  { %v1923_v20 = vmul.f32 %v2293_v54, %v1918_v0 }
0x1112   :  { %v1928_v1 = vadd.f32 %v2294_v59, %v1923_v20  ;;  %v2084_v59 = vld [vmem:[%s3109_s19] sm:$0xff] }
0x1113   :  { %2113 = vmatpush.msra.mxu0 %v2084_v59 }
0x1114   :  { %2212 = vmatmul.msk.f32.gmra.mxu2 %vm135_vm2, %v1928_v1 }
0x118f   :  { %v1971_v10 = vpop.f32.mrf.mxu2 }
0x1190   :  { %v1972_v11 = vadd.f32 %v2295_v9, %v1971_v10 }
0x1192   :  { %v1977_v13 = vmul.f32 %v1972_v11, %v1972_v11 }
0x1194   :  { %v1979_v56 = vmul.f32 %v1977_v13, %v1972_v11 }
0x1196   :  { %v1981_v14 = vmul.f32 0.044715, %v1979_v56 }
0x1197   :  { %v1974_v32 = vpop.f32.mrf.mxu2 }
0x1198   :  { %v1983_v23 = vadd.f32 %v1981_v14, %v1972_v11  ;;  %v1975_v16 = vadd.f32 %v2295_v9, %v1974_v32  ;;  %v2298_v9 = vld [vmem:[%s3107_s18] ss:$0 sm:$0xff] }
0x119a   :  { %v1985_v12 = vmul.f32 0.7978846, %v1983_v23  ;;  %v1978_v3 = vmul.f32 %v1975_v16, %v1975_v16 }
0x119c   :  { %2378 = vtanh.f32 %v1985_v12  ;;  %v1980_v19 = vmul.f32 %v1978_v3, %v1975_v16  ;;  %v2299_v3 = vld [vmem:[%s3108_s20] ss:$0 sm:$0xff] }
0x119e   :  { %v1982_v22 = vmul.f32 0.044715, %v1980_v19 }
0x11a0   :  { %v1984_v25 = vadd.f32 %v1982_v22, %v1975_v16 }
0x11a2   :  { %v2379_v26 = vpop.eup %2378  ;;  %v1986_v28 = vmul.f32 0.7978846, %v1984_v25 }
0x11a3   :  { %v1989_v29 = vadd.f32 1.0, %v2379_v26 }
0x11a4   :  { %2380 = vtanh.f32 %v1986_v28 }
0x11a5   :  { %v1991_v30 = vmul.f32 0.5, %v1989_v29 }
0x11a7   :  { %v1993_v31 = vmul.f32 %v1991_v30, %v1972_v11 }
0x11a9   :  { %2213 = vmatmul.msk.f32.vlgmr.msra.gmra.mxu3 %vm1998_vm8, %v1993_v31 }
0x11aa   :  { %v2381_v62 = vpop.eup %2380 }
0x11ab   :  { %v1990_v33 = vadd.f32 1.0, %v2381_v62 }
0x11ad   :  { %v1992_v34 = vmul.f32 0.5, %v1990_v33 }
0x11af   :  { %v1994_v35 = vmul.f32 %v1992_v34, %v1975_v16 }
0x11b1   :  { %2214 = vmatmul.msk.f32.gmra.mxu3 %vm1998_vm8, %v1994_v35 }
0x122c   :  { %v2022_v17 = vpop.f32.mrf.mxu3 }
0x122d   :  { %v2023_v36 = vadd.f32 %v2296_v27, %v2022_v17 }
0x122f   :  { %v2028_v37 = vadd.f32 %v2023_v36, %v1927_v39 }
0x1231   :  { %v2030_v40 = vsel %vm135_vm2, %v2028_v37, 0.0 }
0x1232   :  { %2031 = vadd.xlane.f32.xlu2 %v2030_v40 }
0x1234   :  { %v2025_v42 = vpop.f32.mrf.mxu3 }
0x1235   :  { %v2026_v44 = vadd.f32 %v2296_v27, %v2025_v42 }
0x1237   :  { %v2029_v45 = vadd.f32 %v2026_v44, %v1928_v1 }
0x1239   :  { %v2033_v46 = vsel %vm135_vm2, %v2029_v45, 0.0 }
0x123a   :  { %2034 = vadd.xlane.f32.xlu1 %v2033_v46 }
0x12a5   :  { %v2032_v47 = vpop.xlane.xlu2 %2031 }
0x12a6   :  { %v2036_v21 = vmul.f32 %v2032_v47, %v2576_v38 }
0x12a8   :  { %v2038_v48 = vsub.f32 %v2028_v37, %v2036_v21 }
0x12aa   :  { %v2040_v49 = vmul.f32 %v2038_v48, %v2038_v48 }
0x12ac   :  { %v2042_v50 = vsel %vm135_vm2, %v2040_v49, 0.0 }
0x12ad   :  { %v2035_v51 = vpop.xlane.xlu1 %2034  ;;  %2043 = vadd.xlane.f32.xlu0 %v2042_v50 }
0x12ae   :  { %v2037_v52 = vmul.f32 %v2035_v51, %v2576_v38 }
0x12b0   :  { %v2039_v43 = vsub.f32 %v2029_v45, %v2037_v52 }
0x12b2   :  { %v2041_v53 = vmul.f32 %v2039_v43, %v2039_v43 }
0x12b4   :  { %v2045_v54 = vsel %vm135_vm2, %v2041_v53, 0.0 }
0x12b5   :  { %2046 = vadd.xlane.f32.xlu2 %v2045_v54 }
0x1320   :  { %v2044_v60 = vpop.xlane.xlu0 %2043 }
0x1321   :  { %v2048_v61 = vmul.f32 %v2044_v60, %v2576_v38 }
0x1323   :  { %v2050_v2 = vadd.f32 1e-12, %v2048_v61 }
0x1325   :  { %2382 = vrsqrt.f32 %v2050_v2  ;;  %vm2058_vm11 = vweird.f32 %v2050_v2 }
0x1328   :  { %v2047_v39 = vpop.xlane.xlu2 %2046 }
0x1329   :  { %v2049_v63 = vmul.f32 %v2047_v39, %v2576_v38 }
0x132b   :  { %v2383_v18 = vpop.eup %2382  ;;  %v2051_v0 = vadd.f32 1e-12, %v2049_v63 }
0x132c   :  { %v2053_v20 = vmul.f32 %v2383_v18, %v2050_v2  ;;  %vm2059_vm9 = vweird.f32 %v2383_v18 }
0x132d   :  { %2384 = vrsqrt.f32 %v2051_v0  ;;  %vm2060_vm12 = vmor %vm2058_vm11, %vm2059_vm9  ;;  %vm2068_vm14 = vweird.f32 %v2051_v0 }
0x132e   :  { %v2054_v1 = vmul.f32 %v2383_v18, %v2053_v20 }
0x1330   :  { %v2055_v5 = vmul.f32 0.5, %v2054_v1 }
0x1332   :  { %v2056_v24 = vsub.f32 1.5, %v2055_v5 }
0x1333   :  { %v2385_v6 = vpop.eup %2384 }
0x1334   :  { %v2057_v41 = vmul.f32 %v2383_v18, %v2056_v24  ;;  %v2063_v4 = vmul.f32 %v2385_v6, %v2051_v0  ;;  %vm2069_vm13 = vweird.f32 %v2385_v6 }
0x1335   :  { %vm2070_vm15 = vmor %vm2068_vm14, %vm2069_vm13 }
0x1336   :  { %v2061_v7 = vsel %vm2060_vm12, %v2383_v18, %v2057_v41  ;;  %v2064_v8 = vmul.f32 %v2385_v6, %v2063_v4 }
0x1337   :  { %v2072_v38 = vmul.f32 %v2061_v7, %v2038_v48 }
0x1338   :  { %v2065_v10 = vmul.f32 0.5, %v2064_v8 }
0x1339   :  { %v2077_v11 = vmul.f32 %v2297_v15, %v2072_v38 }
0x133a   :  { %v2066_v13 = vsub.f32 1.5, %v2065_v10 }
0x133b   :  { %v2082_v56 = vadd.f32 %v2298_v9, %v2077_v11 }
0x133c   :  { %v2067_v14 = vmul.f32 %v2385_v6, %v2066_v13 }
0x133d   :  { %2215 = vmatmul.msk.f32.vlgmr.msra.gmra.mxu0 %vm135_vm2, %v2082_v56 }
0x133e   :  { %v2071_v32 = vsel %vm2070_vm15, %v2385_v6, %v2067_v14 }
0x133f   :  { %v2073_v23 = vmul.f32 %v2071_v32, %v2039_v43 }
0x1341   :  { %v2078_v16 = vmul.f32 %v2297_v15, %v2073_v23 }
0x1343   :  { %v2083_v12 = vadd.f32 %v2298_v9, %v2078_v16 }
0x1345   :  { %2216 = vmatmul.msk.f32.gmra.mxu0 %vm135_vm2, %v2083_v12 }
0x13ba   :  { %v2115_v19 = vpop.f32.mrf.mxu0 }
0x13bb   :  { %v2116_v22 = vadd.f32 %v2299_v3, %v2115_v19 }
0x13bd   :  { %2121 = vst [vmem:[%s3110_s21] sm:$0xff] %v2116_v22 }
0x13c2   :  { %v2118_v25 = vpop.f32.mrf.mxu0 }
0x13c3   :  { %v2119_v26 = vadd.f32 %v2299_v3, %v2118_v25 }
0x13c5   :  { %2122 = vst [vmem:[%s3110_s21 + $0x8] sm:$0xff] %v2119_v26 }

// kernel: fwd.2
= control target key start
LH: loop header
LB: loop body
LE: loop exit
PB: predicated region body
PF: predicated region fallthrough
CT: control target
= control target key end

     0   :  { %s5183_s6 = smov 1   ;;  %s5184_s10 = smov 2   ;;  %s6642_s0 = inlined_call_operand.smem [shape: u32[40], index: -1, kind: input, shape index: {}] }
   0x1   :  { %s5254_s5 = sld [smem:[%s6642_s0]]   ;;  %s5185_s14 = smov 3  }
   0x2   :  { %s5259_s9 = sld [smem:[%s6642_s0 + %s5183_s6]]   ;;  %s5186_s18 = smov 4  }
   0x3   :  { %s5264_s13 = sld [smem:[%s6642_s0 + %s5184_s10]]   ;;  %s5187_s22 = smov 5  }
   0x4   :  { %s5269_s17 = sld [smem:[%s6642_s0 + %s5185_s14]]   ;;  %s5188_s26 = smov 6  }
   0x5   :  { %s5274_s21 = sld [smem:[%s6642_s0 + %s5186_s18]]   ;;  %s5189_s30 = smov 7  }
   0x6   :  { %s5279_s25 = sld [smem:[%s6642_s0 + %s5187_s22]]   ;;  %s5190_s4 = smov 8  }
   0x7   :  { %s5284_s29 = sld [smem:[%s6642_s0 + %s5188_s26]]   ;;  %s5191_s10 = smov 9  }
   0x8   :  { %s5289_s3 = sld [smem:[%s6642_s0 + %s5189_s30]]   ;;  %s5192_s15 = smov 10  }
   0x9   :  { %6657 = sst [smem:[#allocation17_spill]] %s5264_s13  ;;  %s5193_s20 = smov 11  }
   0xa   :  { %s5294_s8 = sld [smem:[%s6642_s0 + %s5190_s4]]   ;;  %s5194_s26 = smov 12  }
   0xb   :  { %s5299_s14 = sld [smem:[%s6642_s0 + %s5191_s10]]   ;;  %s5195_s1 = smov 13  }
   0xc   :  { %s5304_s19 = sld [smem:[%s6642_s0 + %s5192_s15]]   ;;  %s5196_s7 = smov 14  }
   0xd   :  { %s5309_s24 = sld [smem:[%s6642_s0 + %s5193_s20]]   ;;  %s5197_s15 = smov 15  }
   0xe   :  { %s5314_s30 = sld [smem:[%s6642_s0 + %s5194_s26]]   ;;  %s5198_s22 = smov 16  }
   0xf   :  { %s5319_s6 = sld [smem:[%s6642_s0 + %s5195_s1]]   ;;  %s5199_s28 = smov 17  }
  0x10   :  { %s5324_s12 = sld [smem:[%s6642_s0 + %s5196_s7]]   ;;  %s5200_s7 = smov 18  }
  0x11   :  { %s5329_s20 = sld [smem:[%s6642_s0 + %s5197_s15]]   ;;  %s5201_s15 = smov 19  }
  0x12   :  { %s5334_s27 = sld [smem:[%s6642_s0 + %s5198_s22]]   ;;  %s5202_s22 = smov 20  }
  0x13   :  { %s5339_s4 = sld [smem:[%s6642_s0 + %s5199_s28]]   ;;  %s5203_s28 = smov 21  }
  0x14   :  { %s5214_s23 = smov 32   ;;  %s5215_s1 = smov 33  }
  0x15   :  { %s5216_s10 = smov 34   ;;  %s5217_s16 = smov 35  }
  0x16   :  { %6658 = sst [smem:[#allocation18_spill]] %s5324_s12 }
  0x17   :  { %6659 = sst [smem:[#allocation19_spill]] %s5329_s20 }
  0x18   :  { %6660 = sst [smem:[#allocation20_spill]] %s5334_s27 }
  0x19   :  { %6661 = sst [smem:[#allocation21_spill]] %s5339_s4 }
  0x1a   :  { %s5344_s12 = sld [smem:[%s6642_s0 + %s5200_s7]]   ;;  %s5204_s7 = smov 22  }
  0x1b   :  { %s5349_s20 = sld [smem:[%s6642_s0 + %s5201_s15]]   ;;  %s5205_s15 = smov 23  }
  0x1c   :  { %s5354_s27 = sld [smem:[%s6642_s0 + %s5202_s22]]   ;;  %s5206_s22 = smov 24  }
  0x1d   :  { %s5359_s4 = sld [smem:[%s6642_s0 + %s5203_s28]]   ;;  %s5207_s28 = smov 25  }
  0x1e   :  { %s5427_s13 = sld [smem:[%s6642_s0 + %s5217_s16]]   ;;  %s5221_s16 = smov 39  }
  0x20   :  { %6662 = sst [smem:[#allocation22_spill]] %s5344_s12 }
  0x21   :  { %6663 = sst [smem:[#allocation23_spill]] %s5349_s20 }
  0x22   :  { %6664 = sst [smem:[#allocation24_spill]] %s5354_s27 }
  0x23   :  { %6665 = sst [smem:[#allocation25_spill]] %s5359_s4 }
  0x24   :  { %s5364_s12 = sld [smem:[%s6642_s0 + %s5204_s7]]   ;;  %s5208_s7 = smov 26  }
  0x25   :  { %s5369_s20 = sld [smem:[%s6642_s0 + %s5205_s15]]   ;;  %s5209_s15 = smov 27  }
  0x26   :  { %s5374_s27 = sld [smem:[%s6642_s0 + %s5206_s22]]   ;;  %s5210_s22 = smov 28  }
  0x27   :  { %s5379_s4 = sld [smem:[%s6642_s0 + %s5207_s28]]   ;;  %s5211_s28 = smov 29  }
  0x28   :  { %6677 = sst [smem:[#allocation37_spill]] %s5427_s13 }
  0x2a   :  { %6666 = sst [smem:[#allocation26_spill]] %s5364_s12 }
  0x2b   :  { %6667 = sst [smem:[#allocation27_spill]] %s5369_s20 }
  0x2c   :  { %6668 = sst [smem:[#allocation28_spill]] %s5374_s27 }
  0x2d   :  { %6669 = sst [smem:[#allocation29_spill]] %s5379_s4 }
  0x2e   :  { %s5384_s12 = sld [smem:[%s6642_s0 + %s5208_s7]]   ;;  %s5212_s7 = smov 30  }
  0x2f   :  { %s5389_s20 = sld [smem:[%s6642_s0 + %s5209_s15]]   ;;  %s5213_s15 = smov 31  }
  0x30   :  { %s5394_s27 = sld [smem:[%s6642_s0 + %s5210_s22]]  }
  0x31   :  { %s5399_s4 = sld [smem:[%s6642_s0 + %s5211_s28]]  }
  0x34   :  { %6670 = sst [smem:[#allocation30_spill]] %s5384_s12 }
  0x35   :  { %6671 = sst [smem:[#allocation31_spill]] %s5389_s20 }
  0x36   :  { %6672 = sst [smem:[#allocation32_spill]] %s5394_s27 }
  0x37   :  { %6673 = sst [smem:[#allocation33_spill]] %s5399_s4 }
  0x38   :  { %s5404_s12 = sld [smem:[%s6642_s0 + %s5212_s7]]  }
  0x39   :  { %s4498_s20 = sld [smem:[%s6642_s0 + %s5213_s15]]  }
  0x3a   :  { %s5412_s27 = sld [smem:[%s6642_s0 + %s5214_s23]]   ;;  %s5218_s23 = smov 36  }
  0x3b   :  { %s5417_s4 = sld [smem:[%s6642_s0 + %s5215_s1]]   ;;  %s5219_s1 = smov 37  }
  0x3e   :  { %6674 = sst [smem:[#allocation34_spill]] %s5404_s12 }
  0x3f   :  { %s5422_s12 = sld [smem:[%s6642_s0 + %s5216_s10]]   ;;  %v85_v0 = vstv %s4498_s20  ;;  %s5220_s10 = smov 38  }
  0x40   :  { %6675 = sst [smem:[#allocation35_spill]] %s5412_s27  ;;  %86 = vst [vmem:[#allocation2] sm:$0x1] %v85_v0 }
  0x41   :  { %6676 = sst [smem:[#allocation36_spill]] %s5417_s4 }
  0x42   :  { %s5432_s27 = sld [smem:[%s6642_s0 + %s5218_s23]]  }
  0x43   :  { %s5437_s4 = sld [smem:[%s6642_s0 + %s5219_s1]]  }
  0x44   :  { %s5442_s15 = sld [smem:[%s6642_s0 + %s5220_s10]]  }
  0x45   :  { %s5447_s23 = sld [smem:[%s6642_s0 + %s5221_s16]]  }
  0x46   :  { %87 = vsyncpa [#allocation4], 0 }
  0x47   :  { %88 = vsyncpa [#allocation6], 0 }
  0x48   :  { %89 = vsyncpa [#allocation9], 0  ;;  %v174_v1 = vld [vmem:[%s5269_s17 + $0x78] sm:$0xff]  ;;  %v173_v2 = vld [vmem:[%s5269_s17 + $0x70] sm:$0xff]  ;;  %vm187_vm0 = vcmask 523264  }
  0x49   :  { %194 = vmatpush.msra.mxu0 %v174_v1  ;;  %v172_v3 = vld [vmem:[%s5269_s17 + $0x68] sm:$0xff]  ;;  %v182_v4 = vld [vmem:[%s5269_s17 + $0xb8] sm:$0xff]  ;;  %v181_v5 = vld [vmem:[%s5269_s17 + $0xb0] sm:$0xff] }
  0x4a   :  { %225 = vmatpush.msra.mxu2 %v182_v4  ;;  %v171_v6 = vld [vmem:[%s5269_s17 + $0x60] sm:$0xff]  ;;  %v180_v7 = vld [vmem:[%s5269_s17 + $0xa8] sm:$0xff]  ;;  %v170_v8 = vld [vmem:[%s5269_s17 + $0x58] sm:$0xff] }
  0x4b   :  { %195 = vmatpush.msra.mxu0 %v173_v2  ;;  %v179_v9 = vld [vmem:[%s5269_s17 + $0xa0] sm:$0xff]  ;;  %v169_v10 = vld [vmem:[%s5269_s17 + $0x50] sm:$0xff]  ;;  %v178_v11 = vld [vmem:[%s5269_s17 + $0x98] sm:$0xff] }
  0x4c   :  { %226 = vmatpush.msra.mxu2 %v181_v5  ;;  %v168_v12 = vld [vmem:[%s5269_s17 + $0x48] sm:$0xff]  ;;  %v177_v13 = vld [vmem:[%s5269_s17 + $0x90] sm:$0xff]  ;;  %v167_v14 = vld [vmem:[%s5269_s17 + $0x40] sm:$0xff] }
  0x4d   :  { %196 = vmatpush.msra.mxu0 %v172_v3  ;;  %v176_v15 = vld [vmem:[%s5269_s17 + $0x88] sm:$0xff]  ;;  %v166_v16 = vld [vmem:[%s5269_s17 + $0x38] sm:$0xff]  ;;  %v175_v17 = vld [vmem:[%s5269_s17 + $0x80] sm:$0xff] }
  0x4e   :  { %227 = vmatpush.msra.mxu2 %v180_v7  ;;  %v156_v18 = vld [vmem:[%s5254_s5 + $0x8] sm:$0xff]  ;;  %v165_v19 = vld [vmem:[%s5269_s17 + $0x30] sm:$0xff]  ;;  %v163_v21 = vld [vmem:[%s5269_s17 + $0x20] sm:$0xff] }
  0x4f   :  { %197 = vmatpush.msra.mxu0 %v171_v6  ;;  %v164_v20 = vld [vmem:[%s5269_s17 + $0x28] sm:$0xff] }
  0x50   :  { %228 = vmatpush.msra.mxu2 %v179_v9 }
  0x51   :  { %198 = vmatpush.msra.mxu0 %v170_v8 }
  0x52   :  { %229 = vmatpush.msra.mxu2 %v178_v11 }
  0x53   :  { %199 = vmatpush.msra.mxu0 %v169_v10 }
  0x54   :  { %230 = vmatpush.msra.mxu2 %v177_v13 }
  0x55   :  { %200 = vmatpush.msra.mxu0 %v168_v12 }
  0x56   :  { %231 = vmatpush.msra.mxu2 %v176_v15 }
  0x57   :  { %201 = vmatpush.msra.mxu0 %v167_v14 }
  0x58   :  { %232 = vmatpush.msra.mxu2 %v175_v17 }
  0x59   :  { %202 = vmatpush.msra.mxu0 %v166_v16  ;;  %4507 = vmatmul.msk.f32.vlgmr.msra.gmra.mxu2 %vm187_vm0, %v156_v18 }
  0x5b   :  { %203 = vmatpush.msra.mxu0 %v165_v19 }
  0x5d   :  { %204 = vmatpush.msra.mxu0 %v164_v20 }
  0x5e   :  { %90 = vsyncpa [#allocation12], 0  ;;  %v162_v22 = vld [vmem:[%s5269_s17 + $0x18] sm:$0xff]  ;;  %v161_v24 = vld [vmem:[%s5269_s17 + $0x10] sm:$0xff]  ;;  %vm242_vm1 = vcmask 261120   ;;  %v5222_v40 = vmov 32.0  }
  0x5f   :  { %205 = vmatpush.msra.mxu0 %v163_v21  ;;  %v158_v23 = vld [vmem:[%s5254_s5 + $0x18] sm:$0xff]  ;;  %v160_v25 = vld [vmem:[%s5269_s17 + $0x8] sm:$0xff]  ;;  %v159_v26 = vld [vmem:[%s5269_s17] sm:$0xff]  ;;  %4847 = vrcp.f32 %v5222_v40  ;;  %s5223_s0 = smov 96   ;;  %s5225_s13 = smov 88   ;;  %vm475_vm9 = vcmask 64512  }
  0x60   :  { %v155_v27 = vld [vmem:[%s5254_s5] sm:$0xff]  ;;  %v157_v28 = vld [vmem:[%s5254_s5 + $0x10] sm:$0xff]  ;;  %v431_v57 = vld [vmem:[%s5309_s24 + $0x18] sm:$0xff]  ;;  %s5224_s5 = smov 120   ;;  %s5226_s17 = smov 64  }
  0x61   :  { %206 = vmatpush.msra.mxu0 %v162_v22  ;;  %4508 = vmatmul.msk.f32.gmra.mxu2 %vm187_vm0, %v158_v23  ;;  %v4813_v29 = vld [vmem:[%s5274_s21] ss:$0 sm:$0xff]  ;;  %v430_v58 = vld [vmem:[%s5309_s24 + $0x10] sm:$0xff]  ;;  %v429_v59 = vld [vmem:[%s5309_s24 + $0x8] sm:$0xff]  ;;  %s5227_s21 = smov 80   ;;  %s5230_s20 = smov 56  }
  0x62   :  { %461 = vmatpush.msra.mxu3 %v431_v57  ;;  %v428_v60 = vld [vmem:[%s5309_s24] sm:$0xff]  ;;  %s5235_s22 = smov 8   ;;  %s6678_s26 = sld [smem:[#allocation17_spill]] }
  0x63   :  { %207 = vmatpush.msra.mxu0 %v161_v24  ;;  %v4814_v11 = vld [vmem:[%s5279_s25] ss:$0 sm:$0xff]  ;;  %s5228_s25 = smov 112   ;;  %s6679_s1 = sld [smem:[#allocation18_spill]] }
  0x64   :  { %462 = vmatpush.msra.mxu3 %v430_v58  ;;  %v4815_v15 = vld [vmem:[%s5284_s29] ss:$0 sm:$0xff]  ;;  %s5229_s29 = smov 72   ;;  %s6680_s28 = sld [smem:[#allocation19_spill]] }
  0x65   :  { %208 = vmatpush.msra.mxu0 %v160_v25  ;;  %v4848_v41 = vpop.eup %4847  ;;  %v4816_v25 = vld [vmem:[%s5314_s30] ss:$0 sm:$0xff]  ;;  %s6681_s2 = sld [smem:[#allocation20_spill]] }
  0x66   :  { %v250_v42 = vmul.f32 32.0, %v4848_v41  ;;  %vm254_vm2 = vweird.f32 %v4848_v41  ;;  %463 = vmatpush.msra.mxu3 %v429_v59  ;;  %s6685_s10 = sld [smem:[#allocation24_spill]] }
  0x67   :  { %209 = vmatpush.msra.mxu0 %v159_v26  ;;  %s6686_s7 = sld [smem:[#allocation33_spill]] }
  0x68   :  { %210 = vmatmul.f32.vlgmr.msra.gmra.mxu0 %v155_v27  ;;  %v251_v43 = vsub.f32 1.0, %v250_v42  ;;  %464 = vmatpush.msra.mxu3 %v428_v60  ;;  %s6687_s11 = sld [smem:[#allocation27_spill]] }
  0x69   :  { %s6688_s16 = sld [smem:[#allocation31_spill]] }
  0x6a   :  { %v252_v44 = vmul.f32 %v4848_v41, %v251_v43  ;;  %v321_v43 = vlaneseq  ;;  %s6689_s18 = sld [smem:[#allocation25_spill]] }
  0x6c   :  { %v253_v45 = vadd.f32 %v4848_v41, %v252_v44  ;;  %v325_v44 = vshrl.u32 %v321_v43, 7 }
  0x6e   :  { %v5482_v46 = vsel %vm254_vm2, %v4848_v41, %v253_v45  ;;  %4760 = vset.pattern.permute.xlu2 %v325_v44  ;;  %4761 = vset.pattern.permute.xlu0 %v325_v44 }
  0x70   :  { %213 = vmatmul.f32.gmra.mxu0 %v157_v28 }
  0xdc   :  { %v234_v30 = vpop.f32.mrf.mxu2 }
  0xe4   :  { %v237_v36 = vpop.f32.mrf.mxu2 }
  0xe5   :  { %v211_v31 = vpop.f32.mrf.mxu0 }
  0xe6   :  { %v212_v32 = vadd.f32 %v4813_v29, %v211_v31 }
  0xe8   :  { %v235_v33 = vadd.f32 %v234_v30, %v212_v32 }
  0xea   :  { %v243_v34 = vsel %vm242_vm1, %v235_v33, 0.0 }
  0xeb   :  { %244 = vadd.xlane.f32.xlu0 %v243_v34 }
  0xed   :  { %v214_v35 = vpop.f32.mrf.mxu0 }
  0xee   :  { %v215_v37 = vadd.f32 %v4813_v29, %v214_v35 }
  0xf0   :  { %v238_v38 = vadd.f32 %v237_v36, %v215_v37 }
  0xf2   :  { %v246_v39 = vsel %vm242_vm1, %v238_v38, 0.0 }
  0xf3   :  { %247 = vadd.xlane.f32.xlu0 %v246_v39 }
 0x15e   :  { %v245_v47 = vpop.xlane.xlu0 %244 }
 0x15f   :  { %v256_v48 = vmul.f32 %v5482_v46, %v245_v47 }
 0x161   :  { %v258_v49 = vsub.f32 %v235_v33, %v256_v48 }
 0x163   :  { %v260_v50 = vmul.f32 %v258_v49, %v258_v49 }
 0x165   :  { %v262_v51 = vsel %vm242_vm1, %v260_v50, 0.0 }
 0x166   :  { %263 = vadd.xlane.f32.xlu1 %v262_v51  ;;  %v248_v52 = vpop.xlane.xlu0 %247 }
 0x167   :  { %v257_v53 = vmul.f32 %v5482_v46, %v248_v52 }
 0x169   :  { %v259_v54 = vsub.f32 %v238_v38, %v257_v53 }
 0x16b   :  { %v261_v55 = vmul.f32 %v259_v54, %v259_v54 }
 0x16d   :  { %v265_v56 = vsel %vm242_vm1, %v261_v55, 0.0 }
 0x16e   :  { %266 = vadd.xlane.f32.xlu1 %v265_v56 }
 0x1d9   :  { %v264_v61 = vpop.xlane.xlu1 %263 }
 0x1da   :  { %v268_v62 = vmul.f32 %v264_v61, %v5482_v46 }
 0x1dc   :  { %v270_v63 = vadd.f32 1e-12, %v268_v62 }
 0x1de   :  { %4849 = vrsqrt.f32 %v270_v63  ;;  %vm278_vm4 = vweird.f32 %v270_v63 }
 0x1e1   :  { %v267_v0 = vpop.xlane.xlu1 %266 }
 0x1e2   :  { %v269_v1 = vmul.f32 %v267_v0, %v5482_v46 }
 0x1e4   :  { %v4850_v2 = vpop.eup %4849  ;;  %v271_v3 = vadd.f32 1e-12, %v269_v1 }
 0x1e5   :  { %v273_v4 = vmul.f32 %v4850_v2, %v270_v63  ;;  %vm279_vm3 = vweird.f32 %v4850_v2 }
 0x1e6   :  { %4851 = vrsqrt.f32 %v271_v3  ;;  %vm280_vm5 = vmor %vm278_vm4, %vm279_vm3  ;;  %vm288_vm7 = vweird.f32 %v271_v3 }
 0x1e7   :  { %v274_v5 = vmul.f32 %v4850_v2, %v273_v4 }
 0x1e9   :  { %v275_v6 = vmul.f32 0.5, %v274_v5 }
 0x1eb   :  { %v276_v7 = vsub.f32 1.5, %v275_v6 }
 0x1ec   :  { %v4852_v8 = vpop.eup %4851 }
 0x1ed   :  { %v277_v9 = vmul.f32 %v4850_v2, %v276_v7  ;;  %v283_v10 = vmul.f32 %v4852_v8, %v271_v3  ;;  %vm289_vm6 = vweird.f32 %v4852_v8 }
 0x1ee   :  { %vm290_vm8 = vmor %vm288_vm7, %vm289_vm6 }
 0x1ef   :  { %v284_v12 = vmul.f32 %v4852_v8, %v283_v10  ;;  %v281_v13 = vsel %vm280_vm5, %v4850_v2, %v277_v9 }
 0x1f0   :  { %v292_v14 = vmul.f32 %v281_v13, %v258_v49  ;;  %v5554_v49 = vld [vmem:[%s5259_s9] sm:$0x3]  ;;  %s5231_s9 = smov 104  }
 0x1f1   :  { %v285_v16 = vmul.f32 0.5, %v284_v12  ;;  %v323_v50 = vperm.slane %v5554_v49, 0 }
 0x1f2   :  { %v297_v17 = vmul.f32 %v4814_v11, %v292_v14 }
 0x1f3   :  { %v286_v18 = vsub.f32 1.5, %v285_v16 }
 0x1f4   :  { %v5496_v19 = vadd.f32 %v4815_v15, %v297_v17 }
 0x1f5   :  { %v287_v20 = vmul.f32 %v4852_v8, %v286_v18  ;;  %v320_v18 = vld [vmem:[%s5289_s3 + $0x78] sm:$0xff] }
 0x1f6   :  { %4513 = vmatmul.msk.f32.vlgmr.msra.gmra.mxu3 %vm242_vm1, %v5496_v19  ;;  %343 = vmatpush.msrb.mxu2 %v320_v18  ;;  %v366_v18 = vld [vmem:[%s5294_s8] sm:$0xff]  ;;  %s5234_s8 = smov 40  }
 0x1f7   :  { %v291_v21 = vsel %vm290_vm8, %v4852_v8, %v287_v20  ;;  %v319_v20 = vld [vmem:[%s5289_s3 + $0x70] sm:$0xff] }
 0x1f8   :  { %v293_v22 = vmul.f32 %v291_v21, %v259_v54  ;;  %344 = vmatpush.msrb.mxu2 %v319_v20  ;;  %v318_v21 = vld [vmem:[%s5289_s3 + $0x68] sm:$0xff] }
 0x1fa   :  { %v298_v23 = vmul.f32 %v4814_v11, %v293_v22  ;;  %v317_v22 = vld [vmem:[%s5289_s3 + $0x60] sm:$0xff]  ;;  %345 = vmatpush.msrb.mxu2 %v318_v21 }
 0x1fc   :  { %v5500_v24 = vadd.f32 %v4815_v15, %v298_v23  ;;  %346 = vmatpush.msrb.mxu2 %v317_v22  ;;  %v316_v23 = vld [vmem:[%s5289_s3 + $0x58] sm:$0xff] }
 0x1fe   :  { %4514 = vmatmul.msk.f32.gmra.mxu3 %vm242_vm1, %v5500_v24  ;;  %347 = vmatpush.msrb.mxu2 %v316_v23 }
 0x279   :  { %v466_v26 = vpop.f32.mrf.mxu3 }
 0x27a   :  { %v5505_v27 = vadd.f32 %v4816_v25, %v466_v26 }
 0x27c   :  { %473 = vrot.lane.b32.xlu2 %v5505_v27, %s5223_s0 }
 0x281   :  { %v469_v28 = vpop.f32.mrf.mxu3 }
 0x282   :  { %v5509_v29 = vadd.f32 %v4816_v25, %v469_v28  ;;  %v315_v25 = vld [vmem:[%s5289_s3 + $0x50] sm:$0xff]  ;;  %v314_v28 = vld [vmem:[%s5289_s3 + $0x48] sm:$0xff] }
 0x283   :  { %348 = vmatpush.msrb.mxu2 %v315_v25 }
 0x284   :  { %657 = vrot.lane.b32.xlu0 %v5509_v29, %s5224_s5  ;;  %659 = vrot.lane.b32.xlu2 %v5509_v29, %s5225_s13 }
 0x285   :  { %349 = vmatpush.msrb.mxu2 %v314_v28 }
 0x28c   :  { %577 = vrot.lane.b32.xlu0 %v5505_v27, %s5226_s17 }
 0x294   :  { %629 = vrot.lane.b32.xlu0 %v5505_v27, %s5224_s5 }
 0x29c   :  { %501 = vrot.lane.b32.xlu0 %v5509_v29, %s5223_s0 }
 0x2a4   :  { %789 = vrot.lane.b32.xlu0 %v5505_v27, %s5227_s21 }
 0x2ac   :  { %817 = vrot.lane.b32.xlu0 %v5509_v29, %s5227_s21 }
 0x2b4   :  { %815 = vrot.lane.b32.xlu0 %v5509_v29, %s5228_s25 }
 0x2bc   :  { %975 = vrot.lane.b32.xlu0 %v5509_v29, %s5229_s29 }
 0x2d6   :  { %v474_v30 = vpop.permute.xlu2 %473 }
 0x2d7   :  { %4515 = vmatpush.xpose.msk.msrb.mxu3 %vm475_vm9, %v474_v30  ;;  %v313_v30 = vld [vmem:[%s5289_s3 + $0x40] sm:$0xff] }
 0x2d8   :  { %350 = vmatpush.msrb.mxu2 %v313_v30 }
 0x2da   :  { %4516 = vmatmul.msk.f32.vlgmr.msrb.gmra.mxu3 %vm475_vm9, %v5505_v27 }
 0x2de   :  { %v660_v31 = vpop.permute.xlu2 %659 }
 0x2df   :  { %4523 = vmatpush.xpose.msk.msrb.mxu0 %vm475_vm9, %v660_v31  ;;  %v312_v31 = vld [vmem:[%s5289_s3 + $0x38] sm:$0xff] }
 0x2e0   :  { %351 = vmatpush.msrb.mxu2 %v312_v31 }
 0x2f6   :  { %v658_v32 = vpop.permute.xlu0 %657 }
 0x2f7   :  { %4524 = vmatmul.msk.f32.vlgmr.msrb.gmra.mxu0 %vm475_vm9, %v658_v32  ;;  %v311_v32 = vld [vmem:[%s5289_s3 + $0x30] sm:$0xff] }
 0x2f8   :  { %352 = vmatpush.msrb.mxu2 %v311_v32  ;;  %v5639_v32 = vpack.i.bf16 %v5509_v29, %v5505_v27 }
 0x2fe   :  { %v578_v33 = vpop.permute.xlu0 %577 }
 0x2ff   :  { %598 = vmatpush.msra.mxu3 %v578_v33 }
 0x306   :  { %v5534_v34 = vpop.permute.xlu0 %629 }
 0x30e   :  { %v502_v35 = vpop.permute.xlu0 %501 }
 0x30f   :  { %4517 = vmatpush.xpose.msk.msra.mxu1 %vm475_vm9, %v502_v35  ;;  %v309_v35 = vld [vmem:[%s5289_s3 + $0x20] sm:$0xff] }
 0x312   :  { %4518 = vmatmul.msk.f32.vlgmr.msra.gmra.mxu1 %vm475_vm9, %v5509_v29 }
 0x316   :  { %v5539_v36 = vpop.permute.xlu0 %789 }
 0x31e   :  { %v818_v37 = vpop.permute.xlu0 %817 }
 0x31f   :  { %4529 = vmatpush.xpose.msk.msra.mxu0 %vm475_vm9, %v818_v37  ;;  %v308_v37 = vld [vmem:[%s5289_s3 + $0x18] sm:$0xff] }
 0x326   :  { %v816_v38 = vpop.permute.xlu0 %815 }
 0x327   :  { %4530 = vmatmul.msk.f32.vlgmr.msra.gmra.mxu0 %vm475_vm9, %v816_v38  ;;  %v307_v38 = vld [vmem:[%s5289_s3 + $0x10] sm:$0xff] }
 0x32e   :  { %v976_v39 = vpop.permute.xlu0 %975 }
 0x32f   :  { %4535 = vmatpush.xpose.msk.msrb.mxu0 %vm475_vm9, %v976_v39  ;;  %v322_v39 = vand.u32 127, %v321_v43 }
 0x35d   :  { %v497_v40 = vpop.f32.mrf.mxu3 }
 0x35e   :  { %v527_v41 = vmul.f32 0.35355338, %v497_v40 }
 0x360   :  { %v529_v42 = vsel %vm475_vm9, %v527_v41, -inf }
 0x361   :  { %530 = vmax.xlane.f32.xlu1 %v529_v42 }
 0x374   :  { %v682_v45 = vpop.f32.mrf.mxu0 }
 0x375   :  { %v686_v47 = vmul.f32 0.35355338, %v682_v45  ;;  %v305_v45 = vld [vmem:[%s5289_s3] sm:$0xff] }
 0x377   :  { %v690_v48 = vsel %vm475_vm9, %v686_v47, -inf }
 0x378   :  { %691 = vmax.xlane.f32.xlu2 %v690_v48 }
 0x37a   :  { %631 = vrot.lane.b32.xlu1 %v5505_v27, %s5225_s13 }
 0x382   :  { %787 = vrot.lane.b32.xlu1 %v5505_v27, %s5228_s25 }
 0x38f   :  { %v524_v51 = vpop.f32.mrf.mxu1 }
 0x390   :  { %761 = vrot.lane.b32.xlu2 %v5509_v29, %s5230_s20  ;;  %v5557_v52 = vmul.f32 0.35355338, %v524_v51  ;;  %v5232_v51 = vmov 1.0  }
 0x392   :  { %v532_v53 = vsel %vm475_vm9, %v5557_v52, -inf }
 0x398   :  { %328 = vperm.xlu2 %4760, %v323_v50  }
 0x3a4   :  { %v840_v54 = vpop.f32.mrf.mxu0 }
 0x3a5   :  { %v5561_v55 = vmul.f32 0.35355338, %v840_v54 }
 0x3a7   :  { %v848_v56 = vsel %vm475_vm9, %v5561_v55, -inf }
 0x3c1   :  { %533 = vmax.xlane.f32.xlu2 %v532_v53 }
 0x3c9   :  { %849 = vmax.xlane.f32.xlu2 %v848_v56 }
 0x3d4   :  { %v531_v57 = vpop.xlane.xlu1 %530 }
 0x3d5   :  { %v535_v58 = vsub.f32 %v527_v41, %v531_v57  ;;  %v306_v41 = vld [vmem:[%s5289_s3 + $0x8] sm:$0xff] }
 0x3d7   :  { %v537_v59 = vmul.f32 1.442695, %v535_v58 }
 0x3d9   :  { %4853 = vpow2.f32 %v537_v59 }
 0x3df   :  { %v4854_v60 = vpop.eup %4853 }
 0x3e0   :  { %v541_v61 = vsel %vm475_vm9, %v4854_v60, 0.0 }
 0x3e1   :  { %542 = vadd.xlane.f32.xlu1 %v541_v61 }
 0x3eb   :  { %v692_v63 = vpop.xlane.xlu2 %691 }
 0x3ec   :  { %v632_v62 = vpop.permute.xlu1 %631  ;;  %v694_v0 = vsub.f32 %v686_v47, %v692_v63 }
 0x3ed   :  { %4521 = vmatpush.xpose.msk.msrb.mxu3 %vm475_vm9, %v632_v62 }
 0x3ee   :  { %v697_v1 = vmul.f32 1.442695, %v694_v0 }
 0x3f0   :  { %4855 = vpow2.f32 %v697_v1 }
 0x3f3   :  { %v762_v17 = vpop.permute.xlu2 %761 }
 0x3f4   :  { %v5577_v4 = vpop.permute.xlu1 %787 }
 0x3f6   :  { %v5569_v2 = vpop.eup %4855 }
 0x3f7   :  { %v702_v3 = vsel %vm475_vm9, %v5569_v2, 0.0 }
 0x3fa   :  { %947 = vrot.lane.b32.xlu1 %v5505_v27, %s5229_s29 }
 0x3fb   :  { %v329_v44 = vpop.permute.xlu2 %328 }
 0x3fc   :  { %vm337_vm14 = vcmp.eq.s32.totalorder %v329_v44, %v322_v39 }
 0x424   :  { %703 = vadd.xlane.f32.xlu1 %v702_v3 }
 0x434   :  { %v534_v1 = vpop.xlane.xlu2 %533 }
 0x435   :  { %v536_v3 = vsub.f32 %v5557_v52, %v534_v1 }
 0x43d   :  { %945 = vrot.lane.b32.xlu1 %v5505_v27, %s5231_s9 }
 0x445   :  { %973 = vrot.lane.b32.xlu1 %v5509_v29, %s5231_s9 }
 0x454   :  { %v543_v5 = vpop.xlane.xlu1 %542 }
 0x455   :  { %4857 = vrcp.f32 %v543_v5  ;;  %v558_v9 = vand.u32 2147483648, %v543_v5  ;;  %v556_v11 = vand.u32 2147483647, %v543_v5  ;;  %vm552_vm11 = vweird.f32 %v543_v5 }
 0x457   :  { %v559_v13 = vor.u32 1.1754944e-38, %v558_v9  ;;  %vm557_vm13 = vcmp.eq.f32.partialorder %v556_v11, 8.507059e+37 }
 0x45b   :  { %v4858_v6 = vpop.eup %4857 }
 0x45c   :  { %v548_v7 = vmul.f32 %v4858_v6, %v543_v5  ;;  %vm553_vm10 = vweird.f32 %v4858_v6  ;;  %v850_v5 = vpop.xlane.xlu2 %849 }
 0x45d   :  { %vm554_vm12 = vmor %vm552_vm11, %vm553_vm10  ;;  %v852_v9 = vsub.f32 %v5561_v55, %v850_v5 }
 0x45e   :  { %v549_v8 = vsub.f32 1.0, %v548_v7 }
 0x460   :  { %v550_v10 = vmul.f32 %v4858_v6, %v549_v8 }
 0x462   :  { %v551_v12 = vadd.f32 %v4858_v6, %v550_v10 }
 0x464   :  { %v555_v14 = vsel %vm554_vm12, %v4858_v6, %v551_v12 }
 0x465   :  { %v560_v15 = vsel %vm557_vm13, %v559_v13, %v555_v14  ;;  %v855_v13 = vmul.f32 1.442695, %v852_v9 }
 0x466   :  { %v561_v16 = vmul.f32 %v4854_v60, %v560_v15 }
 0x468   :  { %4519 = vmatmul.msk.f32.vlgmr.msra.gmra.mxu3 %vm475_vm9, %v561_v16  ;;  %4033 = vst.msk [vmem:[#allocation7] sm:$0xff] %vm475_vm9, %v561_v16 }
 0x469   :  { %782 = vmatpush.msra.mxu3 %v762_v17 }
 0x46c   :  { %v948_v26 = vpop.permute.xlu1 %947 }
 0x470   :  { %4522 = vmatmul.msk.f32.vlgmr.msrb.gmra.mxu3 %vm475_vm9, %v5534_v34  ;;  %v310_v34 = vld [vmem:[%s5289_s3 + $0x28] sm:$0xff]  ;;  %s5233_s3 = smov 48  }
 0x471   :  { %4527 = vmatpush.xpose.msk.msrb.mxu3 %vm475_vm9, %v5539_v36  ;;  %353 = vmatpush.msrb.mxu2 %v310_v34  ;;  %v330_v36 = vperm.slane %v5554_v49, 1 }
 0x473   :  { %354 = vmatpush.msrb.mxu2 %v309_v35  ;;  %335 = vperm.xlu0 %4761, %v330_v36  }
 0x475   :  { %355 = vmatpush.msrb.mxu2 %v308_v37 }
 0x477   :  { %356 = vmatpush.msrb.mxu2 %v307_v38 }
 0x479   :  { %357 = vmatpush.msrb.mxu2 %v306_v41 }
 0x47b   :  { %358 = vmatpush.msrb.mxu2 %v305_v45 }
 0x47c   :  { %4511 = vmatmul.msk.f32.vlgmr.msrb.gmra.mxu2 %vm337_vm14, %v5232_v51 }
 0x497   :  { %v704_v33 = vpop.xlane.xlu1 %703 }
 0x498   :  { %4859 = vrcp.f32 %v704_v33  ;;  %v731_v48 = vand.u32 2147483648, %v704_v33  ;;  %v729_v49 = vand.u32 2147483647, %v704_v33  ;;  %vm725_vm2 = vweird.f32 %v704_v33 }
 0x49a   :  { %v732_v43 = vor.u32 1.1754944e-38, %v731_v48  ;;  %vm730_vm4 = vcmp.eq.f32.partialorder %v729_v49, 8.507059e+37 }
 0x49e   :  { %v4860_v40 = vpop.eup %4859 }
 0x49f   :  { %v721_v42 = vmul.f32 %v4860_v40, %v704_v33  ;;  %vm726_vm15 = vweird.f32 %v4860_v40 }
 0x4a0   :  { %vm727_vm3 = vmor %vm725_vm2, %vm726_vm15 }
 0x4a1   :  { %v722_v47 = vsub.f32 1.0, %v721_v42 }
 0x4a3   :  { %v723_v50 = vmul.f32 %v4860_v40, %v722_v47 }
 0x4a5   :  { %v724_v53 = vadd.f32 %v4860_v40, %v723_v50 }
 0x4a7   :  { %v728_v54 = vsel %vm727_vm3, %v4860_v40, %v724_v53 }
 0x4a8   :  { %v733_v56 = vsel %vm730_vm4, %v732_v43, %v728_v54 }
 0x4a9   :  { %v734_v57 = vmul.f32 %v5569_v2, %v733_v56 }
 0x4ab   :  { %4526 = vmatmul.msk.f32.vlgmr.msra.gmra.mxu3 %vm475_vm9, %v734_v57  ;;  %4038 = vst.msk [vmem:[#allocation7 + $0x28] sm:$0xff] %vm475_vm9, %v734_v57 }
 0x4ac   :  { %4533 = vmatpush.xpose.msk.msra.mxu3 %vm475_vm9, %v948_v26 }
 0x4af   :  { %v946_v58 = vpop.permute.xlu1 %945 }
 0x4b3   :  { %4528 = vmatmul.msk.f32.vlgmr.msrb.gmra.mxu3 %vm475_vm9, %v5577_v4  ;;  %v539_v4 = vmul.f32 1.442695, %v536_v3 }
 0x4b5   :  { %4861 = vpow2.f32 %v539_v4 }
 0x4b6   :  { %4863 = vpow2.f32 %v855_v13 }
 0x4b7   :  { %v974_v59 = vpop.permute.xlu1 %973 }
 0x4b8   :  { %4536 = vmatmul.msk.f32.vlgmr.msrb.gmra.mxu0 %vm475_vm9, %v974_v59 }
 0x4bb   :  { %4534 = vmatmul.msk.f32.vlgmr.msra.gmra.mxu3 %vm475_vm9, %v946_v58  ;;  %v5620_v14 = vpop.eup %4861 }
 0x4bc   :  { %v544_v16 = vsel %vm475_vm9, %v5620_v14, 0.0  ;;  %v5626_v21 = vpop.eup %4863 }
 0x4bd   :  { %v860_v23 = vsel %vm475_vm9, %v5626_v21, 0.0 }
 0x4e5   :  { %v336_v0 = vpop.permute.xlu0 %335 }
 0x4e6   :  { %vm338_vm5 = vcmp.eq.s32.totalorder %v336_v0, %v322_v39 }
 0x4e7   :  { %4512 = vmatmul.msk.f32.gmra.mxu2 %vm338_vm5, %v5232_v51 }
 0x4eb   :  { %v5611_v60 = vpop.f32.mrf.mxu3 }
 0x4f3   :  { %v654_v61 = vpop.f32.mrf.mxu3 }
 0x4f4   :  { %v685_v62 = vmul.f32 0.35355338, %v654_v61 }
 0x4f6   :  { %v687_v63 = vsel %vm475_vm9, %v685_v62, -inf }
 0x4f7   :  { %688 = vmax.xlane.f32.xlu1 %v687_v63 }
 0x4ff   :  { %v360_v17 = vpop.f32.mrf.mxu2 }
 0x500   :  { %v367_v20 = vadd.f32 %v366_v18, %v360_v17 }
 0x502   :  { %v371_v22 = vsel %vm242_vm1, %v367_v20, 0.0 }
 0x52e   :  { %v5614_v2 = vpop.f32.mrf.mxu3 }
 0x535   :  { %v998_v6 = vpop.f32.mrf.mxu0 }
 0x536   :  { %v1002_v7 = vmul.f32 0.35355338, %v998_v6  ;;  %v812_v8 = vpop.f32.mrf.mxu3 }
 0x537   :  { %v843_v10 = vmul.f32 0.35355338, %v812_v8 }
 0x538   :  { %v1006_v11 = vsel %vm475_vm9, %v1002_v7, -inf }
 0x539   :  { %1007 = vmax.xlane.f32.xlu1 %v1006_v11  ;;  %v845_v12 = vsel %vm475_vm9, %v843_v10, -inf }
 0x53a   :  { %846 = vmax.xlane.f32.xlu0 %v845_v12 }
 0x53e   :  { %v970_v52 = vpop.f32.mrf.mxu3 }
 0x53f   :  { %v1001_v15 = vmul.f32 0.35355338, %v970_v52 }
 0x541   :  { %545 = vadd.xlane.f32.xlu1 %v544_v16  ;;  %v1003_v55 = vsel %vm475_vm9, %v1001_v15, -inf }
 0x542   :  { %1004 = vmax.xlane.f32.xlu2 %v1003_v55 }
 0x549   :  { %861 = vadd.xlane.f32.xlu1 %v860_v23 }
 0x54a   :  { %372 = vadd.xlane.f32.xlu2 %v371_v22 }
 0x54e   :  { %603 = vrot.lane.b32.xlu0 %v5509_v29, %s5226_s17 }
 0x56a   :  { %v689_v25 = vpop.xlane.xlu1 %688  ;;  %v363_v34 = vpop.f32.mrf.mxu2 }
 0x56b   :  { %v693_v26 = vsub.f32 %v685_v62, %v689_v25  ;;  %v5643_v39 = vadd.f32 %v366_v18, %v363_v34 }
 0x56d   :  { %v695_v28 = vmul.f32 1.442695, %v693_v26  ;;  %v374_v41 = vsel %vm242_vm1, %v5643_v39, 0.0 }
 0x56f   :  { %4865 = vpow2.f32 %v695_v28 }
 0x575   :  { %v5633_v30 = vpop.eup %4865 }
 0x576   :  { %v699_v31 = vsel %vm475_vm9, %v5633_v30, 0.0 }
 0x578   :  { %700 = vadd.xlane.f32.xlu0 %v699_v31 }
 0x58c   :  { %4763 = vrot.lane.b32.xlu0 %v5639_v32, %s5233_s3 }
 0x5ac   :  { %v1008_v33 = vpop.xlane.xlu1 %1007 }
 0x5ad   :  { %v1010_v35 = vsub.f32 %v1002_v7, %v1008_v33  ;;  %v847_v36 = vpop.xlane.xlu0 %846 }
 0x5ae   :  { %v851_v38 = vsub.f32 %v843_v10, %v847_v36 }
 0x5af   :  { %v1013_v37 = vmul.f32 1.442695, %v1010_v35 }
 0x5b0   :  { %v853_v40 = vmul.f32 1.442695, %v851_v38 }
 0x5b1   :  { %4867 = vpow2.f32 %v1013_v37 }
 0x5b4   :  { %v546_v42 = vpop.xlane.xlu1 %545 }
 0x5b5   :  { %4869 = vrcp.f32 %v546_v42  ;;  %v1005_v29 = vpop.xlane.xlu2 %1004  ;;  %v573_v57 = vand.u32 2147483648, %v546_v42  ;;  %v571_v58 = vand.u32 2147483647, %v546_v42  ;;  %vm567_vm7 = vweird.f32 %v546_v42 }
 0x5b6   :  { %375 = vadd.xlane.f32.xlu0 %v374_v41  ;;  %4871 = vpow2.f32 %v853_v40  ;;  %v1009_v45 = vsub.f32 %v1001_v15, %v1005_v29  ;;  %v4544_v41 = vld [vmem:[%s5309_s24 + $0x38] sm:$0xff]  ;;  %v4543_v29 = vld [vmem:[%s5309_s24 + $0x30] sm:$0xff] }
 0x5b7   :  { %v5647_v44 = vpop.eup %4867  ;;  %v574_v4 = vor.u32 1.1754944e-38, %v573_v57  ;;  %vm572_vm10 = vcmp.eq.f32.partialorder %v571_v58, 8.507059e+37  ;;  %1262 = vmatpush.msra.mxu0 %v4544_v41 }
 0x5b8   :  { %v1018_v47 = vsel %vm475_vm9, %v5647_v44, 0.0  ;;  %v1011_v50 = vmul.f32 1.442695, %v1009_v45  ;;  %v4542_v45 = vld [vmem:[%s5309_s24 + $0x28] sm:$0xff] }
 0x5b9   :  { %1019 = vadd.xlane.f32.xlu2 %v1018_v47  ;;  %1263 = vmatpush.msra.mxu0 %v4543_v29 }
 0x5bb   :  { %v4870_v48 = vpop.eup %4869  ;;  %1264 = vmatpush.msra.mxu0 %v4542_v45 }
 0x5bc   :  { %v563_v49 = vmul.f32 %v4870_v48, %v546_v42  ;;  %v862_v51 = vpop.xlane.xlu1 %861  ;;  %v5651_v53 = vpop.eup %4871  ;;  %vm568_vm6 = vweird.f32 %v4870_v48 }
 0x5bd   :  { %4873 = vrcp.f32 %v862_v51  ;;  %v373_v43 = vpop.xlane.xlu2 %372  ;;  %v857_v63 = vsel %vm475_vm9, %v5651_v53, 0.0  ;;  %vm569_vm8 = vmor %vm567_vm7, %vm568_vm6  ;;  %v889_v12 = vand.u32 2147483648, %v862_v51  ;;  %v887_v52 = vand.u32 2147483647, %v862_v51 }
 0x5be   :  { %v564_v54 = vsub.f32 1.0, %v563_v49  ;;  %v377_v56 = vmul.f32 %v373_v43, %v5482_v46  ;;  %4875 = vpow2.f32 %v1011_v50  ;;  %vm883_vm12 = vweird.f32 %v862_v51  ;;  %v4541_v49 = vld [vmem:[%s5309_s24 + $0x20] sm:$0xff] }
 0x5bf   :  { %v890_v17 = vor.u32 1.1754944e-38, %v889_v12  ;;  %vm888_vm14 = vcmp.eq.f32.partialorder %v887_v52, 8.507059e+37  ;;  %1265 = vmatpush.msra.mxu0 %v4541_v49 }
 0x5c0   :  { %v565_v59 = vmul.f32 %v4870_v48, %v564_v54  ;;  %v5654_v61 = vsub.f32 %v367_v20, %v377_v56  ;;  %v604_v62 = vpop.permute.xlu0 %603 }
 0x5c1   :  { %624 = vmatpush.msrb.mxu1 %v604_v62  ;;  %858 = vadd.xlane.f32.xlu2 %v857_v63 }
 0x5c2   :  { %v381_v0 = vmul.f32 %v5654_v61, %v5654_v61  ;;  %v566_v1 = vadd.f32 %v4870_v48, %v565_v59 }
 0x5c3   :  { %v4874_v3 = vpop.eup %4873 }
 0x5c4   :  { %v879_v5 = vmul.f32 %v4874_v3, %v862_v51  ;;  %v383_v6 = vsel %vm242_vm1, %v381_v0, 0.0  ;;  %v570_v7 = vsel %vm569_vm8, %v4870_v48, %v566_v1  ;;  %v5661_v8 = vpop.eup %4875  ;;  %vm884_vm11 = vweird.f32 %v4874_v3 }
 0x5c5   :  { %384 = vadd.xlane.f32.xlu1 %v383_v6  ;;  %v575_v9 = vsel %vm572_vm10, %v574_v4, %v570_v7  ;;  %v1015_v15 = vsel %vm475_vm9, %v5661_v8, 0.0  ;;  %vm885_vm13 = vmor %vm883_vm12, %vm884_vm11 }
 0x5c6   :  { %v880_v10 = vsub.f32 1.0, %v879_v5  ;;  %v576_v11 = vmul.f32 %v5620_v14, %v575_v9 }
 0x5c8   :  { %v881_v13 = vmul.f32 %v4874_v3, %v880_v10  ;;  %4520 = vmatmul.msk.f32.vlgmr.msrb.gmra.mxu1 %vm475_vm9, %v576_v11  ;;  %4037 = vst.msk [vmem:[#allocation7 + $0x20] sm:$0xff] %vm475_vm9, %v576_v11 }
 0x5c9   :  { %1016 = vadd.xlane.f32.xlu2 %v1015_v15 }
 0x5ca   :  { %v882_v16 = vadd.f32 %v4874_v3, %v881_v13 }
 0x5cc   :  { %v886_v18 = vsel %vm885_vm13, %v4874_v3, %v882_v16 }
 0x5cd   :  { %v891_v55 = vsel %vm888_vm14, %v890_v17, %v886_v18 }
 0x5ce   :  { %v892_v14 = vmul.f32 %v5626_v21, %v891_v55 }
 0x5d0   :  { %4039 = vst.msk [vmem:[#allocation7 + $0x30] sm:$0xff] %vm475_vm9, %v892_v14 }
 0x5de   :  { %735 = vrot.lane.b32.xlu1 %v5505_v27, %s5230_s20 }
 0x5e1   :  { %4768 = vrot.lane.b32.xlu2 %v5639_v32, %s5234_s8 }
 0x5e9   :  { %1107 = vrot.lane.b32.xlu2 %v5614_v2, %s5235_s22 }
 0x5eb   :  { %v701_v20 = vpop.xlane.xlu0 %700 }
 0x5ec   :  { %4877 = vrcp.f32 %v701_v20  ;;  %v716_v26 = vand.u32 2147483648, %v701_v20  ;;  %v714_v28 = vand.u32 2147483647, %v701_v20  ;;  %vm710_vm2 = vweird.f32 %v701_v20 }
 0x5ee   :  { %v717_v27 = vor.u32 1.1754944e-38, %v716_v26  ;;  %vm715_vm4 = vcmp.eq.f32.partialorder %v714_v28, 8.507059e+37 }
 0x5f2   :  { %v4878_v22 = vpop.eup %4877 }
 0x5f3   :  { %v706_v23 = vmul.f32 %v4878_v22, %v701_v20  ;;  %vm711_vm15 = vweird.f32 %v4878_v22 }
 0x5f4   :  { %vm712_vm3 = vmor %vm710_vm2, %vm711_vm15 }
 0x5f5   :  { %v707_v25 = vsub.f32 1.0, %v706_v23 }
 0x5f7   :  { %v708_v21 = vmul.f32 %v4878_v22, %v707_v25 }
 0x5f9   :  { %v709_v31 = vadd.f32 %v4878_v22, %v708_v21 }
 0x5fb   :  { %v713_v33 = vsel %vm712_vm3, %v4878_v22, %v709_v31 }
 0x5fc   :  { %v718_v32 = vsel %vm715_vm4, %v717_v27, %v713_v33 }
 0x5fd   :  { %v5677_v2 = vmul.f32 %v5633_v30, %v718_v32 }
 0x5fe   :  { %v5679_v34 = vpop.permute.xlu0 %4763 }
 0x5ff   :  { %v4766_v35 = vunpack.i.h.bf16 %v5679_v34  ;;  %4034 = vst.msk [vmem:[#allocation7 + $0x8] sm:$0xff] %vm475_vm9, %v5677_v2 }
 0x601   :  { %940 = vmatpush.msra.mxu2 %v4766_v35 }
 0x602   :  { %4532 = vmatmul.msk.f32.vlgmr.msra.gmra.mxu2 %vm475_vm9, %v892_v14 }
 0x629   :  { %v376_v36 = vpop.xlane.xlu0 %375 }
 0x62a   :  { %v378_v37 = vmul.f32 %v376_v36, %v5482_v46 }
 0x62c   :  { %v5687_v38 = vsub.f32 %v5643_v39, %v378_v37  ;;  %v1020_v30 = vpop.xlane.xlu2 %1019 }
 0x62d   :  { %4879 = vrcp.f32 %v1020_v30  ;;  %v1047_v43 = vand.u32 2147483648, %v1020_v30  ;;  %v1045_v56 = vand.u32 2147483647, %v1020_v30  ;;  %vm1041_vm6 = vweird.f32 %v1020_v30 }
 0x62e   :  { %v382_v40 = vmul.f32 %v5687_v38, %v5687_v38 }
 0x62f   :  { %v1048_v0 = vor.u32 1.1754944e-38, %v1047_v43  ;;  %vm1046_vm8 = vcmp.eq.f32.partialorder %v1045_v56, 8.507059e+37 }
 0x630   :  { %v386_v42 = vsel %vm242_vm1, %v382_v40, 0.0 }
 0x631   :  { %387 = vadd.xlane.f32.xlu1 %v386_v42  ;;  %v4765_v42 = vunpack.i.l.bf16 %v5679_v34 }
 0x633   :  { %v4880_v47 = vpop.eup %4879 }
 0x634   :  { %v1037_v48 = vmul.f32 %v4880_v47, %v1020_v30  ;;  %v859_v50 = vpop.xlane.xlu2 %858  ;;  %vm1042_vm5 = vweird.f32 %v4880_v47  ;;  %v4818_v30 = vld [vmem:[%s5304_s19] ss:$0 sm:$0xff]  ;;  %s5237_s19 = smov 24  }
 0x635   :  { %4881 = vrcp.f32 %v859_v50  ;;  %vm1043_vm7 = vmor %vm1041_vm6, %vm1042_vm5  ;;  %v874_v9 = vand.u32 2147483648, %v859_v50  ;;  %v872_v10 = vand.u32 2147483647, %v859_v50  ;;  %vm868_vm11 = vweird.f32 %v859_v50 }
 0x636   :  { %v1038_v39 = vsub.f32 1.0, %v1037_v48 }
 0x637   :  { %v875_v15 = vor.u32 1.1754944e-38, %v874_v9  ;;  %vm873_vm13 = vcmp.eq.f32.partialorder %v872_v10, 8.507059e+37  ;;  %v433_v9 = vld [vmem:[%s5319_s6] sm:$0xff] }
 0x638   :  { %v1039_v51 = vmul.f32 %v4880_v47, %v1038_v39  ;;  %v385_v54 = vpop.xlane.xlu1 %384 }
 0x639   :  { %v389_v57 = vmul.f32 %v385_v54, %v5482_v46 }
 0x63a   :  { %v1040_v58 = vadd.f32 %v4880_v47, %v1039_v51 }
 0x63b   :  { %v4882_v59 = vpop.eup %4881  ;;  %v391_v62 = vadd.f32 1e-12, %v389_v57 }
 0x63c   :  { %v1044_v63 = vsel %vm1043_vm7, %v4880_v47, %v1040_v58  ;;  %v864_v1 = vmul.f32 %v4882_v59, %v859_v50  ;;  %v1017_v3 = vpop.xlane.xlu2 %1016  ;;  %vm869_vm10 = vweird.f32 %v4882_v59 }
 0x63d   :  { %4883 = vrsqrt.f32 %v391_v62  ;;  %v1049_v5 = vsel %vm1046_vm8, %v1048_v0, %v1044_v63  ;;  %vm870_vm12 = vmor %vm868_vm11, %vm869_vm10  ;;  %v1032_v25 = vand.u32 2147483648, %v1017_v3  ;;  %v1030_v21 = vand.u32 2147483647, %v1017_v3  ;;  %v4819_v63 = vld [vmem:[%s5314_s30 + $0x1] ss:$0 sm:$0xff] }
 0x63e   :  { %v865_v4 = vsub.f32 1.0, %v864_v1  ;;  %4885 = vrcp.f32 %v1017_v3  ;;  %v1050_v6 = vmul.f32 %v5647_v44, %v1049_v5  ;;  %vm1026_vm2 = vweird.f32 %v1017_v3  ;;  %v436_v5 = vld [vmem:[%s5319_s6 + $0x18] sm:$0xff] }
 0x63f   :  { %vm399_vm3 = vweird.f32 %v391_v62  ;;  %v1033_v33 = vor.u32 1.1754944e-38, %v1032_v25  ;;  %vm1031_vm6 = vcmp.eq.f32.partialorder %v1030_v21, 8.507059e+37  ;;  %1156 = vmatpush.msrb.mxu3 %v436_v5  ;;  %vm1132_vm11 = vcmask 195584  }
 0x640   :  { %v866_v7 = vmul.f32 %v4882_v59, %v865_v4  ;;  %4040 = vst.msk [vmem:[#allocation7 + $0x38] sm:$0xff] %vm475_vm9, %v1050_v6 }
 0x642   :  { %v867_v11 = vadd.f32 %v4882_v59, %v866_v7  ;;  %v434_v7 = vld [vmem:[%s5319_s6 + $0x8] sm:$0xff] }
 0x643   :  { %v4884_v12 = vpop.eup %4883 }
 0x644   :  { %v4886_v13 = vpop.eup %4885  ;;  %v871_v52 = vsel %vm870_vm12, %v4882_v59, %v867_v11  ;;  %v394_v16 = vmul.f32 %v4884_v12, %v391_v62  ;;  %v4769_v17 = vpop.permute.xlu2 %4768  ;;  %vm400_vm15 = vweird.f32 %v4884_v12  ;;  %vm1129_vm12 = vcmask 130048  }
 0x645   :  { %v1022_v18 = vmul.f32 %v4886_v13, %v1017_v3  ;;  %v4771_v55 = vunpack.i.h.bf16 %v4769_v17  ;;  %v876_v44 = vsel %vm873_vm13, %v875_v15, %v871_v52  ;;  %vm1027_vm14 = vweird.f32 %v4886_v13  ;;  %vm401_vm5 = vmor %vm399_vm3, %vm400_vm15  ;;  %v626_v59 = vpop.f32.mrf.mxu1 }
 0x646   :  { %v395_v14 = vmul.f32 %v4884_v12, %v394_v16  ;;  %v877_v22 = vmul.f32 %v5651_v53, %v876_v44  ;;  %vm1028_vm4 = vmor %vm1026_vm2, %vm1027_vm14  ;;  %v4817_v53 = vld [vmem:[%s5299_s14] ss:$0 sm:$0xff]  ;;  %v4770_v45 = vunpack.i.l.bf16 %v4769_v17  ;;  %s5236_s14 = smov 16  }
 0x647   :  { %v1023_v20 = vsub.f32 1.0, %v1022_v18  ;;  %1098 = vmatpush.msrb.mxu2 %v4771_v55 }
 0x648   :  { %v396_v23 = vmul.f32 0.5, %v395_v14  ;;  %4538 = vmatmul.msk.f32.vlgmr.msrb.gmra.mxu2 %vm475_vm9, %v1050_v6  ;;  %4035 = vst.msk [vmem:[#allocation7 + $0x10] sm:$0xff] %vm475_vm9, %v877_v22  ;;  %v435_v6 = vld [vmem:[%s5319_s6 + $0x10] sm:$0xff] }
 0x649   :  { %v1024_v26 = vmul.f32 %v4886_v13, %v1023_v20  ;;  %1157 = vmatpush.msrb.mxu3 %v435_v6 }
 0x64a   :  { %v397_v28 = vsub.f32 1.5, %v396_v23 }
 0x64b   :  { %v1025_v31 = vadd.f32 %v4886_v13, %v1024_v26  ;;  %1158 = vmatpush.msrb.mxu3 %v434_v7 }
 0x64c   :  { %v398_v27 = vmul.f32 %v4884_v12, %v397_v28  ;;  %v1108_v10 = vpop.permute.xlu2 %1107 }
 0x64d   :  { %v1029_v32 = vsel %vm1028_vm4, %v4886_v13, %v1025_v31  ;;  %1159 = vmatpush.msrb.mxu3 %v433_v9  ;;  %v1128_v14 = vsel %vm475_vm9, %v626_v59, %v1108_v10 }
 0x64e   :  { %v402_v35 = vsel %vm401_vm5, %v4884_v12, %v398_v27  ;;  %v1034_v36 = vsel %vm1031_vm6, %v1033_v33, %v1029_v32 }
 0x64f   :  { %v413_v37 = vmul.f32 %v402_v35, %v5654_v61  ;;  %v1035_v40 = vmul.f32 %v5661_v8, %v1034_v36  ;;  %v425_v35 = vld [vmem:[%s6678_s26] sm:$0x3] }
 0x650   :  { %v736_v41 = vpop.permute.xlu1 %735 }
 0x651   :  { %v418_v29 = vmul.f32 %v4817_v53, %v413_v37  ;;  %756 = vmatpush.msra.mxu1 %v736_v41  ;;  %4036 = vst.msk [vmem:[#allocation7 + $0x18] sm:$0xff] %vm475_vm9, %v1035_v40 }
 0x652   :  { %4525 = vmatmul.msk.f32.vlgmr.msra.gmra.mxu1 %vm475_vm9, %v5677_v2 }
 0x653   :  { %914 = vmatpush.msrb.mxu1 %v4765_v42  ;;  %v5710_v47 = vadd.f32 %v4818_v30, %v418_v29  ;;  %v5796_v42 = vld [vmem:[%s6679_s1] ss:$0 sm:$0xff] }
 0x655   :  { %1072 = vmatpush.msra.mxu1 %v4770_v45  ;;  %4553 = vmatmul.msk.f32.vlgmr.msra.gmra.mxu0 %vm242_vm1, %v5710_v47 }
 0x65a   :  { %4531 = vmatmul.msk.f32.vlgmr.msrb.gmra.mxu1 %vm475_vm9, %v877_v22 }
 0x662   :  { %4537 = vmatmul.msk.f32.vlgmr.msra.gmra.mxu1 %vm475_vm9, %v1035_v40 }
 0x685   :  { %v942_v61 = vpop.f32.mrf.mxu2 }
 0x686   :  { %1115 = vrot.lane.b32.xlu0 %v942_v61, %s5236_s14 }
 0x6a4   :  { %v388_v8 = vpop.xlane.xlu1 %387 }
 0x6a5   :  { %v390_v34 = vmul.f32 %v388_v8, %v5482_v46 }
 0x6a7   :  { %v392_v48 = vadd.f32 1e-12, %v390_v34 }
 0x6a9   :  { %4887 = vrsqrt.f32 %v392_v48  ;;  %vm409_vm8 = vweird.f32 %v392_v48 }
 0x6af   :  { %v4888_v2 = vpop.eup %4887 }
 0x6b0   :  { %v404_v50 = vmul.f32 %v4888_v2, %v392_v48  ;;  %vm410_vm7 = vweird.f32 %v4888_v2 }
 0x6b1   :  { %vm411_vm10 = vmor %vm409_vm8, %vm410_vm7 }
 0x6b2   :  { %v405_v49 = vmul.f32 %v4888_v2, %v404_v50 }
 0x6b4   :  { %v406_v39 = vmul.f32 0.5, %v405_v49 }
 0x6b6   :  { %v407_v51 = vsub.f32 1.5, %v406_v39 }
 0x6b8   :  { %v408_v43 = vmul.f32 %v4888_v2, %v407_v51 }
 0x6ba   :  { %v412_v54 = vsel %vm411_vm10, %v4888_v2, %v408_v43 }
 0x6bb   :  { %v414_v56 = vmul.f32 %v412_v54, %v5687_v38 }
 0x6bd   :  { %v419_v57 = vmul.f32 %v4817_v53, %v414_v56 }
 0x6bf   :  { %v5719_v58 = vadd.f32 %v4818_v30, %v419_v57  ;;  %v426_v30 = vsub.f32 1.0, %v425_v35 }
 0x6c1   :  { %4554 = vmatmul.msk.f32.gmra.mxu0 %vm242_vm1, %v5719_v58  ;;  %v5792_v41 = vmul.f32 -1e+09, %v426_v30 }
 0x6c3   :  { %v5799_v45 = vperm.slane %v5792_v41, 0 }
 0x6cb   :  { %v1100_v4 = vpop.f32.mrf.mxu2 }
 0x6cf   :  { %v758_v62 = vpop.f32.mrf.mxu1 }
 0x6d0   :  { %1105 = vrot.lane.b32.xlu2 %v758_v62, %s5235_s22 }
 0x6d2   :  { %v1267_v0 = vpop.f32.mrf.mxu0 }
 0x6d3   :  { %v5725_v1 = vadd.f32 %v4819_v63, %v1267_v0 }
 0x6d5   :  { %1437 = vrot.lane.b32.xlu0 %v5725_v1, %s5224_s5  ;;  %1276 = vrot.lane.b32.xlu1 %v5725_v1, %s5223_s0 }
 0x6d7   :  { %v916_v38 = vpop.f32.mrf.mxu1 }
 0x6d8   :  { %1113 = vrot.lane.b32.xlu2 %v916_v38, %s5236_s14 }
 0x6dd   :  { %1597 = vrot.lane.b32.xlu0 %v5725_v1, %s5228_s25  ;;  %1757 = vrot.lane.b32.xlu1 %v5725_v1, %s5231_s9 }
 0x6df   :  { %v1074_v3 = vpop.f32.mrf.mxu1 }
 0x6e0   :  { %1121 = vrot.lane.b32.xlu2 %v1074_v3, %s5237_s19 }
 0x6e8   :  { %1123 = vrot.lane.b32.xlu2 %v1100_v4, %s5237_s19 }
 0x6f0   :  { %1439 = vrot.lane.b32.xlu2 %v5725_v1, %s5225_s13 }
 0x6f8   :  { %1599 = vrot.lane.b32.xlu2 %v5725_v1, %s5227_s21  ;;  %v1116_v18 = vpop.permute.xlu0 %1115 }
 0x700   :  { %1759 = vrot.lane.b32.xlu2 %v5725_v1, %s5229_s29 }
 0x72a   :  { %v1106_v11 = vpop.permute.xlu2 %1105 }
 0x72b   :  { %v1127_v13 = vsel %vm475_vm9, %v5611_v60, %v1106_v11  ;;  %v1131_v60 = vsel %vm1129_vm12, %v1128_v14, %v1116_v18 }
 0x732   :  { %v1114_v12 = vpop.permute.xlu2 %1113 }
 0x733   :  { %v1130_v52 = vsel %vm1129_vm12, %v1127_v13, %v1114_v12 }
 0x73a   :  { %v1122_v15 = vpop.permute.xlu2 %1121 }
 0x73b   :  { %v1133_v16 = vsel %vm1132_vm11, %v1130_v52, %v1122_v15 }
 0x73c   :  { %4539 = vmatmul.msk.f32.vlgmr.msrb.gmra.mxu3 %vm242_vm1, %v1133_v16 }
 0x73e   :  { %v1270_v17 = vpop.f32.mrf.mxu0 }
 0x73f   :  { %v5753_v55 = vadd.f32 %v4819_v63, %v1270_v17 }
 0x741   :  { %1465 = vrot.lane.b32.xlu1 %v5753_v55, %s5224_s5  ;;  %1303 = vrot.lane.b32.xlu0 %v5753_v55, %s5223_s0 }
 0x742   :  { %1467 = vrot.lane.b32.xlu2 %v5753_v55, %s5225_s13  ;;  %v1124_v44 = vpop.permute.xlu2 %1123 }
 0x743   :  { %v1134_v20 = vsel %vm1132_vm11, %v1131_v60, %v1124_v44 }
 0x744   :  { %4540 = vmatmul.msk.f32.gmra.mxu3 %vm242_vm1, %v1134_v20 }
 0x747   :  { %v1277_v22 = vpop.permute.xlu1 %1276  ;;  %v1438_v25 = vpop.permute.xlu0 %1437 }
 0x748   :  { %4555 = vmatpush.xpose.msk.msrb.mxu1 %vm475_vm9, %v1277_v22 }
 0x749   :  { %1625 = vrot.lane.b32.xlu1 %v5753_v55, %s5228_s25  ;;  %1627 = vrot.lane.b32.xlu0 %v5753_v55, %s5227_s21 }
 0x74a   :  { %v1440_v23 = vpop.permute.xlu2 %1439 }
 0x74b   :  { %4556 = vmatmul.msk.f32.vlgmr.msrb.gmra.mxu1 %vm475_vm9, %v5725_v1  ;;  %4561 = vmatpush.xpose.msk.msra.mxu3 %vm475_vm9, %v1440_v23 }
 0x74e   :  { %4562 = vmatmul.msk.f32.vlgmr.msra.gmra.mxu3 %vm475_vm9, %v1438_v25 }
 0x74f   :  { %v1598_v21 = vpop.permute.xlu0 %1597  ;;  %v1758_v31 = vpop.permute.xlu1 %1757 }
 0x751   :  { %1787 = vrot.lane.b32.xlu0 %v5753_v55, %s5229_s29 }
 0x752   :  { %v1600_v26 = vpop.permute.xlu2 %1599 }
 0x753   :  { %4567 = vmatpush.xpose.msk.msrb.mxu3 %vm475_vm9, %v1600_v26 }
 0x756   :  { %4568 = vmatmul.msk.f32.vlgmr.msrb.gmra.mxu3 %vm475_vm9, %v1598_v21  ;;  %v1274_v21 = vrot.slane %v5792_v41, 1 }
 0x759   :  { %1785 = vrot.lane.b32.xlu0 %v5753_v55, %s5231_s9 }
 0x75a   :  { %v1760_v28 = vpop.permute.xlu2 %1759 }
 0x75b   :  { %4573 = vmatpush.xpose.msk.msra.mxu3 %vm475_vm9, %v1760_v28 }
 0x75e   :  { %4574 = vmatmul.msk.f32.vlgmr.msra.gmra.mxu3 %vm475_vm9, %v1758_v31  ;;  %v5838_v31 = vperm.slane %v1274_v21, 0 }
 0x79c   :  { %v1468_v27 = vpop.permute.xlu2 %1467 }
 0x79d   :  { %4563 = vmatpush.xpose.msk.msrb.mxu0 %vm475_vm9, %v1468_v27 }
 0x7b3   :  { %v1304_v33 = vpop.permute.xlu0 %1303  ;;  %v1466_v53 = vpop.permute.xlu1 %1465 }
 0x7b4   :  { %4557 = vmatpush.xpose.msk.msra.mxu2 %vm475_vm9, %v1304_v33  ;;  %4564 = vmatmul.msk.f32.vlgmr.msrb.gmra.mxu0 %vm475_vm9, %v1466_v53 }
 0x7b7   :  { %4558 = vmatmul.msk.f32.vlgmr.msra.gmra.mxu2 %vm475_vm9, %v5753_v55 }
 0x7bb   :  { %v1628_v32 = vpop.permute.xlu0 %1627  ;;  %v1626_v36 = vpop.permute.xlu1 %1625 }
 0x7bc   :  { %4569 = vmatpush.xpose.msk.msra.mxu0 %vm475_vm9, %v1628_v32 }
 0x7bf   :  { %v5789_v37 = vpop.f32.mrf.mxu3  ;;  %4570 = vmatmul.msk.f32.vlgmr.msra.gmra.mxu0 %vm475_vm9, %v1626_v36 }
 0x7c3   :  { %v1788_v40 = vpop.permute.xlu0 %1787 }
 0x7c4   :  { %4575 = vmatpush.xpose.msk.msrb.mxu0 %vm475_vm9, %v1788_v40 }
 0x7c7   :  { %v1164_v29 = vpop.f32.mrf.mxu3 }
 0x7c8   :  { %v5802_v61 = vadd.f32 %v5796_v42, %v1164_v29  ;;  %v1299_v8 = vpop.f32.mrf.mxu1 }
 0x7c9   :  { %v1329_v34 = vmul.f32 0.35355338, %v1299_v8 }
 0x7cb   :  { %v1786_v48 = vpop.permute.xlu0 %1785  ;;  %v1335_v2 = vadd.f32 %v5799_v45, %v1329_v34 }
 0x7cc   :  { %4576 = vmatmul.msk.f32.vlgmr.msrb.gmra.mxu0 %vm475_vm9, %v1786_v48 }
 0x7cd   :  { %v1337_v50 = vsel %vm475_vm9, %v1335_v2, -inf }
 0x7ce   :  { %1338 = vmax.xlane.f32.xlu2 %v1337_v50 }
 0x7d1   :  { %v1462_v49 = vpop.f32.mrf.mxu3 }
 0x7d2   :  { %v1493_v39 = vmul.f32 0.35355338, %v1462_v49 }
 0x7d4   :  { %v1495_v51 = vadd.f32 %v1493_v39, %v5799_v45 }
 0x7d6   :  { %v1497_v43 = vsel %vm475_vm9, %v1495_v51, -inf }
 0x7d7   :  { %1498 = vmax.xlane.f32.xlu1 %v1497_v43 }
 0x7d9   :  { %v1622_v54 = vpop.f32.mrf.mxu3 }
 0x7da   :  { %v1653_v56 = vmul.f32 0.35355338, %v1622_v54 }
 0x7dc   :  { %v1655_v57 = vadd.f32 %v1653_v56, %v5799_v45 }
 0x7de   :  { %v1657_v59 = vsel %vm475_vm9, %v1655_v57, -inf }
 0x7df   :  { %1658 = vmax.xlane.f32.xlu0 %v1657_v59 }
 0x7e1   :  { %v1782_v62 = vpop.f32.mrf.mxu3 }
 0x7e2   :  { %v1813_v63 = vmul.f32 0.35355338, %v1782_v62 }
 0x7e4   :  { %v1815_v0 = vadd.f32 %v1813_v63, %v5799_v45 }
 0x7e6   :  { %v1817_v38 = vsel %vm475_vm9, %v1815_v0, -inf }
 0x7e7   :  { %1818 = vmax.xlane.f32.xlu2 %v1817_v38 }
 0x7f0   :  { %1385 = vrot.lane.b32.xlu1 %v5725_v1, %s5226_s17 }
 0x831   :  { %v1490_v25 = vpop.f32.mrf.mxu0 }
 0x83a   :  { %v1326_v27 = vpop.f32.mrf.mxu2 }
 0x83b   :  { %v1330_v53 = vmul.f32 0.35355338, %v1326_v27 }
 0x83c   :  { %v1650_v26 = vpop.f32.mrf.mxu0 }
 0x83d   :  { %v1654_v28 = vmul.f32 0.35355338, %v1650_v26  ;;  %v5846_v35 = vadd.f32 %v5838_v31, %v1330_v53 }
 0x83f   :  { %v5841_v33 = vadd.f32 %v1654_v28, %v5838_v31  ;;  %v1340_v40 = vsel %vm475_vm9, %v5846_v35, -inf }
 0x841   :  { %v1339_v3 = vpop.xlane.xlu2 %1338  ;;  %v1660_v32 = vsel %vm475_vm9, %v5841_v33, -inf }
 0x842   :  { %v1343_v4 = vsub.f32 %v1335_v2, %v1339_v3 }
 0x844   :  { %v1345_v5 = vmul.f32 1.442695, %v1343_v4 }
 0x846   :  { %4889 = vpow2.f32 %v1345_v5 }
 0x849   :  { %v1810_v36 = vpop.f32.mrf.mxu0 }
 0x84a   :  { %v1499_v6 = vpop.xlane.xlu1 %1498  ;;  %v1814_v30 = vmul.f32 0.35355338, %v1810_v36 }
 0x84b   :  { %v1503_v7 = vsub.f32 %v1495_v51, %v1499_v6 }
 0x84c   :  { %v5815_v9 = vpop.eup %4889  ;;  %v5854_v29 = vadd.f32 %v1814_v30, %v5838_v31 }
 0x84d   :  { %v1505_v10 = vmul.f32 1.442695, %v1503_v7  ;;  %v1349_v11 = vsel %vm475_vm9, %v5815_v9, 0.0 }
 0x84e   :  { %1350 = vadd.xlane.f32.xlu2 %v1349_v11  ;;  %v1820_v34 = vsel %vm475_vm9, %v5854_v29, -inf }
 0x84f   :  { %4891 = vpow2.f32 %v1505_v10 }
 0x852   :  { %v1659_v12 = vpop.xlane.xlu0 %1658 }
 0x853   :  { %v1663_v13 = vsub.f32 %v1655_v57, %v1659_v12 }
 0x855   :  { %v5819_v52 = vpop.eup %4891  ;;  %v1665_v15 = vmul.f32 1.442695, %v1663_v13 }
 0x856   :  { %v1509_v16 = vsel %vm475_vm9, %v5819_v52, 0.0 }
 0x857   :  { %4893 = vpow2.f32 %v1665_v15  ;;  %1510 = vadd.xlane.f32.xlu1 %v1509_v16 }
 0x85a   :  { %v1819_v17 = vpop.xlane.xlu2 %1818 }
 0x85b   :  { %v1823_v18 = vsub.f32 %v1815_v0, %v1819_v17 }
 0x85d   :  { %v5823_v14 = vpop.eup %4893  ;;  %v1825_v60 = vmul.f32 1.442695, %v1823_v18 }
 0x85e   :  { %v1669_v44 = vsel %vm475_vm9, %v5823_v14, 0.0 }
 0x85f   :  { %4895 = vpow2.f32 %v1825_v60  ;;  %1670 = vadd.xlane.f32.xlu2 %v1669_v44 }
 0x862   :  { %v1386_v20 = vpop.permute.xlu1 %1385 }
 0x863   :  { %1406 = vmatpush.msra.mxu1 %v1386_v20 }
 0x865   :  { %v5827_v22 = vpop.eup %4895 }
 0x866   :  { %v1829_v23 = vsel %vm475_vm9, %v5827_v22, 0.0 }
 0x867   :  { %1830 = vadd.xlane.f32.xlu0 %v1829_v23 }
 0x870   :  { %1865 = vrot.lane.b32.xlu1 %v5725_v1, %s5234_s8 }
 0x877   :  { %1545 = vrot.lane.b32.xlu2 %v5725_v1, %s5230_s20 }
 0x87b   :  { %1705 = vrot.lane.b32.xlu0 %v5725_v1, %s5233_s3  ;;  %v1494_v1 = vmul.f32 0.35355338, %v1490_v25 }
 0x87d   :  { %v5851_v41 = vadd.f32 %v1494_v1, %v5838_v31 }
 0x87f   :  { %v1500_v8 = vsel %vm475_vm9, %v5851_v41, -inf }
 0x89a   :  { %1661 = vmax.xlane.f32.xlu1 %v1660_v32 }
 0x8a0   :  { %1341 = vmax.xlane.f32.xlu2 %v1340_v40 }
 0x8a5   :  { %1501 = vmax.xlane.f32.xlu0 %v1500_v8 }
 0x8a8   :  { %1821 = vmax.xlane.f32.xlu2 %v1820_v34 }
 0x8c1   :  { %v1351_v48 = vpop.xlane.xlu2 %1350 }
 0x8c2   :  { %4897 = vrcp.f32 %v1351_v48  ;;  %v1366_v51 = vand.u32 2147483648, %v1351_v48  ;;  %v1364_v54 = vand.u32 2147483647, %v1351_v48  ;;  %vm1360_vm14 = vweird.f32 %v1351_v48 }
 0x8c4   :  { %v1367_v57 = vor.u32 1.1754944e-38, %v1366_v51  ;;  %vm1365_vm2 = vcmp.eq.f32.partialorder %v1364_v54, 8.507059e+37 }
 0x8c8   :  { %v4898_v2 = vpop.eup %4897 }
 0x8c9   :  { %v1356_v50 = vmul.f32 %v4898_v2, %v1351_v48  ;;  %vm1361_vm13 = vweird.f32 %v4898_v2 }
 0x8ca   :  { %v1511_v49 = vpop.xlane.xlu1 %1510  ;;  %vm1362_vm15 = vmor %vm1360_vm14, %vm1361_vm13 }
 0x8cb   :  { %v1357_v39 = vsub.f32 1.0, %v1356_v50  ;;  %4899 = vrcp.f32 %v1511_v49  ;;  %v1526_v5 = vand.u32 2147483648, %v1511_v49  ;;  %v1524_v7 = vand.u32 2147483647, %v1511_v49 }
 0x8cc   :  { %vm1520_vm4 = vweird.f32 %v1511_v49 }
 0x8cd   :  { %v1358_v43 = vmul.f32 %v4898_v2, %v1357_v39  ;;  %v1527_v12 = vor.u32 1.1754944e-38, %v1526_v5  ;;  %vm1525_vm6 = vcmp.eq.f32.partialorder %v1524_v7, 8.507059e+37 }
 0x8cf   :  { %v1359_v56 = vadd.f32 %v4898_v2, %v1358_v43 }
 0x8d1   :  { %v4900_v59 = vpop.eup %4899  ;;  %v1363_v62 = vsel %vm1362_vm15, %v4898_v2, %v1359_v56 }
 0x8d2   :  { %v1368_v63 = vsel %vm1365_vm2, %v1367_v57, %v1363_v62  ;;  %v1516_v0 = vmul.f32 %v4900_v59, %v1511_v49  ;;  %v1671_v38 = vpop.xlane.xlu2 %1670  ;;  %vm1521_vm3 = vweird.f32 %v4900_v59 }
 0x8d3   :  { %4901 = vrcp.f32 %v1671_v38  ;;  %v1369_v4 = vmul.f32 %v5815_v9, %v1368_v63  ;;  %vm1522_vm5 = vmor %vm1520_vm4, %vm1521_vm3  ;;  %v1686_v44 = vand.u32 2147483648, %v1671_v38  ;;  %v1684_v23 = vand.u32 2147483647, %v1671_v38 }
 0x8d4   :  { %v1517_v3 = vsub.f32 1.0, %v1516_v0  ;;  %vm1680_vm8 = vweird.f32 %v1671_v38 }
 0x8d5   :  { %4559 = vmatmul.msk.f32.vlgmr.msra.gmra.mxu1 %vm475_vm9, %v1369_v4  ;;  %4041 = vst.msk [vmem:[#allocation8] sm:$0xff] %vm475_vm9, %v1369_v4  ;;  %v1687_v21 = vor.u32 1.1754944e-38, %v1686_v44  ;;  %vm1685_vm13 = vcmp.eq.f32.partialorder %v1684_v23, 8.507059e+37 }
 0x8d6   :  { %v1518_v6 = vmul.f32 %v4900_v59, %v1517_v3 }
 0x8d8   :  { %v1519_v10 = vadd.f32 %v4900_v59, %v1518_v6 }
 0x8d9   :  { %v4902_v11 = vpop.eup %4901 }
 0x8da   :  { %v1523_v13 = vsel %vm1522_vm5, %v4900_v59, %v1519_v10  ;;  %v1676_v15 = vmul.f32 %v4902_v11, %v1671_v38  ;;  %v1831_v16 = vpop.xlane.xlu0 %1830  ;;  %v1546_v17 = vpop.permute.xlu2 %1545  ;;  %vm1681_vm7 = vweird.f32 %v4902_v11 }
 0x8db   :  { %v1528_v18 = vsel %vm1525_vm6, %v1527_v12, %v1523_v13  ;;  %4903 = vrcp.f32 %v1831_v16  ;;  %1566 = vmatpush.msrb.mxu1 %v1546_v17  ;;  %vm1682_vm10 = vmor %vm1680_vm8, %vm1681_vm7  ;;  %v1846_v1 = vand.u32 2147483648, %v1831_v16  ;;  %v1844_v30 = vand.u32 2147483647, %v1831_v16 }
 0x8dc   :  { %v1677_v9 = vsub.f32 1.0, %v1676_v15  ;;  %v1529_v60 = vmul.f32 %v5819_v52, %v1528_v18  ;;  %vm1840_vm15 = vweird.f32 %v1831_v16 }
 0x8dd   :  { %v1847_v8 = vor.u32 1.1754944e-38, %v1846_v1  ;;  %vm1845_vm3 = vcmp.eq.f32.partialorder %v1844_v30, 8.507059e+37 }
 0x8de   :  { %v1678_v20 = vmul.f32 %v4902_v11, %v1677_v9  ;;  %4565 = vmatmul.msk.f32.vlgmr.msrb.gmra.mxu1 %vm475_vm9, %v1529_v60  ;;  %4042 = vst.msk [vmem:[#allocation8 + $0x8] sm:$0xff] %vm475_vm9, %v1529_v60 }
 0x8e0   :  { %v1679_v25 = vadd.f32 %v4902_v11, %v1678_v20 }
 0x8e1   :  { %v4904_v26 = vpop.eup %4903 }
 0x8e2   :  { %v1683_v28 = vsel %vm1682_vm10, %v4902_v11, %v1679_v25  ;;  %v1836_v27 = vmul.f32 %v4904_v26, %v1831_v16  ;;  %vm1841_vm14 = vweird.f32 %v4904_v26 }
 0x8e3   :  { %v1688_v53 = vsel %vm1685_vm13, %v1687_v21, %v1683_v28  ;;  %vm1842_vm2 = vmor %vm1840_vm15, %vm1841_vm14 }
 0x8e4   :  { %v1837_v32 = vsub.f32 1.0, %v1836_v27  ;;  %v1689_v52 = vmul.f32 %v5823_v14, %v1688_v53  ;;  %v1866_v14 = vpop.permute.xlu1 %1865 }
 0x8e6   :  { %v1838_v36 = vmul.f32 %v4904_v26, %v1837_v32  ;;  %4043 = vst.msk [vmem:[#allocation8 + $0x10] sm:$0xff] %vm475_vm9, %v1689_v52 }
 0x8e8   :  { %v1839_v40 = vadd.f32 %v4904_v26, %v1838_v36 }
 0x8ea   :  { %v1843_v34 = vsel %vm1842_vm2, %v4904_v26, %v1839_v40 }
 0x8eb   :  { %v1848_v48 = vsel %vm1845_vm3, %v1847_v8, %v1843_v34 }
 0x8ec   :  { %v1849_v2 = vmul.f32 %v5827_v22, %v1848_v48 }
 0x8ed   :  { %v1706_v50 = vpop.permute.xlu0 %1705 }
 0x8ee   :  { %1726 = vmatpush.msra.mxu1 %v1706_v50  ;;  %4044 = vst.msk [vmem:[#allocation8 + $0x18] sm:$0xff] %vm475_vm9, %v1849_v2 }
 0x8ef   :  { %4571 = vmatmul.msk.f32.vlgmr.msra.gmra.mxu1 %vm475_vm9, %v1689_v52 }
 0x8f0   :  { %1886 = vmatpush.msrb.mxu1 %v1866_v14 }
 0x8f7   :  { %4577 = vmatmul.msk.f32.vlgmr.msrb.gmra.mxu1 %vm475_vm9, %v1849_v2 }
 0x90d   :  { %v1662_v49 = vpop.xlane.xlu1 %1661 }
 0x90e   :  { %v1664_v39 = vsub.f32 %v5841_v33, %v1662_v49 }
 0x910   :  { %v1667_v51 = vmul.f32 1.442695, %v1664_v39 }
 0x912   :  { %4905 = vpow2.f32 %v1667_v51 }
 0x913   :  { %v1342_v43 = vpop.xlane.xlu2 %1341 }
 0x914   :  { %v1344_v54 = vsub.f32 %v5846_v35, %v1342_v43 }
 0x916   :  { %v1347_v56 = vmul.f32 1.442695, %v1344_v54 }
 0x918   :  { %v4906_v22 = vpop.eup %4905  ;;  %4907 = vpow2.f32 %v1347_v56  ;;  %v1502_v57 = vpop.xlane.xlu0 %1501 }
 0x919   :  { %v1504_v59 = vsub.f32 %v5851_v41, %v1502_v57  ;;  %v1672_v62 = vsel %vm475_vm9, %v4906_v22, 0.0 }
 0x91a   :  { %1673 = vadd.xlane.f32.xlu2 %v1672_v62 }
 0x91b   :  { %v1507_v63 = vmul.f32 1.442695, %v1504_v59  ;;  %v1822_v0 = vpop.xlane.xlu2 %1821 }
 0x91c   :  { %v1824_v38 = vsub.f32 %v5854_v29, %v1822_v0 }
 0x91d   :  { %4909 = vpow2.f32 %v1507_v63 }
 0x91e   :  { %v5877_v33 = vpop.eup %4907  ;;  %v1827_v3 = vmul.f32 1.442695, %v1824_v38 }
 0x91f   :  { %v1352_v35 = vsel %vm475_vm9, %v5877_v33, 0.0 }
 0x920   :  { %1353 = vadd.xlane.f32.xlu0 %v1352_v35  ;;  %4911 = vpow2.f32 %v1827_v3 }
 0x923   :  { %v5881_v4 = vpop.eup %4909 }
 0x924   :  { %v1512_v41 = vsel %vm475_vm9, %v5881_v4, 0.0 }
 0x925   :  { %1513 = vadd.xlane.f32.xlu1 %v1512_v41 }
 0x926   :  { %v5885_v5 = vpop.eup %4911 }
 0x927   :  { %v1832_v29 = vsel %vm475_vm9, %v5885_v5, 0.0 }
 0x92d   :  { %1833 = vadd.xlane.f32.xlu1 %v1832_v29  ;;  %v4549_v29 = vld [vmem:[%s5319_s6 + $0x38] sm:$0xff] }
 0x92e   :  { %1968 = vmatpush.msrb.mxu3 %v4549_v29 }
 0x932   :  { %1571 = vrot.lane.b32.xlu2 %v5753_v55, %s5230_s20 }
 0x934   :  { %1411 = vrot.lane.b32.xlu0 %v5753_v55, %s5226_s17  ;;  %s6693_s17 = sld [smem:[#allocation34_spill]] }
 0x93c   :  { %1891 = vrot.lane.b32.xlu0 %v5753_v55, %s5234_s8 }
 0x946   :  { %1731 = vrot.lane.b32.xlu1 %v5753_v55, %s5233_s3  ;;  %s5047_s3 = scalar_lea.hbm %s5422_s12, 2 }
 0x952   :  { %v5897_v6 = vpop.f32.mrf.mxu1 }
 0x95b   :  { %v1568_v7 = vpop.f32.mrf.mxu1 }
 0x95c   :  { %1919 = vrot.lane.b32.xlu0 %v1568_v7, %s5235_s22  ;;  %v4548_v7 = vld [vmem:[%s5319_s6 + $0x30] sm:$0xff] }
 0x95d   :  { %1969 = vmatpush.msrb.mxu3 %v4548_v7 }
 0x96c   :  { %v1728_v10 = vpop.f32.mrf.mxu1 }
 0x96d   :  { %1927 = vrot.lane.b32.xlu2 %v1728_v10, %s5236_s14 }
 0x974   :  { %v1888_v11 = vpop.f32.mrf.mxu1 }
 0x975   :  { %1935 = vrot.lane.b32.xlu0 %v1888_v11, %s5237_s19  ;;  %v4547_v11 = vld [vmem:[%s5319_s6 + $0x28] sm:$0xff] }
 0x976   :  { %1970 = vmatpush.msrb.mxu3 %v4547_v11 }
 0x98d   :  { %v1674_v12 = vpop.xlane.xlu2 %1673 }
 0x98e   :  { %4913 = vrcp.f32 %v1674_v12  ;;  %v1701_v18 = vand.u32 2147483648, %v1674_v12  ;;  %v1699_v60 = vand.u32 2147483647, %v1674_v12  ;;  %vm1695_vm5 = vweird.f32 %v1674_v12 }
 0x990   :  { %v1702_v25 = vor.u32 1.1754944e-38, %v1701_v18  ;;  %vm1700_vm7 = vcmp.eq.f32.partialorder %v1699_v60, 8.507059e+37 }
 0x993   :  { %v1354_v13 = vpop.xlane.xlu0 %1353 }
 0x994   :  { %v4914_v15 = vpop.eup %4913  ;;  %4915 = vrcp.f32 %v1354_v13  ;;  %v1381_v27 = vand.u32 2147483648, %v1354_v13  ;;  %v1379_v52 = vand.u32 2147483647, %v1354_v13  ;;  %vm1375_vm10 = vweird.f32 %v1354_v13 }
 0x995   :  { %v1691_v16 = vmul.f32 %v4914_v15, %v1674_v12  ;;  %vm1696_vm4 = vweird.f32 %v4914_v15 }
 0x996   :  { %vm1697_vm6 = vmor %vm1695_vm5, %vm1696_vm4  ;;  %v1382_v8 = vor.u32 1.1754944e-38, %v1381_v27  ;;  %vm1380_vm14 = vcmp.eq.f32.partialorder %v1379_v52, 8.507059e+37 }
 0x997   :  { %v1692_v17 = vsub.f32 1.0, %v1691_v16  ;;  %v4546_v16 = vld [vmem:[%s5319_s6 + $0x20] sm:$0xff] }
 0x998   :  { %v1514_v55 = vpop.xlane.xlu1 %1513  ;;  %1971 = vmatpush.msrb.mxu3 %v4546_v16 }
 0x999   :  { %v1693_v9 = vmul.f32 %v4914_v15, %v1692_v17  ;;  %4917 = vrcp.f32 %v1514_v55  ;;  %v1541_v2 = vand.u32 2147483648, %v1514_v55  ;;  %v1539_v49 = vand.u32 2147483647, %v1514_v55 }
 0x99a   :  { %v4916_v44 = vpop.eup %4915  ;;  %vm1535_vm2 = vweird.f32 %v1514_v55 }
 0x99b   :  { %v1694_v20 = vadd.f32 %v4914_v15, %v1693_v9  ;;  %v1371_v23 = vmul.f32 %v4916_v44, %v1354_v13  ;;  %vm1376_vm8 = vweird.f32 %v4916_v44  ;;  %v1542_v56 = vor.u32 1.1754944e-38, %v1541_v2 }
 0x99c   :  { %vm1377_vm13 = vmor %vm1375_vm10, %vm1376_vm8  ;;  %vm1540_vm4 = vcmp.eq.f32.partialorder %v1539_v49, 8.507059e+37 }
 0x99d   :  { %v1698_v26 = vsel %vm1697_vm6, %v4914_v15, %v1694_v20  ;;  %v1372_v21 = vsub.f32 1.0, %v1371_v23 }
 0x99e   :  { %v1703_v28 = vsel %vm1700_vm7, %v1702_v25, %v1698_v26 }
 0x99f   :  { %v4918_v53 = vpop.eup %4917  ;;  %v1373_v32 = vmul.f32 %v4916_v44, %v1372_v21  ;;  %v1704_v1 = vmul.f32 %v4906_v22, %v1703_v28  ;;  %v1572_v22 = vpop.permute.xlu2 %1571  ;;  %v4821_v28 = vld [vmem:[%s6679_s1 + $0x1] ss:$0 sm:$0xff] }
 0x9a0   :  { %v1531_v36 = vmul.f32 %v4918_v53, %v1514_v55  ;;  %v1834_v30 = vpop.xlane.xlu1 %1833  ;;  %vm1536_vm15 = vweird.f32 %v4918_v53 }
 0x9a1   :  { %v1374_v40 = vadd.f32 %v4916_v44, %v1373_v32  ;;  %4919 = vrcp.f32 %v1834_v30  ;;  %4047 = vst.msk [vmem:[#allocation8 + $0x30] sm:$0xff] %vm475_vm9, %v1704_v1  ;;  %vm1537_vm3 = vmor %vm1535_vm2, %vm1536_vm15  ;;  %v1861_v38 = vand.u32 2147483648, %v1834_v30  ;;  %v1859_v3 = vand.u32 2147483647, %v1834_v30 }
 0x9a2   :  { %v1532_v34 = vsub.f32 1.0, %v1531_v36  ;;  %vm1855_vm6 = vweird.f32 %v1834_v30 }
 0x9a3   :  { %v1378_v48 = vsel %vm1377_vm13, %v4916_v44, %v1374_v40  ;;  %v1862_v41 = vor.u32 1.1754944e-38, %v1861_v38  ;;  %vm1860_vm8 = vcmp.eq.f32.partialorder %v1859_v3, 8.507059e+37  ;;  %v4583_v40 = vld [vmem:[%s5309_s24 + $0x50] sm:$0xff]  ;;  %v5950_v38 = vadd.f32 %v5802_v61, %v5500_v24 }
 0x9a4   :  { %v1383_v50 = vsel %vm1380_vm14, %v1382_v8, %v1378_v48  ;;  %v1533_v14 = vmul.f32 %v4918_v53, %v1532_v34  ;;  %v4584_v8 = vld [vmem:[%s5309_s24 + $0x58] sm:$0xff]  ;;  %v4581_v48 = vld [vmem:[%s5309_s24 + $0x40] sm:$0xff] }
 0x9a5   :  { %v1384_v39 = vmul.f32 %v5877_v33, %v1383_v50  ;;  %v4772_v34 = vpack.i.bf16 %v4583_v40, %v4584_v8  ;;  %2074 = vmatpush.msra.mxu0 %v4584_v8 }
 0x9a6   :  { %v1534_v51 = vadd.f32 %v4918_v53, %v1533_v14  ;;  %v1412_v43 = vpop.permute.xlu0 %1411 }
 0x9a7   :  { %v4920_v54 = vpop.eup %4919  ;;  %1432 = vmatpush.msrb.mxu2 %v1412_v43  ;;  %4045 = vst.msk [vmem:[#allocation8 + $0x20] sm:$0xff] %vm475_vm9, %v1384_v39  ;;  %2075 = vmatpush.msra.mxu0 %v4583_v40 }
 0x9a8   :  { %v1538_v57 = vsel %vm1537_vm3, %v4918_v53, %v1534_v51  ;;  %v1851_v59 = vmul.f32 %v4920_v54, %v1834_v30  ;;  %4560 = vmatmul.msk.f32.vlgmr.msrb.gmra.mxu2 %vm475_vm9, %v1384_v39  ;;  %vm1856_vm5 = vweird.f32 %v4920_v54 }
 0x9a9   :  { %v1543_v62 = vsel %vm1540_vm4, %v1542_v56, %v1538_v57  ;;  %1592 = vmatpush.msra.mxu2 %v1572_v22  ;;  %vm1857_vm7 = vmor %vm1855_vm6, %vm1856_vm5 }
 0x9aa   :  { %v1852_v63 = vsub.f32 1.0, %v1851_v59  ;;  %v1544_v0 = vmul.f32 %v5881_v4, %v1543_v62 }
 0x9ac   :  { %v1853_v33 = vmul.f32 %v4920_v54, %v1852_v63  ;;  %4046 = vst.msk [vmem:[#allocation8 + $0x28] sm:$0xff] %vm475_vm9, %v1544_v0 }
 0x9ae   :  { %v1854_v35 = vadd.f32 %v4920_v54, %v1853_v33  ;;  %v1892_v15 = vpop.permute.xlu0 %1891  ;;  %v1172_v33 = vsel %vm242_vm1, %v5950_v38, 0.0 }
 0x9b0   :  { %v1858_v10 = vsel %vm1857_vm7, %v4920_v54, %v1854_v35  ;;  %4566 = vmatmul.msk.f32.vlgmr.msra.gmra.mxu2 %vm475_vm9, %v1544_v0 }
 0x9b1   :  { %v1863_v4 = vsel %vm1860_vm8, %v1862_v41, %v1858_v10 }
 0x9b2   :  { %v1864_v12 = vmul.f32 %v5885_v5, %v1863_v4 }
 0x9b4   :  { %4048 = vst.msk [vmem:[#allocation8 + $0x38] sm:$0xff] %vm475_vm9, %v1864_v12 }
 0x9b8   :  { %v1732_v13 = vpop.permute.xlu1 %1731 }
 0x9b9   :  { %1752 = vmatpush.msrb.mxu2 %v1732_v13 }
 0x9ba   :  { %4572 = vmatmul.msk.f32.vlgmr.msrb.gmra.mxu2 %vm475_vm9, %v1704_v1 }
 0x9bb   :  { %1912 = vmatpush.msra.mxu2 %v1892_v15 }
 0x9c2   :  { %4578 = vmatmul.msk.f32.vlgmr.msra.gmra.mxu2 %vm475_vm9, %v1864_v12 }
 0x9c7   :  { %v1928_v55 = vpop.permute.xlu2 %1927 }
 0x9ce   :  { %v1920_v17 = vpop.permute.xlu0 %1919 }
 0x9cf   :  { %v1941_v18 = vsel %vm475_vm9, %v5897_v6, %v1920_v17  ;;  %v1162_v6 = vadd.f32 %v5796_v42, %v5789_v37 }
 0x9d0   :  { %v1943_v9 = vsel %vm1129_vm12, %v1941_v18, %v1928_v55 }
 0x9d1   :  { %v1167_v26 = vadd.f32 %v1162_v6, %v5496_v19 }
 0x9d3   :  { %v1169_v21 = vsel %vm242_vm1, %v1167_v26, 0.0 }
 0x9e7   :  { %v1936_v5 = vpop.permute.xlu0 %1935 }
 0x9e8   :  { %v1945_v60 = vsel %vm1132_vm11, %v1943_v9, %v1936_v5 }
 0x9e9   :  { %4579 = vmatmul.msk.f32.vlgmr.msrb.gmra.mxu3 %vm242_vm1, %v1945_v60  ;;  %v5962_v60 = vld [vmem:[%s6680_s28] ss:$0 sm:$0xff] }
 0xa2b   :  { %v1434_v44 = vpop.f32.mrf.mxu2 }
 0xa33   :  { %v1594_v20 = vpop.f32.mrf.mxu2 }
 0xa34   :  { %1921 = vrot.lane.b32.xlu2 %v1594_v20, %s5235_s22 }
 0xa3d   :  { %v1754_v23 = vpop.f32.mrf.mxu2 }
 0xa3e   :  { %1929 = vrot.lane.b32.xlu1 %v1754_v23, %s5236_s14 }
 0xa45   :  { %v1914_v25 = vpop.f32.mrf.mxu2 }
 0xa46   :  { %1937 = vrot.lane.b32.xlu0 %v1914_v25, %s5237_s19  ;;  %v5965_v25 = vld [vmem:[%s6681_s2] ss:$0 sm:$0xff] }
 0xa68   :  { %1170 = vadd.xlane.f32.xlu1 %v1169_v21 }
 0xa6c   :  { %v1973_v27 = vpop.f32.mrf.mxu3 }
 0xa6d   :  { %v1974_v53 = vadd.f32 %v4821_v28, %v1973_v27 }
 0xa6f   :  { %v1979_v32 = vadd.f32 %v1974_v53, %v5710_v47  ;;  %v4582_v47 = vld [vmem:[%s5309_s24 + $0x48] sm:$0xff] }
 0xa70   :  { %2076 = vmatpush.msra.mxu0 %v4582_v47  ;;  %v4777_v57 = vpack.i.bf16 %v4581_v48, %v4582_v47 }
 0xa71   :  { %v1981_v52 = vsel %vm242_vm1, %v1979_v32, 0.0 }
 0xa72   :  { %1982 = vadd.xlane.f32.xlu2 %v1981_v52  ;;  %2077 = vmatpush.msra.mxu0 %v4581_v48 }
 0xa81   :  { %4773 = vrot.lane.b32.xlu1 %v4772_v34, %s5223_s0 }
 0xa8e   :  { %v1922_v1 = vpop.permute.xlu2 %1921 }
 0xa8f   :  { %v1942_v37 = vsel %vm475_vm9, %v1434_v44, %v1922_v1 }
 0xab0   :  { %v1930_v36 = vpop.permute.xlu1 %1929 }
 0xab1   :  { %v1944_v19 = vsel %vm1129_vm12, %v1942_v37, %v1930_v36  ;;  %v4825_v36 = vld [vmem:[%s6681_s2 + $0x1] ss:$0 sm:$0xff] }
 0xab8   :  { %v1938_v42 = vpop.permute.xlu0 %1937 }
 0xab9   :  { %v1946_v30 = vsel %vm1132_vm11, %v1944_v19, %v1938_v42 }
 0xaba   :  { %4580 = vmatmul.msk.f32.gmra.mxu3 %vm242_vm1, %v1946_v30 }
 0xadb   :  { %v1171_v2 = vpop.xlane.xlu1 %1170 }
 0xadc   :  { %v1175_v50 = vmul.f32 %v1171_v2, %v5482_v46 }
 0xade   :  { %v1177_v14 = vsub.f32 %v1167_v26, %v1175_v50 }
 0xae0   :  { %v1179_v49 = vmul.f32 %v1177_v14, %v1177_v14 }
 0xae2   :  { %v1181_v39 = vsel %vm242_vm1, %v1179_v49, 0.0 }
 0xae3   :  { %1182 = vadd.xlane.f32.xlu2 %v1181_v39 }
 0xae5   :  { %v1983_v51 = vpop.xlane.xlu2 %1982 }
 0xae6   :  { %v1987_v43 = vmul.f32 %v1983_v51, %v5482_v46 }
 0xae8   :  { %v1989_v54 = vsub.f32 %v1979_v32, %v1987_v43  ;;  %v4823_v32 = vld [vmem:[%s6680_s28 + $0x1] ss:$0 sm:$0xff] }
 0xaea   :  { %v1991_v56 = vmul.f32 %v1989_v54, %v1989_v54 }
 0xaec   :  { %v1993_v22 = vsel %vm242_vm1, %v1991_v56, 0.0 }
 0xaed   :  { %1994 = vadd.xlane.f32.xlu0 %v1993_v22 }
 0xaf3   :  { %v4774_v3 = vpop.permute.xlu1 %4773 }
 0xaf4   :  { %v4775_v35 = vunpack.i.l.bf16 %v4774_v3  ;;  %v4776_v7 = vunpack.i.h.bf16 %v4774_v3 }
 0xaf6   :  { %2122 = vmatpush.msra.mxu1 %v4775_v35 }
 0xaf8   :  { %2123 = vmatpush.msra.mxu1 %v4776_v7 }
 0xafb   :  { %4778 = vrot.lane.b32.xlu2 %v4777_v57, %s5223_s0 }
 0xb3d   :  { %v1976_v59 = vpop.f32.mrf.mxu3 }
 0xb3e   :  { %v1977_v62 = vadd.f32 %v4821_v28, %v1976_v59 }
 0xb40   :  { %v1980_v63 = vadd.f32 %v1977_v62, %v5719_v58  ;;  %v5956_v58 = vld [vmem:[%s5314_s30 + $0x2] ss:$0 sm:$0xff] }
 0xb42   :  { %v1984_v0 = vsel %vm242_vm1, %v1980_v63, 0.0 }
 0xb43   :  { %1985 = vadd.xlane.f32.xlu0 %v1984_v0 }
 0xb4b   :  { %1173 = vadd.xlane.f32.xlu0 %v1172_v33 }
 0xb56   :  { %v1183_v41 = vpop.xlane.xlu2 %1182 }
 0xb57   :  { %v1187_v29 = vmul.f32 %v1183_v41, %v5482_v46 }
 0xb59   :  { %v1189_v10 = vadd.f32 1e-12, %v1187_v29 }
 0xb5b   :  { %4921 = vrsqrt.f32 %v1189_v10  ;;  %vm1197_vm13 = vweird.f32 %v1189_v10 }
 0xb5e   :  { %v4779_v4 = vpop.permute.xlu2 %4778 }
 0xb5f   :  { %v4781_v11 = vunpack.i.h.bf16 %v4779_v4  ;;  %v4780_v24 = vunpack.i.l.bf16 %v4779_v4  ;;  %2101 = vrot.lane.b32.xlu0 %v5956_v58, %s5223_s0 }
 0xb60   :  { %v1995_v61 = vpop.xlane.xlu0 %1994 }
 0xb61   :  { %v4922_v12 = vpop.eup %4921  ;;  %v1999_v13 = vmul.f32 %v1995_v61, %v5482_v46  ;;  %2124 = vmatpush.msra.mxu1 %v4780_v24 }
 0xb62   :  { %v1192_v15 = vmul.f32 %v4922_v12, %v1189_v10  ;;  %vm1198_vm10 = vweird.f32 %v4922_v12 }
 0xb63   :  { %v2001_v16 = vadd.f32 1e-12, %v1999_v13  ;;  %2125 = vmatpush.msra.mxu1 %v4781_v11  ;;  %vm1199_vm14 = vmor %vm1197_vm13, %vm1198_vm10 }
 0xb64   :  { %v1193_v17 = vmul.f32 %v4922_v12, %v1192_v15 }
 0xb65   :  { %4923 = vrsqrt.f32 %v2001_v16  ;;  %vm2009_vm2 = vweird.f32 %v2001_v16 }
 0xb66   :  { %v1194_v18 = vmul.f32 0.5, %v1193_v17 }
 0xb68   :  { %v1195_v55 = vsub.f32 1.5, %v1194_v18 }
 0xb6a   :  { %v1196_v5 = vmul.f32 %v4922_v12, %v1195_v55 }
 0xb6b   :  { %v4924_v9 = vpop.eup %4923 }
 0xb6c   :  { %v1200_v44 = vsel %vm1199_vm14, %v4922_v12, %v1196_v5  ;;  %v2004_v20 = vmul.f32 %v4924_v9, %v2001_v16  ;;  %vm2010_vm15 = vweird.f32 %v4924_v9 }
 0xb6d   :  { %v1211_v23 = vmul.f32 %v1200_v44, %v1177_v14  ;;  %vm2011_vm3 = vmor %vm2009_vm2, %vm2010_vm15 }
 0xb6e   :  { %v2005_v6 = vmul.f32 %v4924_v9, %v2004_v20 }
 0xb6f   :  { %v1216_v26 = vmul.f32 %v5962_v60, %v1211_v23 }
 0xb70   :  { %v2006_v21 = vmul.f32 0.5, %v2005_v6 }
 0xb71   :  { %v5969_v28 = vadd.f32 %v5965_v25, %v1216_v26 }
 0xb72   :  { %v2007_v27 = vsub.f32 1.5, %v2006_v21 }
 0xb73   :  { %4593 = vmatmul.msk.f32.vlgmr.msra.gmra.mxu0 %vm242_vm1, %v5969_v28 }
 0xb74   :  { %v2008_v53 = vmul.f32 %v4924_v9, %v2007_v27 }
 0xb76   :  { %v2012_v52 = vsel %vm2011_vm3, %v4924_v9, %v2008_v53 }
 0xb77   :  { %v2023_v1 = vmul.f32 %v2012_v52, %v1989_v54 }
 0xb79   :  { %v2028_v37 = vmul.f32 %v4823_v32, %v2023_v1 }
 0xb7b   :  { %v5975_v19 = vadd.f32 %v4825_v36, %v2028_v37 }
 0xb7d   :  { %4595 = vmatmul.msk.f32.vlgmr.msra.gmra.mxu1 %vm242_vm1, %v5975_v19 }
 0xbb6   :  { %v1986_v42 = vpop.xlane.xlu0 %1985 }
 0xbb7   :  { %v1988_v30 = vmul.f32 %v1986_v42, %v5482_v46 }
 0xbb9   :  { %v1990_v40 = vsub.f32 %v1980_v63, %v1988_v30 }
 0xbbb   :  { %v1992_v8 = vmul.f32 %v1990_v40, %v1990_v40 }
 0xbbd   :  { %v1996_v34 = vsel %vm242_vm1, %v1992_v8, 0.0 }
 0xbbe   :  { %1997 = vadd.xlane.f32.xlu1 %v1996_v34  ;;  %v1174_v47 = vpop.xlane.xlu0 %1173 }
 0xbbf   :  { %v1176_v48 = vmul.f32 %v1174_v47, %v5482_v46 }
 0xbc1   :  { %v1178_v2 = vsub.f32 %v5950_v38, %v1176_v48 }
 0xbc3   :  { %v1180_v50 = vmul.f32 %v1178_v2, %v1178_v2 }
 0xbc5   :  { %v1184_v14 = vsel %vm242_vm1, %v1180_v50, 0.0  ;;  %v4625_v50 = vld [vmem:[%s5309_s24 + $0x70] sm:$0xff] }
 0xbc6   :  { %1185 = vadd.xlane.f32.xlu2 %v1184_v14  ;;  %v4626_v14 = vld [vmem:[%s5309_s24 + $0x78] sm:$0xff] }
 0xbd1   :  { %v2102_v51 = vpop.permute.xlu0 %2101 }
 0xbf0   :  { %v2079_v49 = vpop.f32.mrf.mxu0 }
 0xbf1   :  { %v2080_v39 = vadd.f32 %v5956_v58, %v2079_v49  ;;  %v4782_v49 = vpack.i.bf16 %v4625_v50, %v4626_v14 }
 0xbf3   :  { %2609 = vrot.lane.b32.xlu2 %v2080_v39, %s5231_s9  ;;  %2289 = vrot.lane.b32.xlu0 %v2080_v39, %s5224_s5 }
 0xbfa   :  { %v2127_v43 = vpop.f32.mrf.mxu1 }
 0xbfb   :  { %v5987_v54 = vadd.f32 %v2127_v43, %v2102_v51 }
 0xbfd   :  { %2611 = vrot.lane.b32.xlu1 %v5987_v54, %s5231_s9  ;;  %2291 = vrot.lane.b32.xlu0 %v5987_v54, %s5224_s5 }
 0xbfe   :  { %4597 = vmatpush.xpose.msk.msrb.mxu2 %vm475_vm9, %v5987_v54 }
 0xc01   :  { %4598 = vmatmul.msk.f32.vlgmr.msrb.gmra.mxu2 %vm475_vm9, %v2080_v39 }
 0xc05   :  { %2451 = vrot.lane.b32.xlu0 %v5987_v54, %s5228_s25 }
 0xc0d   :  { %2449 = vrot.lane.b32.xlu0 %v2080_v39, %s5228_s25 }
 0xc31   :  { %v1998_v56 = vpop.xlane.xlu1 %1997 }
 0xc32   :  { %v2000_v22 = vmul.f32 %v1998_v56, %v5482_v46 }
 0xc34   :  { %v2002_v57 = vadd.f32 1e-12, %v2000_v22 }
 0xc36   :  { %4925 = vrsqrt.f32 %v2002_v57  ;;  %vm2019_vm5 = vweird.f32 %v2002_v57 }
 0xc39   :  { %v1186_v59 = vpop.xlane.xlu2 %1185 }
 0xc3a   :  { %v1188_v62 = vmul.f32 %v1186_v59, %v5482_v46 }
 0xc3c   :  { %v4926_v63 = vpop.eup %4925  ;;  %v1190_v0 = vadd.f32 1e-12, %v1188_v62 }
 0xc3d   :  { %v2014_v38 = vmul.f32 %v4926_v63, %v2002_v57  ;;  %vm2020_vm4 = vweird.f32 %v4926_v63 }
 0xc3e   :  { %4927 = vrsqrt.f32 %v1190_v0  ;;  %vm2021_vm6 = vmor %vm2019_vm5, %vm2020_vm4  ;;  %vm1207_vm8 = vweird.f32 %v1190_v0 }
 0xc3f   :  { %v2015_v33 = vmul.f32 %v4926_v63, %v2014_v38 }
 0xc41   :  { %v2016_v3 = vmul.f32 0.5, %v2015_v33 }
 0xc43   :  { %v2017_v35 = vsub.f32 1.5, %v2016_v3 }
 0xc44   :  { %v4928_v41 = vpop.eup %4927 }
 0xc45   :  { %v2018_v29 = vmul.f32 %v4926_v63, %v2017_v35  ;;  %v1202_v7 = vmul.f32 %v4928_v41, %v1190_v0  ;;  %vm1208_vm7 = vweird.f32 %v4928_v41  ;;  %v4623_v0 = vld [vmem:[%s5309_s24 + $0x60] sm:$0xff] }
 0xc46   :  { %vm1209_vm10 = vmor %vm1207_vm8, %vm1208_vm7 }
 0xc47   :  { %v2022_v10 = vsel %vm2021_vm6, %v4926_v63, %v2018_v29  ;;  %v1203_v4 = vmul.f32 %v4928_v41, %v1202_v7  ;;  %v4624_v63 = vld [vmem:[%s5309_s24 + $0x68] sm:$0xff]  ;;  %s6682_s24 = sld [smem:[#allocation21_spill]] }
 0xc48   :  { %v2024_v11 = vmul.f32 %v2022_v10, %v1990_v40  ;;  %v4787_v38 = vpack.i.bf16 %v4623_v0, %v4624_v63 }
 0xc49   :  { %v1204_v24 = vmul.f32 0.5, %v1203_v4 }
 0xc4a   :  { %v2029_v61 = vmul.f32 %v4823_v32, %v2024_v11 }
 0xc4b   :  { %v1205_v12 = vsub.f32 1.5, %v1204_v24 }
 0xc4c   :  { %v6001_v13 = vadd.f32 %v4825_v36, %v2029_v61 }
 0xc4d   :  { %v1206_v15 = vmul.f32 %v4928_v41, %v1205_v12 }
 0xc4e   :  { %4596 = vmatmul.msk.f32.gmra.mxu1 %vm242_vm1, %v6001_v13 }
 0xc4f   :  { %v1210_v16 = vsel %vm1209_vm10, %v4928_v41, %v1206_v15 }
 0xc50   :  { %v1212_v17 = vmul.f32 %v1210_v16, %v1178_v2 }
 0xc52   :  { %v1217_v18 = vmul.f32 %v5962_v60, %v1212_v17  ;;  %v2610_v60 = vpop.permute.xlu2 %2609 }
 0xc54   :  { %v6007_v55 = vadd.f32 %v5965_v25, %v1217_v18 }
 0xc56   :  { %4594 = vmatmul.msk.f32.gmra.mxu0 %vm242_vm1, %v6007_v55 }
 0xc65   :  { %v2290_v5 = vpop.permute.xlu0 %2289 }
 0xc6f   :  { %v2292_v9 = vpop.permute.xlu0 %2291  ;;  %v2612_v20 = vpop.permute.xlu1 %2611 }
 0xc70   :  { %4603 = vmatpush.xpose.msk.msrb.mxu1 %vm475_vm9, %v2292_v9 }
 0xc73   :  { %4604 = vmatmul.msk.f32.vlgmr.msrb.gmra.mxu1 %vm475_vm9, %v2290_v5 }
 0xc77   :  { %v2452_v44 = vpop.permute.xlu0 %2451 }
 0xc78   :  { %4609 = vmatpush.xpose.msk.msra.mxu1 %vm475_vm9, %v2452_v44 }
 0xc7c   :  { %4615 = vmatpush.xpose.msk.msrb.mxu1 %vm475_vm9, %v2612_v20 }
 0xc7f   :  { %v2450_v23 = vpop.permute.xlu0 %2449 }
 0xc80   :  { %4610 = vmatmul.msk.f32.vlgmr.msra.gmra.mxu1 %vm475_vm9, %v2450_v23 }
 0xc84   :  { %v2156_v27 = vpop.f32.mrf.mxu2 }
 0xc85   :  { %v2185_v53 = vmul.f32 0.35355338, %v2156_v27 }
 0xc87   :  { %v2187_v32 = vadd.f32 %v2185_v53, %v5799_v45 }
 0xc88   :  { %4616 = vmatmul.msk.f32.vlgmr.msrb.gmra.mxu1 %vm475_vm9, %v2610_v60 }
 0xccb   :  { %v2130_v25 = vpop.f32.mrf.mxu1 }
 0xccc   :  { %v6017_v6 = vadd.f32 %v2130_v25, %v2102_v51 }
 0xcce   :  { %2319 = vrot.lane.b32.xlu0 %v6017_v6, %s5224_s5  ;;  %4599 = vmatpush.xpose.msk.msra.mxu2 %vm475_vm9, %v6017_v6 }
 0xcd3   :  { %v2082_v26 = vpop.f32.mrf.mxu0 }
 0xcd4   :  { %v2083_v21 = vadd.f32 %v5956_v58, %v2082_v26  ;;  %v2189_v58 = vsel %vm475_vm9, %v2187_v32, -inf }
 0xcd6   :  { %2477 = vrot.lane.b32.xlu2 %v2083_v21, %s5228_s25  ;;  %2317 = vrot.lane.b32.xlu1 %v2083_v21, %s5224_s5 }
 0xcd7   :  { %4600 = vmatmul.msk.f32.vlgmr.msra.gmra.mxu2 %vm475_vm9, %v2083_v21 }
 0xcde   :  { %2479 = vrot.lane.b32.xlu2 %v6017_v6, %s5228_s25 }
 0xce6   :  { %2639 = vrot.lane.b32.xlu2 %v6017_v6, %s5231_s9 }
 0xcf0   :  { %v2314_v52 = vpop.f32.mrf.mxu1 }
 0xcf1   :  { %v2345_v1 = vmul.f32 0.35355338, %v2314_v52 }
 0xcf3   :  { %v2347_v36 = vadd.f32 %v2345_v1, %v5799_v45 }
 0xcf5   :  { %v2349_v42 = vsel %vm475_vm9, %v2347_v36, -inf }
 0xcf8   :  { %2190 = vmax.xlane.f32.xlu0 %v2189_v58 }
 0xcfd   :  { %v2474_v37 = vpop.f32.mrf.mxu1 }
 0xcfe   :  { %v2505_v40 = vmul.f32 0.35355338, %v2474_v37 }
 0xd00   :  { %2350 = vmax.xlane.f32.xlu1 %v2349_v42  ;;  %v2507_v48 = vadd.f32 %v2505_v40, %v5799_v45 }
 0xd02   :  { %v2509_v2 = vsel %vm475_vm9, %v2507_v48, -inf }
 0xd05   :  { %v2634_v30 = vpop.f32.mrf.mxu1 }
 0xd06   :  { %v2665_v8 = vmul.f32 0.35355338, %v2634_v30 }
 0xd08   :  { %v2667_v34 = vadd.f32 %v2665_v8, %v5799_v45 }
 0xd0a   :  { %v2669_v47 = vsel %vm475_vm9, %v2667_v34, -inf }
 0xd0b   :  { %2670 = vmax.xlane.f32.xlu1 %v2669_v47  ;;  %v6099_v47 = vld [vmem:[%s5314_s30 + $0x3] ss:$0 sm:$0xff]  ;;  %s6683_s30 = sld [smem:[#allocation23_spill]] }
 0xd0c   :  { %2637 = vrot.lane.b32.xlu0 %v2083_v21, %s5231_s9 }
 0xd0f   :  { %2510 = vmax.xlane.f32.xlu2 %v2509_v2 }
 0xd24   :  { %2397 = vrot.lane.b32.xlu1 %v5987_v54, %s5225_s13 }
 0xd27   :  { %2237 = vrot.lane.b32.xlu2 %v5987_v54, %s5223_s0 }
 0xd2f   :  { %2557 = vrot.lane.b32.xlu2 %v5987_v54, %s5227_s21 }
 0xd30   :  { %v2478_v39 = vpop.permute.xlu2 %2477 }
 0xd37   :  { %4783 = vrot.lane.b32.xlu2 %v4782_v49, %s5223_s0 }
 0xd38   :  { %v2480_v45 = vpop.permute.xlu2 %2479 }
 0xd40   :  { %v2320_v51 = vpop.permute.xlu0 %2319  ;;  %v2640_v56 = vpop.permute.xlu2 %2639 }
 0xd41   :  { %4605 = vmatpush.xpose.msk.msrb.mxu2 %vm475_vm9, %v2320_v51 }
 0xd45   :  { %4611 = vmatpush.xpose.msk.msra.mxu2 %vm475_vm9, %v2480_v45 }
 0xd48   :  { %v2318_v43 = vpop.permute.xlu1 %2317 }
 0xd49   :  { %4606 = vmatmul.msk.f32.vlgmr.msrb.gmra.mxu2 %vm475_vm9, %v2318_v43 }
 0xd4a   :  { %4617 = vmatpush.xpose.msk.msrb.mxu2 %vm475_vm9, %v2640_v56 }
 0xd51   :  { %4612 = vmatmul.msk.f32.vlgmr.msra.gmra.mxu2 %vm475_vm9, %v2478_v39 }
 0xd52   :  { %2920 = vmatpush.msra.mxu2 %v4626_v14 }
 0xd54   :  { %2921 = vmatpush.msra.mxu2 %v4625_v50 }
 0xd56   :  { %2922 = vmatpush.msra.mxu2 %v4624_v63 }
 0xd58   :  { %2923 = vmatpush.msra.mxu2 %v4623_v0 }
 0xd5a   :  { %v2182_v22 = vpop.f32.mrf.mxu2 }
 0xd5b   :  { %v2186_v57 = vmul.f32 0.35355338, %v2182_v22 }
 0xd5d   :  { %v2188_v59 = vadd.f32 %v2186_v57, %v5838_v31 }
 0xd5f   :  { %v2192_v62 = vsel %vm475_vm9, %v2188_v59, -inf }
 0xd60   :  { %2193 = vmax.xlane.f32.xlu2 %v2192_v62 }
 0xd6b   :  { %v2191_v33 = vpop.xlane.xlu0 %2190 }
 0xd6c   :  { %v2195_v3 = vsub.f32 %v2187_v32, %v2191_v33 }
 0xd6e   :  { %v2197_v35 = vmul.f32 1.442695, %v2195_v3 }
 0xd70   :  { %4929 = vpow2.f32 %v2197_v35 }
 0xd73   :  { %v2351_v41 = vpop.xlane.xlu1 %2350 }
 0xd74   :  { %v2355_v29 = vsub.f32 %v2347_v36, %v2351_v41 }
 0xd76   :  { %v6058_v7 = vpop.eup %4929  ;;  %v2357_v10 = vmul.f32 1.442695, %v2355_v29 }
 0xd77   :  { %v2201_v4 = vsel %vm475_vm9, %v6058_v7, 0.0 }
 0xd78   :  { %4931 = vpow2.f32 %v2357_v10  ;;  %2202 = vadd.xlane.f32.xlu0 %v2201_v4 }
 0xd7e   :  { %v6062_v11 = vpop.eup %4931  ;;  %v2638_v24 = vpop.permute.xlu0 %2637 }
 0xd7f   :  { %4618 = vmatmul.msk.f32.vlgmr.msrb.gmra.mxu2 %vm475_vm9, %v2638_v24  ;;  %v2361_v61 = vsel %vm475_vm9, %v6062_v11, 0.0  ;;  %v2671_v12 = vpop.xlane.xlu1 %2670 }
 0xd80   :  { %2362 = vadd.xlane.f32.xlu1 %v2361_v61  ;;  %v2675_v17 = vsub.f32 %v2667_v34, %v2671_v12 }
 0xd82   :  { %v2511_v15 = vpop.xlane.xlu2 %2510  ;;  %v2677_v5 = vmul.f32 1.442695, %v2675_v17 }
 0xd83   :  { %v2515_v16 = vsub.f32 %v2507_v48, %v2511_v15 }
 0xd85   :  { %v2517_v18 = vmul.f32 1.442695, %v2515_v16 }
 0xd87   :  { %4933 = vpow2.f32 %v2517_v18  ;;  %4635 = vmatmul.msk.f32.vlgmr.msra.gmra.mxu2 %vm242_vm1, %v5975_v19 }
 0xd88   :  { %4935 = vpow2.f32 %v2677_v5 }
 0xd8a   :  { %v2238_v9 = vpop.permute.xlu2 %2237 }
 0xd8b   :  { %2258 = vmatpush.msra.mxu3 %v2238_v9 }
 0xd8c   :  { %2717 = vrot.lane.b32.xlu0 %v5987_v54, %s5229_s29 }
 0xd8d   :  { %v6071_v44 = vpop.eup %4933 }
 0xd8e   :  { %v2521_v20 = vsel %vm475_vm9, %v6071_v44, 0.0  ;;  %v6077_v23 = vpop.eup %4935 }
 0xd8f   :  { %2522 = vadd.xlane.f32.xlu1 %v2521_v20  ;;  %4636 = vmatmul.msk.f32.gmra.mxu2 %vm242_vm1, %v6001_v13  ;;  %v2681_v25 = vsel %vm475_vm9, %v6077_v23, 0.0 }
 0xd92   :  { %v2558_v54 = vpop.permute.xlu2 %2557 }
 0xd96   :  { %v2398_v60 = vpop.permute.xlu1 %2397 }
 0xd97   :  { %2682 = vadd.xlane.f32.xlu1 %v2681_v25  ;;  %2418 = vmatpush.msrb.mxu3 %v2398_v60 }
 0xd9a   :  { %v6082_v26 = vpop.permute.xlu2 %4783 }
 0xdb0   :  { %4788 = vrot.lane.b32.xlu1 %v4787_v38, %s5223_s0 }
 0xdcc   :  { %v2342_v21 = vpop.f32.mrf.mxu2 }
 0xdcd   :  { %v2346_v27 = vmul.f32 0.35355338, %v2342_v21 }
 0xdcf   :  { %v6085_v53 = vadd.f32 %v2346_v27, %v5838_v31 }
 0xdd1   :  { %v2352_v32 = vsel %vm475_vm9, %v6085_v53, -inf }
 0xdd2   :  { %2353 = vmax.xlane.f32.xlu0 %v2352_v32 }
 0xdd3   :  { %v2194_v52 = vpop.xlane.xlu2 %2193 }
 0xdd4   :  { %v2196_v1 = vsub.f32 %v2188_v59, %v2194_v52  ;;  %v2502_v58 = vpop.f32.mrf.mxu2 }
 0xdd5   :  { %v2506_v36 = vmul.f32 0.35355338, %v2502_v58 }
 0xdd6   :  { %v2199_v37 = vmul.f32 1.442695, %v2196_v1  ;;  %v4785_v1 = vunpack.i.l.bf16 %v6082_v26 }
 0xdd7   :  { %v6090_v42 = vadd.f32 %v2506_v36, %v5838_v31 }
 0xdd8   :  { %4937 = vpow2.f32 %v2199_v37 }
 0xdd9   :  { %v2512_v30 = vsel %vm475_vm9, %v6090_v42, -inf }
 0xdda   :  { %2513 = vmax.xlane.f32.xlu1 %v2512_v30  ;;  %v4786_v30 = vunpack.i.h.bf16 %v6082_v26 }
 0xdde   :  { %v6094_v40 = vpop.eup %4937 }
 0xddf   :  { %v2204_v8 = vsel %vm475_vm9, %v6094_v40, 0.0 }
 0xde0   :  { %2205 = vadd.xlane.f32.xlu0 %v2204_v8 }
 0xdeb   :  { %v2203_v34 = vpop.xlane.xlu0 %2202 }
 0xdec   :  { %4939 = vrcp.f32 %v2203_v34  ;;  %v2218_v49 = vand.u32 2147483648, %v2203_v34  ;;  %v2216_v45 = vand.u32 2147483647, %v2203_v34  ;;  %vm2212_vm14 = vweird.f32 %v2203_v34 }
 0xdee   :  { %v2219_v56 = vor.u32 1.1754944e-38, %v2218_v49  ;;  %vm2217_vm2 = vcmp.eq.f32.partialorder %v2216_v45, 8.507059e+37 }
 0xdf2   :  { %v4940_v48 = vpop.eup %4939 }
 0xdf3   :  { %v2208_v2 = vmul.f32 %v4940_v48, %v2203_v34  ;;  %v2363_v50 = vpop.xlane.xlu1 %2362  ;;  %vm2213_vm13 = vweird.f32 %v4940_v48 }
 0xdf4   :  { %4941 = vrcp.f32 %v2363_v50  ;;  %2947 = vrot.lane.b32.xlu0 %v6099_v47, %s5223_s0  ;;  %vm2214_vm15 = vmor %vm2212_vm14, %vm2213_vm13  ;;  %v2378_v0 = vand.u32 2147483648, %v2363_v50  ;;  %v2376_v33 = vand.u32 2147483647, %v2363_v50  ;;  %vm2372_vm4 = vweird.f32 %v2363_v50 }
 0xdf5   :  { %v2209_v14 = vsub.f32 1.0, %v2208_v2 }
 0xdf6   :  { %v2379_v35 = vor.u32 1.1754944e-38, %v2378_v0  ;;  %vm2377_vm6 = vcmp.eq.f32.partialorder %v2376_v33, 8.507059e+37 }
 0xdf7   :  { %v2210_v39 = vmul.f32 %v4940_v48, %v2209_v14 }
 0xdf9   :  { %v2211_v51 = vadd.f32 %v4940_v48, %v2210_v39 }
 0xdfa   :  { %v4942_v43 = vpop.eup %4941 }
 0xdfb   :  { %v2215_v22 = vsel %vm2214_vm15, %v4940_v48, %v2211_v51  ;;  %v2368_v57 = vmul.f32 %v4942_v43, %v2363_v50  ;;  %vm2373_vm3 = vweird.f32 %v4942_v43 }
 0xdfc   :  { %v2220_v59 = vsel %vm2217_vm2, %v2219_v56, %v2215_v22  ;;  %2583 = vrot.lane.b32.xlu0 %v6017_v6, %s5227_s21  ;;  %vm2374_vm5 = vmor %vm2372_vm4, %vm2373_vm3 }
 0xdfd   :  { %v2369_v62 = vsub.f32 1.0, %v2368_v57  ;;  %v2221_v63 = vmul.f32 %v6058_v7, %v2220_v59 }
 0xdfe   :  { %v2718_v12 = vpop.permute.xlu0 %2717 }
 0xdff   :  { %v2370_v38 = vmul.f32 %v4942_v43, %v2369_v62  ;;  %4601 = vmatmul.msk.f32.vlgmr.msra.gmra.mxu3 %vm475_vm9, %v2221_v63  ;;  %4049 = vst.msk [vmem:[#allocation10] sm:$0xff] %vm475_vm9, %v2221_v63 }
 0xe00   :  { %2578 = vmatpush.msra.mxu3 %v2558_v54 }
 0xe01   :  { %v2371_v3 = vadd.f32 %v4942_v43, %v2370_v38 }
 0xe02   :  { %v2523_v41 = vpop.xlane.xlu1 %2522  ;;  %v2662_v29 = vpop.f32.mrf.mxu2 }
 0xe03   :  { %v2375_v10 = vsel %vm2374_vm5, %v4942_v43, %v2371_v3  ;;  %4943 = vrcp.f32 %v2523_v41  ;;  %v2666_v7 = vmul.f32 0.35355338, %v2662_v29  ;;  %v2538_v9 = vand.u32 2147483648, %v2523_v41 }
 0xe04   :  { %v2380_v4 = vsel %vm2377_vm6, %v2379_v35, %v2375_v10  ;;  %vm2532_vm8 = vweird.f32 %v2523_v41 }
 0xe05   :  { %v2381_v24 = vmul.f32 %v6062_v11, %v2380_v4  ;;  %v6110_v61 = vadd.f32 %v2666_v7, %v5838_v31  ;;  %v2536_v31 = vand.u32 2147483647, %v2523_v41  ;;  %v2539_v25 = vor.u32 1.1754944e-38, %v2538_v9 }
 0xe07   :  { %4607 = vmatmul.msk.f32.vlgmr.msrb.gmra.mxu3 %vm475_vm9, %v2381_v24  ;;  %4050 = vst.msk [vmem:[#allocation10 + $0x8] sm:$0xff] %vm475_vm9, %v2381_v24  ;;  %v2672_v15 = vsel %vm475_vm9, %v6110_v61, -inf  ;;  %vm2537_vm13 = vcmp.eq.f32.partialorder %v2536_v31, 8.507059e+37 }
 0xe08   :  { %2738 = vmatpush.msrb.mxu3 %v2718_v12  ;;  %2673 = vmax.xlane.f32.xlu2 %v2672_v15 }
 0xe09   :  { %v4944_v16 = vpop.eup %4943 }
 0xe0a   :  { %v2528_v17 = vmul.f32 %v4944_v16, %v2523_v41  ;;  %v2683_v18 = vpop.xlane.xlu1 %2682  ;;  %vm2533_vm7 = vweird.f32 %v4944_v16  ;;  %v2925_v49 = vpop.f32.mrf.mxu2 }
 0xe0b   :  { %4945 = vrcp.f32 %v2683_v18  ;;  %vm2534_vm10 = vmor %vm2532_vm8, %vm2533_vm7  ;;  %v2698_v58 = vand.u32 2147483648, %v2683_v18  ;;  %v2696_v37 = vand.u32 2147483647, %v2683_v18  ;;  %vm2692_vm15 = vweird.f32 %v2683_v18 }
 0xe0c   :  { %v2529_v5 = vsub.f32 1.0, %v2528_v17  ;;  %v6127_v39 = vadd.f32 %v6099_v47, %v2925_v49 }
 0xe0d   :  { %v2699_v34 = vor.u32 1.1754944e-38, %v2698_v58  ;;  %vm2697_vm3 = vcmp.eq.f32.partialorder %v2696_v37, 8.507059e+37 }
 0xe0e   :  { %v2530_v11 = vmul.f32 %v4944_v16, %v2529_v5 }
 0xe10   :  { %v2531_v20 = vadd.f32 %v4944_v16, %v2530_v11 }
 0xe11   :  { %v4946_v60 = vpop.eup %4945 }
 0xe12   :  { %v2535_v54 = vsel %vm2534_vm10, %v4944_v16, %v2531_v20  ;;  %v2688_v21 = vmul.f32 %v4946_v60, %v2683_v18  ;;  %vm2693_vm14 = vweird.f32 %v4946_v60  ;;  %v2928_v9 = vpop.f32.mrf.mxu2 }
 0xe13   :  { %v2540_v27 = vsel %vm2537_vm13, %v2539_v25, %v2535_v54  ;;  %vm2694_vm2 = vmor %vm2692_vm15, %vm2693_vm14  ;;  %v6162_v11 = vadd.f32 %v6099_v47, %v2928_v9 }
 0xe14   :  { %v2689_v32 = vsub.f32 1.0, %v2688_v21  ;;  %v2541_v52 = vmul.f32 %v6071_v44, %v2540_v27 }
 0xe16   :  { %v2690_v36 = vmul.f32 %v4946_v60, %v2689_v32  ;;  %4613 = vmatmul.msk.f32.vlgmr.msra.gmra.mxu3 %vm475_vm9, %v2541_v52  ;;  %4051 = vst.msk [vmem:[#allocation10 + $0x10] sm:$0xff] %vm475_vm9, %v2541_v52 }
 0xe17   :  { %2962 = vmatpush.msra.mxu3 %v4785_v1 }
 0xe18   :  { %v2691_v8 = vadd.f32 %v4946_v60, %v2690_v36 }
 0xe19   :  { %2963 = vmatpush.msra.mxu3 %v4786_v30 }
 0xe1a   :  { %v2695_v48 = vsel %vm2694_vm2, %v4946_v60, %v2691_v8 }
 0xe1b   :  { %v2700_v44 = vsel %vm2697_vm3, %v2699_v34, %v2695_v48 }
 0xe1c   :  { %v2701_v2 = vmul.f32 %v6077_v23, %v2700_v44 }
 0xe1e   :  { %4619 = vmatmul.msk.f32.vlgmr.msrb.gmra.mxu3 %vm475_vm9, %v2701_v2  ;;  %4052 = vst.msk [vmem:[#allocation10 + $0x18] sm:$0xff] %vm475_vm9, %v2701_v2 }
 0xe20   :  { %2423 = vrot.lane.b32.xlu2 %v6017_v6, %s5225_s13 }
 0xe22   :  { %v4789_v50 = vpop.permute.xlu1 %4788 }
 0xe23   :  { %v4791_v26 = vunpack.i.h.bf16 %v4789_v50  ;;  %v4790_v14 = vunpack.i.l.bf16 %v4789_v50 }
 0xe25   :  { %2964 = vmatpush.msra.mxu3 %v4790_v14 }
 0xe27   :  { %2965 = vmatpush.msra.mxu3 %v4791_v26 }
 0xe28   :  { %4637 = vmatmul.msk.f32.vlgmr.msra.gmra.mxu3 %vm242_vm1, %v5969_v28  ;;  %3127 = vrot.lane.b32.xlu2 %v6127_v39, %s5224_s5 }
 0xe30   :  { %4638 = vmatmul.msk.f32.gmra.mxu3 %vm242_vm1, %v6007_v55 }
 0xe45   :  { %v2354_v23 = vpop.xlane.xlu0 %2353 }
 0xe46   :  { %v2356_v45 = vsub.f32 %v6085_v53, %v2354_v23 }
 0xe48   :  { %v2359_v51 = vmul.f32 1.442695, %v2356_v45 }
 0xe4a   :  { %4947 = vpow2.f32 %v2359_v51 }
 0xe4d   :  { %v2514_v43 = vpop.xlane.xlu1 %2513 }
 0xe4e   :  { %v2516_v56 = vsub.f32 %v6090_v42, %v2514_v43 }
 0xe50   :  { %v6137_v22 = vpop.eup %4947  ;;  %v2519_v57 = vmul.f32 1.442695, %v2516_v56 }
 0xe51   :  { %v2364_v59 = vsel %vm475_vm9, %v6137_v22, 0.0 }
 0xe52   :  { %4949 = vpow2.f32 %v2519_v57  ;;  %2365 = vadd.xlane.f32.xlu1 %v2364_v59 }
 0xe53   :  { %v2206_v62 = vpop.xlane.xlu0 %2205 }
 0xe54   :  { %4951 = vrcp.f32 %v2206_v62  ;;  %v2233_v42 = vand.u32 2147483648, %v2206_v62  ;;  %v2231_v35 = vand.u32 2147483647, %v2206_v62  ;;  %vm2227_vm5 = vweird.f32 %v2206_v62 }
 0xe56   :  { %v2234_v29 = vor.u32 1.1754944e-38, %v2233_v42  ;;  %vm2232_vm7 = vcmp.eq.f32.partialorder %v2231_v35, 8.507059e+37 }
 0xe58   :  { %v6141_v63 = vpop.eup %4949 }
 0xe59   :  { %v2524_v53 = vsel %vm475_vm9, %v6141_v63, 0.0 }
 0xe5a   :  { %v4952_v0 = vpop.eup %4951  ;;  %2525 = vadd.xlane.f32.xlu2 %v2524_v53 }
 0xe5b   :  { %v2223_v38 = vmul.f32 %v4952_v0, %v2206_v62  ;;  %vm2228_vm4 = vweird.f32 %v4952_v0 }
 0xe5c   :  { %vm2229_vm6 = vmor %vm2227_vm5, %vm2228_vm4 }
 0xe5d   :  { %v2224_v33 = vsub.f32 1.0, %v2223_v38 }
 0xe5f   :  { %v2225_v3 = vmul.f32 %v4952_v0, %v2224_v33 }
 0xe61   :  { %v2226_v41 = vadd.f32 %v4952_v0, %v2225_v3 }
 0xe63   :  { %v2230_v10 = vsel %vm2229_vm6, %v4952_v0, %v2226_v41 }
 0xe64   :  { %v2235_v4 = vsel %vm2232_vm7, %v2234_v29, %v2230_v10 }
 0xe65   :  { %v6146_v7 = vmul.f32 %v6094_v40, %v2235_v4 }
 0xe67   :  { %4053 = vst.msk [vmem:[#allocation10 + $0x20] sm:$0xff] %vm475_vm9, %v6146_v7 }
 0xe6b   :  { %2263 = vrot.lane.b32.xlu1 %v6017_v6, %s5223_s0 }
 0xe73   :  { %2743 = vrot.lane.b32.xlu1 %v6017_v6, %s5229_s29 }
 0xe7b   :  { %v2674_v24 = vpop.xlane.xlu2 %2673 }
 0xe7c   :  { %v2676_v12 = vsub.f32 %v6110_v61, %v2674_v24  ;;  %v2948_v61 = vpop.permute.xlu0 %2947 }
 0xe7e   :  { %v2679_v15 = vmul.f32 1.442695, %v2676_v12 }
 0xe80   :  { %4953 = vpow2.f32 %v2679_v15 }
 0xe82   :  { %v6157_v17 = vpop.f32.mrf.mxu3 }
 0xe83   :  { %v2424_v47 = vpop.permute.xlu2 %2423 }
 0xe84   :  { %v2584_v59 = vpop.permute.xlu0 %2583 }
 0xe86   :  { %v6155_v16 = vpop.eup %4953 }
 0xe87   :  { %v2684_v40 = vsel %vm475_vm9, %v6155_v16, 0.0 }
 0xe88   :  { %2685 = vadd.xlane.f32.xlu2 %v2684_v40 }
 0xe8a   :  { %v2420_v18 = vpop.f32.mrf.mxu3 }
 0xe8b   :  { %v6187_v54 = vpop.permute.xlu2 %3127 }
 0xe99   :  { %v2580_v5 = vpop.f32.mrf.mxu3 }
 0xea0   :  { %3155 = vrot.lane.b32.xlu2 %v6162_v11, %s5224_s5 }
 0xea1   :  { %v6166_v6 = vpop.f32.mrf.mxu3 }
 0xeab   :  { %v2967_v31 = vpop.f32.mrf.mxu3 }
 0xeac   :  { %v6168_v20 = vadd.f32 %v2967_v31, %v2948_v61 }
 0xeae   :  { %3129 = vrot.lane.b32.xlu0 %v6168_v20, %s5224_s5  ;;  %3445 = vrot.lane.b32.xlu2 %v6168_v20, %s5231_s9 }
 0xeb3   :  { %v2970_v60 = vpop.f32.mrf.mxu3 }
 0xeb4   :  { %v6174_v25 = vadd.f32 %v2970_v60, %v2948_v61 }
 0xeb6   :  { %3157 = vrot.lane.b32.xlu1 %v6174_v25, %s5224_s5  ;;  %3287 = vrot.lane.b32.xlu0 %v6168_v20, %s5228_s25  ;;  %s6691_s5 = sld [smem:[#allocation28_spill]] }
 0xeb7   :  { %3473 = vrot.lane.b32.xlu2 %v6174_v25, %s5231_s9 }
 0xebe   :  { %3285 = vrot.lane.b32.xlu1 %v6127_v39, %s5228_s25  ;;  %3315 = vrot.lane.b32.xlu0 %v6174_v25, %s5228_s25 }
 0xebf   :  { %2779 = vrot.lane.b32.xlu2 %v2580_v5, %s5236_s14 }
 0xec5   :  { %v2366_v21 = vpop.xlane.xlu1 %2365 }
 0xec6   :  { %4955 = vrcp.f32 %v2366_v21  ;;  %3313 = vrot.lane.b32.xlu1 %v6162_v11, %s5228_s25  ;;  %3443 = vrot.lane.b32.xlu0 %v6127_v39, %s5231_s9  ;;  %v2393_v58 = vand.u32 2147483648, %v2366_v21  ;;  %v2391_v37 = vand.u32 2147483647, %v2366_v21  ;;  %vm2387_vm10 = vweird.f32 %v2366_v21 }
 0xec8   :  { %v2394_v34 = vor.u32 1.1754944e-38, %v2393_v58  ;;  %vm2392_vm14 = vcmp.eq.f32.partialorder %v2391_v37, 8.507059e+37 }
 0xecc   :  { %v4956_v27 = vpop.eup %4955 }
 0xecd   :  { %v2383_v32 = vmul.f32 %v4956_v27, %v2366_v21  ;;  %v2526_v52 = vpop.xlane.xlu2 %2525  ;;  %vm2388_vm8 = vweird.f32 %v4956_v27 }
 0xece   :  { %4957 = vrcp.f32 %v2526_v52  ;;  %3471 = vrot.lane.b32.xlu1 %v6162_v11, %s5231_s9  ;;  %2771 = vrot.lane.b32.xlu0 %v2420_v18, %s5235_s22  ;;  %vm2389_vm13 = vmor %vm2387_vm10, %vm2388_vm8  ;;  %v2553_v14 = vand.u32 2147483648, %v2526_v52  ;;  %v2551_v23 = vand.u32 2147483647, %v2526_v52  ;;  %vm2547_vm2 = vweird.f32 %v2526_v52 }
 0xecf   :  { %v2384_v1 = vsub.f32 1.0, %v2383_v32 }
 0xed0   :  { %v2554_v51 = vor.u32 1.1754944e-38, %v2553_v14  ;;  %vm2552_vm4 = vcmp.eq.f32.partialorder %v2551_v23, 8.507059e+37 }
 0xed1   :  { %v2385_v36 = vmul.f32 %v4956_v27, %v2384_v1 }
 0xed3   :  { %v2386_v30 = vadd.f32 %v4956_v27, %v2385_v36 }
 0xed4   :  { %v4958_v8 = vpop.eup %4957 }
 0xed5   :  { %v2390_v48 = vsel %vm2389_vm13, %v4956_v27, %v2386_v30  ;;  %v2543_v44 = vmul.f32 %v4958_v8, %v2526_v52  ;;  %vm2548_vm15 = vweird.f32 %v4958_v8 }
 0xed6   :  { %v2395_v2 = vsel %vm2392_vm14, %v2394_v34, %v2390_v48  ;;  %vm2549_vm3 = vmor %vm2547_vm2, %vm2548_vm15 }
 0xed7   :  { %v2544_v50 = vsub.f32 1.0, %v2543_v44  ;;  %v2396_v26 = vmul.f32 %v6137_v22, %v2395_v2 }
 0xed9   :  { %v2545_v49 = vmul.f32 %v4958_v8, %v2544_v50  ;;  %4054 = vst.msk [vmem:[#allocation10 + $0x28] sm:$0xff] %vm475_vm9, %v2396_v26 }
 0xedb   :  { %v2546_v45 = vadd.f32 %v4958_v8, %v2545_v49  ;;  %v6248_v49 = vpack.i.bf16 %v6174_v25, %v6168_v20 }
 0xedd   :  { %v2550_v43 = vsel %vm2549_vm3, %v4958_v8, %v2546_v45  ;;  %v2264_v56 = vpop.permute.xlu1 %2263 }
 0xede   :  { %v2555_v57 = vsel %vm2552_vm4, %v2554_v51, %v2550_v43  ;;  %2284 = vmatpush.msrb.mxu0 %v2264_v56 }
 0xedf   :  { %4602 = vmatmul.msk.f32.vlgmr.msrb.gmra.mxu0 %vm475_vm9, %v6146_v7  ;;  %v2556_v22 = vmul.f32 %v6141_v63, %v2555_v57 }
 0xee0   :  { %2444 = vmatpush.msra.mxu0 %v2424_v47 }
 0xee1   :  { %4055 = vst.msk [vmem:[#allocation10 + $0x30] sm:$0xff] %vm475_vm9, %v2556_v22 }
 0xee2   :  { %2604 = vmatpush.msrb.mxu0 %v2584_v59 }
 0xee5   :  { %v2744_v62 = vpop.permute.xlu1 %2743 }
 0xee7   :  { %4608 = vmatmul.msk.f32.vlgmr.msra.gmra.mxu0 %vm475_vm9, %v2396_v26 }
 0xee8   :  { %2764 = vmatpush.msra.mxu0 %v2744_v62 }
 0xeef   :  { %4614 = vmatmul.msk.f32.vlgmr.msrb.gmra.mxu0 %vm475_vm9, %v2556_v22 }
 0xef0   :  { %4639 = vmatpush.xpose.msk.msrb.mxu0 %vm475_vm9, %v6168_v20 }
 0xefb   :  { %v2686_v53 = vpop.xlane.xlu2 %2685 }
 0xefc   :  { %4959 = vrcp.f32 %v2686_v53  ;;  %v2713_v63 = vand.u32 2147483648, %v2686_v53  ;;  %v2711_v3 = vand.u32 2147483647, %v2686_v53  ;;  %vm2707_vm6 = vweird.f32 %v2686_v53 }
 0xefe   :  { %v2714_v41 = vor.u32 1.1754944e-38, %v2713_v63  ;;  %vm2712_vm8 = vcmp.eq.f32.partialorder %v2711_v3, 8.507059e+37  ;;  %v4588_v3 = vld [vmem:[%s5319_s6 + $0x50] sm:$0xff] }
 0xf02   :  { %v4960_v0 = vpop.eup %4959 }
 0xf03   :  { %v2703_v38 = vmul.f32 %v4960_v0, %v2686_v53  ;;  %vm2708_vm5 = vweird.f32 %v4960_v0  ;;  %v3156_v7 = vpop.permute.xlu2 %3155 }
 0xf04   :  { %vm2709_vm7 = vmor %vm2707_vm6, %vm2708_vm5 }
 0xf05   :  { %v2704_v33 = vsub.f32 1.0, %v2703_v38 }
 0xf07   :  { %v2705_v42 = vmul.f32 %v4960_v0, %v2704_v33 }
 0xf09   :  { %v2706_v35 = vadd.f32 %v4960_v0, %v2705_v42 }
 0xf0b   :  { %v2710_v29 = vsel %vm2709_vm7, %v4960_v0, %v2706_v35  ;;  %v3446_v12 = vpop.permute.xlu2 %3445  ;;  %v4589_v0 = vld [vmem:[%s5319_s6 + $0x58] sm:$0xff]  ;;  %v4587_v35 = vld [vmem:[%s5319_s6 + $0x48] sm:$0xff] }
 0xf0c   :  { %v2715_v10 = vsel %vm2712_vm8, %v2714_v41, %v2710_v29  ;;  %2820 = vmatpush.msra.mxu1 %v4589_v0  ;;  %v4586_v29 = vld [vmem:[%s5319_s6 + $0x40] sm:$0xff] }
 0xf0d   :  { %v2716_v4 = vmul.f32 %v6155_v16, %v2715_v10 }
 0xf0e   :  { %2821 = vmatpush.msra.mxu1 %v4588_v3 }
 0xf0f   :  { %4620 = vmatmul.msk.f32.vlgmr.msra.gmra.mxu0 %vm475_vm9, %v2716_v4  ;;  %4056 = vst.msk [vmem:[#allocation10 + $0x38] sm:$0xff] %vm475_vm9, %v2716_v4 }
 0xf10   :  { %4641 = vmatpush.xpose.msk.msra.mxu0 %vm475_vm9, %v6174_v25  ;;  %2822 = vmatpush.msra.mxu1 %v4587_v35 }
 0xf12   :  { %2823 = vmatpush.msra.mxu1 %v4586_v29 }
 0xf13   :  { %v3474_v18 = vpop.permute.xlu2 %3473 }
 0xf17   :  { %4640 = vmatmul.msk.f32.vlgmr.msrb.gmra.mxu0 %vm475_vm9, %v6127_v39 }
 0xf1b   :  { %v6264_v62 = vpop.permute.xlu2 %2779 }
 0xf1f   :  { %4642 = vmatmul.msk.f32.vlgmr.msra.gmra.mxu0 %vm475_vm9, %v6162_v11 }
 0xf20   :  { %v3130_v24 = vpop.permute.xlu0 %3129 }
 0xf21   :  { %4645 = vmatpush.xpose.msk.msrb.mxu3 %vm475_vm9, %v3130_v24 }
 0xf24   :  { %4646 = vmatmul.msk.f32.vlgmr.msrb.gmra.mxu3 %vm475_vm9, %v6187_v54 }
 0xf28   :  { %v3158_v15 = vpop.permute.xlu1 %3157  ;;  %v3288_v16 = vpop.permute.xlu0 %3287 }
 0xf29   :  { %4647 = vmatpush.xpose.msk.msrb.mxu0 %vm475_vm9, %v3158_v15  ;;  %4651 = vmatpush.xpose.msk.msra.mxu3 %vm475_vm9, %v3288_v16 }
 0xf2c   :  { %4648 = vmatmul.msk.f32.vlgmr.msrb.gmra.mxu0 %vm475_vm9, %v3156_v7 }
 0xf2d   :  { %4657 = vmatpush.xpose.msk.msrb.mxu3 %vm475_vm9, %v3446_v12 }
 0xf30   :  { %v3286_v39 = vpop.permute.xlu1 %3285  ;;  %v3316_v40 = vpop.permute.xlu0 %3315 }
 0xf31   :  { %4652 = vmatmul.msk.f32.vlgmr.msra.gmra.mxu3 %vm475_vm9, %v3286_v39  ;;  %4653 = vmatpush.xpose.msk.msra.mxu0 %vm475_vm9, %v3316_v40 }
 0xf35   :  { %4659 = vmatpush.xpose.msk.msrb.mxu0 %vm475_vm9, %v3474_v18 }
 0xf38   :  { %v3314_v5 = vpop.permute.xlu1 %3313  ;;  %v3444_v9 = vpop.permute.xlu0 %3443 }
 0xf39   :  { %4654 = vmatmul.msk.f32.vlgmr.msra.gmra.mxu0 %vm475_vm9, %v3314_v5  ;;  %4658 = vmatmul.msk.f32.vlgmr.msrb.gmra.mxu3 %vm475_vm9, %v3444_v9 }
 0xf40   :  { %v3472_v11 = vpop.permute.xlu1 %3471  ;;  %v6257_v56 = vpop.permute.xlu0 %2771 }
 0xf41   :  { %4660 = vmatmul.msk.f32.vlgmr.msrb.gmra.mxu0 %vm475_vm9, %v3472_v11 }
 0xf5c   :  { %v6228_v61 = vpop.f32.mrf.mxu0 }
 0xf64   :  { %v2446_v31 = vpop.f32.mrf.mxu0 }
 0xf6c   :  { %v2606_v60 = vpop.f32.mrf.mxu0 }
 0xf8c   :  { %v2766_v47 = vpop.f32.mrf.mxu0 }
 0xf94   :  { %v2996_v54 = vpop.f32.mrf.mxu0 }
 0xf95   :  { %v3025_v21 = vmul.f32 0.35355338, %v2996_v54 }
 0xf97   :  { %v3027_v27 = vsel %vm475_vm9, %v3025_v21, -inf }
 0xf98   :  { %3028 = vmax.xlane.f32.xlu0 %v3027_v27 }
 0xf9c   :  { %v3022_v32 = vpop.f32.mrf.mxu0 }
 0xf9d   :  { %v6231_v52 = vmul.f32 0.35355338, %v3022_v32 }
 0xf9f   :  { %v3030_v1 = vsel %vm475_vm9, %v6231_v52, -inf }
 0xfa0   :  { %3031 = vmax.xlane.f32.xlu2 %v3030_v1 }
 0xfa7   :  { %v3152_v58 = vpop.f32.mrf.mxu3 }
 0xfa8   :  { %v3183_v36 = vmul.f32 0.35355338, %v3152_v58 }
 0xfa9   :  { %v3180_v37 = vpop.f32.mrf.mxu0 }
 0xfaa   :  { %v6235_v30 = vmul.f32 0.35355338, %v3180_v37  ;;  %v3185_v8 = vsel %vm475_vm9, %v3183_v36, -inf }
 0xfab   :  { %3186 = vmax.xlane.f32.xlu1 %v3185_v8 }
 0xfac   :  { %v3188_v34 = vsel %vm475_vm9, %v6235_v30, -inf }
 0xfad   :  { %3189 = vmax.xlane.f32.xlu0 %v3188_v34 }
 0xfb4   :  { %v3310_v48 = vpop.f32.mrf.mxu3 }
 0xfb5   :  { %v3341_v44 = vmul.f32 0.35355338, %v3310_v48 }
 0xfb6   :  { %v3338_v23 = vpop.f32.mrf.mxu0 }
 0xfb7   :  { %v3343_v2 = vsel %vm475_vm9, %v3341_v44, -inf  ;;  %v6266_v53 = vmul.f32 0.35355338, %v3338_v23 }
 0xfb8   :  { %3344 = vmax.xlane.f32.xlu2 %v3343_v2 }
 0xfb9   :  { %v3346_v63 = vsel %vm475_vm9, %v6266_v53, -inf }
 0xfbc   :  { %v3468_v50 = vpop.f32.mrf.mxu3 }
 0xfbd   :  { %v6241_v26 = vmul.f32 0.35355338, %v3468_v50 }
 0xfbe   :  { %v3496_v45 = vpop.f32.mrf.mxu0 }
 0xfbf   :  { %v3501_v14 = vsel %vm475_vm9, %v6241_v26, -inf  ;;  %v6253_v51 = vmul.f32 0.35355338, %v3496_v45 }
 0xfc0   :  { %3502 = vmax.xlane.f32.xlu0 %v3501_v14 }
 0xfc1   :  { %v3504_v43 = vsel %vm475_vm9, %v6253_v51, -inf }
 0xfd0   :  { %2773 = vrot.lane.b32.xlu2 %v2446_v31, %s5235_s22 }
 0xfd4   :  { %4793 = vrot.lane.b32.xlu0 %v6248_v49, %s5223_s0  ;;  %s6690_s0 = sld [smem:[#allocation26_spill]] }
 0xfd8   :  { %2781 = vrot.lane.b32.xlu2 %v2606_v60, %s5236_s14 }
0x1001   :  { %3505 = vmax.xlane.f32.xlu2 %v3504_v43 }
0x100b   :  { %v3029_v57 = vpop.xlane.xlu0 %3028 }
0x100c   :  { %v3033_v22 = vsub.f32 %v3025_v21, %v3029_v57 }
0x100e   :  { %v3035_v20 = vmul.f32 1.442695, %v3033_v22 }
0x1010   :  { %4961 = vpow2.f32 %v3035_v20 }
0x1013   :  { %v3032_v41 = vpop.xlane.xlu2 %3031 }
0x1016   :  { %v6259_v25 = vpop.eup %4961 }
0x1017   :  { %v3039_v59 = vsel %vm475_vm9, %v6259_v25, 0.0 }
0x1018   :  { %3040 = vadd.xlane.f32.xlu1 %v3039_v59 }
0x1019   :  { %2789 = vrot.lane.b32.xlu2 %v2766_v47, %s5237_s19 }
0x101e   :  { %v3187_v38 = vpop.xlane.xlu1 %3186 }
0x101f   :  { %v3191_v33 = vsub.f32 %v3183_v36, %v3187_v38 }
0x1020   :  { %3347 = vmax.xlane.f32.xlu1 %v3346_v63  ;;  %v3190_v16 = vpop.xlane.xlu0 %3189 }
0x1021   :  { %v3193_v42 = vmul.f32 1.442695, %v3191_v33 }
0x1023   :  { %4963 = vpow2.f32 %v3193_v42 }
0x1029   :  { %v6274_v10 = vpop.eup %4963 }
0x102a   :  { %v3197_v4 = vsel %vm475_vm9, %v6274_v10, 0.0 }
0x102b   :  { %3198 = vadd.xlane.f32.xlu0 %v3197_v4  ;;  %v3345_v7 = vpop.xlane.xlu2 %3344  ;;  %v2793_v4 = vsel %vm475_vm9, %v6157_v17, %v6257_v56 }
0x102c   :  { %v3349_v24 = vsub.f32 %v3341_v44, %v3345_v7 }
0x102e   :  { %v3351_v15 = vmul.f32 1.442695, %v3349_v24 }
0x1030   :  { %4965 = vpow2.f32 %v3351_v15 }
0x1033   :  { %v2774_v12 = vpop.permute.xlu2 %2773  ;;  %v3503_v9 = vpop.xlane.xlu0 %3502 }
0x1034   :  { %v2794_v39 = vsel %vm475_vm9, %v6228_v61, %v2774_v12  ;;  %v3192_v61 = vsub.f32 %v6235_v30, %v3190_v16  ;;  %v3507_v32 = vsub.f32 %v6241_v26, %v3503_v9  ;;  %v2795_v16 = vsel %vm1129_vm12, %v2793_v4, %v6264_v62 }
0x1036   :  { %v6285_v5 = vpop.eup %4965  ;;  %v3195_v21 = vmul.f32 1.442695, %v3192_v61  ;;  %v3509_v58 = vmul.f32 1.442695, %v3507_v32 }
0x1037   :  { %v3355_v11 = vsel %vm475_vm9, %v6285_v5, 0.0 }
0x1039   :  { %2787 = vrot.lane.b32.xlu1 %v6166_v6, %s5237_s19  ;;  %v3034_v6 = vsub.f32 %v6231_v52, %v3032_v41 }
0x103b   :  { %v2782_v40 = vpop.permute.xlu2 %2781  ;;  %v3037_v54 = vmul.f32 1.442695, %v3034_v6 }
0x103c   :  { %v6283_v18 = vsel %vm1129_vm12, %v2794_v39, %v2782_v40 }
0x103d   :  { %4967 = vpow2.f32 %v3037_v54 }
0x103e   :  { %4969 = vpow2.f32 %v3195_v21 }
0x103f   :  { %4971 = vpow2.f32 %v3509_v58 }
0x1042   :  { %3356 = vadd.xlane.f32.xlu2 %v3355_v11 }
0x1043   :  { %v6293_v27 = vpop.eup %4967 }
0x1044   :  { %v3042_v1 = vsel %vm475_vm9, %v6293_v27, 0.0  ;;  %v6298_v36 = vpop.eup %4969 }
0x1045   :  { %v3200_v52 = vsel %vm475_vm9, %v6298_v36, 0.0  ;;  %v6302_v37 = vpop.eup %4971 }
0x1046   :  { %v4794_v31 = vpop.permute.xlu0 %4793  ;;  %v3513_v30 = vsel %vm475_vm9, %v6302_v37, 0.0 }
0x1047   :  { %v4796_v60 = vunpack.i.h.bf16 %v4794_v31  ;;  %v4795_v47 = vunpack.i.l.bf16 %v4794_v31 }
0x1049   :  { %3096 = vmatpush.msrb.mxu1 %v4795_v47  ;;  %3122 = vmatpush.msrb.mxu2 %v4796_v60 }
0x105a   :  { %4803 = vrot.lane.b32.xlu2 %v6248_v49, %s5227_s21  ;;  %s5239_s21 = smov [#allocation5]  }
0x105b   :  { %s4376_s25 = sshll.u32 %s5239_s21, 4  ;;  %s4377_s25 = int_to_ptr.vmem [resolvable:$true] %s4376_s25 }
0x1063   :  { %3043 = vadd.xlane.f32.xlu1 %v3042_v1 }
0x106b   :  { %3201 = vadd.xlane.f32.xlu1 %v3200_v52 }
0x1073   :  { %3514 = vadd.xlane.f32.xlu1 %v3513_v30 }
0x1074   :  { %v3506_v8 = vpop.xlane.xlu2 %3505 }
0x1075   :  { %v3508_v34 = vsub.f32 %v6253_v51, %v3506_v8 }
0x1077   :  { %v3511_v48 = vmul.f32 1.442695, %v3508_v34 }
0x1079   :  { %4973 = vpow2.f32 %v3511_v48 }
0x107c   :  { %v2790_v39 = vpop.permute.xlu2 %2789 }
0x107d   :  { %v2798_v62 = vsel %vm1132_vm11, %v6283_v18, %v2790_v39 }
0x107f   :  { %v6307_v44 = vpop.eup %4973 }
0x1080   :  { %v3516_v2 = vsel %vm475_vm9, %v6307_v44, 0.0 }
0x1081   :  { %3517 = vadd.xlane.f32.xlu1 %v3516_v2 }
0x108b   :  { %v3041_v50 = vpop.xlane.xlu1 %3040 }
0x108c   :  { %4975 = vrcp.f32 %v3041_v50  ;;  %v3056_v57 = vand.u32 2147483648, %v3041_v50  ;;  %v3054_v51 = vand.u32 2147483647, %v3041_v50  ;;  %vm3050_vm13 = vweird.f32 %v3041_v50 }
0x108e   :  { %v3057_v0 = vor.u32 1.1754944e-38, %v3056_v57  ;;  %vm3055_vm15 = vcmp.eq.f32.partialorder %v3054_v51, 8.507059e+37 }
0x1092   :  { %v4976_v26 = vpop.eup %4975 }
0x1093   :  { %v3046_v14 = vmul.f32 %v4976_v26, %v3041_v50  ;;  %v3348_v23 = vpop.xlane.xlu1 %3347  ;;  %vm3051_vm10 = vweird.f32 %v4976_v26 }
0x1094   :  { %v3350_v45 = vsub.f32 %v6266_v53, %v3348_v23  ;;  %vm3052_vm14 = vmor %vm3050_vm13, %vm3051_vm10 }
0x1095   :  { %v3047_v43 = vsub.f32 1.0, %v3046_v14 }
0x1096   :  { %v3353_v22 = vmul.f32 1.442695, %v3350_v45 }
0x1097   :  { %v3048_v20 = vmul.f32 %v4976_v26, %v3047_v43 }
0x1098   :  { %4977 = vpow2.f32 %v3353_v22 }
0x1099   :  { %v3049_v59 = vadd.f32 %v4976_v26, %v3048_v20 }
0x109a   :  { %4808 = vrot.lane.b32.xlu1 %v6248_v49, %s5229_s29  ;;  %s4378_s29 = sshll.u32 %s5422_s12, 4  ;;  %s4379_s29 = int_to_ptr.hbm [resolvable:$true] %s4378_s29 }
0x109b   :  { %v3053_v38 = vsel %vm3052_vm14, %v4976_v26, %v3049_v59  ;;  %s5043_s20 = sshra.s32 %s4379_s29, 4  ;;  %s5044_s20 = int_to_ptr.hbm [resolvable:$true] %s5043_s20 }
0x109c   :  { %v3058_v33 = vsel %vm3055_vm15, %v3057_v0, %v3053_v38  ;;  %s5045_s9 = scalar_lea.hbm %s5044_s20, 2  ;;  %p5048_p1 = scmp.lt.s32.totalorder %s5044_s20, %s5422_s12 }
0x109d   :  { %v3059_v53 = vmul.f32 %v6259_v25, %v3058_v33  ;;  %p5046_p0 = scmp.ne.s32.totalorder %s5044_s20, %s5045_s9  ;;  %p5049_p2 = scmp.lt.s32.totalorder %s5047_s3, %s5045_s9 }
0x109e   :  { %v3199_v63 = vpop.xlane.xlu0 %3198  ;;  %v6315_v42 = vpop.eup %4977 }
0x109f   :  { %4979 = vrcp.f32 %v3199_v63  ;;  %v3358_v3 = vsel %vm475_vm9, %v6315_v42, 0.0  ;;  %4057 = vst.msk [vmem:[#allocation11] sm:$0xff] %vm475_vm9, %v3059_v53  ;;  %v3214_v7 = vand.u32 2147483648, %v3199_v63  ;;  %v3212_v25 = vand.u32 2147483647, %v3199_v63  ;;  %p5050_p3 = por %p5049_p2, %p5048_p1 }
0x10a0   :  { %3359 = vadd.xlane.f32.xlu0 %v3358_v3  ;;  %vm3208_vm3 = vweird.f32 %v3199_v63 }
0x10a1   :  { %v3215_v40 = vor.u32 1.1754944e-38, %v3214_v7  ;;  %vm3213_vm5 = vcmp.eq.f32.partialorder %v3212_v25, 8.507059e+37  ;;  %p5051_p4 = pnand %p5050_p3, %p5046_p0 }
0x10a5   :  { %v4980_v35 = vpop.eup %4979 }
0x10a6   :  { %v3204_v41 = vmul.f32 %v4980_v35, %v3199_v63  ;;  %vm3209_vm2 = vweird.f32 %v4980_v35 }
0x10a7   :  { %vm3210_vm4 = vmor %vm3208_vm3, %vm3209_vm2 }
0x10a8   :  { %v3205_v29 = vsub.f32 1.0, %v3204_v41 }
0x10aa   :  { %v3206_v24 = vmul.f32 %v4980_v35, %v3205_v29 }
0x10ab   :  { %v2788_v15 = vpop.permute.xlu1 %2787 }
0x10ac   :  { %v3207_v12 = vadd.f32 %v4980_v35, %v3206_v24  ;;  %v2797_v9 = vsel %vm1132_vm11, %v2795_v16, %v2788_v15 }
0x10ad   :  { %4621 = vmatmul.msk.f32.vlgmr.msra.gmra.mxu1 %vm242_vm1, %v2797_v9 }
0x10ae   :  { %v3211_v11 = vsel %vm3210_vm4, %v4980_v35, %v3207_v12 }
0x10af   :  { %v3216_v17 = vsel %vm3213_vm5, %v3215_v40, %v3211_v11 }
0x10b0   :  { %v6328_v56 = vmul.f32 %v6274_v10, %v3216_v17 }
0x10b2   :  { %4058 = vst.msk [vmem:[#allocation11 + $0x8] sm:$0xff] %vm475_vm9, %v6328_v56 }
0x10b4   :  { %4798 = vrot.lane.b32.xlu0 %v6248_v49, %s5225_s13  ;;  %s6692_s13 = sld [smem:[#allocation32_spill]] }
0x10b5   :  { %v3357_v31 = vpop.xlane.xlu2 %3356  ;;  %4622 = vmatmul.msk.f32.gmra.mxu1 %vm242_vm1, %v2798_v62 }
0x10b6   :  { %4981 = vrcp.f32 %v3357_v31  ;;  %v3372_v10 = vand.u32 2147483648, %v3357_v31  ;;  %v3370_v61 = vand.u32 2147483647, %v3357_v31  ;;  %vm3366_vm7 = vweird.f32 %v3357_v31 }
0x10b8   :  { %v3373_v49 = vor.u32 1.1754944e-38, %v3372_v10  ;;  %vm3371_vm10 = vcmp.eq.f32.partialorder %v3370_v61, 8.507059e+37 }
0x10bc   :  { %v4982_v60 = vpop.eup %4981 }
0x10bd   :  { %v3362_v47 = vmul.f32 %v4982_v60, %v3357_v31  ;;  %4643 = vmatmul.msk.f32.vlgmr.msrb.gmra.mxu1 %vm475_vm9, %v3059_v53  ;;  %vm3367_vm6 = vweird.f32 %v4982_v60 }
0x10be   :  { %vm3368_vm8 = vmor %vm3366_vm7, %vm3367_vm6 }
0x10bf   :  { %v3363_v6 = vsub.f32 1.0, %v3362_v47 }
0x10c1   :  { %v3364_v54 = vmul.f32 %v4982_v60, %v3363_v6 }
0x10c3   :  { %v3365_v21 = vadd.f32 %v4982_v60, %v3364_v54 }
0x10c5   :  { %v3369_v32 = vsel %vm3368_vm8, %v4982_v60, %v3365_v21 }
0x10c6   :  { %v3374_v18 = vsel %vm3371_vm10, %v3373_v49, %v3369_v32 }
0x10c7   :  { %v6339_v1 = vmul.f32 %v6285_v5, %v3374_v18 }
0x10c9   :  { %4059 = vst.msk [vmem:[#allocation11 + $0x10] sm:$0xff] %vm475_vm9, %v6339_v1 }
0x10d6   :  { %v3044_v58 = vpop.xlane.xlu1 %3043 }
0x10d7   :  { %4983 = vrcp.f32 %v3044_v58  ;;  %v3071_v48 = vand.u32 2147483648, %v3044_v58  ;;  %v3069_v50 = vand.u32 2147483647, %v3044_v58  ;;  %vm3065_vm14 = vweird.f32 %v3044_v58 }
0x10d9   :  { %v3072_v5 = vor.u32 1.1754944e-38, %v3071_v48  ;;  %vm3070_vm2 = vcmp.eq.f32.partialorder %v3069_v50, 8.507059e+37 }
0x10dd   :  { %v4984_v52 = vpop.eup %4983 }
0x10de   :  { %v3061_v30 = vmul.f32 %v4984_v52, %v3044_v58  ;;  %v3202_v8 = vpop.xlane.xlu1 %3201  ;;  %vm3066_vm13 = vweird.f32 %v4984_v52 }
0x10df   :  { %4985 = vrcp.f32 %v3202_v8  ;;  %vm3067_vm15 = vmor %vm3065_vm14, %vm3066_vm13  ;;  %v3229_v51 = vand.u32 2147483648, %v3202_v8  ;;  %v3227_v0 = vand.u32 2147483647, %v3202_v8  ;;  %vm3223_vm4 = vweird.f32 %v3202_v8 }
0x10e0   :  { %v3062_v34 = vsub.f32 1.0, %v3061_v30 }
0x10e1   :  { %v3230_v63 = vor.u32 1.1754944e-38, %v3229_v51  ;;  %vm3228_vm6 = vcmp.eq.f32.partialorder %v3227_v0, 8.507059e+37 }
0x10e2   :  { %v3063_v2 = vmul.f32 %v4984_v52, %v3062_v34  ;;  %v4804_v34 = vpop.permute.xlu2 %4803 }
0x10e4   :  { %v3064_v26 = vadd.f32 %v4984_v52, %v3063_v2 }
0x10e5   :  { %v4986_v14 = vpop.eup %4985 }
0x10e6   :  { %v3068_v23 = vsel %vm3067_vm15, %v4984_v52, %v3064_v26  ;;  %v3219_v45 = vmul.f32 %v4986_v14, %v3202_v8  ;;  %v3515_v43 = vpop.xlane.xlu1 %3514  ;;  %vm3224_vm3 = vweird.f32 %v4986_v14 }
0x10e7   :  { %v3073_v57 = vsel %vm3070_vm2, %v3072_v5, %v3068_v23  ;;  %4987 = vrcp.f32 %v3515_v43  ;;  %vm3225_vm5 = vmor %vm3223_vm4, %vm3224_vm3  ;;  %v3530_v29 = vand.u32 2147483648, %v3515_v43  ;;  %v3528_v7 = vand.u32 2147483647, %v3515_v43 }
0x10e8   :  { %v3220_v22 = vsub.f32 1.0, %v3219_v45  ;;  %v3074_v20 = vmul.f32 %v6293_v27, %v3073_v57  ;;  %vm3524_vm8 = vweird.f32 %v3515_v43  ;;  %v4805_v5 = vunpack.i.l.bf16 %v4804_v34 }
0x10e9   :  { %v3531_v12 = vor.u32 1.1754944e-38, %v3530_v29  ;;  %vm3529_vm13 = vcmp.eq.f32.partialorder %v3528_v7, 8.507059e+37  ;;  %v4628_v29 = vld [vmem:[%s5319_s6 + $0x60] sm:$0xff] }
0x10ea   :  { %v3221_v59 = vmul.f32 %v4986_v14, %v3220_v22  ;;  %4644 = vmatmul.msk.f32.vlgmr.msrb.gmra.mxu2 %vm475_vm9, %v3074_v20  ;;  %4061 = vst.msk [vmem:[#allocation11 + $0x20] sm:$0xff] %vm475_vm9, %v3074_v20 }
0x10ec   :  { %v3222_v38 = vadd.f32 %v4986_v14, %v3221_v59 }
0x10ed   :  { %v4988_v33 = vpop.eup %4987 }
0x10ee   :  { %v3226_v53 = vsel %vm3225_vm5, %v4986_v14, %v3222_v38  ;;  %v3520_v3 = vmul.f32 %v4988_v33, %v3515_v43  ;;  %vm3525_vm7 = vweird.f32 %v4988_v33  ;;  %v4806_v14 = vunpack.i.h.bf16 %v4804_v34 }
0x10ef   :  { %v3231_v35 = vsel %vm3228_vm6, %v3230_v63, %v3226_v53  ;;  %vm3526_vm10 = vmor %vm3524_vm8, %vm3525_vm7 }
0x10f0   :  { %v3521_v41 = vsub.f32 1.0, %v3520_v3  ;;  %v6347_v27 = vmul.f32 %v6298_v36, %v3231_v35  ;;  %v4631_v35 = vld [vmem:[%s5319_s6 + $0x78] sm:$0xff] }
0x10f1   :  { %3652 = vmatpush.msra.mxu3 %v4631_v35  ;;  %v6423_v35 = vld [vmem:[%s6681_s2 + $0x2] ss:$0 sm:$0xff] }
0x10f2   :  { %v3522_v4 = vmul.f32 %v4988_v33, %v3521_v41  ;;  %4062 = vst.msk [vmem:[#allocation11 + $0x28] sm:$0xff] %vm475_vm9, %v6347_v27  ;;  %v4630_v41 = vld [vmem:[%s5319_s6 + $0x70] sm:$0xff] }
0x10f3   :  { %3653 = vmatpush.msra.mxu3 %v4630_v41 }
0x10f4   :  { %v3518_v24 = vpop.xlane.xlu1 %3517  ;;  %v3523_v25 = vadd.f32 %v4988_v33, %v3522_v4 }
0x10f5   :  { %4989 = vrcp.f32 %v3518_v24  ;;  %v3545_v11 = vand.u32 2147483648, %v3518_v24  ;;  %v3543_v62 = vand.u32 2147483647, %v3518_v24  ;;  %vm3539_vm15 = vweird.f32 %v3518_v24 }
0x10f6   :  { %v3527_v15 = vsel %vm3526_vm10, %v4988_v33, %v3523_v25 }
0x10f7   :  { %v3532_v16 = vsel %vm3529_vm13, %v3531_v12, %v3527_v15  ;;  %v3546_v60 = vor.u32 1.1754944e-38, %v3545_v11  ;;  %vm3544_vm3 = vcmp.eq.f32.partialorder %v3543_v62, 8.507059e+37  ;;  %v4829_v11 = vld [vmem:[%s6679_s1 + $0x3] ss:$0 sm:$0xff] }
0x10f8   :  { %v3533_v39 = vmul.f32 %v6302_v37, %v3532_v16 }
0x10fa   :  { %4060 = vst.msk [vmem:[#allocation11 + $0x18] sm:$0xff] %vm475_vm9, %v3533_v39 }
0x10fb   :  { %v4990_v36 = vpop.eup %4989 }
0x10fc   :  { %v3535_v40 = vmul.f32 %v4990_v36, %v3518_v24  ;;  %vm3540_vm14 = vweird.f32 %v4990_v36 }
0x10fd   :  { %vm3541_vm2 = vmor %vm3539_vm15, %vm3540_vm14 }
0x10fe   :  { %v3536_v9 = vsub.f32 1.0, %v3535_v40 }
0x1100   :  { %v3537_v17 = vmul.f32 %v4990_v36, %v3536_v9 }
0x1102   :  { %v3538_v31 = vadd.f32 %v4990_v36, %v3537_v17 }
0x1104   :  { %v3542_v47 = vsel %vm3541_vm2, %v4990_v36, %v3538_v31 }
0x1105   :  { %v3547_v6 = vsel %vm3544_vm3, %v3546_v60, %v3542_v47 }
0x1106   :  { %v3548_v10 = vmul.f32 %v6307_v44, %v3547_v6 }
0x1108   :  { %4064 = vst.msk [vmem:[#allocation11 + $0x38] sm:$0xff] %vm475_vm9, %v3548_v10 }
0x110c   :  { %v4809_v2 = vpop.permute.xlu1 %4808 }
0x110d   :  { %v4811_v23 = vunpack.i.h.bf16 %v4809_v2  ;;  %v4810_v45 = vunpack.i.l.bf16 %v4809_v2 }
0x1113   :  { %v3360_v37 = vpop.xlane.xlu0 %3359 }
0x1114   :  { %4991 = vrcp.f32 %v3360_v37  ;;  %v3387_v49 = vand.u32 2147483648, %v3360_v37  ;;  %v3385_v18 = vand.u32 2147483647, %v3360_v37  ;;  %vm3381_vm5 = vweird.f32 %v3360_v37 }
0x1116   :  { %v3388_v52 = vor.u32 1.1754944e-38, %v3387_v49  ;;  %vm3386_vm7 = vcmp.eq.f32.partialorder %v3385_v18, 8.507059e+37 }
0x111a   :  { %v4992_v54 = vpop.eup %4991 }
0x111b   :  { %v3377_v61 = vmul.f32 %v4992_v54, %v3360_v37  ;;  %vm3382_vm4 = vweird.f32 %v4992_v54 }
0x111c   :  { %vm3383_vm6 = vmor %vm3381_vm5, %vm3382_vm4 }
0x111d   :  { %v3378_v21 = vsub.f32 1.0, %v3377_v61 }
0x111f   :  { %v3379_v32 = vmul.f32 %v4992_v54, %v3378_v21 }
0x1121   :  { %v3380_v58 = vadd.f32 %v4992_v54, %v3379_v32 }
0x1123   :  { %v3384_v30 = vsel %vm3383_vm6, %v4992_v54, %v3380_v58 }
0x1124   :  { %v3389_v8 = vsel %vm3386_vm7, %v3388_v52, %v3384_v30  ;;  %v3722_v30 = vld [vmem:[%s6682_s24 + $0x18] sm:$0xff] }
0x1125   :  { %v3390_v44 = vmul.f32 %v6315_v42, %v3389_v8  ;;  %v4828_v42 = vld [vmem:[%s6679_s1 + $0x2] ss:$0 sm:$0xff]  ;;  %3756 = vmatpush.msra.mxu0 %v3722_v30 }
0x1126   :  { %v4799_v48 = vpop.permute.xlu0 %4798 }
0x1127   :  { %v4801_v50 = vunpack.i.h.bf16 %v4799_v48  ;;  %v4800_v26 = vunpack.i.l.bf16 %v4799_v48  ;;  %4063 = vst.msk [vmem:[#allocation11 + $0x30] sm:$0xff] %vm475_vm9, %v3390_v44  ;;  %v3721_v48 = vld [vmem:[%s6682_s24 + $0x10] sm:$0xff] }
0x1128   :  { %3757 = vmatpush.msra.mxu0 %v3721_v48 }
0x1129   :  { %3254 = vmatpush.msra.mxu1 %v4800_v26  ;;  %3280 = vmatpush.msra.mxu2 %v4801_v50  ;;  %v3720_v26 = vld [vmem:[%s6682_s24 + $0x8] sm:$0xff] }
0x112a   :  { %v2825_v43 = vpop.f32.mrf.mxu1  ;;  %4649 = vmatmul.msk.f32.vlgmr.msra.gmra.mxu1 %vm475_vm9, %v6328_v56  ;;  %4650 = vmatmul.msk.f32.vlgmr.msra.gmra.mxu2 %vm475_vm9, %v6347_v27  ;;  %v4629_v27 = vld [vmem:[%s5319_s6 + $0x68] sm:$0xff]  ;;  %s6684_s6 = sld [smem:[#allocation22_spill]] }
0x112b   :  { %3412 = vmatpush.msrb.mxu1 %v4805_v5  ;;  %3438 = vmatpush.msrb.mxu2 %v4806_v14  ;;  %v2826_v63 = vadd.f32 %v4828_v42, %v2825_v43  ;;  %v3719_v14 = vld [vmem:[%s6682_s24] sm:$0xff] }
0x112c   :  { %3654 = vmatpush.msra.mxu3 %v4629_v27  ;;  %3758 = vmatpush.msra.mxu0 %v3720_v26  ;;  %v3729_v26 = vld [vmem:[%s6683_s30 + $0x28] sm:$0xff] }
0x112d   :  { %3570 = vmatpush.msra.mxu1 %v4810_v45  ;;  %3596 = vmatpush.msra.mxu2 %v4811_v23  ;;  %v2831_v53 = vadd.f32 %v2826_v63, %v5969_v28  ;;  %v6420_v63 = vld [vmem:[%s6680_s28 + $0x2] ss:$0 sm:$0xff] }
0x112e   :  { %3655 = vmatpush.msra.mxu3 %v4628_v29  ;;  %3759 = vmatpush.msra.mxu0 %v3719_v14  ;;  %v4672_v29 = vld [vmem:[%s6682_s24 + $0x38] sm:$0xff] }
0x112f   :  { %v2833_v3 = vsel %vm242_vm1, %v2831_v53, 0.0 }
0x1132   :  { %v2828_v57 = vpop.f32.mrf.mxu1  ;;  %4655 = vmatmul.msk.f32.vlgmr.msrb.gmra.mxu1 %vm475_vm9, %v6339_v1  ;;  %4656 = vmatmul.msk.f32.vlgmr.msrb.gmra.mxu2 %vm475_vm9, %v3390_v44 }
0x1133   :  { %v2829_v22 = vadd.f32 %v4828_v42, %v2828_v57  ;;  %3916 = vmatpush.msrb.mxu2 %v4672_v29 }
0x113a   :  { %4661 = vmatmul.msk.f32.vlgmr.msra.gmra.mxu1 %vm475_vm9, %v3533_v39  ;;  %4662 = vmatmul.msk.f32.vlgmr.msra.gmra.mxu2 %vm475_vm9, %v3548_v10  ;;  %v3098_v56 = vpop.f32.mrf.mxu1  ;;  %v2832_v10 = vadd.f32 %v2829_v22, %v6007_v55 }
0x113c   :  { %v2836_v49 = vsel %vm242_vm1, %v2832_v10, 0.0 }
0x116d   :  { %v3124_v20 = vpop.f32.mrf.mxu2 }
0x11a7   :  { %v3256_v51 = vpop.f32.mrf.mxu1 }
0x11a8   :  { %3603 = vrot.lane.b32.xlu0 %v3256_v51, %s5235_s22 }
0x11ad   :  { %v3282_v59 = vpop.f32.mrf.mxu2 }
0x11ae   :  { %3605 = vrot.lane.b32.xlu2 %v3282_v59, %s5235_s22 }
0x11af   :  { %v3414_v0 = vpop.f32.mrf.mxu1 }
0x11b0   :  { %3611 = vrot.lane.b32.xlu0 %v3414_v0, %s5236_s14 }
0x11b5   :  { %v3440_v1 = vpop.f32.mrf.mxu2 }
0x11b6   :  { %3613 = vrot.lane.b32.xlu1 %v3440_v1, %s5236_s14 }
0x11b7   :  { %v3572_v38 = vpop.f32.mrf.mxu1 }
0x11b8   :  { %3619 = vrot.lane.b32.xlu0 %v3572_v38, %s5237_s19 }
0x11bd   :  { %v3598_v33 = vpop.f32.mrf.mxu2 }
0x11c0   :  { %3621 = vrot.lane.b32.xlu0 %v3598_v33, %s5237_s19 }
0x11ea   :  { %2834 = vadd.xlane.f32.xlu0 %v2833_v3 }
0x1208   :  { %v3606_v15 = vpop.permute.xlu2 %3605 }
0x1209   :  { %v3626_v39 = vsel %vm475_vm9, %v3124_v20, %v3606_v15 }
0x121a   :  { %v3604_v4 = vpop.permute.xlu0 %3603 }
0x121b   :  { %v3625_v24 = vsel %vm475_vm9, %v3098_v56, %v3604_v4  ;;  %v4671_v4 = vld [vmem:[%s6682_s24 + $0x30] sm:$0xff] }
0x121c   :  { %3917 = vmatpush.msrb.mxu2 %v4671_v4 }
0x1222   :  { %v3612_v7 = vpop.permute.xlu0 %3611 }
0x1223   :  { %v3627_v25 = vsel %vm1129_vm12, %v3625_v24, %v3612_v7  ;;  %v4670_v7 = vld [vmem:[%s6682_s24 + $0x28] sm:$0xff]  ;;  %v4669_v24 = vld [vmem:[%s6682_s24 + $0x20] sm:$0xff] }
0x1224   :  { %3918 = vmatpush.msrb.mxu2 %v4670_v7 }
0x1226   :  { %3919 = vmatpush.msrb.mxu2 %v4669_v24  ;;  %v4681_v24 = vld [vmem:[%s6683_s30 + $0x78] sm:$0xff] }
0x1227   :  { %3962 = vmatpush.msrb.mxu3 %v4681_v24 }
0x1228   :  { %v3614_v16 = vpop.permute.xlu1 %3613 }
0x1229   :  { %v3628_v36 = vsel %vm1129_vm12, %v3626_v39, %v3614_v16 }
0x122a   :  { %v3620_v12 = vpop.permute.xlu0 %3619 }
0x122b   :  { %v3629_v28 = vsel %vm1132_vm11, %v3627_v25, %v3620_v12 }
0x122c   :  { %4663 = vmatmul.msk.f32.vlgmr.msra.gmra.mxu3 %vm242_vm1, %v3629_v28 }
0x1232   :  { %v3622_v40 = vpop.permute.xlu0 %3621 }
0x1233   :  { %v3630_v9 = vsel %vm1132_vm11, %v3628_v36, %v3622_v40 }
0x1234   :  { %4664 = vmatmul.msk.f32.gmra.mxu3 %vm242_vm1, %v3630_v9 }
0x125d   :  { %v2835_v47 = vpop.xlane.xlu0 %2834 }
0x125e   :  { %v2839_v37 = vmul.f32 %v2835_v47, %v5482_v46 }
0x1260   :  { %v2841_v21 = vsub.f32 %v2831_v53, %v2839_v37 }
0x12af   :  { %v3657_v17 = vpop.f32.mrf.mxu3 }
0x12b0   :  { %v3658_v62 = vadd.f32 %v4829_v11, %v3657_v17 }
0x12b2   :  { %v3663_v31 = vadd.f32 %v3658_v62, %v5975_v19  ;;  %v2843_v19 = vmul.f32 %v2841_v21, %v2841_v21 }
0x12b4   :  { %v3665_v60 = vsel %vm242_vm1, %v3663_v31, 0.0  ;;  %v2845_v18 = vsel %vm242_vm1, %v2843_v19, 0.0 }
0x12b5   :  { %3666 = vadd.xlane.f32.xlu2 %v3665_v60 }
0x12b7   :  { %v3660_v6 = vpop.f32.mrf.mxu3 }
0x12b8   :  { %v3661_v54 = vadd.f32 %v4829_v11, %v3660_v6 }
0x12ba   :  { %v3664_v61 = vadd.f32 %v3661_v54, %v6001_v13  ;;  %v4832_v54 = vld [vmem:[%s6680_s28 + $0x3] ss:$0 sm:$0xff] }
0x12bc   :  { %v3668_v32 = vsel %vm242_vm1, %v3664_v61, 0.0 }
0x12bd   :  { %2837 = vadd.xlane.f32.xlu2 %v2836_v49  ;;  %3669 = vadd.xlane.f32.xlu1 %v3668_v32 }
0x12c5   :  { %2846 = vadd.xlane.f32.xlu2 %v2845_v18  ;;  %v4833_v18 = vld [vmem:[%s6681_s2 + $0x3] ss:$0 sm:$0xff] }
0x1328   :  { %v3667_v55 = vpop.xlane.xlu2 %3666 }
0x1329   :  { %v3671_v58 = vmul.f32 %v3667_v55, %v5482_v46 }
0x132b   :  { %v6397_v52 = vsub.f32 %v3663_v31, %v3671_v58 }
0x132d   :  { %v3675_v13 = vmul.f32 %v6397_v52, %v6397_v52 }
0x132f   :  { %v3677_v8 = vsel %vm242_vm1, %v3675_v13, 0.0 }
0x1330   :  { %v2838_v44 = vpop.xlane.xlu2 %2837  ;;  %3678 = vadd.xlane.f32.xlu1 %v3677_v8  ;;  %v3670_v34 = vpop.xlane.xlu1 %3669  ;;  %v3731_v8 = vld [vmem:[%s6683_s30 + $0x38] sm:$0xff] }
0x1331   :  { %v2840_v2 = vmul.f32 %v2838_v44, %v5482_v46  ;;  %v3672_v50 = vmul.f32 %v3670_v34, %v5482_v46  ;;  %3802 = vmatpush.msrb.mxu1 %v3731_v8 }
0x1333   :  { %v6408_v5 = vsub.f32 %v2832_v10, %v2840_v2  ;;  %v6410_v23 = vsub.f32 %v3664_v61, %v3672_v50  ;;  %v3730_v2 = vld [vmem:[%s6683_s30 + $0x30] sm:$0xff] }
0x1334   :  { %3803 = vmatpush.msrb.mxu1 %v3730_v2 }
0x1335   :  { %v2844_v45 = vmul.f32 %v6408_v5, %v6408_v5  ;;  %v3676_v43 = vmul.f32 %v6410_v23, %v6410_v23 }
0x1336   :  { %3804 = vmatpush.msrb.mxu1 %v3729_v26 }
0x1337   :  { %v2848_v42 = vsel %vm242_vm1, %v2844_v45, 0.0  ;;  %v3680_v57 = vsel %vm242_vm1, %v3676_v43, 0.0 }
0x1338   :  { %2849 = vadd.xlane.f32.xlu1 %v2848_v42  ;;  %3681 = vadd.xlane.f32.xlu0 %v3680_v57  ;;  %v2847_v22 = vpop.xlane.xlu2 %2846  ;;  %v3728_v42 = vld [vmem:[%s6683_s30 + $0x20] sm:$0xff] }
0x1339   :  { %v2851_v56 = vmul.f32 %v2847_v22, %v5482_v46  ;;  %3805 = vmatpush.msrb.mxu1 %v3728_v42 }
0x133b   :  { %v2853_v20 = vadd.f32 1e-12, %v2851_v56  ;;  %v3727_v56 = vld [vmem:[%s6683_s30 + $0x18] sm:$0xff] }
0x133c   :  { %3806 = vmatpush.msrb.mxu1 %v3727_v56  ;;  %v4836_v56 = vld [vmem:[%s6685_s10] ss:$0 sm:$0xff] }
0x133d   :  { %4993 = vrsqrt.f32 %v2853_v20  ;;  %vm2861_vm11 = vweird.f32 %v2853_v20 }
0x1343   :  { %v4994_v51 = vpop.eup %4993 }
0x1344   :  { %v2856_v59 = vmul.f32 %v4994_v51, %v2853_v20  ;;  %vm2862_vm9 = vweird.f32 %v4994_v51 }
0x1345   :  { %vm2863_vm8 = vmor %vm2861_vm11, %vm2862_vm9 }
0x1346   :  { %v2857_v0 = vmul.f32 %v4994_v51, %v2856_v59  ;;  %v3726_v59 = vld [vmem:[%s6683_s30 + $0x10] sm:$0xff] }
0x1347   :  { %3807 = vmatpush.msrb.mxu1 %v3726_v59 }
0x1348   :  { %v2858_v1 = vmul.f32 0.5, %v2857_v0  ;;  %v4834_v0 = vld [vmem:[%s6684_s6] ss:$0 sm:$0xff] }
0x134a   :  { %v2859_v38 = vsub.f32 1.5, %v2858_v1 }
0x134c   :  { %v2860_v33 = vmul.f32 %v4994_v51, %v2859_v38 }
0x134e   :  { %v2864_v53 = vsel %vm2863_vm8, %v4994_v51, %v2860_v33 }
0x134f   :  { %v2875_v3 = vmul.f32 %v2864_v53, %v2841_v21 }
0x1351   :  { %v2880_v41 = vmul.f32 %v6420_v63, %v2875_v3 }
0x1353   :  { %v6427_v27 = vadd.f32 %v6423_v35, %v2880_v41 }
0x1355   :  { %4665 = vmatmul.msk.f32.vlgmr.msra.gmra.mxu0 %vm242_vm1, %v6427_v27 }
0x13a3   :  { %v3679_v25 = vpop.xlane.xlu1 %3678 }
0x13a4   :  { %v3683_v12 = vmul.f32 %v3679_v25, %v5482_v46  ;;  %v4680_v25 = vld [vmem:[%s6683_s30 + $0x70] sm:$0xff] }
0x13a5   :  { %3963 = vmatpush.msrb.mxu3 %v4680_v25 }
0x13a6   :  { %v3685_v28 = vadd.f32 1e-12, %v3683_v12  ;;  %v4679_v12 = vld [vmem:[%s6683_s30 + $0x68] sm:$0xff] }
0x13a7   :  { %3964 = vmatpush.msrb.mxu3 %v4679_v12 }
0x13a8   :  { %4995 = vrsqrt.f32 %v3685_v28  ;;  %vm3693_vm13 = vweird.f32 %v3685_v28 }
0x13ab   :  { %v2850_v15 = vpop.xlane.xlu1 %2849  ;;  %v3682_v16 = vpop.xlane.xlu0 %3681 }
0x13ac   :  { %v2852_v39 = vmul.f32 %v2850_v15, %v5482_v46  ;;  %v3684_v36 = vmul.f32 %v3682_v16, %v5482_v46  ;;  %v4677_v15 = vld [vmem:[%s6683_s30 + $0x58] sm:$0xff]  ;;  %v4676_v16 = vld [vmem:[%s6683_s30 + $0x50] sm:$0xff] }
0x13ae   :  { %v4996_v40 = vpop.eup %4995  ;;  %v2854_v9 = vadd.f32 1e-12, %v2852_v39  ;;  %v3686_v11 = vadd.f32 1e-12, %v3684_v36  ;;  %v4675_v39 = vld [vmem:[%s6683_s30 + $0x48] sm:$0xff]  ;;  %v4674_v36 = vld [vmem:[%s6683_s30 + $0x40] sm:$0xff] }
0x13af   :  { %v3688_v17 = vmul.f32 %v4996_v40, %v3685_v28  ;;  %vm3694_vm10 = vweird.f32 %v4996_v40  ;;  %v4678_v28 = vld [vmem:[%s6683_s30 + $0x60] sm:$0xff] }
0x13b0   :  { %4997 = vrsqrt.f32 %v2854_v9  ;;  %vm3695_vm14 = vmor %vm3693_vm13, %vm3694_vm10  ;;  %vm2871_vm3 = vweird.f32 %v2854_v9  ;;  %vm3703_vm5 = vweird.f32 %v3686_v11  ;;  %3965 = vmatpush.msrb.mxu3 %v4678_v28 }
0x13b1   :  { %v3689_v62 = vmul.f32 %v4996_v40, %v3688_v17  ;;  %4999 = vrsqrt.f32 %v3686_v11 }
0x13b2   :  { %3966 = vmatpush.msrb.mxu3 %v4677_v15 }
0x13b3   :  { %v3690_v31 = vmul.f32 0.5, %v3689_v62 }
0x13b4   :  { %3967 = vmatpush.msrb.mxu3 %v4676_v16 }
0x13b5   :  { %v3691_v60 = vsub.f32 1.5, %v3690_v31 }
0x13b6   :  { %v4998_v47 = vpop.eup %4997  ;;  %3968 = vmatpush.msrb.mxu3 %v4675_v39 }
0x13b7   :  { %v5000_v6 = vpop.eup %4999  ;;  %v3692_v10 = vmul.f32 %v4996_v40, %v3691_v60  ;;  %v2866_v37 = vmul.f32 %v4998_v47, %v2854_v9  ;;  %vm2872_vm15 = vweird.f32 %v4998_v47 }
0x13b8   :  { %v3698_v61 = vmul.f32 %v5000_v6, %v3686_v11  ;;  %vm3704_vm2 = vweird.f32 %v5000_v6  ;;  %vm2873_vm4 = vmor %vm2871_vm3, %vm2872_vm15  ;;  %3969 = vmatpush.msrb.mxu3 %v4674_v36 }
0x13b9   :  { %v3696_v21 = vsel %vm3695_vm14, %v4996_v40, %v3692_v10  ;;  %v2867_v49 = vmul.f32 %v4998_v47, %v2866_v37  ;;  %vm3705_vm6 = vmor %vm3703_vm5, %vm3704_vm2  ;;  %v4835_v40 = vld [vmem:[%s6684_s6 + $0x1] ss:$0 sm:$0xff] }
0x13ba   :  { %v3707_v32 = vmul.f32 %v3696_v21, %v6397_v52  ;;  %v3699_v19 = vmul.f32 %v5000_v6, %v3698_v61 }
0x13bb   :  { %v2868_v55 = vmul.f32 0.5, %v2867_v49 }
0x13bc   :  { %v3712_v58 = vmul.f32 %v4832_v54, %v3707_v32  ;;  %v3700_v13 = vmul.f32 0.5, %v3699_v19 }
0x13bd   :  { %v2869_v30 = vsub.f32 1.5, %v2868_v55 }
0x13be   :  { %v3701_v44 = vsub.f32 1.5, %v3700_v13  ;;  %v6442_v34 = vadd.f32 %v4833_v18, %v3712_v58 }
0x13bf   :  { %v2870_v48 = vmul.f32 %v4998_v47, %v2869_v30 }
0x13c0   :  { %v3702_v52 = vmul.f32 %v5000_v6, %v3701_v44  ;;  %4685 = vmatmul.msk.f32.vlgmr.msrb.gmra.mxu2 %vm242_vm1, %v6442_v34 }
0x13c1   :  { %v2874_v50 = vsel %vm2873_vm4, %v4998_v47, %v2870_v48  ;;  %vm4076_vm4 = vcmask 1041409  }
0x13c2   :  { %v3706_v14 = vsel %vm3705_vm6, %v5000_v6, %v3702_v52  ;;  %v2876_v45 = vmul.f32 %v2874_v50, %v6408_v5  ;;  %v3725_v5 = vld [vmem:[%s6683_s30 + $0x8] sm:$0xff]  ;;  %vm4134_vm6 = vcmask 123904  }
0x13c3   :  { %v3708_v43 = vmul.f32 %v3706_v14, %v6410_v23  ;;  %3808 = vmatpush.msrb.mxu1 %v3725_v5  ;;  %v3724_v23 = vld [vmem:[%s6683_s30] sm:$0xff] }
0x13c4   :  { %v2881_v57 = vmul.f32 %v6420_v63, %v2876_v45 }
0x13c5   :  { %v3713_v22 = vmul.f32 %v4832_v54, %v3708_v43  ;;  %3809 = vmatpush.msrb.mxu1 %v3724_v23  ;;  %v4837_v23 = vld [vmem:[%s6685_s10 + $0x1] ss:$0 sm:$0xff] }
0x13c6   :  { %v6454_v20 = vadd.f32 %v6423_v35, %v2881_v57 }
0x13c7   :  { %v6456_v51 = vadd.f32 %v4833_v18, %v3713_v22 }
0x13c8   :  { %4666 = vmatmul.msk.f32.gmra.mxu0 %vm242_vm1, %v6454_v20 }
0x13c9   :  { %4686 = vmatmul.msk.f32.gmra.mxu2 %vm242_vm1, %v6456_v51 }
0x13d2   :  { %v3761_v1 = vpop.f32.mrf.mxu0 }
0x13d3   :  { %v3762_v38 = vadd.f32 %v4834_v0, %v3761_v1 }
0x13d5   :  { %v3767_v33 = vmul.f32 %v3762_v38, %v3762_v38 }
0x13d7   :  { %v3769_v63 = vmul.f32 %v3767_v33, %v3762_v38 }
0x13d9   :  { %v3771_v53 = vmul.f32 0.044715, %v3769_v63 }
0x13db   :  { %v3773_v3 = vadd.f32 %v3771_v53, %v3762_v38 }
0x13dd   :  { %v3775_v35 = vmul.f32 0.7978846, %v3773_v3 }
0x13df   :  { %5001 = vtanh.f32 %v3775_v35 }
0x13e5   :  { %v5002_v41 = vpop.eup %5001 }
0x13e6   :  { %v3779_v29 = vadd.f32 1.0, %v5002_v41 }
0x13e8   :  { %v3781_v4 = vmul.f32 0.5, %v3779_v29 }
0x13ea   :  { %v3783_v7 = vmul.f32 %v3781_v4, %v3762_v38 }
0x13ec   :  { %4667 = vmatmul.msk.f32.vlgmr.msrb.gmra.mxu1 %vm187_vm0, %v3783_v7 }
0x1443   :  { %v3921_v9 = vpop.f32.mrf.mxu2 }
0x1444   :  { %v3922_v11 = vadd.f32 %v4835_v40, %v3921_v9 }
0x1445   :  { %v3764_v17 = vpop.f32.mrf.mxu0 }
0x1446   :  { %v3927_v62 = vmul.f32 %v3922_v11, %v3922_v11  ;;  %v3765_v31 = vadd.f32 %v4834_v0, %v3764_v17 }
0x1448   :  { %v3929_v60 = vmul.f32 %v3927_v62, %v3922_v11  ;;  %v3768_v47 = vmul.f32 %v3765_v31, %v3765_v31 }
0x144a   :  { %v3931_v6 = vmul.f32 0.044715, %v3929_v60  ;;  %v3770_v10 = vmul.f32 %v3768_v47, %v3765_v31 }
0x144c   :  { %v3933_v37 = vadd.f32 %v3931_v6, %v3922_v11  ;;  %v3772_v54 = vmul.f32 0.044715, %v3770_v10  ;;  %v3924_v61 = vpop.f32.mrf.mxu2 }
0x144d   :  { %v3925_v21 = vadd.f32 %v4835_v40, %v3924_v61 }
0x144e   :  { %v3935_v49 = vmul.f32 0.7978846, %v3933_v37  ;;  %v3774_v32 = vadd.f32 %v3772_v54, %v3765_v31 }
0x144f   :  { %v3928_v19 = vmul.f32 %v3925_v21, %v3925_v21 }
0x1450   :  { %5003 = vtanh.f32 %v3935_v49  ;;  %v3776_v18 = vmul.f32 0.7978846, %v3774_v32  ;;  %v4103_v49 = vld [vmem:[%s6686_s7 + $0x18] sm:$0xff] }
0x1451   :  { %v3930_v55 = vmul.f32 %v3928_v19, %v3925_v21  ;;  %4126 = vmatpush.msra.mxu2 %v4103_v49  ;;  %v4102_v19 = vld [vmem:[%s6686_s7 + $0x10] sm:$0xff] }
0x1452   :  { %5005 = vtanh.f32 %v3776_v18  ;;  %v4101_v18 = vld [vmem:[%s6686_s7 + $0x8] sm:$0xff] }
0x1453   :  { %v3932_v58 = vmul.f32 0.044715, %v3930_v55  ;;  %4127 = vmatpush.msra.mxu2 %v4102_v19  ;;  %v4208_v55 = vld [vmem:[%s6687_s11 + $0x18] sm:$0xff] }
0x1454   :  { %4233 = vmatpush.msra.mxu1 %v4208_v55 }
0x1455   :  { %v3934_v13 = vadd.f32 %v3932_v58, %v3925_v21  ;;  %4128 = vmatpush.msra.mxu2 %v4101_v18 }
0x1456   :  { %v5004_v30 = vpop.eup %5003 }
0x1457   :  { %v3939_v8 = vadd.f32 1.0, %v5004_v30  ;;  %v3936_v44 = vmul.f32 0.7978846, %v3934_v13  ;;  %v4068_v13 = vld [vmem:[%s6688_s16 + $0x18] sm:$0xff]  ;;  %v4100_v30 = vld [vmem:[%s6686_s7] sm:$0xff] }
0x1458   :  { %v5006_v48 = vpop.eup %5005  ;;  %4092 = vmatpush.msrb.mxu0 %v4068_v13  ;;  %4129 = vmatpush.msra.mxu2 %v4100_v30  ;;  %v4844_v13 = vld [vmem:[%s6693_s17] ss:$0 sm:$0xff] }
0x1459   :  { %v3941_v2 = vmul.f32 0.5, %v3939_v8  ;;  %5007 = vtanh.f32 %v3936_v44  ;;  %v3780_v52 = vadd.f32 1.0, %v5006_v48  ;;  %v4207_v8 = vld [vmem:[%s6687_s11 + $0x10] sm:$0xff] }
0x145a   :  { %4234 = vmatpush.msra.mxu1 %v4207_v8 }
0x145b   :  { %v3943_v50 = vmul.f32 %v3941_v2, %v3922_v11  ;;  %v3782_v26 = vmul.f32 0.5, %v3780_v52  ;;  %v4067_v2 = vld [vmem:[%s6688_s16 + $0x10] sm:$0xff] }
0x145c   :  { %4093 = vmatpush.msrb.mxu0 %v4067_v2 }
0x145d   :  { %4687 = vmatmul.msk.f32.vlgmr.msrb.gmra.mxu3 %vm187_vm0, %v3943_v50  ;;  %v3784_v14 = vmul.f32 %v3782_v26, %v3765_v31  ;;  %v4206_v50 = vld [vmem:[%s6687_s11 + $0x8] sm:$0xff] }
0x145e   :  { %v4066_v26 = vld [vmem:[%s6688_s16 + $0x8] sm:$0xff]  ;;  %4235 = vmatpush.msra.mxu1 %v4206_v50 }
0x145f   :  { %v5008_v45 = vpop.eup %5007  ;;  %4668 = vmatmul.msk.f32.gmra.mxu1 %vm187_vm0, %v3784_v14  ;;  %v4205_v14 = vld [vmem:[%s6687_s11] sm:$0xff]  ;;  %4094 = vmatpush.msrb.mxu0 %v4066_v26 }
0x1460   :  { %v3940_v43 = vadd.f32 1.0, %v5008_v45  ;;  %4236 = vmatpush.msra.mxu1 %v4205_v14 }
0x1462   :  { %v3942_v42 = vmul.f32 0.5, %v3940_v43  ;;  %v4065_v43 = vld [vmem:[%s6688_s16] sm:$0xff] }
0x1463   :  { %4095 = vmatpush.msrb.mxu0 %v4065_v43 }
0x1464   :  { %v3944_v57 = vmul.f32 %v3942_v42, %v3925_v21 }
0x1466   :  { %4688 = vmatmul.msk.f32.gmra.mxu3 %vm187_vm0, %v3944_v57 }
0x1469   :  { %v3811_v22 = vpop.f32.mrf.mxu1 }
0x146a   :  { %v3812_v29 = vadd.f32 %v4836_v56, %v3811_v22 }
0x14dc   :  { %v3814_v59 = vpop.f32.mrf.mxu1 }
0x14dd   :  { %v3815_v5 = vadd.f32 %v4836_v56, %v3814_v59 }
0x14df   :  { %v3818_v0 = vadd.f32 %v3815_v5, %v6454_v20  ;;  %v3817_v20 = vadd.f32 %v3812_v29, %v6427_v27 }
0x14e0   :  { %v3971_v1 = vpop.f32.mrf.mxu3 }
0x14e1   :  { %v3972_v38 = vadd.f32 %v4837_v23, %v3971_v1  ;;  %v3822_v33 = vsel %vm242_vm1, %v3818_v0, 0.0  ;;  %v3819_v7 = vsel %vm242_vm1, %v3817_v20, 0.0 }
0x14e2   :  { %3823 = vadd.xlane.f32.xlu1 %v3822_v33 }
0x14e3   :  { %v3977_v63 = vadd.f32 %v3972_v38, %v6442_v34 }
0x14e5   :  { %v3979_v53 = vsel %vm242_vm1, %v3977_v63, 0.0 }
0x14e6   :  { %3980 = vadd.xlane.f32.xlu2 %v3979_v53 }
0x14e9   :  { %v3974_v3 = vpop.f32.mrf.mxu3 }
0x14ea   :  { %v3975_v35 = vadd.f32 %v4837_v23, %v3974_v3 }
0x14ec   :  { %v3978_v41 = vadd.f32 %v3975_v35, %v6456_v51 }
0x14ee   :  { %v3982_v4 = vsel %vm242_vm1, %v3978_v41, 0.0 }
0x14ef   :  { %3983 = vadd.xlane.f32.xlu0 %v3982_v4 }
0x14f7   :  { %3820 = vadd.xlane.f32.xlu0 %v3819_v7 }
0x1555   :  { %v3824_v24 = vpop.xlane.xlu1 %3823 }
0x1556   :  { %v3826_v25 = vmul.f32 %v3824_v24, %v5482_v46 }
0x1558   :  { %v6490_v34 = vsub.f32 %v3818_v0, %v3826_v25 }
0x1559   :  { %v3981_v12 = vpop.xlane.xlu2 %3980 }
0x155a   :  { %v3985_v28 = vmul.f32 %v3981_v12, %v5482_v46  ;;  %v3830_v51 = vmul.f32 %v6490_v34, %v6490_v34 }
0x155c   :  { %v6495_v15 = vsub.f32 %v3977_v63, %v3985_v28  ;;  %v3834_v16 = vsel %vm242_vm1, %v3830_v51, 0.0  ;;  %v4839_v28 = vld [vmem:[%s6689_s18 + $0x1] ss:$0 sm:$0xff] }
0x155d   :  { %3835 = vadd.xlane.f32.xlu0 %v3834_v16 }
0x155e   :  { %v3989_v27 = vmul.f32 %v6495_v15, %v6495_v15 }
0x1560   :  { %v3991_v39 = vsel %vm242_vm1, %v3989_v27, 0.0 }
0x1561   :  { %3992 = vadd.xlane.f32.xlu1 %v3991_v39  ;;  %v4838_v39 = vld [vmem:[%s6689_s18] ss:$0 sm:$0xff] }
0x1562   :  { %v3984_v36 = vpop.xlane.xlu0 %3983 }
0x1563   :  { %v3986_v40 = vmul.f32 %v3984_v36, %v5482_v46 }
0x1565   :  { %v6502_v9 = vsub.f32 %v3978_v41, %v3986_v40 }
0x1567   :  { %v3990_v11 = vmul.f32 %v6502_v9, %v6502_v9 }
0x1569   :  { %v3994_v17 = vsel %vm242_vm1, %v3990_v11, 0.0 }
0x156a   :  { %3995 = vadd.xlane.f32.xlu2 %v3994_v17  ;;  %v3821_v62 = vpop.xlane.xlu0 %3820 }
0x156b   :  { %v3825_v31 = vmul.f32 %v3821_v62, %v5482_v46  ;;  %v4840_v62 = vld [vmem:[%s6690_s0 + $0x1] ss:$0 sm:$0xff] }
0x156d   :  { %v6508_v60 = vsub.f32 %v3817_v20, %v3825_v31 }
0x156f   :  { %v3829_v47 = vmul.f32 %v6508_v60, %v6508_v60 }
0x1571   :  { %v3831_v6 = vsel %vm242_vm1, %v3829_v47, 0.0 }
0x1572   :  { %3832 = vadd.xlane.f32.xlu2 %v3831_v6 }
0x15d0   :  { %v3836_v10 = vpop.xlane.xlu0 %3835 }
0x15d1   :  { %v3838_v37 = vmul.f32 %v3836_v10, %v5482_v46 }
0x15d3   :  { %v6514_v54 = vadd.f32 1e-12, %v3838_v37  ;;  %v4841_v37 = vld [vmem:[%s6690_s0] ss:$0 sm:$0xff] }
0x15d4   :  { %v3993_v61 = vpop.xlane.xlu1 %3992 }
0x15d5   :  { %5009 = vrsqrt.f32 %v6514_v54  ;;  %v3997_v21 = vmul.f32 %v3993_v61, %v5482_v46  ;;  %vm3857_vm8 = vweird.f32 %v6514_v54 }
0x15d7   :  { %v3999_v32 = vadd.f32 1e-12, %v3997_v21 }
0x15d9   :  { %5011 = vrsqrt.f32 %v3999_v32  ;;  %vm4007_vm9 = vweird.f32 %v3999_v32 }
0x15db   :  { %v5010_v58 = vpop.eup %5009 }
0x15dc   :  { %v3852_v44 = vmul.f32 %v5010_v58, %v6514_v54  ;;  %vm3858_vm7 = vweird.f32 %v5010_v58 }
0x15dd   :  { %v3996_v48 = vpop.xlane.xlu2 %3995  ;;  %vm3859_vm13 = vmor %vm3857_vm8, %vm3858_vm7 }
0x15de   :  { %v3998_v52 = vmul.f32 %v3996_v48, %v5482_v46  ;;  %v3853_v22 = vmul.f32 %v5010_v58, %v3852_v44 }
0x15df   :  { %v5012_v45 = vpop.eup %5011 }
0x15e0   :  { %v4002_v42 = vmul.f32 %v5012_v45, %v3999_v32  ;;  %v4000_v57 = vadd.f32 1e-12, %v3998_v52  ;;  %v3854_v5 = vmul.f32 0.5, %v3853_v22  ;;  %vm4008_vm0 = vweird.f32 %v5012_v45 }
0x15e1   :  { %vm4009_vm11 = vmor %vm4007_vm9, %vm4008_vm0 }
0x15e2   :  { %v4003_v56 = vmul.f32 %v5012_v45, %v4002_v42  ;;  %5013 = vrsqrt.f32 %v4000_v57  ;;  %v3855_v63 = vsub.f32 1.5, %v3854_v5  ;;  %vm4017_vm14 = vweird.f32 %v4000_v57 }
0x15e4   :  { %v4004_v59 = vmul.f32 0.5, %v4003_v56  ;;  %v3856_v41 = vmul.f32 %v5010_v58, %v3855_v63  ;;  %v5238_v63 = vmov 0  }
0x15e5   :  { %v3833_v23 = vpop.xlane.xlu2 %3832  ;;  %4812 = vset.pattern.permute.xlu0 %v5238_v63 }
0x15e6   :  { %v3837_v0 = vmul.f32 %v3833_v23, %v5482_v46  ;;  %v4005_v1 = vsub.f32 1.5, %v4004_v59  ;;  %v3860_v24 = vsel %vm3859_vm13, %v5010_v58, %v3856_v41  ;;  %v4842_v58 = vld [vmem:[%s6691_s5] ss:$0 sm:$0xff] }
0x15e7   :  { %v3862_v36 = vmul.f32 %v3860_v24, %v6490_v34 }
0x15e8   :  { %v5014_v38 = vpop.eup %5013  ;;  %v3839_v33 = vadd.f32 1e-12, %v3837_v0  ;;  %v4006_v3 = vmul.f32 %v5012_v45, %v4005_v1 }
0x15e9   :  { %v4012_v53 = vmul.f32 %v5014_v38, %v4000_v57  ;;  %vm4018_vm10 = vweird.f32 %v5014_v38  ;;  %v3867_v6 = vmul.f32 %v4838_v39, %v3862_v36 }
0x15ea   :  { %5015 = vrsqrt.f32 %v3839_v33  ;;  %v4010_v4 = vsel %vm4009_vm11, %v5012_v45, %v4006_v3  ;;  %vm4019_vm15 = vmor %vm4017_vm14, %vm4018_vm10  ;;  %vm3847_vm3 = vweird.f32 %v3839_v33 }
0x15eb   :  { %v4013_v35 = vmul.f32 %v5014_v38, %v4012_v53  ;;  %v4021_v51 = vmul.f32 %v4010_v4, %v6495_v15  ;;  %v3872_v49 = vadd.f32 %v4841_v37, %v3867_v6 }
0x15ed   :  { %v4014_v29 = vmul.f32 0.5, %v4013_v35  ;;  %v4026_v17 = vmul.f32 %v4839_v28, %v4021_v51  ;;  %v4075_v18 = vrot.slane %v3872_v49, 7 }
0x15ef   :  { %v4015_v20 = vsub.f32 1.5, %v4014_v29  ;;  %v4031_v15 = vadd.f32 %v4840_v62, %v4026_v17 }
0x15f0   :  { %v5016_v7 = vpop.eup %5015 }
0x15f1   :  { %v4016_v25 = vmul.f32 %v5014_v38, %v4015_v20  ;;  %v3842_v12 = vmul.f32 %v5016_v7, %v3839_v33  ;;  %vm3848_vm2 = vweird.f32 %v5016_v7 }
0x15f2   :  { %vm3849_vm5 = vmor %vm3847_vm3, %vm3848_vm2 }
0x15f3   :  { %v4020_v16 = vsel %vm4019_vm15, %v5014_v38, %v4016_v25  ;;  %v3843_v27 = vmul.f32 %v5016_v7, %v3842_v12 }
0x15f4   :  { %v4022_v40 = vmul.f32 %v4020_v16, %v6502_v9 }
0x15f5   :  { %v3844_v11 = vmul.f32 0.5, %v3843_v27 }
0x15f6   :  { %v4027_v31 = vmul.f32 %v4839_v28, %v4022_v40 }
0x15f7   :  { %v3845_v47 = vsub.f32 1.5, %v3844_v11 }
0x15f8   :  { %v4032_v10 = vadd.f32 %v4840_v62, %v4027_v31 }
0x15f9   :  { %v3846_v54 = vmul.f32 %v5016_v7, %v3845_v47 }
0x15fa   :  { %v4110_v61 = vrot.slane %v4032_v10, 7 }
0x15fb   :  { %v3850_v34 = vsel %vm3849_vm5, %v5016_v7, %v3846_v54 }
0x15fc   :  { %v3861_v9 = vmul.f32 %v3850_v34, %v6508_v60  ;;  %v4111_v21 = vsel %vm4076_vm4, %v4110_v61, %v4031_v15  ;;  %v4843_v60 = vld [vmem:[%s6692_s13] ss:$0 sm:$0xff] }
0x15fd   :  { %4690 = vmatmul.msk.f32.vlgmr.msra.gmra.mxu2 %vm242_vm1, %v4111_v21 }
0x15fe   :  { %v3866_v32 = vmul.f32 %v4838_v39, %v3861_v9 }
0x1600   :  { %v3871_v19 = vadd.f32 %v4841_v37, %v3866_v32 }
0x1602   :  { %4693 = vmatmul.msk.f32.vlgmr.msra.gmra.mxu1 %vm242_vm1, %v3871_v19  ;;  %v4077_v55 = vsel %vm4076_vm4, %v4075_v18, %v3871_v19 }
0x1603   :  { %4689 = vmatmul.msk.f32.vlgmr.msrb.gmra.mxu0 %vm242_vm1, %v4077_v55 }
0x160a   :  { %4694 = vmatmul.msk.f32.gmra.mxu1 %vm242_vm1, %v4031_v15 }
0x1612   :  { %4695 = vmatmul.msk.f32.gmra.mxu1 %vm242_vm1, %v3872_v49 }
0x161a   :  { %4696 = vmatmul.msk.f32.gmra.mxu1 %vm242_vm1, %v4032_v10  ;;  %v4167_v10 = vld [vmem:[#allocation2] sm:$0x1] }
0x161b   :  { %v4168_v9 = vmul.f32 1.442695, %v4167_v10 }
0x167f   :  { %v4238_v30 = vpop.f32.mrf.mxu1 }
0x1680   :  { %v4239_v8 = vadd.f32 %v4842_v58, %v4238_v30  ;;  %v4097_v44 = vpop.f32.mrf.mxu0  ;;  %v4131_v48 = vpop.f32.mrf.mxu2 }
0x1681   :  { %v6551_v2 = vadd.f32 %v4843_v60, %v4097_v44  ;;  %v6553_v52 = vadd.f32 %v4844_v13, %v4131_v48 }
0x1682   :  { %v4252_v50 = vsel %vm242_vm1, %v4239_v8, 0.0 }
0x1683   :  { %4253 = vadd.xlane.f32.xlu2 %v4252_v50  ;;  %v4152_v26 = vmul.f32 %v6553_v52, %v6553_v52  ;;  %4135 = vst.msk [vmem:[#allocation3] sm:$0x3] %vm4134_vm6, %v6551_v2  ;;  %v4137_v14 = vmul.f32 %v6551_v2, %v6551_v2 }
0x1684   :  { %4136 = vst.msk [vmem:[#allocation5] sm:$0x3] %vm4134_vm6, %v6553_v52 }
0x1685   :  { %v4153_v45 = vsel %vm4134_vm6, %v4152_v26, 0.0  ;;  %v4138_v43 = vsel %vm4134_vm6, %v4137_v14, 0.0 }
0x1686   :  { %4154 = vadd.xlane.f32.xlu1 %v4153_v45  ;;  %4139 = vadd.xlane.f32.xlu0 %v4138_v43 }
0x1687   :  { %v4241_v42 = vpop.f32.mrf.mxu1 }
0x1688   :  { %v4242_v57 = vadd.f32 %v4842_v58, %v4241_v42 }
0x168a   :  { %v4255_v22 = vsel %vm242_vm1, %v4242_v57, 0.0 }
0x168e   :  { %4256 = vadd.xlane.f32.xlu1 %v4255_v22 }
0x168f   :  { %v4244_v56 = vpop.f32.mrf.mxu1 }
0x1690   :  { %v4245_v59 = vadd.f32 %v4842_v58, %v4244_v56 }
0x1692   :  { %v4258_v5 = vsel %vm242_vm1, %v4245_v59, 0.0 }
0x1693   :  { %4259 = vadd.xlane.f32.xlu0 %v4258_v5 }
0x1697   :  { %v4247_v23 = vpop.f32.mrf.mxu1 }
0x1698   :  { %v4248_v0 = vadd.f32 %v4842_v58, %v4247_v23 }
0x169a   :  { %v4261_v1 = vsel %vm242_vm1, %v4248_v0, 0.0 }
0x169b   :  { %4262 = vadd.xlane.f32.xlu2 %v4261_v1 }
0x16f6   :  { %v4254_v38 = vpop.xlane.xlu2 %4253 }
0x16f7   :  { %v4264_v33 = vmul.f32 %v4254_v38, %v5482_v46 }
0x16f9   :  { %v6566_v53 = vsub.f32 %v4239_v8, %v4264_v33  ;;  %v4155_v3 = vpop.xlane.xlu1 %4154  ;;  %v4140_v35 = vpop.xlane.xlu0 %4139 }
0x16fa   :  { %5017 = vrsqrt.f32 %v4155_v3  ;;  %vm4162_vm9 = vweird.f32 %v4155_v3  ;;  %vm4147_vm8 = vweird.f32 %v4140_v35 }
0x16fb   :  { %5019 = vrsqrt.f32 %v4140_v35  ;;  %v4272_v41 = vmul.f32 %v6566_v53, %v6566_v53 }
0x16fc   :  { %5021 = vpow2.f32 %v4168_v9 }
0x16fd   :  { %v4276_v29 = vsel %vm242_vm1, %v4272_v41, 0.0 }
0x16fe   :  { %4277 = vadd.xlane.f32.xlu1 %v4276_v29 }
0x1700   :  { %v5018_v4 = vpop.eup %5017 }
0x1701   :  { %v5020_v20 = vpop.eup %5019  ;;  %v4157_v7 = vmul.f32 %v5018_v4, %v4155_v3  ;;  %v4257_v24 = vpop.xlane.xlu1 %4256  ;;  %vm4163_vm0 = vweird.f32 %v5018_v4 }
0x1702   :  { %v4142_v25 = vmul.f32 %v5020_v20, %v4140_v35  ;;  %v4265_v12 = vmul.f32 %v4257_v24, %v5482_v46  ;;  %vm4148_vm7 = vweird.f32 %v5020_v20  ;;  %vm4164_vm11 = vmor %vm4162_vm9, %vm4163_vm0  ;;  %v5022_v60 = vpop.eup %5021 }
0x1703   :  { %v4158_v28 = vmul.f32 %v5018_v4, %v4157_v7  ;;  %vm4149_vm10 = vmor %vm4147_vm8, %vm4148_vm7  ;;  %v4197_v13 = vperm.slane %v5022_v60, 0 }
0x1704   :  { %v4143_v51 = vmul.f32 %v5020_v20, %v4142_v25  ;;  %v6572_v16 = vsub.f32 %v4242_v57, %v4265_v12 }
0x1705   :  { %v4159_v27 = vmul.f32 0.5, %v4158_v28 }
0x1706   :  { %v4144_v39 = vmul.f32 0.5, %v4143_v51  ;;  %v4260_v36 = vpop.xlane.xlu0 %4259  ;;  %v4273_v40 = vmul.f32 %v6572_v16, %v6572_v16 }
0x1707   :  { %v4160_v11 = vsub.f32 1.5, %v4159_v27  ;;  %v4266_v17 = vmul.f32 %v4260_v36, %v5482_v46 }
0x1708   :  { %v4145_v62 = vsub.f32 1.5, %v4144_v39  ;;  %v4279_v31 = vsel %vm242_vm1, %v4273_v40, 0.0 }
0x1709   :  { %v4161_v47 = vmul.f32 %v5018_v4, %v4160_v11  ;;  %v6578_v6 = vsub.f32 %v4245_v59, %v4266_v17  ;;  %4280 = vadd.xlane.f32.xlu0 %v4279_v31 }
0x170a   :  { %v4146_v37 = vmul.f32 %v5020_v20, %v4145_v62 }
0x170b   :  { %v4165_v54 = vsel %vm4164_vm11, %v5018_v4, %v4161_v47  ;;  %v4274_v15 = vmul.f32 %v6578_v6, %v6578_v6 }
0x170c   :  { %v4166_v61 = vmul.f32 %v4165_v54, %v6553_v52  ;;  %v4150_v34 = vsel %vm4149_vm10, %v5020_v20, %v4146_v37 }
0x170d   :  { %v4282_v21 = vsel %vm242_vm1, %v4274_v15, 0.0  ;;  %v4151_v32 = vmul.f32 %v4150_v34, %v6551_v2 }
0x170e   :  { %4691 = vmatpush.xpose.msk.msra.mxu0 %vm1129_vm12, %v4166_v61  ;;  %v4263_v49 = vpop.xlane.xlu2 %4262  ;;  %4283 = vadd.xlane.f32.xlu2 %v4282_v21 }
0x170f   :  { %v4267_v19 = vmul.f32 %v4263_v49, %v5482_v46 }
0x1711   :  { %v6587_v18 = vsub.f32 %v4248_v0, %v4267_v19  ;;  %4692 = vmatmul.msk.f32.vlgmr.msra.gmra.mxu0 %vm1129_vm12, %v4151_v32 }
0x1713   :  { %v4275_v55 = vmul.f32 %v6587_v18, %v6587_v18 }
0x1715   :  { %v4285_v58 = vsel %vm242_vm1, %v4275_v55, 0.0 }
0x1716   :  { %4286 = vadd.xlane.f32.xlu1 %v4285_v58 }
0x171d   :  { %4199 = vperm.xlu0 %4812, %v4197_v13  }
0x171e   :  { %5054 = shalt.err (!%p5051_p4)
}
0x171f   :  { %4381 = dma.vmem_to_hbm [thread:$0]  %s4377_s25, 32, %s4379_s29, [#allocation6]  }
0x1720   :  { %s5240_s8 = smov [#allocation8]   ;;  %s4403_s19 = sshll.u32 %s5437_s4, 4  ;;  %s4404_s19 = int_to_ptr.hbm [resolvable:$true] %s4403_s19 }
0x1721   :  { %s4401_s14 = sshll.u32 %s5240_s8, 4  ;;  %s5067_s26 = sshra.s32 %s4404_s19, 4  ;;  %s4402_s14 = int_to_ptr.vmem [resolvable:$true] %s4401_s14  ;;  %s5068_s26 = int_to_ptr.hbm [resolvable:$true] %s5067_s26 }
0x1722   :  { %s5069_s1 = scalar_lea.hbm %s5068_s26, 64  ;;  %s5071_s28 = scalar_lea.hbm %s5437_s4, 64 }
0x1723   :  { %p5070_p5 = scmp.ne.s32.totalorder %s5068_s26, %s5069_s1  ;;  %p5072_p6 = scmp.lt.s32.totalorder %s5068_s26, %s5437_s4 }
0x1724   :  { %p5073_p7 = scmp.lt.s32.totalorder %s5071_s28, %s5069_s1 }
0x1726   :  { %p5074_p8 = por %p5073_p7, %p5072_p6 }
0x1728   :  { %p5075_p9 = pnand %p5074_p8, %p5070_p5 }
0x172a   :  { %5078 = shalt.err (!%p5075_p9)
}
0x172b   :  { %s5241_s12 = smov 128   ;;  %s6694_s2 = sld [smem:[#allocation36_spill]] }
0x172c   :  { %4409 = dma.vmem_to_hbm [thread:$0]  %s4402_s14, 1024, %s4404_s19, [#allocation9], %s5241_s12, %s5241_s12, %s5235_s22  }
0x172d   :  { %s5242_s24 = smov [#allocation3]  }
0x172e   :  { %s4365_s30 = sshll.u32 %s5242_s24, 4  ;;  %s4366_s30 = int_to_ptr.vmem [resolvable:$true] %s4365_s30 }
0x1731   :  { %s4367_s6 = sshll.u32 %s6694_s2, 4  ;;  %s5095_s7 = scalar_lea.hbm %s6694_s2, 2  ;;  %s4368_s6 = int_to_ptr.hbm [resolvable:$true] %s4367_s6 }
0x1732   :  { %s5091_s10 = sshra.s32 %s4368_s6, 4  ;;  %s5092_s10 = int_to_ptr.hbm [resolvable:$true] %s5091_s10 }
0x1733   :  { %s5093_s4 = scalar_lea.hbm %s5092_s10, 2  ;;  %p5096_p11 = scmp.lt.s32.totalorder %s5092_s10, %s6694_s2 }
0x1734   :  { %p5094_p10 = scmp.ne.s32.totalorder %s5092_s10, %s5093_s4  ;;  %p5097_p12 = scmp.lt.s32.totalorder %s5095_s7, %s5093_s4 }
0x1736   :  { %p5098_p13 = por %p5097_p12, %p5096_p11 }
0x1738   :  { %p5099_p0 = pnand %p5098_p13, %p5094_p10 }
0x173a   :  { %5102 = shalt.err (!%p5099_p0)
}
0x173b   :  { %4370 = dma.vmem_to_hbm [thread:$0]  %s4366_s30, 32, %s4368_s6, [#allocation4]  }
0x173c   :  { %s4390_s11 = sshll.u32 %s5432_s27, 4  ;;  %s5243_s16 = smov [#allocation7]   ;;  %s4391_s11 = int_to_ptr.hbm [resolvable:$true] %s4390_s11 }
0x173d   :  { %s4388_s18 = sshll.u32 %s5243_s16, 4  ;;  %s5115_s0 = sshra.s32 %s4391_s11, 4  ;;  %s4389_s18 = int_to_ptr.vmem [resolvable:$true] %s4388_s18  ;;  %s5116_s0 = int_to_ptr.hbm [resolvable:$true] %s5115_s0 }
0x173e   :  { %s5117_s5 = scalar_lea.hbm %s5116_s0, 64  ;;  %s5119_s13 = scalar_lea.hbm %s5432_s27, 64 }
0x173f   :  { %p5118_p1 = scmp.ne.s32.totalorder %s5116_s0, %s5117_s5  ;;  %p5120_p2 = scmp.lt.s32.totalorder %s5116_s0, %s5432_s27 }
0x1740   :  { %p5121_p3 = scmp.lt.s32.totalorder %s5119_s13, %s5117_s5 }
0x1742   :  { %p5122_p4 = por %p5121_p3, %p5120_p2 }
0x1744   :  { %p5123_p5 = pnand %p5122_p4, %p5118_p1 }
0x1746   :  { %5126 = shalt.err (!%p5123_p5)
}
0x1747   :  { %4396 = dma.vmem_to_hbm [thread:$0]  %s4389_s18, 1024, %s4391_s11, [#allocation6], %s5241_s12, %s5241_s12, %s5235_s22  }
0x1748   :  { %s5244_s17 = smov [#allocation10]   ;;  %s4416_s25 = sshll.u32 %s5442_s15, 4  ;;  %s4417_s25 = int_to_ptr.hbm [resolvable:$true] %s4416_s25 }
0x1749   :  { %s4414_s21 = sshll.u32 %s5244_s17, 4  ;;  %s5139_s29 = sshra.s32 %s4417_s25, 4  ;;  %s4415_s21 = int_to_ptr.vmem [resolvable:$true] %s4414_s21  ;;  %s5140_s29 = int_to_ptr.hbm [resolvable:$true] %s5139_s29 }
0x174a   :  { %s5141_s20 = scalar_lea.hbm %s5140_s29, 64  ;;  %s5143_s27 = scalar_lea.hbm %s5442_s15, 64 }
0x174b   :  { %p5142_p6 = scmp.ne.s32.totalorder %s5140_s29, %s5141_s20  ;;  %p5144_p7 = scmp.lt.s32.totalorder %s5140_s29, %s5442_s15 }
0x174c   :  { %p5145_p8 = scmp.lt.s32.totalorder %s5143_s27, %s5141_s20 }
0x174e   :  { %p5146_p9 = por %p5145_p8, %p5144_p7 }
0x1750   :  { %p5147_p10 = pnand %p5146_p9, %p5142_p6 }
0x1752   :  { %5150 = shalt.err (!%p5147_p10)
}
0x1753   :  { %4422 = dma.vmem_to_hbm [thread:$0]  %s4415_s21, 1024, %s4417_s25, [#allocation9], %s5241_s12, %s5241_s12, %s5235_s22  }
0x1754   :  { %s4429_s9 = sshll.u32 %s5447_s23, 4  ;;  %s5245_s3 = smov [#allocation11]   ;;  %s4430_s9 = int_to_ptr.hbm [resolvable:$true] %s4429_s9 }
0x1755   :  { %s4427_s8 = sshll.u32 %s5245_s3, 4  ;;  %s5163_s14 = sshra.s32 %s4430_s9, 4  ;;  %s4428_s8 = int_to_ptr.vmem [resolvable:$true] %s4427_s8  ;;  %s5164_s14 = int_to_ptr.hbm [resolvable:$true] %s5163_s14 }
0x1756   :  { %s5165_s19 = scalar_lea.hbm %s5164_s14, 64  ;;  %s5167_s15 = scalar_lea.hbm %s5447_s23, 64 }
0x1757   :  { %p5166_p11 = scmp.ne.s32.totalorder %s5164_s14, %s5165_s19  ;;  %p5168_p12 = scmp.lt.s32.totalorder %s5164_s14, %s5447_s23 }
0x1758   :  { %p5169_p13 = scmp.lt.s32.totalorder %s5167_s15, %s5165_s19 }
0x175a   :  { %p5170_p0 = por %p5169_p13, %p5168_p12 }
0x175c   :  { %p5171_p1 = pnand %p5170_p0, %p5166_p11 }
0x175e   :  { %5174 = shalt.err (!%p5171_p1)
}
0x175f   :  { %4435 = dma.vmem_to_hbm [thread:$0]  %s4428_s8, 1024, %s4430_s9, [#allocation12], %s5241_s12, %s5241_s12, %s5235_s22   ;;  %vm4203_vm2 = vcmask 9216  }
0x1760   :  { %s6695_s26 = sld [smem:[#allocation29_spill]] }
0x1761   :  { %s6696_s23 = sld [smem:[#allocation30_spill]] }
0x1762   :  { %s6697_s22 = sld [smem:[#allocation35_spill]] }
0x1763   :  { %s6698_s1 = sld [smem:[#allocation37_spill]] }
0x1766   :  { %v4845_v59 = vld [vmem:[%s6695_s26] ss:$0 sm:$0xff] }
0x1767   :  { %v4846_v0 = vld [vmem:[%s6696_s23] ss:$0 sm:$0xff] }
0x1771   :  { %v4278_v30 = vpop.xlane.xlu1 %4277 }
0x1772   :  { %v4288_v8 = vmul.f32 %v4278_v30, %v5482_v46 }
0x1774   :  { %v4292_v44 = vadd.f32 1e-12, %v4288_v8 }
0x1776   :  { %5023 = vrsqrt.f32 %v4292_v44  ;;  %vm4302_vm13 = vweird.f32 %v4292_v44 }
0x177c   :  { %v5024_v48 = vpop.eup %5023  ;;  %v4281_v2 = vpop.xlane.xlu0 %4280 }
0x177d   :  { %v4297_v52 = vmul.f32 %v5024_v48, %v4292_v44  ;;  %v4289_v50 = vmul.f32 %v4281_v2, %v5482_v46  ;;  %vm4303_vm12 = vweird.f32 %v5024_v48 }
0x177e   :  { %vm4304_vm14 = vmor %vm4302_vm13, %vm4303_vm12 }
0x177f   :  { %v4298_v26 = vmul.f32 %v5024_v48, %v4297_v52  ;;  %v4293_v14 = vadd.f32 1e-12, %v4289_v50 }
0x1781   :  { %v4299_v45 = vmul.f32 0.5, %v4298_v26  ;;  %5025 = vrsqrt.f32 %v4293_v14  ;;  %v4284_v43 = vpop.xlane.xlu2 %4283  ;;  %vm4312_vm3 = vweird.f32 %v4293_v14 }
0x1782   :  { %v4290_v42 = vmul.f32 %v4284_v43, %v5482_v46 }
0x1783   :  { %v4300_v57 = vsub.f32 1.5, %v4299_v45 }
0x1784   :  { %v4294_v22 = vadd.f32 1e-12, %v4290_v42 }
0x1785   :  { %v4301_v56 = vmul.f32 %v5024_v48, %v4300_v57 }
0x1786   :  { %5027 = vrsqrt.f32 %v4294_v22  ;;  %vm4322_vm6 = vweird.f32 %v4294_v22 }
0x1787   :  { %v5026_v5 = vpop.eup %5025  ;;  %v4305_v23 = vsel %vm4304_vm14, %v5024_v48, %v4301_v56 }
0x1788   :  { %v4336_v1 = vmul.f32 %v4305_v23, %v6566_v53  ;;  %v4307_v38 = vmul.f32 %v5026_v5, %v4293_v14  ;;  %vm4313_vm15 = vweird.f32 %v5026_v5 }
0x1789   :  { %v4287_v33 = vpop.xlane.xlu1 %4286  ;;  %vm4314_vm4 = vmor %vm4312_vm3, %vm4313_vm15 }
0x178a   :  { %v4343_v63 = vmul.f32 %v4845_v59, %v4336_v1  ;;  %v4308_v3 = vmul.f32 %v5026_v5, %v4307_v38  ;;  %v4291_v35 = vmul.f32 %v4287_v33, %v5482_v46 }
0x178c   :  { %v5028_v41 = vpop.eup %5027  ;;  %v4350_v29 = vadd.f32 %v4846_v0, %v4343_v63  ;;  %v4309_v4 = vmul.f32 0.5, %v4308_v3  ;;  %v4295_v20 = vadd.f32 1e-12, %v4291_v35 }
0x178d   :  { %v4317_v7 = vmul.f32 %v5028_v41, %v4294_v22  ;;  %vm4323_vm5 = vweird.f32 %v5028_v41 }
0x178e   :  { %4354 = vst.msk [vmem:[%s6697_s22] sm:$0xff] %vm242_vm1, %v4350_v29  ;;  %v4310_v24 = vsub.f32 1.5, %v4309_v4  ;;  %5029 = vrsqrt.f32 %v4295_v20  ;;  %v4193_v25 = vpop.f32.mrf.mxu0  ;;  %vm4324_vm0 = vmor %vm4322_vm6, %vm4323_vm5  ;;  %vm4332_vm9 = vweird.f32 %v4295_v20 }
0x178f   :  { %v4318_v12 = vmul.f32 %v5028_v41, %v4317_v7  ;;  %v4200_v53 = vpop.permute.xlu0 %4199 }
0x1790   :  { %v4311_v28 = vmul.f32 %v5026_v5, %v4310_v24  ;;  %v4202_v51 = vmul.f32 %v4200_v53, %v4193_v25 }
0x1791   :  { %v4319_v46 = vmul.f32 0.5, %v4318_v12 }
0x1792   :  { %v4315_v27 = vsel %vm4314_vm4, %v5026_v5, %v4311_v28  ;;  %4204 = vst.msk [vmem:[%s6698_s1] sm:$0x3] %vm4203_vm2, %v4202_v51 }
0x1793   :  { %v4337_v39 = vmul.f32 %v4315_v27, %v6572_v16  ;;  %v4320_v36 = vsub.f32 1.5, %v4319_v46 }
0x1794   :  { %v5030_v40 = vpop.eup %5029 }
0x1795   :  { %v4344_v11 = vmul.f32 %v4845_v59, %v4337_v39  ;;  %v4321_v17 = vmul.f32 %v5028_v41, %v4320_v36  ;;  %v4327_v62 = vmul.f32 %v5030_v40, %v4295_v20  ;;  %vm4333_vm7 = vweird.f32 %v5030_v40 }
0x1796   :  { %vm4334_vm11 = vmor %vm4332_vm9, %vm4333_vm7 }
0x1797   :  { %v4351_v31 = vadd.f32 %v4846_v0, %v4344_v11  ;;  %v4325_v47 = vsel %vm4324_vm0, %v5028_v41, %v4321_v17  ;;  %v4328_v10 = vmul.f32 %v5030_v40, %v4327_v62 }
0x1798   :  { %v4338_v37 = vmul.f32 %v4325_v47, %v6578_v6 }
0x1799   :  { %4355 = vst.msk [vmem:[%s6697_s22 + $0x8] sm:$0xff] %vm242_vm1, %v4351_v31  ;;  %v4329_v54 = vmul.f32 0.5, %v4328_v10 }
0x179a   :  { %v4345_v15 = vmul.f32 %v4845_v59, %v4338_v37 }
0x179b   :  { %v4330_v16 = vsub.f32 1.5, %v4329_v54 }
0x179c   :  { %v4352_v61 = vadd.f32 %v4846_v0, %v4345_v15 }
0x179d   :  { %v4331_v34 = vmul.f32 %v5030_v40, %v4330_v16 }
0x179e   :  { %4356 = vst.msk [vmem:[%s6697_s22 + $0x10] sm:$0xff] %vm242_vm1, %v4352_v61 }
0x179f   :  { %v4335_v9 = vsel %vm4334_vm11, %v5030_v40, %v4331_v34 }
0x17a0   :  { %v4339_v21 = vmul.f32 %v4335_v9, %v6587_v18 }
0x17a2   :  { %v4346_v49 = vmul.f32 %v4845_v59, %v4339_v21 }
0x17a4   :  { %v4353_v32 = vadd.f32 %v4846_v0, %v4346_v49 }
0x17a6   :  { %4357 = vst.msk [vmem:[%s6697_s22 + $0x18] sm:$0xff] %vm242_vm1, %v4353_v32 }
0x17a7   :  { %5175 = dma.done.wait [#allocation4], 32  }
0x17a8   :  { %5176 = vsyncadd [#allocation4], 4294967264 }
0x17a9   :  { %5177 = dma.done.wait [#allocation6], 1056  }
0x17aa   :  { %5178 = vsyncadd [#allocation6], 4294966240 }
0x17ab   :  { %5179 = dma.done.wait [#allocation9], 2048  }
0x17ac   :  { %5180 = vsyncadd [#allocation9], 4294965248 }
0x17ad   :  { %5181 = dma.done.wait [#allocation12], 1024  }
0x17ae   :  { %5182 = vsyncadd [#allocation12], 4294966272 }
0x17af   :  { %4464 = vsyncpa [#allocation4], 1 }
0x17b0   :  { %4465 = vsyncpa [#allocation6], 1 }
0x17b1   :  { %4466 = vsyncpa [#allocation9], 1 }
0x17b2   :  { %4467 = vsyncpa [#allocation12], 1 }

</bundles_post_ra>
